<compile_context>
chip_gen: v6e
topology: v6e:2x2x1
jax: 0.10.0
libtpu: 0.0.40
codegen_flags: <defaults>
</compile_context>

<pallas_src>
import jax
import jax.numpy as jnp
import numpy as np
from jax import lax
from jax.experimental import pallas as pl
from jax.experimental.pallas import tpu as pltpu

# ----- physics constants (ctor args of UNETRWithPhysics) -----
REACTION_RATE = 0.05
DIFFUSION_RATE = 0.01
TIME_STEP = 0.1

# base 5x5 kernel from the PyTorch module
_K2 = np.array([[0, 0, 1, 0, 0],
                [0, 1, 2, 1, 0],
                [1, 2, -24, 2, 1],
                [0, 1, 2, 1, 0],
                [0, 0, 1, 0, 0]], dtype=np.float32)

KD, KH, KW = 5, 25, 25                      # effective conv3d kernel extents
PAD_D, PAD_H, PAD_W = (KD - 1) // 2, (KH - 1) // 2, (KW - 1) // 2   # (2, 12, 12)


# --------------------------------------------------------------------------
# Fused kernel: pointwise "UNETR" stand-in + reaction-diffusion physics step
# --------------------------------------------------------------------------
def _fused_kernel(x_ref, w_ref, b_ref, out_ref, padhw_ref, padd_ref):
    """One (batch, out-channel) volume per grid step.

    x_ref     : (1, Cin, D, H, W)       VMEM  input features for this batch
    w_ref     : (Cout*Cin,)             SMEM  channel-mix weights, [ci*Cin + c]
    b_ref     : (Cout,)                 SMEM  channel-mix bias
    out_ref   : (1, 1, D, H, W)         VMEM  updated segmentation
    padhw_ref : (D, H+24, W+24)         VMEM  HW-zero-padded segmentation
    padd_ref  : (D+4, H, W)             VMEM  depth-zero-padded 2D stencil result
    """
    _, cin, D, H, W = x_ref.shape
    ci = pl.program_id(1)                       # which output channel

    # --- 1) stand-in UNETR: pointwise channel mix + sigmoid (VPU + EUP) ------
    terms = [x_ref[0, c] * w_ref[ci * cin + c] for c in range(cin)]
    while len(terms) > 1:                       # pairwise tree sum (short chain)
        nxt = [terms[i] + terms[i + 1] for i in range(0, len(terms) - 1, 2)]
        if len(terms) % 2:
            nxt.append(terms[-1])
        terms = nxt
    seg = jax.nn.sigmoid(terms[0] + b_ref[ci])  # (D, H, W)

    # --- 2) HW halo handled on-chip: zero scratch, write interior ------------
    # (re-zeroed every step: scratch state must not leak across megacore
    #  partitions of the "parallel" grid axes)
    padhw_ref[...] = jnp.zeros_like(padhw_ref)
    padhw_ref[:, PAD_H:PAD_H + H, PAD_W:PAD_W + W] = seg

    # --- 3) stride-5 box-sum over H (5x tiling of the base kernel along H) ---
    Hc, Wc = H + 4, W + 4
    bs = ((padhw_ref[:, 0:Hc] + padhw_ref[:, 5:5 + Hc])
          + (padhw_ref[:, 10:10 + Hc] + padhw_ref[:, 15:15 + Hc])) \
         + padhw_ref[:, 20:20 + Hc]                                # (D, H+4, W+24)

    # --- 4) stride-5 box-sum over W ------------------------------------------
    cs = ((bs[:, :, 0:Wc] + bs[:, :, 5:5 + Wc])
          + (bs[:, :, 10:10 + Wc] + bs[:, :, 15:15 + Wc])) \
         + bs[:, :, 20:20 + Wc]                                    # (D, H+4, W+4)

    # --- 5) 13-tap 5x5 base stencil, grouped by weight, independent partials -
    c_ctr = cs[:, 2:2 + H, 2:2 + W]                                    # -24
    c_w2 = (cs[:, 1:1 + H, 2:2 + W] + cs[:, 3:3 + H, 2:2 + W]) \
         + (cs[:, 2:2 + H, 1:1 + W] + cs[:, 2:2 + H, 3:3 + W])         # x2
    c_ax = (cs[:, 0:H, 2:2 + W] + cs[:, 4:4 + H, 2:2 + W]) \
         + (cs[:, 2:2 + H, 0:W] + cs[:, 2:2 + H, 4:4 + W])             # x1 (axes)
    c_dg = (cs[:, 1:1 + H, 1:1 + W] + cs[:, 1:1 + H, 3:3 + W]) \
         + (cs[:, 3:3 + H, 1:1 + W] + cs[:, 3:3 + H, 3:3 + W])         # x1 (diag)
    s2d = (-24.0 * c_ctr + 2.0 * c_w2) + (c_ax + c_dg)                 # (D, H, W)

    # --- 6) depth box-sum LAST (kernel constant along depth), unpadded HW ----
    # Leading-dim slices only: no sublane/lane relayouts in this stage.
    zpad = jnp.zeros((PAD_D, H, W), jnp.float32)
    padd_ref[0:PAD_D] = zpad
    padd_ref[PAD_D + D:PAD_D + D + PAD_D] = zpad
    padd_ref[PAD_D:PAD_D + D] = s2d
    lap = ((padd_ref[0:D] + padd_ref[1:1 + D])
           + (padd_ref[2:2 + D] + padd_ref[3:3 + D])) + padd_ref[4:4 + D]

    # --- 7) reaction-diffusion update ----------------------------------------
    reaction = REACTION_RATE * seg * (1.0 - seg)
    out_ref[0, 0] = seg + TIME_STEP * (reaction + DIFFUSION_RATE * lap)
    # TODO(synk): a lane-dense (D, H*W) output store would need an in-kernel
    # (D,H,W)->(D,H*W) relayout; skipped to keep lowering risk at zero.


def unetr_with_physics_forward(x, w, b):
    """x: (B,Cin,D,H,W) f32; w: (Cin,Cout); b: (1,Cout) -> (B,Cout,D,H,W) f32."""
    B, Cin, D, H, W = x.shape
    Cout = w.shape[1]
    # SMEM scalars: flatten (Cout, Cin) weights to 1D to avoid 2D-SMEM padding.
    wflat = jnp.transpose(w).astype(jnp.float32).reshape(-1)    # [ci*Cin + c]
    bias = jnp.reshape(b, (Cout,)).astype(jnp.float32)

    # TODO(synk): at production UNETR resolutions (>= 96^3) tile the grid over D
    # with a 4-plane halo so per-step VMEM stays within v7x's 64 MiB budget.
    return pl.pallas_call(
        _fused_kernel,
        out_shape=jax.ShapeDtypeStruct((B, Cout, D, H, W), jnp.float32),
        grid=(B, Cout),
        in_specs=[
            pl.BlockSpec((1, Cin, D, H, W), lambda bi, ci: (bi, 0, 0, 0, 0)),
            pl.BlockSpec(memory_space=pltpu.MemorySpace.SMEM),   # wflat
            pl.BlockSpec(memory_space=pltpu.MemorySpace.SMEM),   # bias
        ],
        out_specs=pl.BlockSpec((1, 1, D, H, W), lambda bi, ci: (bi, ci, 0, 0, 0)),
        scratch_shapes=[
            pltpu.VMEM((D, H + 2 * PAD_H, W + 2 * PAD_W), jnp.float32),  # HW pad
            pltpu.VMEM((D + 2 * PAD_D, H, W), jnp.float32),              # D pad
        ],
        compiler_params=pltpu.CompilerParams(
            dimension_semantics=("parallel", "parallel"),   # megacore-splittable
            vmem_limit_bytes=32 * 1024 * 1024),
    )(x, wflat, bias)


# --------------------------------------------------------------------------
# Pure-JAX reference (mirrors the PyTorch forward) for a correctness check
# --------------------------------------------------------------------------
def _reference_forward(x, w, b):
    B, Cin, D, H, W = x.shape
    Cout = w.shape[1]
    x2d = jnp.transpose(x, (0, 2, 3, 4, 1)).reshape(-1, Cin)
    seg = jax.nn.sigmoid(x2d @ w + b)
    seg = jnp.transpose(seg.reshape(B, D, H, W, Cout), (0, 4, 1, 2, 3))

    k2 = jnp.asarray(_K2)
    kfull = jnp.tile(k2, (5, 5))                          # (25, 25): K2[h%5, w%5]
    kfull = jnp.broadcast_to(kfull[None], (KD, KH, KW))   # constant along depth
    wgt = jnp.broadcast_to(kfull[None, None], (Cout, 1, KD, KH, KW))
    lap = lax.conv_general_dilated(
        seg, wgt, window_strides=(1, 1, 1),
        padding=[(PAD_D, PAD_D), (PAD_H, PAD_H), (PAD_W, PAD_W)],
        dimension_numbers=("NCDHW", "OIDHW", "NCDHW"),
        feature_group_count=Cout)
    reaction = REACTION_RATE * seg * (1.0 - seg)
    return seg + TIME_STEP * (reaction + DIFFUSION_RATE * lap)


if __name__ == "__main__":
    B, Cin, Cout, D, H, W = 2, 4, 2, 16, 16, 16

    key = jax.random.PRNGKey(0)
    kx, kw, kb = jax.random.split(key, 3)
    x = jax.random.normal(kx, (B, Cin, D, H, W), jnp.float32)
    w = 0.5 * jax.random.normal(kw, (Cin, Cout), jnp.float32)
    b = 0.1 * jax.random.normal(kb, (1, Cout), jnp.float32)

    out = jax.block_until_ready(unetr_with_physics_forward(x, w, b))
    ref = jax.block_until_ready(_reference_forward(x, w, b))
    np.testing.assert_allclose(np.asarray(out), np.asarray(ref),
                               rtol=2e-3, atol=2e-3)
    print("KERNEL_OK")
</pallas_src>

<mosaic_0001>
module attributes {stable_mosaic.version = 11 : i64} {
  func.func @_fused_kernel(%arg0: i32, %arg1: i32, %arg2: memref<1x4x16x16x16xf32, #tpu.memory_space<vmem>>, %arg3: memref<8xf32, #tpu.memory_space<smem>>, %arg4: memref<2xf32, #tpu.memory_space<smem>>, %arg5: memref<1x1x16x16x16xf32, #tpu.memory_space<vmem>>, %arg6: memref<16x40x40xf32, #tpu.memory_space<vmem>>, %arg7: memref<20x16x16xf32, #tpu.memory_space<vmem>>) attributes {dimension_semantics = [#tpu.dimension_semantics<parallel>, #tpu.dimension_semantics<parallel>], iteration_bounds = array<i64: 2, 2>, scalar_prefetch = 0 : i64, scratch_operands = 2 : i64, tpu.core_type = #tpu.core_type<tc>, window_params = [{transform_indices = @transform_0, window_bounds = array<i64: 1, 4, 16, 16, 16>}, {transform_indices = @transform_1, window_bounds = array<i64: 8>}, {transform_indices = @transform_2, window_bounds = array<i64: 2>}, {transform_indices = @transform_3, window_bounds = array<i64: 1, 1, 16, 16, 16>}]} {
    %c0 = arith.constant 0 : index
    %c0_0 = arith.constant 0 : index
    %c0_1 = arith.constant 0 : index
    %c0_2 = arith.constant 0 : index
    %c0_3 = arith.constant 0 : index
    %0 = vector.load %arg2[%c0, %c0_0, %c0_1, %c0_2, %c0_3] : memref<1x4x16x16x16xf32, #tpu.memory_space<vmem>>, vector<1x1x16x16x16xf32>
    %1 = vector.shape_cast %0 : vector<1x1x16x16x16xf32> to vector<16x16x16xf32>
    %c4_i32 = arith.constant 4 : i32
    %2 = arith.muli %arg1, %c4_i32 : i32
    %c0_i32 = arith.constant 0 : i32
    %3 = arith.addi %2, %c0_i32 : i32
    %4 = arith.index_cast %3 : i32 to index
    %5 = memref.load %arg3[%4] : memref<8xf32, #tpu.memory_space<smem>>
    %6 = vector.broadcast %5 : f32 to vector<16x16x16xf32>
    %7 = arith.mulf %1, %6 : vector<16x16x16xf32>
    %c0_4 = arith.constant 0 : index
    %c1 = arith.constant 1 : index
    %c0_5 = arith.constant 0 : index
    %c0_6 = arith.constant 0 : index
    %c0_7 = arith.constant 0 : index
    %8 = vector.load %arg2[%c0_4, %c1, %c0_5, %c0_6, %c0_7] : memref<1x4x16x16x16xf32, #tpu.memory_space<vmem>>, vector<1x1x16x16x16xf32>
    %9 = vector.shape_cast %8 : vector<1x1x16x16x16xf32> to vector<16x16x16xf32>
    %c4_i32_8 = arith.constant 4 : i32
    %10 = arith.muli %arg1, %c4_i32_8 : i32
    %c1_i32 = arith.constant 1 : i32
    %11 = arith.addi %10, %c1_i32 : i32
    %12 = arith.index_cast %11 : i32 to index
    %13 = memref.load %arg3[%12] : memref<8xf32, #tpu.memory_space<smem>>
    %14 = vector.broadcast %13 : f32 to vector<16x16x16xf32>
    %15 = arith.mulf %9, %14 : vector<16x16x16xf32>
    %c0_9 = arith.constant 0 : index
    %c2 = arith.constant 2 : index
    %c0_10 = arith.constant 0 : index
    %c0_11 = arith.constant 0 : index
    %c0_12 = arith.constant 0 : index
    %16 = vector.load %arg2[%c0_9, %c2, %c0_10, %c0_11, %c0_12] : memref<1x4x16x16x16xf32, #tpu.memory_space<vmem>>, vector<1x1x16x16x16xf32>
    %17 = vector.shape_cast %16 : vector<1x1x16x16x16xf32> to vector<16x16x16xf32>
    %c4_i32_13 = arith.constant 4 : i32
    %18 = arith.muli %arg1, %c4_i32_13 : i32
    %c2_i32 = arith.constant 2 : i32
    %19 = arith.addi %18, %c2_i32 : i32
    %20 = arith.index_cast %19 : i32 to index
    %21 = memref.load %arg3[%20] : memref<8xf32, #tpu.memory_space<smem>>
    %22 = vector.broadcast %21 : f32 to vector<16x16x16xf32>
    %23 = arith.mulf %17, %22 : vector<16x16x16xf32>
    %c0_14 = arith.constant 0 : index
    %c3 = arith.constant 3 : index
    %c0_15 = arith.constant 0 : index
    %c0_16 = arith.constant 0 : index
    %c0_17 = arith.constant 0 : index
    %24 = vector.load %arg2[%c0_14, %c3, %c0_15, %c0_16, %c0_17] : memref<1x4x16x16x16xf32, #tpu.memory_space<vmem>>, vector<1x1x16x16x16xf32>
    %25 = vector.shape_cast %24 : vector<1x1x16x16x16xf32> to vector<16x16x16xf32>
    %c4_i32_18 = arith.constant 4 : i32
    %26 = arith.muli %arg1, %c4_i32_18 : i32
    %c3_i32 = arith.constant 3 : i32
    %27 = arith.addi %26, %c3_i32 : i32
    %28 = arith.index_cast %27 : i32 to index
    %29 = memref.load %arg3[%28] : memref<8xf32, #tpu.memory_space<smem>>
    %30 = vector.broadcast %29 : f32 to vector<16x16x16xf32>
    %31 = arith.mulf %25, %30 : vector<16x16x16xf32>
    %32 = arith.addf %7, %15 : vector<16x16x16xf32>
    %33 = arith.addf %23, %31 : vector<16x16x16xf32>
    %34 = arith.addf %32, %33 : vector<16x16x16xf32>
    %35 = arith.index_cast %arg1 : i32 to index
    %36 = memref.load %arg4[%35] : memref<2xf32, #tpu.memory_space<smem>>
    %37 = vector.broadcast %36 : f32 to vector<16x16x16xf32>
    %38 = arith.addf %34, %37 : vector<16x16x16xf32>
    %39 = arith.negf %38 : vector<16x16x16xf32>
    %40 = math.exp %39 : vector<16x16x16xf32>
    %cst = arith.constant 1.000000e+00 : f32
    %41 = vector.broadcast %cst : f32 to vector<16x16x16xf32>
    %42 = arith.addf %41, %40 : vector<16x16x16xf32>
    %43 = arith.divf %41, %42 : vector<16x16x16xf32>
    %cst_19 = arith.constant 0.000000e+00 : f32
    %44 = vector.broadcast %cst_19 : f32 to vector<16x40x40xf32>
    %c0_20 = arith.constant 0 : index
    %c0_21 = arith.constant 0 : index
    %c0_22 = arith.constant 0 : index
    %45 = vector.load %arg6[%c0_20, %c0_21, %c0_22] : memref<16x40x40xf32, #tpu.memory_space<vmem>>, vector<16x40x40xf32>
    tpu.vector_store %arg6[%c0_20, %c0_21, %c0_22], %44 {strides = array<i32>} : memref<16x40x40xf32, #tpu.memory_space<vmem>>, vector<16x40x40xf32>,
    %c0_23 = arith.constant 0 : index
    %c12 = arith.constant 12 : index
    %c12_24 = arith.constant 12 : index
    %46 = vector.load %arg6[%c0_23, %c12, %c12_24] : memref<16x40x40xf32, #tpu.memory_space<vmem>>, vector<16x16x16xf32>
    tpu.vector_store %arg6[%c0_23, %c12, %c12_24], %43 {strides = array<i32>} : memref<16x40x40xf32, #tpu.memory_space<vmem>>, vector<16x16x16xf32>,
    %c0_25 = arith.constant 0 : index
    %c0_26 = arith.constant 0 : index
    %c0_27 = arith.constant 0 : index
    %47 = vector.load %arg6[%c0_25, %c0_26, %c0_27] : memref<16x40x40xf32, #tpu.memory_space<vmem>>, vector<16x20x40xf32>
    %c0_28 = arith.constant 0 : index
    %c5 = arith.constant 5 : index
    %c0_29 = arith.constant 0 : index
    %48 = vector.load %arg6[%c0_28, %c5, %c0_29] : memref<16x40x40xf32, #tpu.memory_space<vmem>>, vector<16x20x40xf32>
    %49 = arith.addf %47, %48 : vector<16x20x40xf32>
    %c0_30 = arith.constant 0 : index
    %c10 = arith.constant 10 : index
    %c0_31 = arith.constant 0 : index
    %50 = vector.load %arg6[%c0_30, %c10, %c0_31] : memref<16x40x40xf32, #tpu.memory_space<vmem>>, vector<16x20x40xf32>
    %c0_32 = arith.constant 0 : index
    %c15 = arith.constant 15 : index
    %c0_33 = arith.constant 0 : index
    %51 = vector.load %arg6[%c0_32, %c15, %c0_33] : memref<16x40x40xf32, #tpu.memory_space<vmem>>, vector<16x20x40xf32>
    %52 = arith.addf %50, %51 : vector<16x20x40xf32>
    %53 = arith.addf %49, %52 : vector<16x20x40xf32>
    %c0_34 = arith.constant 0 : index
    %c20 = arith.constant 20 : index
    %c0_35 = arith.constant 0 : index
    %54 = vector.load %arg6[%c0_34, %c20, %c0_35] : memref<16x40x40xf32, #tpu.memory_space<vmem>>, vector<16x20x40xf32>
    %55 = arith.addf %53, %54 : vector<16x20x40xf32>
    %56 = vector.extract_strided_slice %55 {offsets = [0, 0, 0], sizes = [16, 20, 20], strides = [1, 1, 1]} : vector<16x20x40xf32> to vector<16x20x20xf32>
    %57 = vector.extract_strided_slice %55 {offsets = [0, 0, 5], sizes = [16, 20, 20], strides = [1, 1, 1]} : vector<16x20x40xf32> to vector<16x20x20xf32>
    %58 = arith.addf %56, %57 : vector<16x20x20xf32>
    %59 = vector.extract_strided_slice %55 {offsets = [0, 0, 10], sizes = [16, 20, 20], strides = [1, 1, 1]} : vector<16x20x40xf32> to vector<16x20x20xf32>
    %60 = vector.extract_strided_slice %55 {offsets = [0, 0, 15], sizes = [16, 20, 20], strides = [1, 1, 1]} : vector<16x20x40xf32> to vector<16x20x20xf32>
    %61 = arith.addf %59, %60 : vector<16x20x20xf32>
    %62 = arith.addf %58, %61 : vector<16x20x20xf32>
    %63 = vector.extract_strided_slice %55 {offsets = [0, 0, 20], sizes = [16, 20, 20], strides = [1, 1, 1]} : vector<16x20x40xf32> to vector<16x20x20xf32>
    %64 = arith.addf %62, %63 : vector<16x20x20xf32>
    %65 = vector.extract_strided_slice %64 {offsets = [0, 2, 2], sizes = [16, 16, 16], strides = [1, 1, 1]} : vector<16x20x20xf32> to vector<16x16x16xf32>
    %66 = vector.extract_strided_slice %64 {offsets = [0, 1, 2], sizes = [16, 16, 16], strides = [1, 1, 1]} : vector<16x20x20xf32> to vector<16x16x16xf32>
    %67 = vector.extract_strided_slice %64 {offsets = [0, 3, 2], sizes = [16, 16, 16], strides = [1, 1, 1]} : vector<16x20x20xf32> to vector<16x16x16xf32>
    %68 = arith.addf %66, %67 : vector<16x16x16xf32>
    %69 = vector.extract_strided_slice %64 {offsets = [0, 2, 1], sizes = [16, 16, 16], strides = [1, 1, 1]} : vector<16x20x20xf32> to vector<16x16x16xf32>
    %70 = vector.extract_strided_slice %64 {offsets = [0, 2, 3], sizes = [16, 16, 16], strides = [1, 1, 1]} : vector<16x20x20xf32> to vector<16x16x16xf32>
    %71 = arith.addf %69, %70 : vector<16x16x16xf32>
    %72 = arith.addf %68, %71 : vector<16x16x16xf32>
    %73 = vector.extract_strided_slice %64 {offsets = [0, 0, 2], sizes = [16, 16, 16], strides = [1, 1, 1]} : vector<16x20x20xf32> to vector<16x16x16xf32>
    %74 = vector.extract_strided_slice %64 {offsets = [0, 4, 2], sizes = [16, 16, 16], strides = [1, 1, 1]} : vector<16x20x20xf32> to vector<16x16x16xf32>
    %75 = arith.addf %73, %74 : vector<16x16x16xf32>
    %76 = vector.extract_strided_slice %64 {offsets = [0, 2, 0], sizes = [16, 16, 16], strides = [1, 1, 1]} : vector<16x20x20xf32> to vector<16x16x16xf32>
    %77 = vector.extract_strided_slice %64 {offsets = [0, 2, 4], sizes = [16, 16, 16], strides = [1, 1, 1]} : vector<16x20x20xf32> to vector<16x16x16xf32>
    %78 = arith.addf %76, %77 : vector<16x16x16xf32>
    %79 = arith.addf %75, %78 : vector<16x16x16xf32>
    %80 = vector.extract_strided_slice %64 {offsets = [0, 1, 1], sizes = [16, 16, 16], strides = [1, 1, 1]} : vector<16x20x20xf32> to vector<16x16x16xf32>
    %81 = vector.extract_strided_slice %64 {offsets = [0, 1, 3], sizes = [16, 16, 16], strides = [1, 1, 1]} : vector<16x20x20xf32> to vector<16x16x16xf32>
    %82 = arith.addf %80, %81 : vector<16x16x16xf32>
    %83 = vector.extract_strided_slice %64 {offsets = [0, 3, 1], sizes = [16, 16, 16], strides = [1, 1, 1]} : vector<16x20x20xf32> to vector<16x16x16xf32>
    %84 = vector.extract_strided_slice %64 {offsets = [0, 3, 3], sizes = [16, 16, 16], strides = [1, 1, 1]} : vector<16x20x20xf32> to vector<16x16x16xf32>
    %85 = arith.addf %83, %84 : vector<16x16x16xf32>
    %86 = arith.addf %82, %85 : vector<16x16x16xf32>
    %cst_36 = arith.constant -2.400000e+01 : f32
    %87 = vector.broadcast %cst_36 : f32 to vector<16x16x16xf32>
    %88 = arith.mulf %87, %65 : vector<16x16x16xf32>
    %cst_37 = arith.constant 2.000000e+00 : f32
    %89 = vector.broadcast %cst_37 : f32 to vector<16x16x16xf32>
    %90 = arith.mulf %89, %72 : vector<16x16x16xf32>
    %91 = arith.addf %88, %90 : vector<16x16x16xf32>
    %92 = arith.addf %79, %86 : vector<16x16x16xf32>
    %93 = arith.addf %91, %92 : vector<16x16x16xf32>
    %cst_38 = arith.constant 0.000000e+00 : f32
    %94 = vector.broadcast %cst_38 : f32 to vector<2x16x16xf32>
    %c0_39 = arith.constant 0 : index
    %c0_40 = arith.constant 0 : index
    %c0_41 = arith.constant 0 : index
    %95 = vector.load %arg7[%c0_39, %c0_40, %c0_41] : memref<20x16x16xf32, #tpu.memory_space<vmem>>, vector<2x16x16xf32>
    tpu.vector_store %arg7[%c0_39, %c0_40, %c0_41], %94 {strides = array<i32>} : memref<20x16x16xf32, #tpu.memory_space<vmem>>, vector<2x16x16xf32>,
    %c18 = arith.constant 18 : index
    %c0_42 = arith.constant 0 : index
    %c0_43 = arith.constant 0 : index
    %96 = vector.load %arg7[%c18, %c0_42, %c0_43] : memref<20x16x16xf32, #tpu.memory_space<vmem>>, vector<2x16x16xf32>
    tpu.vector_store %arg7[%c18, %c0_42, %c0_43], %94 {strides = array<i32>} : memref<20x16x16xf32, #tpu.memory_space<vmem>>, vector<2x16x16xf32>,
    %c2_44 = arith.constant 2 : index
    %c0_45 = arith.constant 0 : index
    %c0_46 = arith.constant 0 : index
    %97 = vector.load %arg7[%c2_44, %c0_45, %c0_46] : memref<20x16x16xf32, #tpu.memory_space<vmem>>, vector<16x16x16xf32>
    tpu.vector_store %arg7[%c2_44, %c0_45, %c0_46], %93 {strides = array<i32>} : memref<20x16x16xf32, #tpu.memory_space<vmem>>, vector<16x16x16xf32>,
    %c0_47 = arith.constant 0 : index
    %c0_48 = arith.constant 0 : index
    %c0_49 = arith.constant 0 : index
    %98 = vector.load %arg7[%c0_47, %c0_48, %c0_49] : memref<20x16x16xf32, #tpu.memory_space<vmem>>, vector<16x16x16xf32>
    %c1_50 = arith.constant 1 : index
    %c0_51 = arith.constant 0 : index
    %c0_52 = arith.constant 0 : index
    %99 = vector.load %arg7[%c1_50, %c0_51, %c0_52] : memref<20x16x16xf32, #tpu.memory_space<vmem>>, vector<16x16x16xf32>
    %100 = arith.addf %98, %99 : vector<16x16x16xf32>
    %c2_53 = arith.constant 2 : index
    %c0_54 = arith.constant 0 : index
    %c0_55 = arith.constant 0 : index
    %101 = vector.load %arg7[%c2_53, %c0_54, %c0_55] : memref<20x16x16xf32, #tpu.memory_space<vmem>>, vector<16x16x16xf32>
    %c3_56 = arith.constant 3 : index
    %c0_57 = arith.constant 0 : index
    %c0_58 = arith.constant 0 : index
    %102 = vector.load %arg7[%c3_56, %c0_57, %c0_58] : memref<20x16x16xf32, #tpu.memory_space<vmem>>, vector<16x16x16xf32>
    %103 = arith.addf %101, %102 : vector<16x16x16xf32>
    %104 = arith.addf %100, %103 : vector<16x16x16xf32>
    %c4 = arith.constant 4 : index
    %c0_59 = arith.constant 0 : index
    %c0_60 = arith.constant 0 : index
    %105 = vector.load %arg7[%c4, %c0_59, %c0_60] : memref<20x16x16xf32, #tpu.memory_space<vmem>>, vector<16x16x16xf32>
    %106 = arith.addf %104, %105 : vector<16x16x16xf32>
    %cst_61 = arith.constant 5.000000e-02 : f32
    %107 = vector.broadcast %cst_61 : f32 to vector<16x16x16xf32>
    %108 = arith.mulf %107, %43 : vector<16x16x16xf32>
    %cst_62 = arith.constant 1.000000e+00 : f32
    %109 = vector.broadcast %cst_62 : f32 to vector<16x16x16xf32>
    %110 = arith.subf %109, %43 : vector<16x16x16xf32>
    %111 = arith.mulf %108, %110 : vector<16x16x16xf32>
    %cst_63 = arith.constant 0.00999999977 : f32
    %112 = vector.broadcast %cst_63 : f32 to vector<16x16x16xf32>
    %113 = arith.mulf %112, %106 : vector<16x16x16xf32>
    %114 = arith.addf %111, %113 : vector<16x16x16xf32>
    %cst_64 = arith.constant 1.000000e-01 : f32
    %115 = vector.broadcast %cst_64 : f32 to vector<16x16x16xf32>
    %116 = arith.mulf %115, %114 : vector<16x16x16xf32>
    %117 = arith.addf %43, %116 : vector<16x16x16xf32>
    %c0_65 = arith.constant 0 : index
    %c0_66 = arith.constant 0 : index
    %c0_67 = arith.constant 0 : index
    %c0_68 = arith.constant 0 : index
    %c0_69 = arith.constant 0 : index
    %118 = vector.load %arg5[%c0_65, %c0_66, %c0_67, %c0_68, %c0_69] : memref<1x1x16x16x16xf32, #tpu.memory_space<vmem>>, vector<1x1x16x16x16xf32>
    %119 = vector.shape_cast %118 : vector<1x1x16x16x16xf32> to vector<16x16x16xf32>
    %120 = vector.shape_cast %117 : vector<16x16x16xf32> to vector<1x1x16x16x16xf32>
    tpu.vector_store %arg5[%c0_65, %c0_66, %c0_67, %c0_68, %c0_69], %120 {strides = array<i32>} : memref<1x1x16x16x16xf32, #tpu.memory_space<vmem>>, vector<1x1x16x16x16xf32>,
    return
  }
  func.func @transform_0(%arg0: i32, %arg1: i32) -> (i32, i32, i32, i32, i32) {
    %c0_i32 = arith.constant 0 : i32
    %c0_i32_0 = arith.constant 0 : i32
    %c0_i32_1 = arith.constant 0 : i32
    %c0_i32_2 = arith.constant 0 : i32
    %c0_i32_3 = arith.constant 0 : i32
    return %arg0, %c0_i32, %c0_i32_0, %c0_i32_1, %c0_i32_2 : i32, i32, i32, i32, i32
  }
  func.func @transform_1(%arg0: i32, %arg1: i32) -> i32 {
    %c0_i32 = arith.constant 0 : i32
    %c0_i32_0 = arith.constant 0 : i32
    return %c0_i32 : i32
  }
  func.func @transform_2(%arg0: i32, %arg1: i32) -> i32 {
    %c0_i32 = arith.constant 0 : i32
    %c0_i32_0 = arith.constant 0 : i32
    return %c0_i32 : i32
  }
  func.func @transform_3(%arg0: i32, %arg1: i32) -> (i32, i32, i32, i32, i32) {
    %c0_i32 = arith.constant 0 : i32
    %c0_i32_0 = arith.constant 0 : i32
    %c0_i32_1 = arith.constant 0 : i32
    %c0_i32_2 = arith.constant 0 : i32
    return %arg0, %arg1, %c0_i32, %c0_i32_0, %c0_i32_1 : i32, i32, i32, i32, i32
  }
}

</mosaic_0001>

<bundles_post_ra>
// kernel: tpu_custom_call.1
= control target key start
LH: loop header
LB: loop body
LE: loop exit
PB: predicated region body
PF: predicated region fallthrough
CT: control target
= control target key end

     0   :  { %s10155_s0 = inlined_call_operand.hbm [shape: f32[2,4,16,16,16], index: 0, kind: input, shape index: {}]   ;;  %s10156_s1 = inlined_call_operand.vmem [shape: f32[8], index: 1, kind: input, shape index: {}]   ;;  %s10157_s2 = inlined_call_operand.vmem [shape: f32[2], index: 2, kind: input, shape index: {}]   ;;  %s10158_s3 = inlined_call_operand.hbm [shape: f32[2,2,16,16,16], index: 3, kind: output, shape index: {}]  }
   0x1   :  { %10401 = sst [smem:[#allocation208_spill]] %s10156_s1 }
   0x2   :  { %10402 = sst [smem:[#allocation209_spill]] %s10157_s2 }
   0x3   :  { %8 = vsyncpa [#allocation5], 0 }
   0x4   :  { %10 = vsyncpa [#allocation5 + $0x1], 0 }
   0x5   :  { %11 = vsyncpa [#allocation7], 0 }
   0x6   :  { %12 = vsyncpa [#allocation10], 0 }
   0x7   :  { %13 = vsyncpa [#allocation6], 0 }
   0x8   :  { %15 = vsyncpa [#allocation6 + $0x1], 0  ;;  %s5994_s12 = smov 0   ;;  %s5996_s13 = smov 0  }
   0x9   :  { %s5998_s14 = smov 0   ;;  %s6000_s15 = smov 0  }
   0xa   :  { %s6002_s16 = smov 0   ;;  %s6004_s17 = smov 0  }
   0xb   :  { %s6006_s18 = smov 0   ;;  %s6008_s19 = smov 0  }
   0xc   :  { %s6010_s20 = smov 0   ;;  %s6012_s21 = smov 0  }
   0xd   :  { %s6014_s22 = smov 0  }
   0xe LB: > { %10403 = sst [smem:[#allocation16_spill]] %s5915_s12  ;;  %s5355_s23 = sadd.s32 4294967295, %s5955_s22   ;;  %s5955_s22 = sphi %s6014_s22, %s21_s22   ;;  %s5951_s21 = sphi %s6012_s21, %s11084_s21   ;;  %s5947_s20 = sphi %s6010_s20, %s11083_s20   ;;  %s5943_s19 = sphi %s6008_s19, %s11082_s19   ;;  %s5939_s18 = sphi %s6006_s18, %s11074_s18   ;;  %s5935_s17 = sphi %s6004_s17, %s11081_s17   ;;  %s5931_s16 = sphi %s6002_s16, %s11080_s16   ;;  %s5927_s15 = sphi %s6000_s15, %s11079_s15   ;;  %s5923_s14 = sphi %s5998_s14, %s11078_s14   ;;  %s5919_s13 = sphi %s5996_s13, %s11077_s13   ;;  %s5915_s12 = sphi %s5994_s12, %s11076_s12  }
   0xf   : > { %10404 = sst [smem:[#allocation17_spill]] %s5947_s20  ;;  %s5356_s24 = sadd.s32 4294967294, %s5955_s22  }
  0x10   : > { %10405 = sst [smem:[#allocation18_spill]] %s5955_s22  ;;  %p47_p0 = scmp.ne.s32.totalorder %s5935_s17, %s5931_s16 }
  0x11   : > { %p48_p1 = scmp.eq.s32.totalorder %s5955_s22, 0  ;;  %p53_p2 = scmp.ne.s32.totalorder %s5931_s16, %s5927_s15 }
  0x12   : > { %p6054_p3 = scmp.eq.s32.totalorder %s5355_s23, 0  ;;  %p120_p5 = scmp.ne.s32.totalorder %s5923_s14, %s5919_s13 }
  0x13   : > { %p6059_p4 = por %p48_p1, %p47_p0  ;;  %p121_p7 = scmp.eq.s32.totalorder %s5355_s23, 3 }
  0x14   : > { %s10406_s26 = scalar_select %p6054_p3, 1, 0 }
  0x15   : > { %p6067_p6 = por %p6054_p3, %p53_p2  ;;  %p126_p8 = scmp.ne.s32.totalorder %s5919_s13, %s5915_s12 }
  0x16   : > { %p127_p9 = scmp.eq.s32.totalorder %s5356_s24, 3  ;;  %p6073_p10 = por %p121_p7, %p120_p5 }
  0x17   : > { %s10408_s29 = scalar_select %p6067_p6, 1, 0 }
  0x18   : > { %s10409_s30 = scalar_select %p6073_p10, 1, 0 }
  0x19   : > { %p5357_p11 = scmp.ge.s32.totalorder %s5955_s22, 1  ;;  %p6078_p12 = por %p127_p9, %p126_p8 }
  0x1a   : > { %p134_p13 = scmp.lt.s32.totalorder %s5955_s22, 5  ;;  %s10412_s1 = sld [smem:[#allocation208_spill]] }
  0x1b   : > { %s10410_s4 = scalar_select %p6078_p12, 1, 0 }
  0x1c   : > { %p6086_p0 = pnand %p5357_p11, %p134_p13  ;;  %p5534_p2 = scmp.lt.s32.totalorder %s5955_s22, 4 }
  0x1d   : > { %10411 = sst [smem:[#allocation19_spill]] %s10410_s4 }
  0x1e   : > { %s10413_s8 = scalar_select %p6086_p0, 1, 0 }
  0x1f   : > { %p5517_p1 = pneg %p6086_p0  ;;  %s10414_s2 = sld [smem:[#allocation209_spill]] }
  0x20   : > { %s147_s7 = sshll.u32 %s10412_s1, 4  ;;  %p6104_p7 = pnand %p5534_p2, %p6059_p4  ;;  %s148_s7 = int_to_ptr.vmem [resolvable:$true] %s147_s7 }
  0x21   : > { %p6098_p5 = pnand %p5517_p1, %p6054_p3  ;;  %s5769_s24 = scalar_lea.vmem %s148_s7, 16 }
  0x22   : > { %s10416_s23 = scalar_select %p6104_p7, 1, 0 }
  0x23   : > { %p5770_p8 = scmp.ne.s32.totalorder %s148_s7, %s5769_s24  ;;  %p5771_p9 = pneg %p6098_p5 }
  0x24   : > { %p5777_p12 = scmp.lt.s32.totalorder %s148_s7, %s148_s7  ;;  %p5778_p10 = scmp.lt.s32.totalorder %s5769_s24, %s5769_s24 }
  0x25   : > { %s158_s11 = sshll.u32 %s10414_s2, 4  ;;  %p5772_p11 = pnand %p5771_p9, %p5770_p8  ;;  %s159_s11 = int_to_ptr.vmem [resolvable:$true] %s158_s11 }
  0x26   : > { %p5779_p6 = por %p5778_p10, %p5777_p12 }
  0x27   : > { %p5773_p13 = pneg %p5772_p11 }
  0x29   : > { %p5780_p1 = pnand %p5779_p6, %p5773_p13 }
  0x2b   : > { %5783 = shalt.err (!%p5780_p1)
}
  0x2c   : > { %s5957_s5 = smov [#allocation8]   ;;  %s5784_s28 = scalar_lea.vmem %s159_s11, 16 }
  0x2d   : > { %5520 = dma.vmem_to_smem (!%p6098_p5), %s148_s7, 16, %s5957_s5, [#allocation7]  }
  0x2e   : > { %p5785_p4 = scmp.ne.s32.totalorder %s159_s11, %s5784_s28  ;;  %p5792_p0 = scmp.lt.s32.totalorder %s159_s11, %s159_s11 }
  0x2f   : > { %p5793_p7 = scmp.lt.s32.totalorder %s5784_s28, %s5784_s28 }
  0x30   : > { %p5787_p2 = pnand %p5785_p4, %p5771_p9 }
  0x31   : > { %p5794_p8 = por %p5793_p7, %p5792_p0 }
  0x32   : > { %p5788_p3 = pneg %p5787_p2 }
  0x34   : > { %p5795_p11 = pnand %p5794_p8, %p5788_p3 }
  0x36   : > { %5798 = shalt.err (!%p5795_p11)
}
  0x37   : > { %s5958_s6 = smov [#allocation9]   ;;  %s30_s7 = sadd.s32 1, %s5947_s20 }
  0x38   : > { %5523 = dma.vmem_to_smem (!%p6098_p5), %s159_s11, 16, %s5958_s6, [#allocation10]  }
  0x39   : > { %p31_p6 = scmp.ge.s32.totalorder %s30_s7, 2  ;;  %s33_s9 = sadd.s32 1, %s5951_s21 }
  0x3a   : > { %s169_s10 = sand.u32 1, %s5935_s17   ;;  %s5504_s24 = sshll.u32 %s5951_s21, 14 }
  0x3b   : > { %s11086_s7 = smov (%p31_p6, %s30_s7), 0  ;;  %s11088_s9 = smov (!%p31_p6, %s33_s9), %s5951_s21 }
  0x3c   : > { %10417 = sst [smem:[#allocation20_spill]] %s11086_s7  ;;  %s106_s15 = ssub.s32 %s5947_s20, %s11086_s7 }
  0x3d   : > { %p35_p3 = scmp.ge.s32.totalorder %s11088_s9, 2  ;;  %s5361_s5 = sshll.u32 %s169_s10, 10 }
  0x3e   : > { %s6126_s11 = scalar_lea.hbm %s10155_s0, %s5504_s24  ;;  %s173_s6 = scalar_lea.vmem [#allocation4], %s5361_s5 }
  0x3f   : > { %s11090_s9 = smov (%p35_p3, %s11088_s9), 0  ;;  %s180_s25 = sshll.u32 %s173_s6, 4  ;;  %s181_s25 = int_to_ptr.vmem [resolvable:$true] %s180_s25 }
  0x40   : > { %s37_s1 = ssub.s32 %s5951_s21, %s11090_s9  ;;  %s10418_s4 = sadd.s32 1, %s5935_s17 }
  0x41   : > { %p38_p10 = scmp.eq.s32.totalorder %s37_s1, 0  ;;  %s107_s2 = sor.u32 %s106_s15, %s37_s1 }
  0x42   : > { %p108_p12 = scmp.eq.s32.totalorder %s107_s2, 0  ;;  %s10419_s7 = sadd.s32 1, %s5923_s14 }
  0x43   : > { %s6135_s12 = scalar_select %p38_p10, %s5935_s17, %s10418_s4  }
  0x44   : > { %s6140_s20 = scalar_select %p108_p12, %s5923_s14, %s10419_s7  }
  0x45   : > { %s170_s22 = scalar_lea.sflag [#allocation5], %s169_s10  ;;  %p10420_p0 = scmp.ne.s32.totalorder %s10416_s23, 0 }
  0x46   : > { %s5812_s27 = scalar_lea.vmem %s181_s25, 16384  ;;  %s5959_s24 = smov [#allocation4]  }
  0x47   : > { %p5801_p5 = pneg %p10420_p0  ;;  %p5813_p7 = scmp.ne.s32.totalorder %s181_s25, %s5812_s27 }
  0x48   : > { %s5817_s5 = sshll.u32 %s5959_s24, 4  ;;  %s5818_s5 = int_to_ptr.vmem [resolvable:$false] %s5817_s5 }
  0x49   : > { %p5815_p9 = pnand %p5813_p7, %p5801_p5  ;;  %s5819_s28 = scalar_lea.vmem %s5818_s5, 32768 }
  0x4a   : > { %p5820_p1 = scmp.lt.s32.totalorder %s181_s25, %s5818_s5  ;;  %p5821_p4 = scmp.lt.s32.totalorder %s5819_s28, %s5812_s27 }
  0x4b   : > { %p5816_p13 = pneg %p5815_p9 }
  0x4c   : > { %p5822_p2 = por %p5821_p4, %p5820_p1 }
  0x4e   : > { %p5823_p8 = pnand %p5822_p2, %p5816_p13 }
  0x50   : > { %5826 = shalt.err (!%p5823_p8)
}
  0x51   : > { %s5960_s1 = smov 128   ;;  %s5961_s2 = smov 8  }
  0x52   : > { %5527 = dma.hbm_to_vmem [thread:$0]  (!%p10420_p0), %s6126_s11, 16384, %s181_s25, %s170_s22, %s5960_s1, %s5960_s1, %s5961_s2  }
  0x53   : > { %p10421_p11 = scmp.ne.s32.totalorder %s10413_s8, 0 }
  0x55   : > { %192 = sbr.rel (%p10421_p11) target bundleno = 1451 (0x5ab), region = 32 }
  0x5a   : > { %s194_s4 = sand.u32 1, %s5931_s16   ;;  %p10422_p6 = scmp.ne.s32.totalorder %s10408_s29, 0 }
  0x5b   : > { %s5365_s7 = sshll.u32 %s194_s4, 10  ;;  %s195_s10 = scalar_lea.sflag [#allocation5], %s194_s4 }
  0x5c   : > { %s6150_s15 = scalar_lea.vmem [#allocation4], %s5365_s7 }
  0x5d   : > { %5898 = dma.done.wait (%p10422_p6), %s195_s10, 16384  }
  0x5e   : > { %5900 = vsyncadd (%p10422_p6), %s195_s10, 4294950912  ;;  %p10423_p3 = scmp.ne.s32.totalorder %s10406_s26, 0 }
  0x60   : > { %5902 = dma.done.wait (%p10423_p3), [#allocation7], 16  }
  0x61   : > { %5904 = vsyncadd (%p10423_p3), [#allocation7], 4294967280 }
  0x62   : > { %5906 = dma.done.wait (%p10423_p3), [#allocation10], 16  }
  0x63   : > { %5908 = vsyncadd (%p10423_p3), [#allocation10], 4294967280 }
  0x64   : > { %211 = sfence }
  0x65   : > { %s5369_s22 = sshll.u32 %s5939_s18, 2  ;;  %s597_s25 = sld [smem:[#allocation9 + %s5939_s18]]  ;;  %v232_v0 = vld [vmem:[%s6150_s15 + $0x10] sm:$0xff]  ;;  %v230_v2 = vld [vmem:[%s6150_s15] sm:$0xff]  ;;  %v233_v3 = vld [vmem:[%s6150_s15 + $0x18] sm:$0xff]  ;;  %vm823_vm0 = vcmask 326656  }
  0x66   : > { %s263_s29 = sld [smem:[#allocation8 + %s5369_s22]]  ;;  %s330_s8 = sadd.s32 1, %s5369_s22  ;;  %v5372_v1 = vld [vmem:[%s6150_s15 + $0x110] sm:$0xff]  ;;  %v5370_v5 = vld [vmem:[%s6150_s15 + $0x100] sm:$0xff]  ;;  %v5373_v6 = vld [vmem:[%s6150_s15 + $0x118] sm:$0xff]  ;;  %vm1032_vm1 = vcmask 228448  }
  0x67   : > { %s331_s23 = sld [smem:[#allocation8 + %s330_s8]]  ;;  %s398_s11 = sadd.s32 2, %s5369_s22  ;;  %v5404_v4 = vld [vmem:[%s6150_s15 + $0x210] sm:$0xff]  ;;  %v5402_v9 = vld [vmem:[%s6150_s15 + $0x200] sm:$0xff]  ;;  %v5405_v10 = vld [vmem:[%s6150_s15 + $0x218] sm:$0xff]  ;;  %vm2217_vm2 = vcmask 1045504  }
  0x68   : > { %s399_s26 = sld [smem:[#allocation8 + %s398_s11]]  ;;  %s466_s6 = sadd.s32 3, %s5369_s22  ;;  %v5436_v13 = vld [vmem:[%s6150_s15 + $0x310] sm:$0xff]  ;;  %v5434_v15 = vld [vmem:[%s6150_s15 + $0x300] sm:$0xff]  ;;  %v5437_v21 = vld [vmem:[%s6150_s15 + $0x318] sm:$0xff]  ;;  %vm2634_vm3 = vcmask 1046528  }
  0x69   : > { %s467_s27 = sld [smem:[#allocation8 + %s466_s6]]  ;;  %v231_v22 = vld [vmem:[%s6150_s15 + $0x8] sm:$0xff]  ;;  %v234_v46 = vld [vmem:[%s6150_s15 + $0x20] sm:$0xff]  ;;  %s5962_s24 = smov 12   ;;  %vm2907_vm4 = vcmask 1043456   ;;  %vm3820_vm5 = vcmask 1040384  }
  0x6a   : > { %v5371_v23 = vld [vmem:[%s6150_s15 + $0x108] sm:$0xff]  ;;  %v5374_v51 = vld [vmem:[%s6150_s15 + $0x120] sm:$0xff]  ;;  %s5964_s5 = smov 123   ;;  %s5965_s28 = smov 108   ;;  %vm4430_vm6 = vcmask 130048   ;;  %vm4285_vm7 = vcmask 1041408  }
  0x6b   : > { %v6175_v8 = vstv %s597_s25  ;;  %v5403_v28 = vld [vmem:[%s6150_s15 + $0x208] sm:$0xff]  ;;  %v5406_v56 = vld [vmem:[%s6150_s15 + $0x220] sm:$0xff]  ;;  %s5966_s1 = smov 118   ;;  %s5967_s2 = smov 126   ;;  %vm4633_vm8 = vcmask 130050   ;;  %vm4636_vm9 = vcmask 123904  }
  0x6c   : > { %v6173_v7 = vstv %s263_s29  ;;  %v5435_v29 = vld [vmem:[%s6150_s15 + $0x308] sm:$0xff]  ;;  %v5438_v57 = vld [vmem:[%s6150_s15 + $0x320] sm:$0xff]  ;;  %s5968_s4 = smov 1   ;;  %s5969_s7 = smov 124  }
  0x6d   : > { %v267_v11 = vmul.f32 %v6173_v7, %v232_v0  ;;  %v6180_v12 = vstv %s331_s23  ;;  %v265_v14 = vmul.f32 %v6173_v7, %v230_v2  ;;  %v268_v16 = vmul.f32 %v6173_v7, %v233_v3  ;;  %v235_v34 = vld [vmem:[%s6150_s15 + $0x28] sm:$0xff]  ;;  %v237_v2 = vld [vmem:[%s6150_s15 + $0x38] sm:$0xff]  ;;  %s5970_s10 = smov 2   ;;  %s5499_s29 = sshll.u32 %s5939_s18, 5 }
  0x6e   : > { %v335_v17 = vmul.f32 %v5372_v1, %v6180_v12  ;;  %v6187_v18 = vstv %s399_s26  ;;  %v333_v19 = vmul.f32 %v5370_v5, %v6180_v12  ;;  %v336_v20 = vmul.f32 %v5373_v6, %v6180_v12  ;;  %v5375_v35 = vld [vmem:[%s6150_s15 + $0x128] sm:$0xff]  ;;  %s5500_s8 = sshll.u32 %s5943_s19, 6  ;;  %p11068_p12 = scmp.ne.s32.totalorder %s10409_s30, 0 }
  0x6f   : > { %v403_v24 = vmul.f32 %v5404_v4, %v6187_v18  ;;  %v6195_v25 = vstv %s467_s27  ;;  %v401_v26 = vmul.f32 %v5402_v9, %v6187_v18  ;;  %v404_v27 = vmul.f32 %v5405_v10, %v6187_v18  ;;  %v5407_v40 = vld [vmem:[%s6150_s15 + $0x228] sm:$0xff]  ;;  %v5377_v9 = vld [vmem:[%s6150_s15 + $0x138] sm:$0xff]  ;;  %s5243_s23 = sadd.s32 %s5500_s8, %s5499_s29 }
  0x70   : > { %v471_v30 = vmul.f32 %v5436_v13, %v6195_v25  ;;  %v503_v31 = vadd.f32 %v335_v17, %v267_v11  ;;  %v469_v32 = vmul.f32 %v5434_v15, %v6195_v25  ;;  %v501_v33 = vadd.f32 %v333_v19, %v265_v14  ;;  %v5439_v45 = vld [vmem:[%s6150_s15 + $0x328] sm:$0xff]  ;;  %v5409_v10 = vld [vmem:[%s6150_s15 + $0x238] sm:$0xff]  ;;  %s5501_s19 = sshll.u32 %s5243_s23, 7 }
  0x71   : > { %v472_v36 = vmul.f32 %v5437_v21, %v6195_v25  ;;  %v504_v37 = vadd.f32 %v336_v20, %v268_v16  ;;  %v266_v38 = vmul.f32 %v6173_v7, %v231_v22  ;;  %v334_v39 = vmul.f32 %v5371_v23, %v6180_v12  ;;  %v5441_v16 = vld [vmem:[%s6150_s15 + $0x338] sm:$0xff]  ;;  %v236_v22 = vld [vmem:[%s6150_s15 + $0x30] sm:$0xff]  ;;  %s10087_s6 = scalar_lea.hbm %s10158_s3, %s5501_s19 }
  0x72   : > { %v535_v41 = vadd.f32 %v471_v30, %v403_v24  ;;  %v533_v42 = vadd.f32 %v469_v32, %v401_v26  ;;  %v402_v43 = vmul.f32 %v5403_v28, %v6187_v18  ;;  %v470_v44 = vmul.f32 %v5435_v29, %v6195_v25  ;;  %v5376_v23 = vld [vmem:[%s6150_s15 + $0x130] sm:$0xff] }
  0x73   : > { %v536_v47 = vadd.f32 %v472_v36, %v404_v27  ;;  %v502_v48 = vadd.f32 %v334_v39, %v266_v38  ;;  %v270_v49 = vmul.f32 %v6173_v7, %v235_v34  ;;  %v338_v50 = vmul.f32 %v5375_v35, %v6180_v12  ;;  %v5440_v32 = vld [vmem:[%s6150_s15 + $0x330] sm:$0xff] }
  0x74   : > { %v567_v52 = vadd.f32 %v535_v41, %v503_v31  ;;  %v565_v53 = vadd.f32 %v533_v42, %v501_v33  ;;  %v534_v54 = vadd.f32 %v470_v44, %v402_v43  ;;  %v406_v55 = vmul.f32 %v5407_v40, %v6187_v18  ;;  %v5408_v31 = vld [vmem:[%s6150_s15 + $0x230] sm:$0xff]  ;;  %v239_v33 = vld [vmem:[%s6150_s15 + $0x48] sm:$0xff]  ;;  %v238_v43 = vld [vmem:[%s6150_s15 + $0x40] sm:$0xff] }
  0x75   : > { %v568_v58 = vadd.f32 %v536_v47, %v504_v37  ;;  %v474_v59 = vmul.f32 %v5439_v45, %v6195_v25  ;;  %v506_v60 = vadd.f32 %v338_v50, %v270_v49  ;;  %v269_v61 = vmul.f32 %v6173_v7, %v234_v46  ;;  %v5379_v37 = vld [vmem:[%s6150_s15 + $0x148] sm:$0xff] }
  0x76   : > { %v601_v62 = vadd.f32 %v6175_v8, %v567_v52  ;;  %v599_v63 = vadd.f32 %v6175_v8, %v565_v53  ;;  %v566_v0 = vadd.f32 %v534_v54, %v502_v48  ;;  %v337_v1 = vmul.f32 %v5374_v51, %v6180_v12  ;;  %v5411_v41 = vld [vmem:[%s6150_s15 + $0x248] sm:$0xff]  ;;  %v5378_v48 = vld [vmem:[%s6150_s15 + $0x140] sm:$0xff] }
  0x77   : > { %v602_v3 = vadd.f32 %v6175_v8, %v568_v58  ;;  %v538_v4 = vadd.f32 %v474_v59, %v406_v55  ;;  %v405_v5 = vmul.f32 %v5406_v56, %v6187_v18  ;;  %v473_v6 = vmul.f32 %v5438_v57, %v6195_v25  ;;  %v5443_v42 = vld [vmem:[%s6150_s15 + $0x348] sm:$0xff]  ;;  %v5410_v52 = vld [vmem:[%s6150_s15 + $0x240] sm:$0xff]  ;;  %v241_v58 = vld [vmem:[%s6150_s15 + $0x58] sm:$0xff] }
  0x78   : > { %v5468_v11 = vmul.f32 -1.442695, %v601_v62  ;;  %v5466_v13 = vmul.f32 -1.442695, %v599_v63  ;;  %v600_v14 = vadd.f32 %v6175_v8, %v566_v0  ;;  %v505_v15 = vadd.f32 %v337_v1, %v269_v61  ;;  %v5442_v53 = vld [vmem:[%s6150_s15 + $0x340] sm:$0xff]  ;;  %v5381_v59 = vld [vmem:[%s6150_s15 + $0x158] sm:$0xff] }
  0x79   : > { %v5469_v17 = vmul.f32 -1.442695, %v602_v3  ;;  %v570_v19 = vadd.f32 %v538_v4, %v506_v60  ;;  %v537_v20 = vadd.f32 %v473_v6, %v405_v5  ;;  %v272_v21 = vmul.f32 %v6173_v7, %v237_v2  ;;  %v5413_v63 = vld [vmem:[%s6150_s15 + $0x258] sm:$0xff]  ;;  %v240_v5 = vld [vmem:[%s6150_s15 + $0x50] sm:$0xff] }
  0x7a   : > { %5641 = vpow2.f32 %v5468_v11  ;;  %v5467_v24 = vmul.f32 -1.442695, %v600_v14  ;;  %v340_v26 = vmul.f32 %v5377_v9, %v6180_v12  ;;  %v408_v27 = vmul.f32 %v5409_v10, %v6187_v18  ;;  %v5445_v4 = vld [vmem:[%s6150_s15 + $0x358] sm:$0xff] }
  0x7b   : > { %5643 = vpow2.f32 %v5466_v13  ;;  %v604_v28 = vadd.f32 %v6175_v8, %v570_v19  ;;  %v569_v29 = vadd.f32 %v537_v20, %v505_v15  ;;  %v476_v30 = vmul.f32 %v5441_v16, %v6195_v25  ;;  %v5380_v13 = vld [vmem:[%s6150_s15 + $0x150] sm:$0xff] }
  0x7c   : > { %5645 = vpow2.f32 %v5469_v17  ;;  %v508_v34 = vadd.f32 %v340_v26, %v272_v21  ;;  %v271_v35 = vmul.f32 %v6173_v7, %v236_v22  ;;  %v339_v36 = vmul.f32 %v5376_v23, %v6180_v12  ;;  %v5412_v19 = vld [vmem:[%s6150_s15 + $0x250] sm:$0xff]  ;;  %v243_v21 = vld [vmem:[%s6150_s15 + $0x68] sm:$0xff] }
  0x7d   : > { %5647 = vpow2.f32 %v5467_v24  ;;  %v5471_v38 = vmul.f32 -1.442695, %v604_v28  ;;  %v603_v39 = vadd.f32 %v6175_v8, %v569_v29  ;;  %v540_v40 = vadd.f32 %v476_v30, %v408_v27  ;;  %v5444_v20 = vld [vmem:[%s6150_s15 + $0x350] sm:$0xff] }
  0x7e   : > { %v407_v44 = vmul.f32 %v5408_v31, %v6187_v18  ;;  %v475_v45 = vmul.f32 %v5440_v32, %v6195_v25  ;;  %v507_v46 = vadd.f32 %v339_v36, %v271_v35  ;;  %v274_v47 = vmul.f32 %v6173_v7, %v239_v33  ;;  %v5383_v35 = vld [vmem:[%s6150_s15 + $0x168] sm:$0xff] }
  0x7f   : > { %5649 = vpow2.f32 %v5471_v38  ;;  %v5470_v49 = vmul.f32 -1.442695, %v603_v39  ;;  %v572_v50 = vadd.f32 %v540_v40, %v508_v34  ;;  %v342_v51 = vmul.f32 %v5379_v37, %v6180_v12 }
  0x80   : > { %v539_v54 = vadd.f32 %v475_v45, %v407_v44  ;;  %v410_v55 = vmul.f32 %v5411_v41, %v6187_v18  ;;  %v478_v56 = vmul.f32 %v5443_v42, %v6195_v25  ;;  %v273_v57 = vmul.f32 %v6173_v7, %v238_v43  ;;  %v5415_v45 = vld [vmem:[%s6150_s15 + $0x268] sm:$0xff] }
  0x81   : > { %5651 = vpow2.f32 %v5470_v49  ;;  %v606_v60 = vadd.f32 %v6175_v8, %v572_v50  ;;  %v510_v61 = vadd.f32 %v342_v51, %v274_v47  ;;  %v341_v62 = vmul.f32 %v5378_v48, %v6180_v12 }
  0x82   : > { %v571_v0 = vadd.f32 %v539_v54, %v507_v46  ;;  %v542_v1 = vadd.f32 %v478_v56, %v410_v55  ;;  %v409_v2 = vmul.f32 %v5410_v52, %v6187_v18  ;;  %v477_v3 = vmul.f32 %v5442_v53, %v6195_v25  ;;  %v5447_v46 = vld [vmem:[%s6150_s15 + $0x368] sm:$0xff]  ;;  %v242_v54 = vld [vmem:[%s6150_s15 + $0x60] sm:$0xff] }
  0x83   : > { %v5473_v6 = vmul.f32 -1.442695, %v606_v60  ;;  %v509_v9 = vadd.f32 %v341_v62, %v273_v57  ;;  %v276_v10 = vmul.f32 %v6173_v7, %v241_v58  ;;  %v344_v11 = vmul.f32 %v5381_v59, %v6180_v12  ;;  %v5382_v55 = vld [vmem:[%s6150_s15 + $0x160] sm:$0xff] }
  0x84   : > { %v605_v14 = vadd.f32 %v6175_v8, %v571_v0  ;;  %v574_v15 = vadd.f32 %v542_v1, %v510_v61  ;;  %v541_v16 = vadd.f32 %v477_v3, %v409_v2  ;;  %v412_v17 = vmul.f32 %v5413_v63, %v6187_v18  ;;  %v5414_v60 = vld [vmem:[%s6150_s15 + $0x260] sm:$0xff] }
  0x85   : > { %5653 = vpow2.f32 %v5473_v6  ;;  %v480_v22 = vmul.f32 %v5445_v4, %v6195_v25  ;;  %v512_v23 = vadd.f32 %v344_v11, %v276_v10  ;;  %v275_v24 = vmul.f32 %v6173_v7, %v240_v5  ;;  %v5446_v0 = vld [vmem:[%s6150_s15 + $0x360] sm:$0xff]  ;;  %v245_v5 = vld [vmem:[%s6150_s15 + $0x78] sm:$0xff] }
  0x86   : > { %v5472_v26 = vmul.f32 -1.442695, %v605_v14  ;;  %v608_v27 = vadd.f32 %v6175_v8, %v574_v15  ;;  %v573_v28 = vadd.f32 %v541_v16, %v509_v9  ;;  %v343_v29 = vmul.f32 %v5380_v13, %v6180_v12  ;;  %v5385_v6 = vld [vmem:[%s6150_s15 + $0x178] sm:$0xff] }
  0x87   : > { %v5642_v30 = vpop.eup %5641  ;;  %v544_v31 = vadd.f32 %v480_v22, %v412_v17  ;;  %v411_v32 = vmul.f32 %v5412_v19, %v6187_v18  ;;  %v479_v33 = vmul.f32 %v5444_v20, %v6195_v25  ;;  %v278_v34 = vmul.f32 %v6173_v7, %v243_v21  ;;  %v5417_v9 = vld [vmem:[%s6150_s15 + $0x278] sm:$0xff]  ;;  %v244_v19 = vld [vmem:[%s6150_s15 + $0x70] sm:$0xff] }
  0x88   : > { %v5644_v36 = vpop.eup %5643  ;;  %v729_v37 = vadd.f32 1.0, %v5642_v30  ;;  %5655 = vpow2.f32 %v5472_v26  ;;  %v5475_v38 = vmul.f32 -1.442695, %v608_v27  ;;  %v607_v39 = vadd.f32 %v6175_v8, %v573_v28  ;;  %v5449_v14 = vld [vmem:[%s6150_s15 + $0x378] sm:$0xff]  ;;  %v5448_v30 = vld [vmem:[%s6150_s15 + $0x370] sm:$0xff] }
  0x89   : > { %v5646_v40 = vpop.eup %5645  ;;  %v727_v41 = vadd.f32 1.0, %v5644_v36  ;;  %v576_v42 = vadd.f32 %v544_v31, %v512_v23  ;;  %v511_v43 = vadd.f32 %v343_v29, %v275_v24  ;;  %v543_v44 = vadd.f32 %v479_v33, %v411_v32  ;;  %v5384_v23 = vld [vmem:[%s6150_s15 + $0x170] sm:$0xff]  ;;  %v247_v31 = vld [vmem:[%s6150_s15 + $0x88] sm:$0xff] }
  0x8a   : > { %v5648_v47 = vpop.eup %5647  ;;  %5657 = vrcp.f32 %v729_v37  ;;  %v730_v48 = vadd.f32 1.0, %v5646_v40  ;;  %v5474_v49 = vmul.f32 -1.442695, %v607_v39  ;;  %v346_v50 = vmul.f32 %v5383_v35, %v6180_v12  ;;  %v5416_v29 = vld [vmem:[%s6150_s15 + $0x270] sm:$0xff]  ;;  %v5387_v39 = vld [vmem:[%s6150_s15 + $0x188] sm:$0xff] }
  0x8b   : > { %5659 = vrcp.f32 %v727_v41  ;;  %v728_v51 = vadd.f32 1.0, %v5648_v47  ;;  %v610_v52 = vadd.f32 %v6175_v8, %v576_v42  ;;  %v575_v53 = vadd.f32 %v543_v44, %v511_v43  ;;  %v5419_v40 = vld [vmem:[%s6150_s15 + $0x288] sm:$0xff] }
  0x8c   : > { %v5650_v56 = vpop.eup %5649  ;;  %5661 = vrcp.f32 %v730_v48  ;;  %v414_v57 = vmul.f32 %v5415_v45, %v6187_v18  ;;  %v482_v58 = vmul.f32 %v5447_v46, %v6195_v25  ;;  %v514_v59 = vadd.f32 %v346_v50, %v278_v34  ;;  %v5451_v45 = vld [vmem:[%s6150_s15 + $0x388] sm:$0xff]  ;;  %v5386_v50 = vld [vmem:[%s6150_s15 + $0x180] sm:$0xff] }
  0x8d   : > { %5663 = vrcp.f32 %v728_v51  ;;  %v732_v61 = vadd.f32 1.0, %v5650_v56  ;;  %v5477_v62 = vmul.f32 -1.442695, %v610_v52  ;;  %v609_v63 = vadd.f32 %v6175_v8, %v575_v53  ;;  %v5418_v56 = vld [vmem:[%s6150_s15 + $0x280] sm:$0xff] }
  0x8e   : > { %v5652_v1 = vpop.eup %5651  ;;  %5665 = vpow2.f32 %v5475_v38  ;;  %v546_v2 = vadd.f32 %v482_v58, %v414_v57  ;;  %v277_v3 = vmul.f32 %v6173_v7, %v242_v54  ;;  %v345_v4 = vmul.f32 %v5382_v55, %v6180_v12 }
  0x8f   : > { %5667 = vrcp.f32 %v732_v61  ;;  %v731_v10 = vadd.f32 1.0, %v5652_v1  ;;  %v5476_v11 = vmul.f32 -1.442695, %v609_v63  ;;  %v413_v13 = vmul.f32 %v5414_v60, %v6187_v18  ;;  %v5450_v61 = vld [vmem:[%s6150_s15 + $0x380] sm:$0xff] }
  0x90   : > { %5669 = vpow2.f32 %v5474_v49  ;;  %v578_v15 = vadd.f32 %v546_v2, %v514_v59  ;;  %v481_v16 = vmul.f32 %v5446_v0, %v6195_v25  ;;  %v513_v17 = vadd.f32 %v345_v4, %v277_v3  ;;  %v246_v49 = vld [vmem:[%s6150_s15 + $0x80] sm:$0xff]  ;;  %v5389_v4 = vld [vmem:[%s6150_s15 + $0x198] sm:$0xff] }
  0x91   : > { %5671 = vrcp.f32 %v731_v10  ;;  %v280_v20 = vmul.f32 %v6173_v7, %v245_v5  ;;  %v348_v21 = vmul.f32 %v5385_v6, %v6180_v12  ;;  %v416_v22 = vmul.f32 %v5417_v9, %v6187_v18 }
  0x92   : > { %v5654_v24 = vpop.eup %5653  ;;  %5673 = vpow2.f32 %v5477_v62  ;;  %v612_v26 = vadd.f32 %v6175_v8, %v578_v15  ;;  %v545_v27 = vadd.f32 %v481_v16, %v413_v13  ;;  %v484_v28 = vmul.f32 %v5449_v14, %v6195_v25  ;;  %v249_v62 = vld [vmem:[%s6150_s15 + $0x98] sm:$0xff] }
  0x93   : > { %v734_v32 = vadd.f32 1.0, %v5654_v24  ;;  %5675 = vpow2.f32 %v5476_v11  ;;  %v516_v33 = vadd.f32 %v348_v21, %v280_v20  ;;  %v279_v34 = vmul.f32 %v6173_v7, %v244_v19  ;;  %v5421_v11 = vld [vmem:[%s6150_s15 + $0x298] sm:$0xff]  ;;  %v248_v24 = vld [vmem:[%s6150_s15 + $0x90] sm:$0xff] }
  0x94   : > { %v5479_v35 = vmul.f32 -1.442695, %v612_v26  ;;  %v577_v36 = vadd.f32 %v545_v27, %v513_v17  ;;  %v548_v37 = vadd.f32 %v484_v28, %v416_v22  ;;  %v347_v38 = vmul.f32 %v5384_v23, %v6180_v12  ;;  %v5453_v13 = vld [vmem:[%s6150_s15 + $0x398] sm:$0xff] }
  0x95   : > { %v5656_v41 = vpop.eup %5655  ;;  %5677 = vrcp.f32 %v734_v32  ;;  %v415_v42 = vmul.f32 %v5416_v29, %v6187_v18  ;;  %v483_v43 = vmul.f32 %v5448_v30, %v6195_v25  ;;  %v282_v44 = vmul.f32 %v6173_v7, %v247_v31  ;;  %v5388_v31 = vld [vmem:[%s6150_s15 + $0x190] sm:$0xff] }
  0x96   : > { %v733_v46 = vadd.f32 1.0, %v5656_v41  ;;  %5679 = vpow2.f32 %v5479_v35  ;;  %v611_v47 = vadd.f32 %v6175_v8, %v577_v36  ;;  %v580_v48 = vadd.f32 %v548_v37, %v516_v33  ;;  %v5420_v36 = vld [vmem:[%s6150_s15 + $0x290] sm:$0xff] }
  0x97   : > { %v6325_v51 = vpop.eup %5657  ;;  %v515_v52 = vadd.f32 %v347_v38, %v279_v34  ;;  %v547_v53 = vadd.f32 %v483_v43, %v415_v42  ;;  %v350_v54 = vmul.f32 %v5387_v39, %v6180_v12  ;;  %v418_v55 = vmul.f32 %v5419_v40, %v6187_v18  ;;  %v5452_v41 = vld [vmem:[%s6150_s15 + $0x390] sm:$0xff]  ;;  %v251_v42 = vld [vmem:[%s6150_s15 + $0xa8] sm:$0xff] }
  0x98   : > { %10424 = vst [vmem:[#allocation21_spill] sm:$0xff] %v6325_v51  ;;  %v6330_v57 = vpop.eup %5659  ;;  %940 = vrot.lane.b32.xlu1 %v6325_v51, %s5962_s24  ;;  %5681 = vrcp.f32 %v733_v46  ;;  %v5478_v58 = vmul.f32 -1.442695, %v611_v47  ;;  %v614_v59 = vadd.f32 %v6175_v8, %v580_v48  ;;  %v486_v60 = vmul.f32 %v5451_v45, %v6195_v25  ;;  %v5391_v47 = vld [vmem:[%s6150_s15 + $0x1a8] sm:$0xff] }
  0x99   : > { %10425 = vst [vmem:[#allocation22_spill] sm:$0xff] %v6330_v57  ;;  %v6338_v63 = vpop.eup %5661  ;;  %936 = vrot.lane.b32.xlu0 %v6330_v57, %s5962_s24  ;;  %v579_v0 = vadd.f32 %v547_v53, %v515_v52  ;;  %v518_v1 = vadd.f32 %v350_v54, %v282_v44  ;;  %v281_v2 = vmul.f32 %v6173_v7, %v246_v49  ;;  %v5423_v53 = vld [vmem:[%s6150_s15 + $0x2a8] sm:$0xff] }
  0x9a   : > { %10426 = vst [vmem:[#allocation23_spill] sm:$0xff] %v6338_v63  ;;  %v349_v3 = vmul.f32 %v5386_v50, %v6180_v12  ;;  %v6345_v5 = vpop.eup %5663  ;;  %5683 = vpow2.f32 %v5478_v58  ;;  %v5481_v6 = vmul.f32 -1.442695, %v614_v59  ;;  %v550_v9 = vadd.f32 %v486_v60, %v418_v55  ;;  %v5455_v59 = vld [vmem:[%s6150_s15 + $0x3a8] sm:$0xff] }
  0x9b   : > { %10427 = vst [vmem:[#allocation24_spill] sm:$0xff] %v6345_v5  ;;  %v417_v10 = vmul.f32 %v5418_v56, %v6187_v18  ;;  %v5666_v14 = vpop.eup %5665  ;;  %v613_v15 = vadd.f32 %v6175_v8, %v579_v0  ;;  %v485_v16 = vmul.f32 %v5450_v61, %v6195_v25  ;;  %v284_v19 = vmul.f32 %v6173_v7, %v249_v62 }
  0x9c   : > { %v517_v17 = vadd.f32 %v349_v3, %v281_v2  ;;  %v6353_v20 = vpop.eup %5667  ;;  %942 = vrot.lane.b32.xlu1 %v6338_v63, %s5962_s24  ;;  %v736_v21 = vadd.f32 1.0, %v5666_v14  ;;  %5685 = vpow2.f32 %v5481_v6  ;;  %v582_v22 = vadd.f32 %v550_v9, %v518_v1  ;;  %v250_v1 = vld [vmem:[%s6150_s15 + $0xa0] sm:$0xff] }
  0x9d   : > { %10428 = vst [vmem:[#allocation25_spill] sm:$0xff] %v6353_v20  ;;  %v352_v23 = vmul.f32 %v5389_v4, %v6180_v12  ;;  %v5670_v26 = vpop.eup %5669  ;;  %938 = vrot.lane.b32.xlu0 %v6345_v5, %s5962_s24  ;;  %v5480_v27 = vmul.f32 -1.442695, %v613_v15  ;;  %v549_v28 = vadd.f32 %v485_v16, %v417_v10  ;;  %v420_v29 = vmul.f32 %v5421_v11, %v6187_v18  ;;  %v5390_v2 = vld [vmem:[%s6150_s15 + $0x1a0] sm:$0xff]  ;;  %v253_v16 = vld [vmem:[%s6150_s15 + $0xb8] sm:$0xff] }
  0x9e   : > { %v488_v30 = vmul.f32 %v5453_v13, %v6195_v25  ;;  %v6364_v32 = vpop.eup %5671  ;;  %5687 = vrcp.f32 %v736_v21  ;;  %v735_v33 = vadd.f32 1.0, %v5670_v26  ;;  %v616_v34 = vadd.f32 %v6175_v8, %v582_v22  ;;  %v5422_v9 = vld [vmem:[%s6150_s15 + $0x2a0] sm:$0xff]  ;;  %v5393_v22 = vld [vmem:[%s6150_s15 + $0x1b8] sm:$0xff] }
  0x9f   : > { %10429 = vst [vmem:[#allocation26_spill] sm:$0xff] %v6364_v32  ;;  %v520_v35 = vadd.f32 %v352_v23, %v284_v19  ;;  %v5674_v37 = vpop.eup %5673  ;;  %5689 = vpow2.f32 %v5480_v27  ;;  %v581_v38 = vadd.f32 %v549_v28, %v517_v17  ;;  %v283_v40 = vmul.f32 %v6173_v7, %v248_v24  ;;  %v5454_v10 = vld [vmem:[%s6150_s15 + $0x3a0] sm:$0xff]  ;;  %v5425_v23 = vld [vmem:[%s6150_s15 + $0x2b8] sm:$0xff] }
  0xa0   : > { %v552_v39 = vadd.f32 %v488_v30, %v420_v29  ;;  %v5676_v43 = vpop.eup %5675  ;;  %946 = vrot.lane.b32.xlu1 %v6353_v20, %s5962_s24  ;;  %5691 = vrcp.f32 %v735_v33  ;;  %v738_v44 = vadd.f32 1.0, %v5674_v37  ;;  %v5483_v45 = vmul.f32 -1.442695, %v616_v34  ;;  %v5457_v29 = vld [vmem:[%s6150_s15 + $0x3b8] sm:$0xff] }
  0xa1   : > { %v351_v46 = vmul.f32 %v5388_v31, %v6180_v12  ;;  %944 = vrot.lane.b32.xlu0 %v6364_v32, %s5962_s24  ;;  %v737_v48 = vadd.f32 1.0, %v5676_v43  ;;  %v615_v49 = vadd.f32 %v6175_v8, %v581_v38  ;;  %v419_v52 = vmul.f32 %v5420_v36, %v6187_v18 }
  0xa2   : > { %v584_v50 = vadd.f32 %v552_v39, %v520_v35  ;;  %v6380_v54 = vpop.eup %5677  ;;  %5693 = vrcp.f32 %v738_v44  ;;  %v487_v55 = vmul.f32 %v5452_v41, %v6195_v25  ;;  %v286_v58 = vmul.f32 %v6173_v7, %v251_v42  ;;  %v252_v35 = vld [vmem:[%s6150_s15 + $0xb0] sm:$0xff] }
  0xa3   : > { %10430 = vst [vmem:[#allocation27_spill] sm:$0xff] %v6380_v54  ;;  %v519_v56 = vadd.f32 %v351_v46, %v283_v40  ;;  %v5680_v60 = vpop.eup %5679  ;;  %5695 = vrcp.f32 %v737_v48  ;;  %v5482_v61 = vmul.f32 -1.442695, %v615_v49  ;;  %v354_v0 = vmul.f32 %v5391_v47, %v6180_v12  ;;  %v5392_v41 = vld [vmem:[%s6150_s15 + $0x1b0] sm:$0xff] }
  0xa4   : > { %v618_v62 = vadd.f32 %v6175_v8, %v584_v50  ;;  %950 = vrot.lane.b32.xlu1 %v6380_v54, %s5962_s24  ;;  %v740_v3 = vadd.f32 1.0, %v5680_v60  ;;  %5697 = vpow2.f32 %v5483_v45  ;;  %v551_v4 = vadd.f32 %v487_v55, %v419_v52  ;;  %v5424_v42 = vld [vmem:[%s6150_s15 + $0x2b0] sm:$0xff]  ;;  %v5395_v60 = vld [vmem:[%s6150_s15 + $0x1c8] sm:$0xff] }
  0xa5   : > { %v422_v6 = vmul.f32 %v5423_v53, %v6187_v18  ;;  %v6394_v11 = vpop.eup %5681  ;;  %5699 = vpow2.f32 %v5482_v61  ;;  %v490_v14 = vmul.f32 %v5455_v59, %v6195_v25  ;;  %v522_v15 = vadd.f32 %v354_v0, %v286_v58  ;;  %v5456_v52 = vld [vmem:[%s6150_s15 + $0x3b0] sm:$0xff]  ;;  %v255_v53 = vld [vmem:[%s6150_s15 + $0xc8] sm:$0xff] }
  0xa6   : > { %10431 = vst [vmem:[#allocation28_spill] sm:$0xff] %v6394_v11  ;;  %v5485_v13 = vmul.f32 -1.442695, %v618_v62  ;;  %948 = vrot.lane.b32.xlu0 %v6394_v11, %s5962_s24  ;;  %5701 = vrcp.f32 %v740_v3  ;;  %v583_v17 = vadd.f32 %v551_v4, %v519_v56  ;;  %v285_v19 = vmul.f32 %v6173_v7, %v250_v1  ;;  %v5427_v61 = vld [vmem:[%s6150_s15 + $0x2c8] sm:$0xff] }
  0xa7   : > { %v353_v21 = vmul.f32 %v5390_v2, %v6180_v12  ;;  %v5684_v24 = vpop.eup %5683  ;;  %v554_v26 = vadd.f32 %v490_v14, %v422_v6  ;;  %v421_v27 = vmul.f32 %v5422_v9, %v6187_v18  ;;  %v489_v28 = vmul.f32 %v5454_v10, %v6195_v25  ;;  %v5459_v3 = vld [vmem:[%s6150_s15 + $0x3c8] sm:$0xff]  ;;  %v5394_v14 = vld [vmem:[%s6150_s15 + $0x1c0] sm:$0xff] }
  0xa8   : > { %5703 = vpow2.f32 %v5485_v13  ;;  %v739_v30 = vadd.f32 1.0, %v5684_v24  ;;  %v617_v31 = vadd.f32 %v6175_v8, %v583_v17  ;;  %v288_v34 = vmul.f32 %v6173_v7, %v253_v16  ;;  %v254_v13 = vld [vmem:[%s6150_s15 + $0xc0] sm:$0xff] }
  0xa9   : > { %v521_v33 = vadd.f32 %v353_v21, %v285_v19  ;;  %v5686_v36 = vpop.eup %5685  ;;  %v586_v37 = vadd.f32 %v554_v26, %v522_v15  ;;  %v553_v38 = vadd.f32 %v489_v28, %v421_v27  ;;  %v356_v39 = vmul.f32 %v5393_v22, %v6180_v12  ;;  %v5426_v26 = vld [vmem:[%s6150_s15 + $0x2c0] sm:$0xff] }
  0xaa   : > { %v424_v40 = vmul.f32 %v5425_v23, %v6187_v18  ;;  %5705 = vrcp.f32 %v739_v30  ;;  %v742_v43 = vadd.f32 1.0, %v5686_v36  ;;  %v5484_v44 = vmul.f32 -1.442695, %v617_v31  ;;  %v5458_v27 = vld [vmem:[%s6150_s15 + $0x3c0] sm:$0xff] }
  0xab   : > { %v492_v45 = vmul.f32 %v5457_v29, %v6195_v25  ;;  %v6415_v46 = vpop.eup %5687  ;;  %v620_v47 = vadd.f32 %v6175_v8, %v586_v37  ;;  %v585_v48 = vadd.f32 %v553_v38, %v521_v33  ;;  %v524_v49 = vadd.f32 %v356_v39, %v288_v34  ;;  %v257_v33 = vld [vmem:[%s6150_s15 + $0xd8] sm:$0xff] }
  0xac   : > { %10432 = vst [vmem:[#allocation29_spill] sm:$0xff] %v6415_v46  ;;  %v287_v50 = vmul.f32 %v6173_v7, %v252_v35  ;;  %v5690_v55 = vpop.eup %5689  ;;  %954 = vrot.lane.b32.xlu1 %v6415_v46, %s5962_s24  ;;  %5707 = vrcp.f32 %v742_v43  ;;  %v355_v58 = vmul.f32 %v5392_v41, %v6180_v12  ;;  %v423_v59 = vmul.f32 %v5424_v42, %v6187_v18  ;;  %v5397_v39 = vld [vmem:[%s6150_s15 + $0x1d8] sm:$0xff] }
  0xad   : > { %v556_v56 = vadd.f32 %v492_v45, %v424_v40  ;;  %v6427_v62 = vpop.eup %5691  ;;  %v741_v0 = vadd.f32 1.0, %v5690_v55  ;;  %5709 = vpow2.f32 %v5484_v44  ;;  %v5487_v1 = vmul.f32 -1.442695, %v620_v47  ;;  %v5429_v45 = vld [vmem:[%s6150_s15 + $0x2d8] sm:$0xff] }
  0xae   : > { %10433 = vst [vmem:[#allocation30_spill] sm:$0xff] %v6427_v62  ;;  %v619_v2 = vadd.f32 %v6175_v8, %v585_v48  ;;  %952 = vrot.lane.b32.xlu0 %v6427_v62, %s5962_s24  ;;  %v491_v6 = vmul.f32 %v5456_v52, %v6195_v25  ;;  %v523_v9 = vadd.f32 %v355_v58, %v287_v50  ;;  %v5461_v52 = vld [vmem:[%s6150_s15 + $0x3d8] sm:$0xff]  ;;  %v256_v58 = vld [vmem:[%s6150_s15 + $0xd0] sm:$0xff] }
  0xaf   : > { %v588_v4 = vadd.f32 %v556_v56, %v524_v49  ;;  %v290_v10 = vmul.f32 %v6173_v7, %v255_v53  ;;  %v6437_v15 = vpop.eup %5693  ;;  %5711 = vrcp.f32 %v741_v0  ;;  %v358_v17 = vmul.f32 %v5395_v60, %v6180_v12 }
  0xb0   : > { %10434 = vst [vmem:[#allocation31_spill] sm:$0xff] %v6437_v15  ;;  %v5486_v16 = vmul.f32 -1.442695, %v619_v2  ;;  %v426_v19 = vmul.f32 %v5427_v61, %v6187_v18  ;;  %v6441_v21 = vpop.eup %5695  ;;  %958 = vrot.lane.b32.xlu1 %v6437_v15, %s5962_s24  ;;  %5713 = vpow2.f32 %v5487_v1  ;;  %v555_v23 = vadd.f32 %v491_v6, %v423_v59  ;;  %v5396_v59 = vld [vmem:[%s6150_s15 + $0x1d0] sm:$0xff] }
  0xb1   : > { %10435 = vst [vmem:[#allocation32_spill] sm:$0xff] %v6441_v21  ;;  %v622_v22 = vadd.f32 %v6175_v8, %v588_v4  ;;  %v494_v24 = vmul.f32 %v5459_v3, %v6195_v25  ;;  %v5698_v28 = vpop.eup %5697  ;;  %v526_v29 = vadd.f32 %v358_v17, %v290_v10  ;;  %v289_v30 = vmul.f32 %v6173_v7, %v254_v13  ;;  %v5428_v1 = vld [vmem:[%s6150_s15 + $0x2d0] sm:$0xff]  ;;  %v259_v10 = vld [vmem:[%s6150_s15 + $0xe8] sm:$0xff] }
  0xb2   : > { %5715 = vpow2.f32 %v5486_v16  ;;  %v357_v31 = vmul.f32 %v5394_v14, %v6180_v12  ;;  %v5700_v34 = vpop.eup %5699  ;;  %956 = vrot.lane.b32.xlu0 %v6441_v21, %s5962_s24  ;;  %v744_v35 = vadd.f32 1.0, %v5698_v28  ;;  %v587_v37 = vadd.f32 %v555_v23, %v523_v9  ;;  %v5460_v2 = vld [vmem:[%s6150_s15 + $0x3d0] sm:$0xff]  ;;  %v5399_v13 = vld [vmem:[%s6150_s15 + $0x1e8] sm:$0xff] }
  0xb3   : > { %v5489_v36 = vmul.f32 -1.442695, %v622_v22  ;;  %v558_v38 = vadd.f32 %v494_v24, %v426_v19  ;;  %v6455_v40 = vpop.eup %5701  ;;  %v743_v41 = vadd.f32 1.0, %v5700_v34  ;;  %v425_v42 = vmul.f32 %v5426_v26, %v6187_v18  ;;  %v5463_v28 = vld [vmem:[%s6150_s15 + $0x3e8] sm:$0xff] }
  0xb4   : > { %10436 = vst [vmem:[#allocation33_spill] sm:$0xff] %v6455_v40  ;;  %v493_v43 = vmul.f32 %v5458_v27, %v6195_v25  ;;  %v525_v44 = vadd.f32 %v357_v31, %v289_v30  ;;  %962 = vrot.lane.b32.xlu1 %v6455_v40, %s5962_s24  ;;  %5717 = vrcp.f32 %v744_v35  ;;  %v621_v48 = vadd.f32 %v6175_v8, %v587_v37  ;;  %v5431_v27 = vld [vmem:[%s6150_s15 + $0x2e8] sm:$0xff]  ;;  %v5398_v35 = vld [vmem:[%s6150_s15 + $0x1e0] sm:$0xff] }
  0xb5   : > { %v5704_v47 = vpop.eup %5703  ;;  %v590_v49 = vadd.f32 %v558_v38, %v526_v29  ;;  %v292_v50 = vmul.f32 %v6173_v7, %v257_v33  ;;  %5719 = vrcp.f32 %v743_v41  ;;  %v360_v56 = vmul.f32 %v5397_v39, %v6180_v12  ;;  %v258_v29 = vld [vmem:[%s6150_s15 + $0xe0] sm:$0xff] }
  0xb6   : > { %v746_v53 = vadd.f32 1.0, %v5704_v47  ;;  %v557_v55 = vadd.f32 %v493_v43, %v425_v42  ;;  %5721 = vpow2.f32 %v5489_v36  ;;  %v5488_v60 = vmul.f32 -1.442695, %v621_v48  ;;  %v5430_v41 = vld [vmem:[%s6150_s15 + $0x2e0] sm:$0xff] }
  0xb7   : > { %v624_v61 = vadd.f32 %v6175_v8, %v590_v49  ;;  %v428_v0 = vmul.f32 %v5429_v45, %v6187_v18  ;;  %v6472_v3 = vpop.eup %5705  ;;  %v496_v6 = vmul.f32 %v5461_v52, %v6195_v25  ;;  %v528_v9 = vadd.f32 %v360_v56, %v292_v50  ;;  %v5462_v48 = vld [vmem:[%s6150_s15 + $0x3e0] sm:$0xff] }
  0xb8   : > { %10437 = vst [vmem:[#allocation34_spill] sm:$0xff] %v6472_v3  ;;  %5723 = vrcp.f32 %v746_v53  ;;  %v589_v4 = vadd.f32 %v557_v55, %v525_v44  ;;  %960 = vrot.lane.b32.xlu0 %v6472_v3, %s5962_s24  ;;  %v291_v16 = vmul.f32 %v6173_v7, %v256_v58  ;;  %v359_v17 = vmul.f32 %v5396_v59, %v6180_v12  ;;  %v261_v55 = vld [vmem:[%s6150_s15 + $0xf8] sm:$0xff] }
  0xb9   : > { %5725 = vpow2.f32 %v5488_v60  ;;  %v5491_v14 = vmul.f32 -1.442695, %v624_v61  ;;  %v6481_v19 = vpop.eup %5707  ;;  %v560_v23 = vadd.f32 %v496_v6, %v428_v0  ;;  %v427_v24 = vmul.f32 %v5428_v1, %v6187_v18  ;;  %v5401_v61 = vld [vmem:[%s6150_s15 + $0x1f8] sm:$0xff] }
  0xba   : > { %10438 = vst [vmem:[#allocation35_spill] sm:$0xff] %v6481_v19  ;;  %v623_v22 = vadd.f32 %v6175_v8, %v589_v4  ;;  %v495_v26 = vmul.f32 %v5460_v2, %v6195_v25  ;;  %v5710_v30 = vpop.eup %5709  ;;  %966 = vrot.lane.b32.xlu1 %v6481_v19, %s5962_s24  ;;  %v527_v31 = vadd.f32 %v359_v17, %v291_v16  ;;  %v5433_v6 = vld [vmem:[%s6150_s15 + $0x2f8] sm:$0xff]  ;;  %v260_v16 = vld [vmem:[%s6150_s15 + $0xf0] sm:$0xff] }
  0xbb   : > { %5727 = vpow2.f32 %v5491_v14  ;;  %v294_v33 = vmul.f32 %v6173_v7, %v259_v10  ;;  %v362_v34 = vmul.f32 %v5399_v13, %v6180_v12  ;;  %v745_v36 = vadd.f32 1.0, %v5710_v30 }
  0xbc   : > { %v5490_v37 = vmul.f32 -1.442695, %v623_v22  ;;  %v592_v38 = vadd.f32 %v560_v23, %v528_v9  ;;  %v559_v39 = vadd.f32 %v495_v26, %v427_v24  ;;  %v6495_v42 = vpop.eup %5711  ;;  %v430_v43 = vmul.f32 %v5431_v27, %v6187_v18  ;;  %v5465_v9 = vld [vmem:[%s6150_s15 + $0x3f8] sm:$0xff]  ;;  %v5400_v26 = vld [vmem:[%s6150_s15 + $0x1f0] sm:$0xff] }
  0xbd   : > { %10439 = vst [vmem:[#allocation36_spill] sm:$0xff] %v6495_v42  ;;  %v498_v44 = vmul.f32 %v5463_v28, %v6195_v25  ;;  %v530_v45 = vadd.f32 %v362_v34, %v294_v33  ;;  %v293_v47 = vmul.f32 %v6173_v7, %v258_v29  ;;  %v5714_v49 = vpop.eup %5713  ;;  %964 = vrot.lane.b32.xlu0 %v6495_v42, %s5962_s24  ;;  %5729 = vrcp.f32 %v745_v36  ;;  %v5464_v33 = vld [vmem:[%s6150_s15 + $0x3f0] sm:$0xff] }
  0xbe   : > { %v626_v50 = vadd.f32 %v6175_v8, %v592_v38  ;;  %v591_v52 = vadd.f32 %v559_v39, %v527_v31  ;;  %v361_v53 = vmul.f32 %v5398_v35, %v6180_v12  ;;  %v748_v58 = vadd.f32 1.0, %v5714_v49  ;;  %v5432_v31 = vld [vmem:[%s6150_s15 + $0x2f0] sm:$0xff]  ;;  %s227_s15 = sand.u32 1, %s5919_s13  }
  0xbf   : > { %v5716_v56 = vpop.eup %5715  ;;  %5731 = vpow2.f32 %v5490_v37  ;;  %v562_v59 = vadd.f32 %v498_v44, %v430_v43  ;;  %v429_v60 = vmul.f32 %v5430_v41, %v6187_v18  ;;  %v497_v4 = vmul.f32 %v5462_v48, %v6195_v25  ;;  %s5368_s22 = sshll.u32 %s227_s15, 8  ;;  %s10095_s27 = scalar_lea.sflag [#allocation6], %s227_s15 }
  0xc0   : > { %v747_v0 = vadd.f32 1.0, %v5716_v56  ;;  %v5493_v1 = vmul.f32 -1.442695, %v626_v50  ;;  %v625_v2 = vadd.f32 %v6175_v8, %v591_v52  ;;  %5733 = vrcp.f32 %v748_v58  ;;  %s9817_s25 = scalar_lea.vmem [#allocation11], %s5368_s22 }
  0xc1   : > { %v594_v10 = vadd.f32 %v562_v59, %v530_v45  ;;  %v529_v13 = vadd.f32 %v361_v53, %v293_v47  ;;  %v296_v14 = vmul.f32 %v6173_v7, %v261_v55  ;;  %v6514_v17 = vpop.eup %5717  ;;  %v561_v23 = vadd.f32 %v497_v4, %v429_v60  ;;  %s5246_s18 = sshll.u32 %s9817_s25, 4  ;;  %s10081_s18 = int_to_ptr.vmem [resolvable:$true] %s5246_s18 }
  0xc2   : > { %10440 = vst [vmem:[#allocation37_spill] sm:$0xff] %v6514_v17  ;;  %5735 = vrcp.f32 %v747_v0  ;;  %v5492_v22 = vmul.f32 -1.442695, %v625_v2  ;;  %v364_v24 = vmul.f32 %v5401_v61, %v6180_v12  ;;  %v6518_v27 = vpop.eup %5719  ;;  %970 = vrot.lane.b32.xlu1 %v6514_v17, %s5962_s24  ;;  %v432_v29 = vmul.f32 %v5433_v6, %v6187_v18 }
  0xc3   : > { %10441 = vst [vmem:[#allocation38_spill] sm:$0xff] %v6518_v27  ;;  %5737 = vpow2.f32 %v5493_v1  ;;  %v628_v28 = vadd.f32 %v6175_v8, %v594_v10  ;;  %v500_v30 = vmul.f32 %v5465_v9, %v6195_v25  ;;  %v5722_v34 = vpop.eup %5721  ;;  %968 = vrot.lane.b32.xlu0 %v6518_v27, %s5962_s24  ;;  %v593_v35 = vadd.f32 %v561_v23, %v529_v13 }
  0xc4   : > { %5739 = vpow2.f32 %v5492_v22  ;;  %v532_v36 = vadd.f32 %v364_v24, %v296_v14  ;;  %v295_v37 = vmul.f32 %v6173_v7, %v260_v16  ;;  %v750_v39 = vadd.f32 1.0, %v5722_v34 }
  0xc5   : > { %v6530_v38 = vpop.eup %5723  ;;  %v5495_v41 = vmul.f32 -1.442695, %v628_v28  ;;  %v564_v43 = vadd.f32 %v500_v30, %v432_v29  ;;  %v363_v44 = vmul.f32 %v5400_v26, %v6180_v12  ;;  %v627_v47 = vadd.f32 %v6175_v8, %v593_v35 }
  0xc6   : > { %10442 = vst [vmem:[#allocation39_spill] sm:$0xff] %v6530_v38  ;;  %v5726_v45 = vpop.eup %5725  ;;  %v431_v48 = vmul.f32 %v5432_v31, %v6187_v18  ;;  %v499_v49 = vmul.f32 %v5464_v33, %v6195_v25  ;;  %974 = vrot.lane.b32.xlu1 %v6530_v38, %s5962_s24  ;;  %5741 = vrcp.f32 %v750_v39  ;;  %v10171_v25 = vmov 0.0  }
  0xc7   : > { %v749_v7 = vadd.f32 1.0, %v5726_v45  ;;  %v596_v50 = vadd.f32 %v564_v43, %v532_v36  ;;  %v6538_v52 = vadd.f32 %v363_v44, %v295_v37  ;;  %5743 = vpow2.f32 %v5495_v41  ;;  %830 = vst.msk [vmem:[#allocation2 + $0x30] sm:$0xff] %vm823_vm0, %v10171_v25  ;;  %831 = vst.msk [vmem:[#allocation2 + $0x38] sm:$0xff] %vm823_vm0, %v10171_v25 }
  0xc8   : > { %v5728_v53 = vpop.eup %5727  ;;  %v6540_v55 = vmul.f32 -1.442695, %v627_v47  ;;  %v6542_v12 = vadd.f32 %v499_v49, %v431_v48  ;;  %824 = vst.msk [vmem:[#allocation2] sm:$0xff] %vm823_vm0, %v10171_v25  ;;  %825 = vst.msk [vmem:[#allocation2 + $0x8] sm:$0xff] %vm823_vm0, %v10171_v25 }
  0xc9   : > { %5745 = vrcp.f32 %v749_v7  ;;  %v6544_v56 = vadd.f32 1.0, %v5728_v53  ;;  %v6547_v18 = vadd.f32 %v6175_v8, %v596_v50  ;;  %826 = vst.msk [vmem:[#allocation2 + $0x10] sm:$0xff] %vm823_vm0, %v10171_v25  ;;  %827 = vst.msk [vmem:[#allocation2 + $0x18] sm:$0xff] %vm823_vm0, %v10171_v25 }
  0xca   : > { %828 = vst.msk [vmem:[#allocation2 + $0x20] sm:$0xff] %vm823_vm0, %v10171_v25  ;;  %829 = vst.msk [vmem:[#allocation2 + $0x28] sm:$0xff] %vm823_vm0, %v10171_v25  ;;  %5747 = vpow2.f32 %v6540_v55  ;;  %v595_v58 = vadd.f32 %v6542_v12, %v6538_v52  ;;  %v6712_v59 = vpop.eup %5729 }
  0xcb   : > { %832 = vst.msk [vmem:[#allocation2 + $0x40] sm:$0xff] %vm823_vm0, %v10171_v25  ;;  %833 = vst.msk [vmem:[#allocation2 + $0x48] sm:$0xff] %vm823_vm0, %v10171_v25  ;;  %5749 = vrcp.f32 %v6544_v56  ;;  %v5497_v60 = vmul.f32 -1.442695, %v6547_v18  ;;  %972 = vrot.lane.b32.xlu0 %v6712_v59, %s5962_s24 }
  0xcc   : > { %834 = vst.msk [vmem:[#allocation2 + $0x50] sm:$0xff] %vm823_vm0, %v10171_v25  ;;  %835 = vst.msk [vmem:[#allocation2 + $0x58] sm:$0xff] %vm823_vm0, %v10171_v25  ;;  %v5732_v61 = vpop.eup %5731  ;;  %v629_v0 = vadd.f32 %v6175_v8, %v595_v58 }
  0xcd   : > { %836 = vst.msk [vmem:[#allocation2 + $0x60] sm:$0xff] %vm823_vm0, %v10171_v25  ;;  %837 = vst.msk [vmem:[#allocation2 + $0x68] sm:$0xff] %vm823_vm0, %v10171_v25  ;;  %v751_v1 = vadd.f32 1.0, %v5732_v61  ;;  %5751 = vpow2.f32 %v5497_v60  ;;  %v6719_v2 = vpop.eup %5733 }
  0xce   : > { %838 = vst.msk [vmem:[#allocation2 + $0x70] sm:$0xff] %vm823_vm0, %v10171_v25  ;;  %839 = vst.msk [vmem:[#allocation2 + $0x78] sm:$0xff] %vm823_vm0, %v10171_v25  ;;  %v5496_v4 = vmul.f32 -1.442695, %v629_v0  ;;  %978 = vrot.lane.b32.xlu1 %v6719_v2, %s5962_s24 }
  0xcf   : > { %840 = vst.msk [vmem:[#allocation2 + $0x80] sm:$0xff] %vm823_vm0, %v10171_v25  ;;  %841 = vst.msk [vmem:[#allocation2 + $0x88] sm:$0xff] %vm823_vm0, %v10171_v25  ;;  %v6721_v6 = vpop.eup %5735  ;;  %5753 = vrcp.f32 %v751_v1  ;;  %v1065_v50 = vld [vmem:[#allocation2] sm:$0xff] }
  0xd0   : > { %842 = vst.msk [vmem:[#allocation2 + $0x90] sm:$0xff] %vm823_vm0, %v10171_v25  ;;  %843 = vst.msk [vmem:[#allocation2 + $0x98] sm:$0xff] %vm823_vm0, %v10171_v25  ;;  %v5738_v9 = vpop.eup %5737  ;;  %976 = vrot.lane.b32.xlu0 %v6721_v6, %s5962_s24  ;;  %5755 = vpow2.f32 %v5496_v4 }
  0xd1   : > { %844 = vst.msk [vmem:[#allocation2 + $0xa0] sm:$0xff] %vm823_vm0, %v10171_v25  ;;  %845 = vst.msk [vmem:[#allocation2 + $0xa8] sm:$0xff] %vm823_vm0, %v10171_v25  ;;  %v5740_v10 = vpop.eup %5739  ;;  %v754_v13 = vadd.f32 1.0, %v5738_v9  ;;  %v1068_v52 = vld [vmem:[#allocation2 + $0x28] sm:$0xff]  ;;  %v1259_v56 = vld [vmem:[#allocation2 + $0x1f] sm:$0xf] }
  0xd2   : > { %846 = vst.msk [vmem:[#allocation2 + $0xb0] sm:$0xff] %vm823_vm0, %v10171_v25  ;;  %847 = vst.msk [vmem:[#allocation2 + $0xb8] sm:$0xff] %vm823_vm0, %v10171_v25  ;;  %v753_v14 = vadd.f32 1.0, %v5740_v10 }
  0xd3   : > { %848 = vst.msk [vmem:[#allocation2 + $0xc0] sm:$0xff] %vm823_vm0, %v10171_v25  ;;  %849 = vst.msk [vmem:[#allocation2 + $0xc8] sm:$0xff] %vm823_vm0, %v10171_v25  ;;  %5757 = vrcp.f32 %v754_v13  ;;  %v6727_v8 = vpop.eup %5741 }
  0xd4   : > { %850 = vst.msk [vmem:[#allocation2 + $0xd0] sm:$0xff] %vm823_vm0, %v10171_v25  ;;  %851 = vst.msk [vmem:[#allocation2 + $0xd8] sm:$0xff] %vm823_vm0, %v10171_v25  ;;  %5759 = vrcp.f32 %v753_v14  ;;  %v5744_v16 = vpop.eup %5743  ;;  %982 = vrot.lane.b32.xlu1 %v6727_v8, %s5962_s24 }
  0xd5   : > { %852 = vst.msk [vmem:[#allocation2 + $0xe0] sm:$0xff] %vm823_vm0, %v10171_v25  ;;  %853 = vst.msk [vmem:[#allocation2 + $0xe8] sm:$0xff] %vm823_vm0, %v10171_v25  ;;  %v756_v23 = vadd.f32 1.0, %v5744_v16 }
  0xd6   : > { %854 = vst.msk [vmem:[#allocation2 + $0xf0] sm:$0xff] %vm823_vm0, %v10171_v25  ;;  %855 = vst.msk [vmem:[#allocation2 + $0xf8] sm:$0xff] %vm823_vm0, %v10171_v25  ;;  %v6731_v22 = vpop.eup %5745 }
  0xd7   : > { %856 = vst.msk [vmem:[#allocation2 + $0x100] sm:$0xff] %vm823_vm0, %v10171_v25  ;;  %857 = vst.msk [vmem:[#allocation2 + $0x108] sm:$0xff] %vm823_vm0, %v10171_v25  ;;  %v5748_v24 = vpop.eup %5747  ;;  %980 = vrot.lane.b32.xlu0 %v6731_v22, %s5962_s24  ;;  %5761 = vrcp.f32 %v756_v23 }
  0xd8   : > { %858 = vst.msk [vmem:[#allocation2 + $0x110] sm:$0xff] %vm823_vm0, %v10171_v25  ;;  %859 = vst.msk [vmem:[#allocation2 + $0x118] sm:$0xff] %vm823_vm0, %v10171_v25  ;;  %v6735_v26 = vpop.eup %5749  ;;  %v755_v28 = vadd.f32 1.0, %v5748_v24 }
  0xd9   : > { %860 = vst.msk [vmem:[#allocation2 + $0x120] sm:$0xff] %vm823_vm0, %v10171_v25  ;;  %861 = vst.msk [vmem:[#allocation2 + $0x128] sm:$0xff] %vm823_vm0, %v10171_v25  ;;  %986 = vrot.lane.b32.xlu1 %v6735_v26, %s5962_s24 }
  0xda   : > { %862 = vst.msk [vmem:[#allocation2 + $0x130] sm:$0xff] %vm823_vm0, %v10171_v25  ;;  %863 = vst.msk [vmem:[#allocation2 + $0x138] sm:$0xff] %vm823_vm0, %v10171_v25  ;;  %v5752_v29 = vpop.eup %5751  ;;  %5763 = vrcp.f32 %v755_v28 }
  0xdb   : > { %864 = vst.msk [vmem:[#allocation2 + $0x140] sm:$0xff] %vm823_vm0, %v10171_v25  ;;  %865 = vst.msk [vmem:[#allocation2 + $0x148] sm:$0xff] %vm823_vm0, %v10171_v25  ;;  %v758_v30 = vadd.f32 1.0, %v5752_v29  ;;  %v1402_v29 = vld [vmem:[#allocation2 + $0x1c] sm:$0xff] }
  0xdc   : > { %866 = vst.msk [vmem:[#allocation2 + $0x150] sm:$0xff] %vm823_vm0, %v10171_v25  ;;  %867 = vst.msk [vmem:[#allocation2 + $0x158] sm:$0xff] %vm823_vm0, %v10171_v25  ;;  %v6739_v31 = vpop.eup %5753 }
  0xdd   : > { %868 = vst.msk [vmem:[#allocation2 + $0x160] sm:$0xff] %vm823_vm0, %v10171_v25  ;;  %869 = vst.msk [vmem:[#allocation2 + $0x168] sm:$0xff] %vm823_vm0, %v10171_v25  ;;  %v5756_v33 = vpop.eup %5755  ;;  %984 = vrot.lane.b32.xlu0 %v6739_v31, %s5962_s24  ;;  %5765 = vrcp.f32 %v758_v30 }
  0xde   : > { %870 = vst.msk [vmem:[#allocation2 + $0x170] sm:$0xff] %vm823_vm0, %v10171_v25  ;;  %871 = vst.msk [vmem:[#allocation2 + $0x178] sm:$0xff] %vm823_vm0, %v10171_v25  ;;  %v757_v34 = vadd.f32 1.0, %v5756_v33  ;;  %v1262_v33 = vld [vmem:[#allocation2 + $0x47] sm:$0xf] }
  0xdf   : > { %872 = vst.msk [vmem:[#allocation2 + $0x180] sm:$0xff] %vm823_vm0, %v10171_v25  ;;  %873 = vst.msk [vmem:[#allocation2 + $0x188] sm:$0xff] %vm823_vm0, %v10171_v25 }
  0xe0   : > { %874 = vst.msk [vmem:[#allocation2 + $0x190] sm:$0xff] %vm823_vm0, %v10171_v25  ;;  %875 = vst.msk [vmem:[#allocation2 + $0x198] sm:$0xff] %vm823_vm0, %v10171_v25  ;;  %v6743_v35 = vpop.eup %5757  ;;  %5767 = vrcp.f32 %v757_v34 }
  0xe1   : > { %876 = vst.msk [vmem:[#allocation2 + $0x1a0] sm:$0xff] %vm823_vm0, %v10171_v25  ;;  %877 = vst.msk [vmem:[#allocation2 + $0x1a8] sm:$0xff] %vm823_vm0, %v10171_v25  ;;  %v6745_v36 = vpop.eup %5759  ;;  %990 = vrot.lane.b32.xlu1 %v6743_v35, %s5962_s24 }
  0xe2   : > { %878 = vst.msk [vmem:[#allocation2 + $0x1b0] sm:$0xff] %vm823_vm0, %v10171_v25  ;;  %879 = vst.msk [vmem:[#allocation2 + $0x1b8] sm:$0xff] %vm823_vm0, %v10171_v25  ;;  %988 = vrot.lane.b32.xlu0 %v6745_v36, %s5962_s24 }
  0xe3   : > { %880 = vst.msk [vmem:[#allocation2 + $0x1c0] sm:$0xff] %vm823_vm0, %v10171_v25  ;;  %881 = vst.msk [vmem:[#allocation2 + $0x1c8] sm:$0xff] %vm823_vm0, %v10171_v25 }
  0xe4   : > { %882 = vst.msk [vmem:[#allocation2 + $0x1d0] sm:$0xff] %vm823_vm0, %v10171_v25  ;;  %883 = vst.msk [vmem:[#allocation2 + $0x1d8] sm:$0xff] %vm823_vm0, %v10171_v25  ;;  %v6751_v37 = vpop.eup %5761 }
  0xe5   : > { %884 = vst.msk [vmem:[#allocation2 + $0x1e0] sm:$0xff] %vm823_vm0, %v10171_v25  ;;  %885 = vst.msk [vmem:[#allocation2 + $0x1e8] sm:$0xff] %vm823_vm0, %v10171_v25  ;;  %994 = vrot.lane.b32.xlu1 %v6751_v37, %s5962_s24 }
  0xe6   : > { %886 = vst.msk [vmem:[#allocation2 + $0x1f0] sm:$0xff] %vm823_vm0, %v10171_v25  ;;  %887 = vst.msk [vmem:[#allocation2 + $0x1f8] sm:$0xff] %vm823_vm0, %v10171_v25 }
  0xe7   : > { %888 = vst.msk [vmem:[#allocation2 + $0x200] sm:$0xff] %vm823_vm0, %v10171_v25  ;;  %889 = vst.msk [vmem:[#allocation2 + $0x208] sm:$0xff] %vm823_vm0, %v10171_v25  ;;  %v6755_v39 = vpop.eup %5763 }
  0xe8   : > { %890 = vst.msk [vmem:[#allocation2 + $0x210] sm:$0xff] %vm823_vm0, %v10171_v25  ;;  %891 = vst.msk [vmem:[#allocation2 + $0x218] sm:$0xff] %vm823_vm0, %v10171_v25  ;;  %992 = vrot.lane.b32.xlu0 %v6755_v39, %s5962_s24 }
  0xe9   : > { %892 = vst.msk [vmem:[#allocation2 + $0x220] sm:$0xff] %vm823_vm0, %v10171_v25  ;;  %893 = vst.msk [vmem:[#allocation2 + $0x228] sm:$0xff] %vm823_vm0, %v10171_v25 }
  0xea   : > { %894 = vst.msk [vmem:[#allocation2 + $0x230] sm:$0xff] %vm823_vm0, %v10171_v25  ;;  %895 = vst.msk [vmem:[#allocation2 + $0x238] sm:$0xff] %vm823_vm0, %v10171_v25  ;;  %v6759_v41 = vpop.eup %5765 }
  0xeb   : > { %896 = vst.msk [vmem:[#allocation2 + $0x240] sm:$0xff] %vm823_vm0, %v10171_v25  ;;  %897 = vst.msk [vmem:[#allocation2 + $0x248] sm:$0xff] %vm823_vm0, %v10171_v25  ;;  %998 = vrot.lane.b32.xlu1 %v6759_v41, %s5962_s24 }
  0xec   : > { %898 = vst.msk [vmem:[#allocation2 + $0x250] sm:$0xff] %vm823_vm0, %v10171_v25  ;;  %899 = vst.msk [vmem:[#allocation2 + $0x258] sm:$0xff] %vm823_vm0, %v10171_v25 }
  0xed   : > { %900 = vst.msk [vmem:[#allocation2 + $0x260] sm:$0xff] %vm823_vm0, %v10171_v25  ;;  %901 = vst.msk [vmem:[#allocation2 + $0x268] sm:$0xff] %vm823_vm0, %v10171_v25  ;;  %v6763_v43 = vpop.eup %5767 }
  0xee   : > { %902 = vst.msk [vmem:[#allocation2 + $0x270] sm:$0xff] %vm823_vm0, %v10171_v25  ;;  %903 = vst.msk [vmem:[#allocation2 + $0x278] sm:$0xff] %vm823_vm0, %v10171_v25  ;;  %996 = vrot.lane.b32.xlu0 %v6763_v43, %s5962_s24  ;;  %s5827_s24 = scalar_lea.vmem %s10081_s18, 4096 }
  0xef   : > { %10443 = vst [vmem:[#allocation40_spill] sm:$0xff] %v6712_v59  ;;  %10444 = vst [vmem:[#allocation41_spill] sm:$0xff] %v6719_v2  ;;  %p5828_p10 = scmp.ne.s32.totalorder %s10081_s18, %s5827_s24 }
  0xf0   : > { %10445 = vst [vmem:[#allocation42_spill] sm:$0xff] %v6721_v6  ;;  %10446 = vst [vmem:[#allocation43_spill] sm:$0xff] %v6727_v8 }
  0xf1   : > { %10447 = vst [vmem:[#allocation44_spill] sm:$0xff] %v6731_v22  ;;  %10448 = vst [vmem:[#allocation45_spill] sm:$0xff] %v6735_v26  ;;  %p5829_p0 = pnand %p5828_p10, %p11068_p12 }
  0xf2   : > { %10449 = vst [vmem:[#allocation46_spill] sm:$0xff] %v6739_v31  ;;  %10450 = vst [vmem:[#allocation47_spill] sm:$0xff] %v6743_v35 }
  0xf3   : > { %10451 = vst [vmem:[#allocation48_spill] sm:$0xff] %v6745_v36  ;;  %10452 = vst [vmem:[#allocation49_spill] sm:$0xff] %v6751_v37  ;;  %p5830_p5 = pneg %p5829_p0 }
  0xf4   : > { %10453 = vst [vmem:[#allocation50_spill] sm:$0xff] %v6755_v39  ;;  %10454 = vst [vmem:[#allocation51_spill] sm:$0xff] %v6759_v41 }
  0xf5   : > { %10455 = vst [vmem:[#allocation52_spill] sm:$0xff] %v6763_v43 }
 0x10a   : > { %v941_v44 = vpop.permute.xlu1 %940 }
 0x10b   : > { %1035 = vst.msk [vmem:[#allocation2 + $0x34] sm:$0xff] %vm1032_vm1, %v941_v44  ;;  %v937_v45 = vpop.permute.xlu0 %936 }
 0x10c   : > { %1033 = vst.msk [vmem:[#allocation2 + $0xc] sm:$0xff] %vm1032_vm1, %v937_v45 }
 0x10e   : > { %v943_v47 = vpop.permute.xlu1 %942 }
 0x10f   : > { %1036 = vst.msk [vmem:[#allocation2 + $0x3c] sm:$0xff] %vm1032_vm1, %v943_v47  ;;  %v939_v48 = vpop.permute.xlu0 %938 }
 0x110   : > { %1034 = vst.msk [vmem:[#allocation2 + $0x14] sm:$0xff] %vm1032_vm1, %v939_v48 }
 0x112   : > { %v947_v49 = vpop.permute.xlu1 %946  ;;  %v1116_v53 = vld [vmem:[#allocation2 + $0x2d] sm:$0xff]  ;;  %v1070_v41 = vld [vmem:[#allocation2 + $0x38] sm:$0xf] }
 0x113   : > { %1038 = vst.msk [vmem:[#allocation2 + $0x64] sm:$0xff] %vm1032_vm1, %v947_v49  ;;  %v945_v7 = vpop.permute.xlu0 %944  ;;  %v1113_v55 = vld [vmem:[#allocation2 + $0x5] sm:$0xff]  ;;  %v1212_v18 = vld [vmem:[#allocation2 + $0x32] sm:$0xff]  ;;  %v1164_v47 = vadd.f32 %v1116_v53, %v1068_v52 }
 0x114   : > { %1037 = vst.msk [vmem:[#allocation2 + $0x5c] sm:$0xff] %vm1032_vm1, %v945_v7  ;;  %v1209_v12 = vld [vmem:[#allocation2 + $0xa] sm:$0xff]  ;;  %v1161_v14 = vadd.f32 %v1113_v55, %v1065_v50 }
 0x115   : > { %v1066_v60 = vld [vmem:[#allocation2 + $0x8] sm:$0xff]  ;;  %v1067_v61 = vld [vmem:[#allocation2 + $0x10] sm:$0xf] }
 0x116   : > { %v951_v58 = vpop.permute.xlu1 %950  ;;  %v1260_v0 = vld [vmem:[#allocation2 + $0x37] sm:$0xff]  ;;  %v1261_v7 = vld [vmem:[#allocation2 + $0x3f] sm:$0xff] }
 0x117   : > { %1040 = vst.msk [vmem:[#allocation2 + $0x8c] sm:$0xff] %vm1032_vm1, %v951_v58  ;;  %v1257_v1 = vld [vmem:[#allocation2 + $0xf] sm:$0xff]  ;;  %v1258_v28 = vld [vmem:[#allocation2 + $0x17] sm:$0xff]  ;;  %v1308_v48 = vadd.f32 %v1260_v0, %v1212_v18  ;;  %v1214_v55 = vld [vmem:[#allocation2 + $0x42] sm:$0xf] }
 0x118   : > { %v1114_v4 = vld [vmem:[#allocation2 + $0xd] sm:$0xff]  ;;  %v1117_v10 = vld [vmem:[#allocation2 + $0x35] sm:$0xff]  ;;  %v949_v13 = vpop.permute.xlu0 %948  ;;  %v1305_v16 = vadd.f32 %v1257_v1, %v1209_v12  ;;  %v1118_v50 = vld [vmem:[#allocation2 + $0x3d] sm:$0xf] }
 0x119   : > { %v1069_v9 = vld [vmem:[#allocation2 + $0x30] sm:$0xff]  ;;  %v1162_v23 = vadd.f32 %v1114_v4, %v1066_v60  ;;  %1039 = vst.msk [vmem:[#allocation2 + $0x84] sm:$0xff] %vm1032_vm1, %v949_v13  ;;  %v1211_v45 = vld [vmem:[#allocation2 + $0x1a] sm:$0xf]  ;;  %v1403_v1 = vld [vmem:[#allocation2 + $0x24] sm:$0xf]  ;;  %v1356_v0 = vadd.f32 %v1308_v48, %v1164_v47 }
 0x11a   : > { %v1210_v24 = vld [vmem:[#allocation2 + $0x12] sm:$0xff]  ;;  %v1213_v49 = vld [vmem:[#allocation2 + $0x3a] sm:$0xff]  ;;  %v1353_v58 = vadd.f32 %v1305_v16, %v1161_v14  ;;  %v1307_v25 = vadd.f32 %v1259_v56, %v1211_v45  ;;  %v1166_v56 = vadd.f32 %v1118_v50, %v1070_v41  ;;  %v1310_v14 = vadd.f32 %v1262_v33, %v1214_v55  ;;  %v1264_v45 = vld [vmem:[#allocation2 + $0x67] sm:$0xff] }
 0x11b   : > { %v1115_v30 = vld [vmem:[#allocation2 + $0x15] sm:$0xf]  ;;  %v1306_v34 = vadd.f32 %v1258_v28, %v1210_v24  ;;  %v1165_v24 = vadd.f32 %v1117_v10, %v1069_v9  ;;  %v1120_v52 = vld [vmem:[#allocation2 + $0x5d] sm:$0xff] }
 0x11c   : > { %v1163_v44 = vadd.f32 %v1115_v30, %v1067_v61  ;;  %v1401_v12 = vld [vmem:[#allocation2 + $0x14] sm:$0xff]  ;;  %v1309_v61 = vadd.f32 %v1261_v7, %v1213_v49  ;;  %v1216_v53 = vld [vmem:[#allocation2 + $0x62] sm:$0xff]  ;;  %v1265_v49 = vld [vmem:[#allocation2 + $0x6f] sm:$0xf]  ;;  %v1358_v50 = vadd.f32 %v1310_v14, %v1166_v56 }
 0x11d   : > { %v1354_v60 = vadd.f32 %v1306_v34, %v1162_v23  ;;  %v1071_v4 = vld [vmem:[#allocation2 + $0x50] sm:$0xff]  ;;  %v6775_v35 = vadd.f32 %v1401_v12, %v1353_v58  ;;  %v1072_v28 = vld [vmem:[#allocation2 + $0x58] sm:$0xff]  ;;  %v1312_v10 = vadd.f32 %v1264_v45, %v1216_v53  ;;  %v1073_v55 = vld [vmem:[#allocation2 + $0x60] sm:$0xf] }
 0x11e   : > { %v1119_v37 = vld [vmem:[#allocation2 + $0x55] sm:$0xff]  ;;  %v1355_v13 = vadd.f32 %v1307_v25, %v1163_v44  ;;  %v1263_v30 = vld [vmem:[#allocation2 + $0x5f] sm:$0xff]  ;;  %v955_v34 = vpop.permute.xlu1 %954  ;;  %v1168_v9 = vadd.f32 %v1120_v52, %v1072_v28  ;;  %v1357_v33 = vadd.f32 %v1309_v61, %v1165_v24  ;;  %v1406_v44 = vld [vmem:[#allocation2 + $0x4c] sm:$0xf] }
 0x11f   : > { %v6777_v18 = vadd.f32 %v1402_v29, %v1354_v60  ;;  %v1215_v16 = vld [vmem:[#allocation2 + $0x5a] sm:$0xff]  ;;  %1545 = vrot.lane.b32.xlu0 %v6775_v35, %s5964_s5  ;;  %1042 = vst.msk [vmem:[#allocation2 + $0xb4] sm:$0xff] %vm1032_vm1, %v955_v34  ;;  %v1405_v25 = vld [vmem:[#allocation2 + $0x44] sm:$0xff]  ;;  %v1167_v47 = vadd.f32 %v1119_v37, %v1071_v4  ;;  %v1408_v4 = vld [vmem:[#allocation2 + $0x6c] sm:$0xff]  ;;  %v6796_v45 = vadd.f32 %v1406_v44, %v1358_v50 }
 0x120   : > { %v1404_v23 = vld [vmem:[#allocation2 + $0x3c] sm:$0xff]  ;;  %v6784_v29 = vadd.f32 %v1403_v1, %v1355_v13  ;;  %v953_v41 = vpop.permute.xlu0 %952  ;;  %v1311_v48 = vadd.f32 %v1263_v30, %v1215_v16  ;;  %v1121_v12 = vld [vmem:[#allocation2 + $0x65] sm:$0xf]  ;;  %v1217_v60 = vld [vmem:[#allocation2 + $0x6a] sm:$0xf]  ;;  %v1360_v37 = vadd.f32 %v1312_v10, %v1168_v9  ;;  %v6794_v61 = vadd.f32 %v1405_v25, %v1357_v33 }
 0x121   : > { %1547 = vrot.lane.b32.xlu1 %v6777_v18, %s5964_s5  ;;  %v1074_v7 = vld [vmem:[#allocation2 + $0x78] sm:$0xff]  ;;  %v6786_v58 = vadd.f32 %v1404_v23, %v1356_v0  ;;  %1041 = vst.msk [vmem:[#allocation2 + $0xac] sm:$0xff] %vm1032_vm1, %v953_v41  ;;  %v1218_v28 = vld [vmem:[#allocation2 + $0x82] sm:$0xff]  ;;  %v1169_v56 = vadd.f32 %v1121_v12, %v1073_v55  ;;  %v1313_v14 = vadd.f32 %v1265_v49, %v1217_v60  ;;  %v1267_v30 = vld [vmem:[#allocation2 + $0x8f] sm:$0xff] }
 0x122   : > { %v959_v1 = vpop.permute.xlu1 %958  ;;  %v1122_v13 = vld [vmem:[#allocation2 + $0x7d] sm:$0xff]  ;;  %v1266_v24 = vld [vmem:[#allocation2 + $0x87] sm:$0xff]  ;;  %v1359_v53 = vadd.f32 %v1311_v48, %v1167_v47  ;;  %v1268_v16 = vld [vmem:[#allocation2 + $0x97] sm:$0xf]  ;;  %v6803_v47 = vadd.f32 %v1408_v4, %v1360_v37 }
 0x123   : > { %1549 = vrot.lane.b32.xlu0 %v6784_v29, %s5964_s5  ;;  %1044 = vst.msk [vmem:[#allocation2 + $0xdc] sm:$0xff] %vm1032_vm1, %v959_v1  ;;  %v1407_v0 = vld [vmem:[#allocation2 + $0x64] sm:$0xff]  ;;  %v1170_v23 = vadd.f32 %v1122_v13, %v1074_v7  ;;  %v1314_v34 = vadd.f32 %v1266_v24, %v1218_v28  ;;  %v1124_v10 = vld [vmem:[#allocation2 + $0x8d] sm:$0xf]  ;;  %v1220_v33 = vld [vmem:[#allocation2 + $0x92] sm:$0xf]  ;;  %v1361_v50 = vadd.f32 %v1313_v14, %v1169_v56 }
 0x124   : > { %v957_v52 = vpop.permute.xlu0 %956  ;;  %v1075_v41 = vld [vmem:[#allocation2 + $0x80] sm:$0xff]  ;;  %v1219_v1 = vld [vmem:[#allocation2 + $0x8a] sm:$0xff]  ;;  %v1409_v44 = vld [vmem:[#allocation2 + $0x74] sm:$0xf]  ;;  %v6806_v7 = vadd.f32 %v1407_v0, %v1359_v53  ;;  %v1316_v39 = vadd.f32 %v1268_v16, %v1220_v33 }
 0x125   : > { %1551 = vrot.lane.b32.xlu1 %v6786_v58, %s5964_s5  ;;  %1043 = vst.msk [vmem:[#allocation2 + $0xd4] sm:$0xff] %vm1032_vm1, %v957_v52  ;;  %v1123_v43 = vld [vmem:[#allocation2 + $0x85] sm:$0xff]  ;;  %v1315_v12 = vadd.f32 %v1267_v30, %v1219_v1  ;;  %v1362_v24 = vadd.f32 %v1314_v34, %v1170_v23  ;;  %v6813_v0 = vadd.f32 %v1409_v44, %v1361_v50  ;;  %v1412_v56 = vld [vmem:[#allocation2 + $0x9c] sm:$0xf]  ;;  %v1411_v16 = vld [vmem:[#allocation2 + $0x94] sm:$0xff] }
 0x126   : > { %v963_v25 = vpop.permute.xlu1 %962  ;;  %v1076_v9 = vld [vmem:[#allocation2 + $0x88] sm:$0xf]  ;;  %v1077_v48 = vld [vmem:[#allocation2 + $0xa0] sm:$0xff]  ;;  %v1270_v49 = vld [vmem:[#allocation2 + $0xb7] sm:$0xff]  ;;  %v1171_v55 = vadd.f32 %v1123_v43, %v1075_v41 }
 0x127   : > { %1553 = vrot.lane.b32.xlu0 %v6794_v61, %s5964_s5  ;;  %1046 = vst.msk [vmem:[#allocation2 + $0x104] sm:$0xff] %vm1032_vm1, %v963_v25  ;;  %v1172_v52 = vadd.f32 %v1124_v10, %v1076_v9  ;;  %v1410_v4 = vld [vmem:[#allocation2 + $0x8c] sm:$0xff]  ;;  %v1271_v41 = vld [vmem:[#allocation2 + $0xbf] sm:$0xf]  ;;  %v1127_v31 = vld [vmem:[#allocation2 + $0xb5] sm:$0xf] }
 0x128   : > { %v1125_v60 = vld [vmem:[#allocation2 + $0xa5] sm:$0xff]  ;;  %v1269_v28 = vld [vmem:[#allocation2 + $0xaf] sm:$0xff]  ;;  %v1363_v14 = vadd.f32 %v1315_v12, %v1171_v55  ;;  %v6815_v9 = vadd.f32 %v1410_v4, %v1362_v24  ;;  %v1414_v50 = vld [vmem:[#allocation2 + $0xbc] sm:$0xff] }
 0x129   : > { %1555 = vrot.lane.b32.xlu1 %v6796_v45, %s5964_s5  ;;  %v1221_v13 = vld [vmem:[#allocation2 + $0xaa] sm:$0xff]  ;;  %v1222_v37 = vld [vmem:[#allocation2 + $0xb2] sm:$0xff]  ;;  %v1173_v23 = vadd.f32 %v1125_v60, %v1077_v48  ;;  %v1364_v10 = vadd.f32 %v1316_v39, %v1172_v52 }
 0x12a   : > { %v1078_v36 = vld [vmem:[#allocation2 + $0xa8] sm:$0xff]  ;;  %v961_v25 = vpop.permute.xlu0 %960  ;;  %v1318_v53 = vadd.f32 %v1270_v49, %v1222_v37  ;;  %v1317_v34 = vadd.f32 %v1269_v28, %v1221_v13  ;;  %v1079_v33 = vld [vmem:[#allocation2 + $0xb0] sm:$0xf]  ;;  %v6822_v55 = vadd.f32 %v1411_v16, %v1363_v14  ;;  %v1413_v12 = vld [vmem:[#allocation2 + $0xb4] sm:$0xff] }
 0x12b   : > { %v1126_v26 = vld [vmem:[#allocation2 + $0xad] sm:$0xff]  ;;  %1557 = vrot.lane.b32.xlu0 %v6806_v7, %s5964_s5  ;;  %1045 = vst.msk [vmem:[#allocation2 + $0xfc] sm:$0xff] %vm1032_vm1, %v961_v25  ;;  %v1223_v25 = vld [vmem:[#allocation2 + $0xba] sm:$0xf]  ;;  %v1175_v60 = vadd.f32 %v1127_v31, %v1079_v33  ;;  %v1274_v28 = vld [vmem:[#allocation2 + $0xe7] sm:$0xf]  ;;  %v6825_v52 = vadd.f32 %v1412_v56, %v1364_v10 }
 0x12c   : > { %v1174_v43 = vadd.f32 %v1126_v26, %v1078_v36  ;;  %v967_v30 = vpop.permute.xlu1 %966  ;;  %v1080_v1 = vld [vmem:[#allocation2 + $0xc8] sm:$0xff]  ;;  %v1224_v36 = vld [vmem:[#allocation2 + $0xd2] sm:$0xff]  ;;  %v1365_v39 = vadd.f32 %v1317_v34, %v1173_v23  ;;  %v1319_v13 = vadd.f32 %v1271_v41, %v1223_v25  ;;  %v1273_v24 = vld [vmem:[#allocation2 + $0xdf] sm:$0xff] }
 0x12d   : > { %1559 = vrot.lane.b32.xlu1 %v6803_v47, %s5964_s5  ;;  %1048 = vst.msk [vmem:[#allocation2 + $0x12c] sm:$0xff] %vm1032_vm1, %v967_v30  ;;  %v1128_v26 = vld [vmem:[#allocation2 + $0xcd] sm:$0xff]  ;;  %v1272_v44 = vld [vmem:[#allocation2 + $0xd7] sm:$0xff]  ;;  %v1226_v14 = vld [vmem:[#allocation2 + $0xe2] sm:$0xf] }
 0x12e   : > { %v1366_v49 = vadd.f32 %v1318_v53, %v1174_v43  ;;  %v1176_v37 = vadd.f32 %v1128_v26, %v1080_v1  ;;  %v1320_v4 = vadd.f32 %v1272_v44, %v1224_v36  ;;  %v1081_v30 = vld [vmem:[#allocation2 + $0xd0] sm:$0xff]  ;;  %v1225_v22 = vld [vmem:[#allocation2 + $0xda] sm:$0xff]  ;;  %v1415_v16 = vld [vmem:[#allocation2 + $0xc4] sm:$0xf]  ;;  %v6833_v34 = vadd.f32 %v1413_v12, %v1365_v39 }
 0x12f   : > { %1561 = vrot.lane.b32.xlu0 %v6813_v0, %s5964_s5  ;;  %v965_v48 = vpop.permute.xlu0 %964  ;;  %v1129_v8 = vld [vmem:[#allocation2 + $0xd5] sm:$0xff]  ;;  %v1130_v53 = vld [vmem:[#allocation2 + $0xdd] sm:$0xf]  ;;  %v1276_v56 = vld [vmem:[#allocation2 + $0x107] sm:$0xff]  ;;  %v1367_v41 = vadd.f32 %v1319_v13, %v1175_v60  ;;  %v1321_v33 = vadd.f32 %v1273_v24, %v1225_v22  ;;  %v1322_v6 = vadd.f32 %v1274_v28, %v1226_v14 }
 0x130   : > { %1047 = vst.msk [vmem:[#allocation2 + $0x124] sm:$0xff] %vm1032_vm1, %v965_v48  ;;  %v1082_v43 = vld [vmem:[#allocation2 + $0xd8] sm:$0xf]  ;;  %v6831_v31 = vadd.f32 %v1414_v50, %v1366_v49  ;;  %v1083_v23 = vld [vmem:[#allocation2 + $0xf0] sm:$0xff]  ;;  %v1177_v10 = vadd.f32 %v1129_v8, %v1081_v30  ;;  %v1368_v44 = vadd.f32 %v1320_v4, %v1176_v37  ;;  %v1416_v39 = vld [vmem:[#allocation2 + $0xdc] sm:$0xff] }
 0x131   : > { %1563 = vrot.lane.b32.xlu1 %v6815_v9, %s5964_s5  ;;  %v1178_v2 = vadd.f32 %v1130_v53, %v1082_v43  ;;  %v6841_v12 = vadd.f32 %v1415_v16, %v1367_v41  ;;  %v1418_v60 = vld [vmem:[#allocation2 + $0xec] sm:$0xf]  ;;  %v1417_v24 = vld [vmem:[#allocation2 + $0xe4] sm:$0xff]  ;;  %v1086_v43 = vld [vmem:[#allocation2 + $0x118] sm:$0xff] }
 0x132   : > { %v1084_v25 = vld [vmem:[#allocation2 + $0xf8] sm:$0xff]  ;;  %v1228_v36 = vld [vmem:[#allocation2 + $0x102] sm:$0xff]  ;;  %v1369_v13 = vadd.f32 %v1321_v33, %v1177_v10  ;;  %v1277_v30 = vld [vmem:[#allocation2 + $0x10f] sm:$0xf]  ;;  %v6843_v53 = vadd.f32 %v1416_v39, %v1368_v44 }
 0x133   : > { %1565 = vrot.lane.b32.xlu0 %v6822_v55, %s5964_s5  ;;  %v1132_v26 = vld [vmem:[#allocation2 + $0xfd] sm:$0xff]  ;;  %v1131_v49 = vld [vmem:[#allocation2 + $0xf5] sm:$0xff]  ;;  %v1324_v22 = vadd.f32 %v1276_v56, %v1228_v36  ;;  %v1370_v14 = vadd.f32 %v1322_v6, %v1178_v2  ;;  %v1229_v59 = vld [vmem:[#allocation2 + $0x10a] sm:$0xf] }
 0x134   : > { %v971_v1 = vpop.permute.xlu1 %970  ;;  %v1227_v50 = vld [vmem:[#allocation2 + $0xfa] sm:$0xff]  ;;  %v1180_v8 = vadd.f32 %v1132_v26, %v1084_v25  ;;  %v1179_v37 = vadd.f32 %v1131_v49, %v1083_v23  ;;  %v1420_v23 = vld [vmem:[#allocation2 + $0x10c] sm:$0xff]  ;;  %v6850_v10 = vadd.f32 %v1417_v24, %v1369_v13  ;;  %v1419_v2 = vld [vmem:[#allocation2 + $0x104] sm:$0xff]  ;;  %v1325_v25 = vadd.f32 %v1277_v30, %v1229_v59 }
 0x135   : > { %1567 = vrot.lane.b32.xlu1 %v6825_v52, %s5964_s5  ;;  %1050 = vst.msk [vmem:[#allocation2 + $0x154] sm:$0xff] %vm1032_vm1, %v971_v1  ;;  %v969_v48 = vpop.permute.xlu0 %968  ;;  %v1275_v38 = vld [vmem:[#allocation2 + $0xff] sm:$0xff]  ;;  %v1280_v26 = vld [vmem:[#allocation2 + $0x137] sm:$0xf]  ;;  %v1279_v36 = vld [vmem:[#allocation2 + $0x12f] sm:$0xff]  ;;  %v6852_v44 = vadd.f32 %v1418_v60, %v1370_v14 }
 0x136   : > { %1049 = vst.msk [vmem:[#allocation2 + $0x14c] sm:$0xff] %vm1032_vm1, %v969_v48  ;;  %v1323_v4 = vadd.f32 %v1275_v38, %v1227_v50  ;;  %v1085_v1 = vld [vmem:[#allocation2 + $0x100] sm:$0xf]  ;;  %v1133_v48 = vld [vmem:[#allocation2 + $0x105] sm:$0xf]  ;;  %v1372_v38 = vadd.f32 %v1324_v22, %v1180_v8 }
 0x137   : > { %1569 = vrot.lane.b32.xlu0 %v6833_v34, %s5964_s5  ;;  %v1134_v16 = vld [vmem:[#allocation2 + $0x11d] sm:$0xff]  ;;  %v1278_v41 = vld [vmem:[#allocation2 + $0x127] sm:$0xff]  ;;  %v1181_v6 = vadd.f32 %v1133_v48, %v1085_v1  ;;  %v1232_v13 = vld [vmem:[#allocation2 + $0x132] sm:$0xf] }
 0x138   : > { %v975_v28 = vpop.permute.xlu1 %974  ;;  %v1230_v56 = vld [vmem:[#allocation2 + $0x122] sm:$0xff]  ;;  %v1371_v33 = vadd.f32 %v1323_v4, %v1179_v37  ;;  %v1182_v50 = vadd.f32 %v1134_v16, %v1086_v43  ;;  %v1231_v27 = vld [vmem:[#allocation2 + $0x12a] sm:$0xff]  ;;  %v6859_v59 = vadd.f32 %v1420_v23, %v1372_v38  ;;  %v1421_v60 = vld [vmem:[#allocation2 + $0x114] sm:$0xf]  ;;  %v1328_v42 = vadd.f32 %v1280_v26, %v1232_v13 }
 0x139   : > { %1571 = vrot.lane.b32.xlu1 %v6831_v31, %s5964_s5  ;;  %1052 = vst.msk [vmem:[#allocation2 + $0x17c] sm:$0xff] %vm1032_vm1, %v975_v28  ;;  %v1326_v39 = vadd.f32 %v1278_v41, %v1230_v56  ;;  %v1087_v28 = vld [vmem:[#allocation2 + $0x120] sm:$0xff]  ;;  %v1088_v8 = vld [vmem:[#allocation2 + $0x128] sm:$0xf]  ;;  %v1136_v22 = vld [vmem:[#allocation2 + $0x12d] sm:$0xf]  ;;  %v1373_v30 = vadd.f32 %v1325_v25, %v1181_v6  ;;  %v1327_v1 = vadd.f32 %v1279_v36, %v1231_v27 }
 0x13a   : > { %v1135_v17 = vld [vmem:[#allocation2 + $0x125] sm:$0xff]  ;;  %v6861_v4 = vadd.f32 %v1419_v2, %v1371_v33  ;;  %v1184_v19 = vadd.f32 %v1136_v22, %v1088_v8  ;;  %v1424_v6 = vld [vmem:[#allocation2 + $0x13c] sm:$0xf]  ;;  %v1423_v36 = vld [vmem:[#allocation2 + $0x134] sm:$0xff] }
 0x13b   : > { %1573 = vrot.lane.b32.xlu0 %v6841_v12, %s5964_s5  ;;  %v1089_v24 = vld [vmem:[#allocation2 + $0x140] sm:$0xff]  ;;  %v1183_v14 = vadd.f32 %v1135_v17, %v1087_v28  ;;  %v1374_v41 = vadd.f32 %v1326_v39, %v1182_v50  ;;  %v1422_v33 = vld [vmem:[#allocation2 + $0x12c] sm:$0xff]  ;;  %v6869_v2 = vadd.f32 %v1421_v60, %v1373_v30 }
 0x13c   : > { %v1282_v37 = vld [vmem:[#allocation2 + $0x157] sm:$0xff]  ;;  %v1283_v39 = vld [vmem:[#allocation2 + $0x15f] sm:$0xf]  ;;  %v1092_v28 = vld [vmem:[#allocation2 + $0x168] sm:$0xff]  ;;  %v1376_v22 = vadd.f32 %v1328_v42, %v1184_v19 }
 0x13d   : > { %1575 = vrot.lane.b32.xlu1 %v6843_v53, %s5964_s5  ;;  %v973_v49 = vpop.permute.xlu0 %972  ;;  %v1090_v48 = vld [vmem:[#allocation2 + $0x148] sm:$0xff]  ;;  %v1234_v56 = vld [vmem:[#allocation2 + $0x152] sm:$0xff]  ;;  %v1375_v25 = vadd.f32 %v1327_v1, %v1183_v14  ;;  %v6871_v8 = vadd.f32 %v1422_v33, %v1374_v41 }
 0x13e   : > { %1051 = vst.msk [vmem:[#allocation2 + $0x174] sm:$0xff] %vm1032_vm1, %v973_v49  ;;  %v1138_v16 = vld [vmem:[#allocation2 + $0x14d] sm:$0xff]  ;;  %v1137_v38 = vld [vmem:[#allocation2 + $0x145] sm:$0xff]  ;;  %v1330_v27 = vadd.f32 %v1282_v37, %v1234_v56 }
 0x13f   : > { %1577 = vrot.lane.b32.xlu0 %v6850_v10, %s5964_s5  ;;  %v1233_v23 = vld [vmem:[#allocation2 + $0x14a] sm:$0xff]  ;;  %v1186_v17 = vadd.f32 %v1138_v16, %v1090_v48  ;;  %v1185_v26 = vadd.f32 %v1137_v38, %v1089_v24  ;;  %v1426_v24 = vld [vmem:[#allocation2 + $0x15c] sm:$0xff]  ;;  %v6878_v14 = vadd.f32 %v1423_v36, %v1375_v25  ;;  %v1425_v1 = vld [vmem:[#allocation2 + $0x154] sm:$0xff] }
 0x140   : > { %v979_v43 = vpop.permute.xlu1 %978  ;;  %v1281_v40 = vld [vmem:[#allocation2 + $0x14f] sm:$0xff]  ;;  %v1286_v41 = vld [vmem:[#allocation2 + $0x187] sm:$0xf]  ;;  %v1285_v38 = vld [vmem:[#allocation2 + $0x17f] sm:$0xff] }
 0x141   : > { %1579 = vrot.lane.b32.xlu1 %v6852_v44, %s5964_s5  ;;  %1054 = vst.msk [vmem:[#allocation2 + $0x1a4] sm:$0xff] %vm1032_vm1, %v979_v43  ;;  %v1329_v50 = vadd.f32 %v1281_v40, %v1233_v23  ;;  %v1091_v13 = vld [vmem:[#allocation2 + $0x150] sm:$0xf]  ;;  %v1139_v43 = vld [vmem:[#allocation2 + $0x155] sm:$0xf]  ;;  %v1378_v40 = vadd.f32 %v1330_v27, %v1186_v17  ;;  %v6880_v23 = vadd.f32 %v1424_v6, %v1376_v22 }
 0x142   : > { %v977_v49 = vpop.permute.xlu0 %976  ;;  %v1187_v16 = vadd.f32 %v1139_v43, %v1091_v13  ;;  %v1142_v25 = vld [vmem:[#allocation2 + $0x17d] sm:$0xf]  ;;  %v1238_v36 = vld [vmem:[#allocation2 + $0x182] sm:$0xf] }
 0x143   : > { %1581 = vrot.lane.b32.xlu0 %v6861_v4, %s5964_s5  ;;  %1053 = vst.msk [vmem:[#allocation2 + $0x19c] sm:$0xff] %vm1032_vm1, %v977_v49  ;;  %v1235_v49 = vld [vmem:[#allocation2 + $0x15a] sm:$0xf]  ;;  %v1377_v42 = vadd.f32 %v1329_v50, %v1185_v26  ;;  %v6887_v26 = vadd.f32 %v1426_v24, %v1378_v40  ;;  %v1427_v6 = vld [vmem:[#allocation2 + $0x164] sm:$0xf]  ;;  %v1095_v50 = vld [vmem:[#allocation2 + $0x190] sm:$0xff]  ;;  %v1334_v46 = vadd.f32 %v1286_v41, %v1238_v36 }
 0x144   : > { %v1331_v56 = vadd.f32 %v1283_v39, %v1235_v49  ;;  %v1428_v24 = vld [vmem:[#allocation2 + $0x17c] sm:$0xff] }
 0x145   : > { %1583 = vrot.lane.b32.xlu1 %v6859_v59, %s5964_s5  ;;  %v1140_v37 = vld [vmem:[#allocation2 + $0x16d] sm:$0xff]  ;;  %v1284_v30 = vld [vmem:[#allocation2 + $0x177] sm:$0xff] }
 0x146   : > { %v983_v48 = vpop.permute.xlu1 %982  ;;  %v1236_v60 = vld [vmem:[#allocation2 + $0x172] sm:$0xff]  ;;  %v1188_v33 = vadd.f32 %v1140_v37, %v1092_v28  ;;  %v6890_v28 = vadd.f32 %v1425_v1, %v1377_v42  ;;  %v1379_v22 = vadd.f32 %v1331_v56, %v1187_v16  ;;  %v1429_v16 = vld [vmem:[#allocation2 + $0x184] sm:$0xff] }
 0x147   : > { %1585 = vrot.lane.b32.xlu0 %v6869_v2, %s5964_s5  ;;  %1056 = vst.msk [vmem:[#allocation2 + $0x1cc] sm:$0xff] %vm1032_vm1, %v983_v48  ;;  %v1332_v3 = vadd.f32 %v1284_v30, %v1236_v60  ;;  %v1093_v15 = vld [vmem:[#allocation2 + $0x170] sm:$0xff]  ;;  %v1237_v48 = vld [vmem:[#allocation2 + $0x17a] sm:$0xff] }
 0x148   : > { %v1141_v21 = vld [vmem:[#allocation2 + $0x175] sm:$0xff]  ;;  %v1288_v39 = vld [vmem:[#allocation2 + $0x1a7] sm:$0xff]  ;;  %v1333_v43 = vadd.f32 %v1285_v38, %v1237_v48  ;;  %v6897_v42 = vadd.f32 %v1427_v6, %v1379_v22  ;;  %v1289_v38 = vld [vmem:[#allocation2 + $0x1af] sm:$0xf] }
 0x149   : > { %1587 = vrot.lane.b32.xlu1 %v6871_v8, %s5964_s5  ;;  %v981_v19 = vpop.permute.xlu0 %980  ;;  %v1094_v27 = vld [vmem:[#allocation2 + $0x178] sm:$0xf]  ;;  %v1189_v13 = vadd.f32 %v1141_v21, %v1093_v15  ;;  %v1380_v30 = vadd.f32 %v1332_v3, %v1188_v33  ;;  %v1430_v3 = vld [vmem:[#allocation2 + $0x18c] sm:$0xf]  ;;  %v1145_v36 = vld [vmem:[#allocation2 + $0x1a5] sm:$0xf] }
 0x14a   : > { %1055 = vst.msk [vmem:[#allocation2 + $0x1c4] sm:$0xff] %vm1032_vm1, %v981_v19  ;;  %v1096_v49 = vld [vmem:[#allocation2 + $0x198] sm:$0xff]  ;;  %v1240_v60 = vld [vmem:[#allocation2 + $0x1a2] sm:$0xff]  ;;  %v1190_v19 = vadd.f32 %v1142_v25, %v1094_v27  ;;  %v1241_v11 = vld [vmem:[#allocation2 + $0x1aa] sm:$0xf] }
 0x14b   : > { %1589 = vrot.lane.b32.xlu0 %v6878_v14, %s5964_s5  ;;  %v987_v17 = vpop.permute.xlu1 %986  ;;  %v1144_v37 = vld [vmem:[#allocation2 + $0x19d] sm:$0xff]  ;;  %v1143_v62 = vld [vmem:[#allocation2 + $0x195] sm:$0xff]  ;;  %v1336_v21 = vadd.f32 %v1288_v39, %v1240_v60  ;;  %v1381_v1 = vadd.f32 %v1333_v43, %v1189_v13  ;;  %v6899_v48 = vadd.f32 %v1428_v24, %v1380_v30  ;;  %v1337_v60 = vadd.f32 %v1289_v38, %v1241_v11 }
 0x14c   : > { %1058 = vst.msk [vmem:[#allocation2 + $0x1f4] sm:$0xff] %vm1032_vm1, %v987_v17  ;;  %v1239_v54 = vld [vmem:[#allocation2 + $0x19a] sm:$0xff]  ;;  %v1192_v15 = vadd.f32 %v1144_v37, %v1096_v49  ;;  %v1191_v56 = vadd.f32 %v1143_v62, %v1095_v50  ;;  %v1382_v27 = vadd.f32 %v1334_v46, %v1190_v19  ;;  %v1432_v50 = vld [vmem:[#allocation2 + $0x1ac] sm:$0xff]  ;;  %v1431_v43 = vld [vmem:[#allocation2 + $0x1a4] sm:$0xff] }
 0x14d   : > { %1591 = vrot.lane.b32.xlu1 %v6880_v23, %s5964_s5  ;;  %v1287_v40 = vld [vmem:[#allocation2 + $0x19f] sm:$0xff]  ;;  %v6906_v13 = vadd.f32 %v1429_v16, %v1381_v1  ;;  %v1292_v30 = vld [vmem:[#allocation2 + $0x1d7] sm:$0xf] }
 0x14e   : > { %v1335_v41 = vadd.f32 %v1287_v40, %v1239_v54  ;;  %v1098_v33 = vld [vmem:[#allocation2 + $0x1b8] sm:$0xff]  ;;  %v1097_v25 = vld [vmem:[#allocation2 + $0x1a0] sm:$0xf]  ;;  %v1384_v62 = vadd.f32 %v1336_v21, %v1192_v15  ;;  %v1291_v19 = vld [vmem:[#allocation2 + $0x1cf] sm:$0xff]  ;;  %v6909_v40 = vadd.f32 %v1430_v3, %v1382_v27 }
 0x14f   : > { %1593 = vrot.lane.b32.xlu0 %v6890_v28, %s5964_s5  ;;  %v985_v17 = vpop.permute.xlu0 %984  ;;  %v1193_v37 = vadd.f32 %v1145_v36, %v1097_v25  ;;  %v1148_v21 = vld [vmem:[#allocation2 + $0x1cd] sm:$0xf]  ;;  %v1244_v1 = vld [vmem:[#allocation2 + $0x1d2] sm:$0xf]  ;;  %v1101_v3 = vld [vmem:[#allocation2 + $0x1e0] sm:$0xff] }
 0x150   : > { %1057 = vst.msk [vmem:[#allocation2 + $0x1ec] sm:$0xff] %vm1032_vm1, %v985_v17  ;;  %v1383_v46 = vadd.f32 %v1335_v41, %v1191_v56  ;;  %v6915_v16 = vadd.f32 %v1432_v50, %v1384_v62  ;;  %v1433_v11 = vld [vmem:[#allocation2 + $0x1b4] sm:$0xf]  ;;  %v1340_v51 = vadd.f32 %v1292_v30, %v1244_v1 }
 0x151   : > { %1595 = vrot.lane.b32.xlu1 %v6887_v26, %s5964_s5  ;;  %v1146_v39 = vld [vmem:[#allocation2 + $0x1bd] sm:$0xff]  ;;  %v1290_v22 = vld [vmem:[#allocation2 + $0x1c7] sm:$0xff] }
 0x152   : > { %v1242_v6 = vld [vmem:[#allocation2 + $0x1c2] sm:$0xff]  ;;  %v1194_v24 = vadd.f32 %v1146_v39, %v1098_v33  ;;  %10456 = vst [vmem:[#allocation53_spill] sm:$0xff] %v6915_v16  ;;  %v6917_v38 = vadd.f32 %v1431_v43, %v1383_v46  ;;  %v1385_v33 = vadd.f32 %v1337_v60, %v1193_v37  ;;  %v1434_v46 = vld [vmem:[#allocation2 + $0x1cc] sm:$0xff]  ;;  %v1436_v37 = vld [vmem:[#allocation2 + $0x1dc] sm:$0xf] }
 0x153   : > { %1597 = vrot.lane.b32.xlu0 %v6897_v42, %s5964_s5  ;;  %v991_v49 = vpop.permute.xlu1 %990  ;;  %v1338_v17 = vadd.f32 %v1290_v22, %v1242_v6  ;;  %v1099_v20 = vld [vmem:[#allocation2 + $0x1c0] sm:$0xff]  ;;  %v1100_v15 = vld [vmem:[#allocation2 + $0x1c8] sm:$0xf]  ;;  %v1294_v41 = vld [vmem:[#allocation2 + $0x1f7] sm:$0xff] }
 0x154   : > { %1060 = vst.msk [vmem:[#allocation2 + $0x21c] sm:$0xff] %vm1032_vm1, %v991_v49  ;;  %v989_v54 = vpop.permute.xlu0 %988  ;;  %v1147_v32 = vld [vmem:[#allocation2 + $0x1c5] sm:$0xff]  ;;  %10457 = vst [vmem:[#allocation54_spill] sm:$0xff] %v6917_v38  ;;  %v1196_v63 = vadd.f32 %v1148_v21, %v1100_v15  ;;  %v6925_v43 = vadd.f32 %v1433_v11, %v1385_v33  ;;  %v1247_v57 = vld [vmem:[#allocation2 + $0x1fa] sm:$0xf] }
 0x155   : > { %1599 = vrot.lane.b32.xlu1 %v6899_v48, %s5964_s5  ;;  %1059 = vst.msk [vmem:[#allocation2 + $0x214] sm:$0xff] %vm1032_vm1, %v989_v54  ;;  %v1243_v49 = vld [vmem:[#allocation2 + $0x1ca] sm:$0xff]  ;;  %v1195_v27 = vadd.f32 %v1147_v32, %v1099_v20  ;;  %v1386_v22 = vadd.f32 %v1338_v17, %v1194_v24 }
 0x156   : > { %v1339_v25 = vadd.f32 %v1291_v19, %v1243_v49  ;;  %10458 = vst [vmem:[#allocation55_spill] sm:$0xff] %v6925_v43  ;;  %v1435_v19 = vld [vmem:[#allocation2 + $0x1d4] sm:$0xff]  ;;  %v1295_v49 = vld [vmem:[#allocation2 + $0x1ff] sm:$0xf]  ;;  %v1104_v15 = vld [vmem:[#allocation2 + $0x208] sm:$0xff]  ;;  %v1388_v1 = vadd.f32 %v1340_v51, %v1196_v63 }
 0x157   : > { %1601 = vrot.lane.b32.xlu0 %v6906_v13, %s5964_s5  ;;  %v995_v56 = vpop.permute.xlu1 %994  ;;  %v1102_v36 = vld [vmem:[#allocation2 + $0x1e8] sm:$0xff]  ;;  %v1246_v6 = vld [vmem:[#allocation2 + $0x1f2] sm:$0xff]  ;;  %v6927_v21 = vadd.f32 %v1434_v46, %v1386_v22 }
 0x158   : > { %1062 = vst.msk [vmem:[#allocation2 + $0x244] sm:$0xff] %vm1032_vm1, %v995_v56  ;;  %v1150_v39 = vld [vmem:[#allocation2 + $0x1ed] sm:$0xff]  ;;  %v1149_v62 = vld [vmem:[#allocation2 + $0x1e5] sm:$0xff]  ;;  %v1342_v32 = vadd.f32 %v1294_v41, %v1246_v6  ;;  %v1387_v60 = vadd.f32 %v1339_v25, %v1195_v27  ;;  %v1438_v27 = vld [vmem:[#allocation2 + $0x1fc] sm:$0xff] }
 0x159   : > { %1603 = vrot.lane.b32.xlu1 %v6909_v40, %s5964_s5  ;;  %v1245_v50 = vld [vmem:[#allocation2 + $0x1ea] sm:$0xff]  ;;  %v1198_v20 = vadd.f32 %v1150_v39, %v1102_v36  ;;  %v1197_v24 = vadd.f32 %v1149_v62, %v1101_v3  ;;  %10459 = vst [vmem:[#allocation56_spill] sm:$0xff] %v6927_v21  ;;  %v1437_v63 = vld [vmem:[#allocation2 + $0x1f4] sm:$0xff]  ;;  %v1343_v39 = vadd.f32 %v1295_v49, %v1247_v57  ;;  %v1439_v57 = vld [vmem:[#allocation2 + $0x204] sm:$0xf] }
 0x15a   : > { %v993_v54 = vpop.permute.xlu0 %992  ;;  %v1293_v5 = vld [vmem:[#allocation2 + $0x1ef] sm:$0xff]  ;;  %v6934_v25 = vadd.f32 %v1435_v19, %v1387_v60  ;;  %v1298_v6 = vld [vmem:[#allocation2 + $0x227] sm:$0xf]  ;;  %v6937_v62 = vadd.f32 %v1436_v37, %v1388_v1 }
 0x15b   : > { %1605 = vrot.lane.b32.xlu0 %v6917_v38, %s5964_s5  ;;  %1061 = vst.msk [vmem:[#allocation2 + $0x23c] sm:$0xff] %vm1032_vm1, %v993_v54  ;;  %v1341_v17 = vadd.f32 %v1293_v5, %v1245_v50  ;;  %v1103_v56 = vld [vmem:[#allocation2 + $0x1f0] sm:$0xf]  ;;  %v1151_v54 = vld [vmem:[#allocation2 + $0x1f5] sm:$0xf]  ;;  %v1390_v3 = vadd.f32 %v1342_v32, %v1198_v20 }
 0x15c   : > { %v1152_v11 = vld [vmem:[#allocation2 + $0x20d] sm:$0xff]  ;;  %v1296_v33 = vld [vmem:[#allocation2 + $0x217] sm:$0xff]  ;;  %10460 = vst [vmem:[#allocation57_spill] sm:$0xff] %v6934_v25  ;;  %v1199_v36 = vadd.f32 %v1151_v54, %v1103_v56  ;;  %v1250_v60 = vld [vmem:[#allocation2 + $0x222] sm:$0xf] }
 0x15d   : > { %1607 = vrot.lane.b32.xlu1 %v6915_v16, %s5964_s5  ;;  %v999_v30 = vpop.permute.xlu1 %998  ;;  %v1248_v41 = vld [vmem:[#allocation2 + $0x212] sm:$0xff]  ;;  %v1389_v51 = vadd.f32 %v1341_v17, %v1197_v24  ;;  %v1200_v50 = vadd.f32 %v1152_v11, %v1104_v15  ;;  %v1154_v32 = vld [vmem:[#allocation2 + $0x21d] sm:$0xf]  ;;  %v6943_v19 = vadd.f32 %v1438_v27, %v1390_v3 }
 0x15e   : > { %1064 = vst.msk [vmem:[#allocation2 + $0x26c] sm:$0xff] %vm1032_vm1, %v999_v30  ;;  %v1105_v22 = vld [vmem:[#allocation2 + $0x210] sm:$0xff]  ;;  %v1344_v46 = vadd.f32 %v1296_v33, %v1248_v41  ;;  %v1106_v20 = vld [vmem:[#allocation2 + $0x218] sm:$0xf]  ;;  %v1391_v49 = vadd.f32 %v1343_v39, %v1199_v36  ;;  %v1440_v3 = vld [vmem:[#allocation2 + $0x21c] sm:$0xff] }
 0x15f   : > { %1609 = vrot.lane.b32.xlu0 %v6925_v43, %s5964_s5  ;;  %v1153_v30 = vld [vmem:[#allocation2 + $0x215] sm:$0xff]  ;;  %10461 = vst [vmem:[#allocation58_spill] sm:$0xff] %v6943_v19  ;;  %v1300_v37 = vld [vmem:[#allocation2 + $0x247] sm:$0xff]  ;;  %v6945_v17 = vadd.f32 %v1437_v63, %v1389_v51  ;;  %v1202_v33 = vadd.f32 %v1154_v32, %v1106_v20 }
 0x160   : > { %v997_v5 = vpop.permute.xlu0 %996  ;;  %v1249_v43 = vld [vmem:[#allocation2 + $0x21a] sm:$0xff]  ;;  %v1107_v24 = vld [vmem:[#allocation2 + $0x230] sm:$0xff]  ;;  %v1201_v15 = vadd.f32 %v1153_v30, %v1105_v22  ;;  %v1392_v41 = vadd.f32 %v1344_v46, %v1200_v50  ;;  %v6951_v63 = vadd.f32 %v1439_v57, %v1391_v49  ;;  %v1441_v36 = vld [vmem:[#allocation2 + $0x224] sm:$0xff] }
 0x161   : > { %1611 = vrot.lane.b32.xlu1 %v6927_v21, %s5964_s5  ;;  %1063 = vst.msk [vmem:[#allocation2 + $0x264] sm:$0xff] %vm1032_vm1, %v997_v5  ;;  %v1297_v21 = vld [vmem:[#allocation2 + $0x21f] sm:$0xff]  ;;  %v1346_v5 = vadd.f32 %v1298_v6, %v1250_v60  ;;  %v1301_v6 = vld [vmem:[#allocation2 + $0x24f] sm:$0xf]  ;;  %v1253_v60 = vld [vmem:[#allocation2 + $0x24a] sm:$0xf] }
 0x162   : > { %v1345_v1 = vadd.f32 %v1297_v21, %v1249_v43  ;;  %v1108_v56 = vld [vmem:[#allocation2 + $0x238] sm:$0xff]  ;;  %v1252_v11 = vld [vmem:[#allocation2 + $0x242] sm:$0xff]  ;;  %10462 = vst [vmem:[#allocation59_spill] sm:$0xff] %v6951_v63  ;;  %v1442_v43 = vld [vmem:[#allocation2 + $0x22c] sm:$0xf]  ;;  %v6953_v46 = vadd.f32 %v1440_v3, %v1392_v41 }
 0x163   : > { %1613 = vrot.lane.b32.xlu0 %v6934_v25, %s5964_s5  ;;  %v1156_v54 = vld [vmem:[#allocation2 + $0x23d] sm:$0xff]  ;;  %v1155_v25 = vld [vmem:[#allocation2 + $0x235] sm:$0xff]  ;;  %v1348_v51 = vadd.f32 %v1300_v37, %v1252_v11  ;;  %v1394_v30 = vadd.f32 %v1346_v5, %v1202_v33  ;;  %v1157_v32 = vld [vmem:[#allocation2 + $0x245] sm:$0xf] }
 0x164   : > { %v1251_v16 = vld [vmem:[#allocation2 + $0x23a] sm:$0xff]  ;;  %v1204_v27 = vadd.f32 %v1156_v54, %v1108_v56  ;;  %v1393_v21 = vadd.f32 %v1345_v1, %v1201_v15  ;;  %v1203_v39 = vadd.f32 %v1155_v25, %v1107_v24  ;;  %v1444_v25 = vld [vmem:[#allocation2 + $0x24c] sm:$0xff]  ;;  %v1443_v24 = vld [vmem:[#allocation2 + $0x244] sm:$0xff]  ;;  %v1349_v1 = vadd.f32 %v1301_v6, %v1253_v60 }
 0x165   : > { %1615 = vrot.lane.b32.xlu1 %v6937_v62, %s5964_s5  ;;  %v1299_v38 = vld [vmem:[#allocation2 + $0x23f] sm:$0xff]  ;;  %v1304_v54 = vld [vmem:[#allocation2 + $0x277] sm:$0xf]  ;;  %v1303_v11 = vld [vmem:[#allocation2 + $0x26f] sm:$0xff]  ;;  %v6961_v41 = vadd.f32 %v1442_v43, %v1394_v30 }
 0x166   : > { %v1347_v22 = vadd.f32 %v1299_v38, %v1251_v16  ;;  %v1110_v50 = vld [vmem:[#allocation2 + $0x258] sm:$0xff]  ;;  %v1109_v20 = vld [vmem:[#allocation2 + $0x240] sm:$0xf]  ;;  %v1396_v49 = vadd.f32 %v1348_v51, %v1204_v27  ;;  %v6959_v16 = vadd.f32 %v1441_v36, %v1393_v21  ;;  %v1160_v51 = vld [vmem:[#allocation2 + $0x26d] sm:$0xf] }
 0x167   : > { %1617 = vrot.lane.b32.xlu0 %v6945_v17, %s5964_s5  ;;  %v1205_v15 = vadd.f32 %v1157_v32, %v1109_v20  ;;  %v1256_v21 = vld [vmem:[#allocation2 + $0x272] sm:$0xf] }
 0x168   : > { %v1158_v56 = vld [vmem:[#allocation2 + $0x25d] sm:$0xff]  ;;  %v1302_v57 = vld [vmem:[#allocation2 + $0x267] sm:$0xff]  ;;  %v1395_v38 = vadd.f32 %v1347_v22, %v1203_v39  ;;  %v6967_v36 = vadd.f32 %v1444_v25, %v1396_v49  ;;  %v1352_v32 = vadd.f32 %v1304_v54, %v1256_v21  ;;  %v1447_v25 = vld [vmem:[#allocation2 + $0x274] sm:$0xff] }
 0x169   : > { %1619 = vrot.lane.b32.xlu1 %v6943_v19, %s5964_s5  ;;  %v1254_v37 = vld [vmem:[#allocation2 + $0x262] sm:$0xff]  ;;  %v1206_v33 = vadd.f32 %v1158_v56, %v1110_v50  ;;  %v1255_v19 = vld [vmem:[#allocation2 + $0x26a] sm:$0xff]  ;;  %v1397_v43 = vadd.f32 %v1349_v1, %v1205_v15  ;;  %v1445_v50 = vld [vmem:[#allocation2 + $0x254] sm:$0xf] }
 0x16a   : > { %v1350_v5 = vadd.f32 %v1302_v57, %v1254_v37  ;;  %v1111_v3 = vld [vmem:[#allocation2 + $0x260] sm:$0xff]  ;;  %v1112_v27 = vld [vmem:[#allocation2 + $0x268] sm:$0xf]  ;;  %v6969_v39 = vadd.f32 %v1443_v24, %v1395_v38  ;;  %v1351_v6 = vadd.f32 %v1303_v11, %v1255_v19  ;;  %v1446_v60 = vld [vmem:[#allocation2 + $0x26c] sm:$0xff] }
 0x16b   : > { %1621 = vrot.lane.b32.xlu0 %v6951_v63, %s5964_s5  ;;  %v1159_v63 = vld [vmem:[#allocation2 + $0x265] sm:$0xff]  ;;  %v1208_v20 = vadd.f32 %v1160_v51, %v1112_v27  ;;  %v6975_v56 = vadd.f32 %v1445_v50, %v1397_v43  ;;  %v1448_v19 = vld [vmem:[#allocation2 + $0x27c] sm:$0xf] }
 0x16c   : > { %v1207_v22 = vadd.f32 %v1159_v63, %v1111_v3  ;;  %v1398_v30 = vadd.f32 %v1350_v5, %v1206_v33 }
 0x16d   : > { %1623 = vrot.lane.b32.xlu1 %v6953_v46, %s5964_s5  ;;  %v1400_v49 = vadd.f32 %v1352_v32, %v1208_v20 }
 0x16e   : > { %v1399_v37 = vadd.f32 %v1351_v6, %v1207_v22  ;;  %v6977_v57 = vadd.f32 %v1446_v60, %v1398_v30 }
 0x16f   : > { %1625 = vrot.lane.b32.xlu0 %v6959_v16, %s5964_s5  ;;  %v6985_v38 = vadd.f32 %v1448_v19, %v1400_v49 }
 0x170   : > { %v6983_v63 = vadd.f32 %v1447_v25, %v1399_v37 }
 0x171   : > { %1627 = vrot.lane.b32.xlu1 %v6961_v41, %s5964_s5 }
 0x173   : > { %1629 = vrot.lane.b32.xlu0 %v6969_v39, %s5964_s5 }
 0x175   : > { %1631 = vrot.lane.b32.xlu1 %v6967_v36, %s5964_s5 }
 0x177   : > { %1633 = vrot.lane.b32.xlu0 %v6975_v56, %s5964_s5 }
 0x179   : > { %1635 = vrot.lane.b32.xlu1 %v6977_v57, %s5964_s5 }
 0x17b   : > { %1637 = vrot.lane.b32.xlu0 %v6983_v63, %s5964_s5 }
 0x17d   : > { %1639 = vrot.lane.b32.xlu1 %v6985_v38, %s5964_s5  ;;  %s5971_s5 = smov [#allocation11]  }
 0x17f   : > { %1977 = vrot.lane.b32.xlu0 %v6775_v35, %s5965_s28 }
 0x181   : > { %1979 = vrot.lane.b32.xlu1 %v6777_v18, %s5965_s28 }
 0x183   : > { %1981 = vrot.lane.b32.xlu0 %v6784_v29, %s5965_s28 }
 0x185   : > { %1983 = vrot.lane.b32.xlu1 %v6786_v58, %s5965_s28 }
 0x187   : > { %1985 = vrot.lane.b32.xlu0 %v6794_v61, %s5965_s28 }
 0x189   : > { %1987 = vrot.lane.b32.xlu1 %v6796_v45, %s5965_s28 }
 0x18b   : > { %1989 = vrot.lane.b32.xlu0 %v6806_v7, %s5965_s28 }
 0x18d   : > { %1991 = vrot.lane.b32.xlu1 %v6803_v47, %s5965_s28 }
 0x18f   : > { %1993 = vrot.lane.b32.xlu0 %v6813_v0, %s5965_s28 }
 0x191   : > { %1995 = vrot.lane.b32.xlu1 %v6815_v9, %s5965_s28  ;;  %v1546_v24 = vpop.permute.xlu0 %1545 }
 0x192   : > { %v7032_v21 = vadd.f32 %v1546_v24, %v6775_v35 }
 0x193   : > { %v1548_v15 = vpop.permute.xlu1 %1547  ;;  %1997 = vrot.lane.b32.xlu0 %v6822_v55, %s5965_s28 }
 0x194   : > { %v7035_v22 = vadd.f32 %v1548_v15, %v6777_v18 }
 0x195   : > { %1999 = vrot.lane.b32.xlu1 %v6825_v52, %s5965_s28  ;;  %v1550_v1 = vpop.permute.xlu0 %1549 }
 0x196   : > { %v7042_v50 = vadd.f32 %v1550_v1, %v6784_v29 }
 0x197   : > { %v1552_v54 = vpop.permute.xlu1 %1551  ;;  %2001 = vrot.lane.b32.xlu0 %v6833_v34, %s5965_s28 }
 0x198   : > { %v7045_v20 = vadd.f32 %v1552_v54, %v6786_v58 }
 0x199   : > { %2003 = vrot.lane.b32.xlu1 %v6831_v31, %s5965_s28  ;;  %v1554_v11 = vpop.permute.xlu0 %1553 }
 0x19a   : > { %v7052_v18 = vadd.f32 %v1554_v11, %v6794_v61 }
 0x19b   : > { %v1556_v33 = vpop.permute.xlu1 %1555  ;;  %2005 = vrot.lane.b32.xlu0 %v6841_v12, %s5965_s28 }
 0x19c   : > { %v7055_v60 = vadd.f32 %v1556_v33, %v6796_v45 }
 0x19d   : > { %2007 = vrot.lane.b32.xlu1 %v6843_v53, %s5965_s28  ;;  %v1558_v5 = vpop.permute.xlu0 %1557 }
 0x19e   : > { %v7062_v58 = vadd.f32 %v1558_v5, %v6806_v7 }
 0x19f   : > { %v1560_v3 = vpop.permute.xlu1 %1559  ;;  %2009 = vrot.lane.b32.xlu0 %v6850_v10, %s5965_s28 }
 0x1a0   : > { %v7065_v49 = vadd.f32 %v1560_v3, %v6803_v47 }
 0x1a1   : > { %2011 = vrot.lane.b32.xlu1 %v6852_v44, %s5965_s28  ;;  %v1562_v27 = vpop.permute.xlu0 %1561 }
 0x1a2   : > { %v7072_v45 = vadd.f32 %v1562_v27, %v6813_v0 }
 0x1a3   : > { %v1564_v51 = vpop.permute.xlu1 %1563  ;;  %2013 = vrot.lane.b32.xlu0 %v6861_v4, %s5965_s28 }
 0x1a4   : > { %v7075_v19 = vadd.f32 %v1564_v51, %v6815_v9 }
 0x1a5   : > { %2015 = vrot.lane.b32.xlu1 %v6859_v59, %s5965_s28  ;;  %v1566_v43 = vpop.permute.xlu0 %1565 }
 0x1a6   : > { %v7082_v47 = vadd.f32 %v1566_v43, %v6822_v55 }
 0x1a7   : > { %v1568_v6 = vpop.permute.xlu1 %1567  ;;  %1785 = vrot.lane.b32.xlu0 %v7032_v21, %s5966_s1 }
 0x1a8   : > { %v7085_v15 = vadd.f32 %v1568_v6, %v6825_v52 }
 0x1a9   : > { %1787 = vrot.lane.b32.xlu1 %v7035_v22, %s5966_s1  ;;  %v1570_v30 = vpop.permute.xlu0 %1569 }
 0x1aa   : > { %v7092_v9 = vadd.f32 %v1570_v30, %v6833_v34 }
 0x1ab   : > { %v1572_v35 = vpop.permute.xlu1 %1571  ;;  %1789 = vrot.lane.b32.xlu0 %v7042_v50, %s5966_s1 }
 0x1ac   : > { %v7095_v54 = vadd.f32 %v1572_v35, %v6831_v31 }
 0x1ad   : > { %1791 = vrot.lane.b32.xlu1 %v7045_v20, %s5966_s1  ;;  %v1574_v32 = vpop.permute.xlu0 %1573 }
 0x1ae   : > { %v7102_v52 = vadd.f32 %v1574_v32, %v6841_v12 }
 0x1af   : > { %v1576_v29 = vpop.permute.xlu1 %1575  ;;  %1793 = vrot.lane.b32.xlu0 %v7052_v18, %s5966_s1 }
 0x1b0   : > { %v7105_v33 = vadd.f32 %v1576_v29, %v6843_v53 }
 0x1b1   : > { %1795 = vrot.lane.b32.xlu1 %v7055_v60, %s5966_s1  ;;  %v1578_v37 = vpop.permute.xlu0 %1577 }
 0x1b2   : > { %v7112_v31 = vadd.f32 %v1578_v37, %v6850_v10 }
 0x1b3   : > { %v1580_v61 = vpop.permute.xlu1 %1579  ;;  %1797 = vrot.lane.b32.xlu0 %v7062_v58, %s5966_s1 }
 0x1b4   : > { %v7115_v3 = vadd.f32 %v1580_v61, %v6852_v44 }
 0x1b5   : > { %1799 = vrot.lane.b32.xlu1 %v7065_v49, %s5966_s1  ;;  %v1582_v25 = vpop.permute.xlu0 %1581 }
 0x1b6   : > { %v7122_v53 = vadd.f32 %v1582_v25, %v6861_v4 }
 0x1b7   : > { %v1584_v7 = vpop.permute.xlu1 %1583  ;;  %1801 = vrot.lane.b32.xlu0 %v7072_v45, %s5966_s1 }
 0x1b8   : > { %v7125_v51 = vadd.f32 %v1584_v7, %v6859_v59 }
 0x1b9   : > { %1803 = vrot.lane.b32.xlu1 %v7075_v19, %s5966_s1  ;;  %v1586_v24 = vpop.permute.xlu0 %1585 }
 0x1ba   : > { %10463 = vst [vmem:[#allocation60_spill] sm:$0xff] %v7125_v51  ;;  %v7132_v44 = vadd.f32 %v1586_v24, %v6869_v2 }
 0x1bb   : > { %v1588_v0 = vpop.permute.xlu1 %1587  ;;  %1805 = vrot.lane.b32.xlu0 %v7082_v47, %s5966_s1 }
 0x1bc   : > { %10464 = vst [vmem:[#allocation61_spill] sm:$0xff] %v7132_v44  ;;  %v7135_v6 = vadd.f32 %v1588_v0, %v6871_v8 }
 0x1bd   : > { %1807 = vrot.lane.b32.xlu1 %v7085_v15, %s5966_s1  ;;  %v1590_v1 = vpop.permute.xlu0 %1589 }
 0x1be   : > { %10465 = vst [vmem:[#allocation62_spill] sm:$0xff] %v7135_v6  ;;  %v7142_v59 = vadd.f32 %v1590_v1, %v6878_v14 }
 0x1bf   : > { %v1592_v55 = vpop.permute.xlu1 %1591  ;;  %1809 = vrot.lane.b32.xlu0 %v7092_v9, %s5966_s1 }
 0x1c0   : > { %10466 = vst [vmem:[#allocation63_spill] sm:$0xff] %v7142_v59  ;;  %v7145_v35 = vadd.f32 %v1592_v55, %v6880_v23 }
 0x1c1   : > { %1811 = vrot.lane.b32.xlu1 %v7095_v54, %s5966_s1  ;;  %v1594_v11 = vpop.permute.xlu0 %1593 }
 0x1c2   : > { %10467 = vst [vmem:[#allocation64_spill] sm:$0xff] %v7145_v35  ;;  %v7152_v29 = vadd.f32 %v1594_v11, %v6890_v28 }
 0x1c3   : > { %v1596_v34 = vpop.permute.xlu1 %1595  ;;  %1813 = vrot.lane.b32.xlu0 %v7102_v52, %s5966_s1 }
 0x1c4   : > { %10468 = vst [vmem:[#allocation65_spill] sm:$0xff] %v7152_v29  ;;  %v7155_v61 = vadd.f32 %v1596_v34, %v6887_v26 }
 0x1c5   : > { %1815 = vrot.lane.b32.xlu1 %v7105_v33, %s5966_s1  ;;  %v1598_v5 = vpop.permute.xlu0 %1597 }
 0x1c6   : > { %10469 = vst [vmem:[#allocation66_spill] sm:$0xff] %v7155_v61  ;;  %v7162_v7 = vadd.f32 %v1598_v5, %v6897_v42 }
 0x1c7   : > { %v1600_v12 = vpop.permute.xlu1 %1599  ;;  %1817 = vrot.lane.b32.xlu0 %v7112_v31, %s5966_s1 }
 0x1c8   : > { %10470 = vst [vmem:[#allocation67_spill] sm:$0xff] %v7162_v7  ;;  %v7165_v0 = vadd.f32 %v1600_v12, %v6899_v48  ;;  %v10474_v12 = vld [vmem:[#allocation54_spill] sm:$0xff] }
 0x1c9   : > { %1819 = vrot.lane.b32.xlu1 %v7115_v3, %s5966_s1  ;;  %v1602_v27 = vpop.permute.xlu0 %1601 }
 0x1ca   : > { %10471 = vst [vmem:[#allocation68_spill] sm:$0xff] %v7165_v0  ;;  %v7172_v55 = vadd.f32 %v1602_v27, %v6906_v13 }
 0x1cb   : > { %v1604_v10 = vpop.permute.xlu1 %1603  ;;  %1821 = vrot.lane.b32.xlu0 %v7122_v53, %s5966_s1 }
 0x1cc   : > { %10472 = vst [vmem:[#allocation69_spill] sm:$0xff] %v7172_v55  ;;  %v7175_v34 = vadd.f32 %v1604_v10, %v6909_v40  ;;  %v10478_v10 = vld [vmem:[#allocation55_spill] sm:$0xff] }
 0x1cd   : > { %1823 = vrot.lane.b32.xlu1 %v7125_v51, %s5966_s1  ;;  %v1606_v43 = vpop.permute.xlu0 %1605 }
 0x1ce   : > { %10473 = vst [vmem:[#allocation70_spill] sm:$0xff] %v7175_v34 }
 0x1cf   : > { %v1608_v4 = vpop.permute.xlu1 %1607  ;;  %1825 = vrot.lane.b32.xlu0 %v7132_v44, %s5966_s1  ;;  %v10486_v44 = vld [vmem:[#allocation58_spill] sm:$0xff] }
 0x1d1   : > { %1827 = vrot.lane.b32.xlu1 %v7135_v6, %s5966_s1  ;;  %v1610_v30 = vpop.permute.xlu0 %1609 }
 0x1d3   : > { %v1612_v32 = vpop.permute.xlu1 %1611  ;;  %1829 = vrot.lane.b32.xlu0 %v7142_v59, %s5966_s1  ;;  %v10480_v59 = vld [vmem:[#allocation56_spill] sm:$0xff] }
 0x1d5   : > { %1831 = vrot.lane.b32.xlu1 %v7145_v35, %s5966_s1  ;;  %v1614_v37 = vpop.permute.xlu0 %1613  ;;  %v7192_v35 = vadd.f32 %v1610_v30, %v10478_v10 }
 0x1d7   : > { %v1616_v25 = vpop.permute.xlu1 %1615  ;;  %1833 = vrot.lane.b32.xlu0 %v7152_v29, %s5966_s1  ;;  %v10476_v29 = vld [vmem:[#allocation53_spill] sm:$0xff]  ;;  %10479 = vst [vmem:[#allocation55_spill] sm:$0xff] %v7192_v35 }
 0x1d9   : > { %1835 = vrot.lane.b32.xlu1 %v7155_v61, %s5966_s1  ;;  %v1618_v24 = vpop.permute.xlu0 %1617  ;;  %v7182_v61 = vadd.f32 %v1606_v43, %v10474_v12 }
 0x1db   : > { %v1620_v1 = vpop.permute.xlu1 %1619  ;;  %1837 = vrot.lane.b32.xlu0 %v7162_v7, %s5966_s1  ;;  %10475 = vst [vmem:[#allocation54_spill] sm:$0xff] %v7182_v61 }
 0x1dd   : > { %1839 = vrot.lane.b32.xlu1 %v7165_v0, %s5966_s1  ;;  %v1622_v11 = vpop.permute.xlu0 %1621  ;;  %v7185_v0 = vadd.f32 %v1608_v4, %v10476_v29  ;;  %v10482_v4 = vld [vmem:[#allocation57_spill] sm:$0xff] }
 0x1de   : > { %v7202_v6 = vadd.f32 %v1614_v37, %v10482_v4 }
 0x1df   : > { %v1624_v5 = vpop.permute.xlu1 %1623  ;;  %1841 = vrot.lane.b32.xlu0 %v7172_v55, %s5966_s1  ;;  %10477 = vst [vmem:[#allocation53_spill] sm:$0xff] %v7185_v0 }
 0x1e0   : > { %10483 = vst [vmem:[#allocation57_spill] sm:$0xff] %v7202_v6 }
 0x1e1   : > { %1843 = vrot.lane.b32.xlu1 %v7175_v34, %s5966_s1  ;;  %v1626_v7 = vpop.permute.xlu0 %1625  ;;  %v7195_v34 = vadd.f32 %v1612_v32, %v10480_v59  ;;  %v7212_v32 = vadd.f32 %v1618_v24, %v6945_v17 }
 0x1e3   : > { %v1628_v27 = vpop.permute.xlu1 %1627  ;;  %1845 = vrot.lane.b32.xlu0 %v7182_v61, %s5966_s1  ;;  %10481 = vst [vmem:[#allocation56_spill] sm:$0xff] %v7195_v34  ;;  %10485 = vst [vmem:[#allocation72_spill] sm:$0xff] %v7212_v32 }
 0x1e5   : > { %1847 = vrot.lane.b32.xlu1 %v7185_v0, %s5966_s1  ;;  %v1630_v55 = vpop.permute.xlu0 %1629  ;;  %v7205_v0 = vadd.f32 %v1616_v25, %v6937_v62  ;;  %v10488_v25 = vld [vmem:[#allocation59_spill] sm:$0xff] }
 0x1e6   : > { %v7222_v51 = vadd.f32 %v1622_v11, %v10488_v25  ;;  %v7241_v11 = vadd.f32 %v1628_v27, %v6961_v41 }
 0x1e7   : > { %v1632_v43 = vpop.permute.xlu1 %1631  ;;  %1849 = vrot.lane.b32.xlu0 %v7192_v35, %s5966_s1  ;;  %10484 = vst [vmem:[#allocation71_spill] sm:$0xff] %v7205_v0 }
 0x1e8   : > { %10489 = vst [vmem:[#allocation59_spill] sm:$0xff] %v7222_v51  ;;  %10492 = vst [vmem:[#allocation75_spill] sm:$0xff] %v7241_v11 }
 0x1e9   : > { %1851 = vrot.lane.b32.xlu1 %v7195_v34, %s5966_s1  ;;  %v1634_v61 = vpop.permute.xlu0 %1633  ;;  %v7215_v34 = vadd.f32 %v1620_v1, %v10486_v44  ;;  %v7236_v1 = vadd.f32 %v1626_v7, %v6959_v16  ;;  %v7255_v7 = vadd.f32 %v1632_v43, %v6967_v36 }
 0x1ea   : > { %v7264_v27 = vadd.f32 %v1634_v61, %v6975_v56 }
 0x1eb   : > { %v1636_v30 = vpop.permute.xlu1 %1635  ;;  %1853 = vrot.lane.b32.xlu0 %v7202_v6, %s5966_s1  ;;  %10487 = vst [vmem:[#allocation58_spill] sm:$0xff] %v7215_v34  ;;  %10491 = vst [vmem:[#allocation74_spill] sm:$0xff] %v7236_v1 }
 0x1ec   : > { %10494 = vst [vmem:[#allocation77_spill] sm:$0xff] %v7255_v7  ;;  %10495 = vst [vmem:[#allocation78_spill] sm:$0xff] %v7264_v27 }
 0x1ed   : > { %1855 = vrot.lane.b32.xlu1 %v7205_v0, %s5966_s1  ;;  %v1638_v35 = vpop.permute.xlu0 %1637  ;;  %v7227_v0 = vadd.f32 %v1624_v5, %v6953_v46  ;;  %v7250_v5 = vadd.f32 %v1630_v55, %v6969_v39  ;;  %v7269_v55 = vadd.f32 %v1636_v30, %v6977_v57 }
 0x1ee   : > { %v7278_v43 = vadd.f32 %v1638_v35, %v6983_v63 }
 0x1ef   : > { %v1640_v37 = vpop.permute.xlu1 %1639  ;;  %1857 = vrot.lane.b32.xlu0 %v7212_v32, %s5966_s1  ;;  %10490 = vst [vmem:[#allocation73_spill] sm:$0xff] %v7227_v0  ;;  %10493 = vst [vmem:[#allocation76_spill] sm:$0xff] %v7250_v5 }
 0x1f0   : > { %10496 = vst [vmem:[#allocation79_spill] sm:$0xff] %v7269_v55  ;;  %10497 = vst [vmem:[#allocation80_spill] sm:$0xff] %v7278_v43  ;;  %v7283_v61 = vadd.f32 %v1640_v37, %v6985_v38 }
 0x1f1   : > { %1859 = vrot.lane.b32.xlu1 %v7215_v34, %s5966_s1  ;;  %v7224_v6 = vpop.permute.xlu0 %1977 }
 0x1f2   : > { %10498 = vst [vmem:[#allocation81_spill] sm:$0xff] %v7283_v61 }
 0x1f3   : > { %v7229_v24 = vpop.permute.xlu1 %1979  ;;  %1861 = vrot.lane.b32.xlu0 %v7222_v51, %s5966_s1 }
 0x1f5   : > { %1863 = vrot.lane.b32.xlu1 %v7227_v0, %s5966_s1  ;;  %v7238_v34 = vpop.permute.xlu0 %1981 }
 0x1f7   : > { %v7243_v32 = vpop.permute.xlu1 %1983  ;;  %1865 = vrot.lane.b32.xlu0 %v7236_v1, %s5966_s1 }
 0x1f9   : > { %1867 = vrot.lane.b32.xlu1 %v7241_v11, %s5966_s1  ;;  %v7252_v0 = vpop.permute.xlu0 %1985 }
 0x1fb   : > { %v7257_v51 = vpop.permute.xlu1 %1987  ;;  %1869 = vrot.lane.b32.xlu0 %v7250_v5, %s5966_s1 }
 0x1fd   : > { %1871 = vrot.lane.b32.xlu1 %v7255_v7, %s5966_s1  ;;  %v7266_v11 = vpop.permute.xlu0 %1989 }
 0x1ff   : > { %v7271_v1 = vpop.permute.xlu1 %1991  ;;  %1873 = vrot.lane.b32.xlu0 %v7264_v27, %s5966_s1 }
 0x201   : > { %1875 = vrot.lane.b32.xlu1 %v7269_v55, %s5966_s1  ;;  %v7280_v7 = vpop.permute.xlu0 %1993 }
 0x203   : > { %v7285_v5 = vpop.permute.xlu1 %1995  ;;  %1877 = vrot.lane.b32.xlu0 %v7278_v43, %s5966_s1 }
 0x205   : > { %1879 = vrot.lane.b32.xlu1 %v7283_v61, %s5966_s1  ;;  %v7291_v30 = vpop.permute.xlu0 %1997 }
 0x207   : > { %v7293_v27 = vpop.permute.xlu1 %1999  ;;  %2017 = vrot.lane.b32.xlu0 %v6869_v2, %s5965_s28 }
 0x209   : > { %2019 = vrot.lane.b32.xlu1 %v6871_v8, %s5965_s28  ;;  %v7299_v35 = vpop.permute.xlu0 %2001 }
 0x20b   : > { %v7301_v37 = vpop.permute.xlu1 %2003  ;;  %2021 = vrot.lane.b32.xlu0 %v6878_v14, %s5965_s28 }
 0x20d   : > { %2023 = vrot.lane.b32.xlu1 %v6880_v23, %s5965_s28  ;;  %v7307_v61 = vpop.permute.xlu0 %2005 }
 0x20f   : > { %v7309_v43 = vpop.permute.xlu1 %2007  ;;  %2025 = vrot.lane.b32.xlu0 %v6890_v28, %s5965_s28 }
 0x211   : > { %2027 = vrot.lane.b32.xlu1 %v6887_v26, %s5965_s28  ;;  %v7315_v2 = vpop.permute.xlu0 %2009 }
 0x213   : > { %v7317_v8 = vpop.permute.xlu1 %2011  ;;  %2029 = vrot.lane.b32.xlu0 %v6897_v42, %s5965_s28 }
 0x215   : > { %2031 = vrot.lane.b32.xlu1 %v6899_v48, %s5965_s28  ;;  %v7323_v14 = vpop.permute.xlu0 %2013 }
 0x217   : > { %v7325_v23 = vpop.permute.xlu1 %2015  ;;  %2033 = vrot.lane.b32.xlu0 %v6906_v13, %s5965_s28 }
 0x218   : > { %10499 = vst [vmem:[#allocation82_spill] sm:$0xff] %v7325_v23 }
 0x219   : > { %2035 = vrot.lane.b32.xlu1 %v6909_v40, %s5965_s28  ;;  %v1786_v26 = vpop.permute.xlu0 %1785 }
 0x21b   : > { %v1788_v28 = vpop.permute.xlu1 %1787  ;;  %2037 = vrot.lane.b32.xlu0 %v10474_v12, %s5965_s28 }
 0x21d   : > { %2039 = vrot.lane.b32.xlu1 %v10476_v29, %s5965_s28  ;;  %v1790_v42 = vpop.permute.xlu0 %1789 }
 0x21f   : > { %v1792_v48 = vpop.permute.xlu1 %1791  ;;  %2041 = vrot.lane.b32.xlu0 %v10478_v10, %s5965_s28 }
 0x221   : > { %2043 = vrot.lane.b32.xlu1 %v10480_v59, %s5965_s28  ;;  %v1794_v13 = vpop.permute.xlu0 %1793 }
 0x223   : > { %v1796_v55 = vpop.permute.xlu1 %1795  ;;  %2045 = vrot.lane.b32.xlu0 %v10482_v4, %s5965_s28 }
 0x225   : > { %2047 = vrot.lane.b32.xlu1 %v6937_v62, %s5965_s28  ;;  %v1798_v40 = vpop.permute.xlu0 %1797 }
 0x227   : > { %v1800_v12 = vpop.permute.xlu1 %1799  ;;  %2049 = vrot.lane.b32.xlu0 %v6945_v17, %s5965_s28 }
 0x229   : > { %2051 = vrot.lane.b32.xlu1 %v10486_v44, %s5965_s28  ;;  %v1802_v29 = vpop.permute.xlu0 %1801 }
 0x22b   : > { %v1804_v10 = vpop.permute.xlu1 %1803  ;;  %2053 = vrot.lane.b32.xlu0 %v10488_v25, %s5965_s28 }
 0x22d   : > { %2055 = vrot.lane.b32.xlu1 %v6953_v46, %s5965_s28  ;;  %v1806_v59 = vpop.permute.xlu0 %1805  ;;  %v1929_v46 = vadd.f32 %v1786_v26, %v7032_v21  ;;  %v1932_v21 = vadd.f32 %v1792_v48, %v7045_v20  ;;  %v1934_v20 = vadd.f32 %v1796_v55, %v7055_v60  ;;  %v1936_v60 = vadd.f32 %v1800_v12, %v7065_v49 }
 0x22e   : > { %v1938_v49 = vadd.f32 %v1804_v10, %v7075_v19 }
 0x22f   : > { %v1808_v4 = vpop.permute.xlu1 %1807  ;;  %2057 = vrot.lane.b32.xlu0 %v6959_v16, %s5965_s28 }
 0x230   : > { %v1940_v19 = vadd.f32 %v1808_v4, %v7085_v15 }
 0x231   : > { %2059 = vrot.lane.b32.xlu1 %v6961_v41, %s5965_s28  ;;  %v1810_v62 = vpop.permute.xlu0 %1809  ;;  %v1930_v41 = vadd.f32 %v1788_v28, %v7035_v22 }
 0x233   : > { %v1812_v17 = vpop.permute.xlu1 %1811  ;;  %2061 = vrot.lane.b32.xlu0 %v6969_v39, %s5965_s28  ;;  %v1931_v39 = vadd.f32 %v1790_v42, %v7042_v50 }
 0x234   : > { %v1942_v15 = vadd.f32 %v1812_v17, %v7095_v54 }
 0x235   : > { %2063 = vrot.lane.b32.xlu1 %v6967_v36, %s5965_s28  ;;  %v1814_v44 = vpop.permute.xlu0 %1813  ;;  %v7374_v36 = vadd.f32 %v7224_v6, %v1929_v46  ;;  %v7396_v6 = vadd.f32 %v7243_v32, %v1932_v21  ;;  %v7412_v32 = vadd.f32 %v7257_v51, %v1934_v20  ;;  %v7428_v51 = vadd.f32 %v7271_v1, %v1936_v60 }
 0x236   : > { %v7444_v1 = vadd.f32 %v7285_v5, %v1938_v49  ;;  %v7460_v5 = vadd.f32 %v7293_v27, %v1940_v19  ;;  %v7476_v27 = vadd.f32 %v7301_v37, %v1942_v15 }
 0x237   : > { %v1816_v25 = vpop.permute.xlu1 %1815  ;;  %2065 = vrot.lane.b32.xlu0 %v6975_v56, %s5965_s28  ;;  %10500 = vst [vmem:[#allocation83_spill] sm:$0xff] %v7374_v36  ;;  %10503 = vst [vmem:[#allocation86_spill] sm:$0xff] %v7396_v6 }
 0x238   : > { %10505 = vst [vmem:[#allocation88_spill] sm:$0xff] %v7412_v32  ;;  %10507 = vst [vmem:[#allocation90_spill] sm:$0xff] %v7428_v51  ;;  %v1944_v54 = vadd.f32 %v1816_v25, %v7105_v33 }
 0x239   : > { %2067 = vrot.lane.b32.xlu1 %v6977_v57, %s5965_s28  ;;  %v7364_v16 = vpop.permute.xlu0 %1817  ;;  %v7380_v57 = vadd.f32 %v7229_v24, %v1930_v41  ;;  %10509 = vst [vmem:[#allocation92_spill] sm:$0xff] %v7444_v1  ;;  %10511 = vst [vmem:[#allocation94_spill] sm:$0xff] %v7460_v5 }
 0x23a   : > { %10513 = vst [vmem:[#allocation96_spill] sm:$0xff] %v7476_v27  ;;  %v7493_v37 = vadd.f32 %v7309_v43, %v1944_v54 }
 0x23b   : > { %v7367_v23 = vpop.permute.xlu1 %1819  ;;  %2069 = vrot.lane.b32.xlu0 %v6983_v63, %s5965_s28  ;;  %10501 = vst [vmem:[#allocation84_spill] sm:$0xff] %v7380_v57  ;;  %v7390_v63 = vadd.f32 %v7238_v34, %v1931_v39 }
 0x23c   : > { %10515 = vst [vmem:[#allocation98_spill] sm:$0xff] %v7493_v37  ;;  %v1946_v33 = vadd.f32 %v7367_v23, %v7115_v3  ;;  %v10518_v3 = vld [vmem:[#allocation60_spill] sm:$0xff] }
 0x23d   : > { %2071 = vrot.lane.b32.xlu1 %v6985_v38, %s5965_s28  ;;  %v7377_v56 = vpop.permute.xlu0 %1821  ;;  %10502 = vst [vmem:[#allocation85_spill] sm:$0xff] %v7390_v63  ;;  %v1933_v38 = vadd.f32 %v1794_v13, %v7052_v18  ;;  %v1935_v18 = vadd.f32 %v1798_v40, %v7062_v58  ;;  %v1937_v58 = vadd.f32 %v1802_v29, %v7072_v45  ;;  %s5831_s28 = sshll.u32 %s5971_s5, 4  ;;  %s5832_s28 = int_to_ptr.vmem [resolvable:$false] %s5831_s28 }
 0x23e   : > { %v1939_v45 = vadd.f32 %v1806_v59, %v7082_v47  ;;  %v1941_v47 = vadd.f32 %v1810_v62, %v7092_v9  ;;  %v1943_v9 = vadd.f32 %v1814_v44, %v7102_v52  ;;  %v1945_v52 = vadd.f32 %v7364_v16, %v7112_v31  ;;  %v10520_v44 = vld [vmem:[#allocation82_spill] sm:$0xff]  ;;  %s5833_s1 = scalar_lea.vmem %s5832_s28, 8192  ;;  %p5834_p7 = scmp.lt.s32.totalorder %s10081_s18, %s5832_s28 }
 0x23f   : > { %v7383_v22 = vpop.permute.xlu1 %1823  ;;  %2394 = vrot.lane.b32.xlu0 %v7374_v36, %s5967_s2  ;;  %v7406_v34 = vadd.f32 %v7252_v0, %v1933_v38  ;;  %v7422_v0 = vadd.f32 %v7266_v11, %v1935_v18  ;;  %v7438_v11 = vadd.f32 %v7280_v7, %v1937_v58  ;;  %v1947_v31 = vadd.f32 %v7377_v56, %v7122_v53  ;;  %v10522_v18 = vld [vmem:[#allocation61_spill] sm:$0xff]  ;;  %v10523_v58 = vld [vmem:[#allocation62_spill] sm:$0xff]  ;;  %p5835_p9 = scmp.lt.s32.totalorder %s5833_s1, %s5827_s24 }
 0x240   : > { %v7454_v7 = vadd.f32 %v7291_v30, %v1939_v45  ;;  %v7470_v30 = vadd.f32 %v7299_v35, %v1941_v47  ;;  %v7486_v35 = vadd.f32 %v7307_v61, %v1943_v9  ;;  %v7504_v61 = vadd.f32 %v7315_v2, %v1945_v52  ;;  %v10526_v9 = vld [vmem:[#allocation63_spill] sm:$0xff]  ;;  %v10527_v52 = vld [vmem:[#allocation64_spill] sm:$0xff] }
 0x241   : > { %2396 = vrot.lane.b32.xlu1 %v7380_v57, %s5967_s2  ;;  %v7393_v50 = vpop.permute.xlu0 %1825  ;;  %10504 = vst [vmem:[#allocation87_spill] sm:$0xff] %v7406_v34  ;;  %10506 = vst [vmem:[#allocation89_spill] sm:$0xff] %v7422_v0  ;;  %v7511_v43 = vadd.f32 %v7317_v8, %v1946_v33  ;;  %v1948_v23 = vadd.f32 %v7383_v22, %v10518_v3  ;;  %v7522_v2 = vadd.f32 %v7323_v14, %v1947_v31  ;;  %p5836_p13 = por %p5835_p9, %p5834_p7 }
 0x242   : > { %10508 = vst [vmem:[#allocation91_spill] sm:$0xff] %v7438_v11  ;;  %10510 = vst [vmem:[#allocation93_spill] sm:$0xff] %v7454_v7  ;;  %v1949_v60 = vadd.f32 %v7393_v50, %v10522_v18 }
 0x243   : > { %v7399_v24 = vpop.permute.xlu1 %1827  ;;  %2398 = vrot.lane.b32.xlu0 %v7390_v63, %s5967_s2  ;;  %10512 = vst [vmem:[#allocation95_spill] sm:$0xff] %v7470_v30  ;;  %10514 = vst [vmem:[#allocation97_spill] sm:$0xff] %v7486_v35  ;;  %v7527_v25 = vadd.f32 %v10520_v44, %v1948_v23  ;;  %v10530_v23 = vld [vmem:[#allocation65_spill] sm:$0xff]  ;;  %p5837_p1 = pnand %p5836_p13, %p5830_p5 }
 0x244   : > { %10516 = vst [vmem:[#allocation99_spill] sm:$0xff] %v7504_v61  ;;  %10517 = vst [vmem:[#allocation100_spill] sm:$0xff] %v7511_v43  ;;  %v1950_v49 = vadd.f32 %v7399_v24, %v10523_v58 }
 0x245   : > { %2400 = vrot.lane.b32.xlu1 %v7396_v6, %s5967_s2  ;;  %v7409_v26 = vpop.permute.xlu0 %1829  ;;  %10519 = vst [vmem:[#allocation60_spill] sm:$0xff] %v7522_v2  ;;  %10521 = vst [vmem:[#allocation82_spill] sm:$0xff] %v7527_v25 }
 0x246   : > { %v1951_v54 = vadd.f32 %v7409_v26, %v10526_v9  ;;  %v10531_v26 = vld [vmem:[#allocation66_spill] sm:$0xff] }
 0x247   : > { %v7415_v55 = vpop.permute.xlu1 %1831  ;;  %2402 = vrot.lane.b32.xlu0 %v7406_v34, %s5967_s2 }
 0x248   : > { %v1952_v33 = vadd.f32 %v7415_v55, %v10527_v52 }
 0x249   : > { %2404 = vrot.lane.b32.xlu1 %v7412_v32, %s5967_s2  ;;  %v7425_v28 = vpop.permute.xlu0 %1833 }
 0x24a   : > { %v1953_v44 = vadd.f32 %v7425_v28, %v10530_v23  ;;  %v10535_v28 = vld [vmem:[#allocation68_spill] sm:$0xff] }
 0x24b   : > { %v7431_v42 = vpop.permute.xlu1 %1835  ;;  %2406 = vrot.lane.b32.xlu0 %v7422_v0, %s5967_s2 }
 0x24c   : > { %v1954_v18 = vadd.f32 %v7431_v42, %v10531_v26 }
 0x24d   : > { %2408 = vrot.lane.b32.xlu1 %v7428_v51, %s5967_s2  ;;  %v7441_v48 = vpop.permute.xlu0 %1837 }
 0x24f   : > { %v7447_v13 = vpop.permute.xlu1 %1839  ;;  %2410 = vrot.lane.b32.xlu0 %v7438_v11, %s5967_s2 }
 0x250   : > { %v1956_v9 = vadd.f32 %v7447_v13, %v10535_v28 }
 0x251   : > { %2412 = vrot.lane.b32.xlu1 %v7444_v1, %s5967_s2  ;;  %v7457_v40 = vpop.permute.xlu0 %1841 }
 0x253   : > { %v7463_v12 = vpop.permute.xlu1 %1843  ;;  %2414 = vrot.lane.b32.xlu0 %v7454_v7, %s5967_s2 }
 0x255   : > { %2416 = vrot.lane.b32.xlu1 %v7460_v5, %s5967_s2  ;;  %v7473_v29 = vpop.permute.xlu0 %1845 }
 0x257   : > { %v7479_v10 = vpop.permute.xlu1 %1847  ;;  %2418 = vrot.lane.b32.xlu0 %v7470_v30, %s5967_s2 }
 0x259   : > { %2420 = vrot.lane.b32.xlu1 %v7476_v27, %s5967_s2  ;;  %v7490_v59 = vpop.permute.xlu0 %1849 }
 0x25b   : > { %v7497_v4 = vpop.permute.xlu1 %1851  ;;  %2422 = vrot.lane.b32.xlu0 %v7486_v35, %s5967_s2 }
 0x25d   : > { %2424 = vrot.lane.b32.xlu1 %v7493_v37, %s5967_s2  ;;  %v7508_v62 = vpop.permute.xlu0 %1853 }
 0x25f   : > { %v7515_v17 = vpop.permute.xlu1 %1855  ;;  %2426 = vrot.lane.b32.xlu0 %v7504_v61, %s5967_s2 }
 0x261   : > { %2428 = vrot.lane.b32.xlu1 %v7511_v43, %s5967_s2  ;;  %v7524_v53 = vpop.permute.xlu0 %1857 }
 0x263   : > { %v7529_v8 = vpop.permute.xlu1 %1859  ;;  %2430 = vrot.lane.b32.xlu0 %v7522_v2, %s5967_s2 }
 0x265   : > { %2432 = vrot.lane.b32.xlu1 %v7527_v25, %s5967_s2  ;;  %v7535_v46 = vpop.permute.xlu0 %1861 }
 0x267   : > { %v7537_v16 = vpop.permute.xlu1 %1863 }
 0x269   : > { %v7539_v41 = vpop.permute.xlu0 %1865 }
 0x26b   : > { %v7541_v14 = vpop.permute.xlu1 %1867 }
 0x26d   : > { %v7543_v39 = vpop.permute.xlu0 %1869 }
 0x26f   : > { %v7545_v56 = vpop.permute.xlu1 %1871 }
 0x271   : > { %v7547_v21 = vpop.permute.xlu0 %1873 }
 0x273   : > { %v7549_v22 = vpop.permute.xlu1 %1875 }
 0x275   : > { %v7551_v38 = vpop.permute.xlu0 %1877 }
 0x277   : > { %v7553_v20 = vpop.permute.xlu1 %1879 }
 0x279   : > { %v2018_v45 = vpop.permute.xlu0 %2017 }
 0x27a   : > { %v7559_v47 = vadd.f32 %v2018_v45, %v1949_v60  ;;  %v10534_v45 = vld [vmem:[#allocation67_spill] sm:$0xff] }
 0x27b   : > { %v2020_v19 = vpop.permute.xlu1 %2019 }
 0x27c   : > { %10524 = vst [vmem:[#allocation61_spill] sm:$0xff] %v7559_v47  ;;  %v7561_v15 = vadd.f32 %v2020_v19, %v1950_v49  ;;  %2434 = vrot.lane.b32.xlu0 %v7559_v47, %s5967_s2  ;;  %v1955_v19 = vadd.f32 %v7441_v48, %v10534_v45  ;;  %v10539_v48 = vld [vmem:[#allocation70_spill] sm:$0xff] }
 0x27d   : > { %v2022_v50 = vpop.permute.xlu0 %2021  ;;  %v1958_v23 = vadd.f32 %v7463_v12, %v10539_v48 }
 0x27e   : > { %10525 = vst [vmem:[#allocation62_spill] sm:$0xff] %v7561_v15  ;;  %2436 = vrot.lane.b32.xlu1 %v7561_v15, %s5967_s2  ;;  %v7571_v31 = vadd.f32 %v2022_v50, %v1951_v54  ;;  %v10538_v50 = vld [vmem:[#allocation69_spill] sm:$0xff] }
 0x27f   : > { %v2024_v24 = vpop.permute.xlu1 %2023 }
 0x280   : > { %10528 = vst [vmem:[#allocation63_spill] sm:$0xff] %v7571_v31  ;;  %v7573_v3 = vadd.f32 %v2024_v24, %v1952_v33  ;;  %2438 = vrot.lane.b32.xlu0 %v7571_v31, %s5967_s2  ;;  %v1957_v24 = vadd.f32 %v7457_v40, %v10538_v50  ;;  %v10543_v40 = vld [vmem:[#allocation53_spill] sm:$0xff] }
 0x281   : > { %v2026_v55 = vpop.permute.xlu0 %2025  ;;  %v1960_v45 = vadd.f32 %v7479_v10, %v10543_v40 }
 0x282   : > { %10529 = vst [vmem:[#allocation64_spill] sm:$0xff] %v7573_v3  ;;  %2440 = vrot.lane.b32.xlu1 %v7573_v3, %s5967_s2  ;;  %v7583_v58 = vadd.f32 %v2026_v55, %v1953_v44  ;;  %v10542_v55 = vld [vmem:[#allocation54_spill] sm:$0xff] }
 0x283   : > { %v2028_v60 = vpop.permute.xlu1 %2027 }
 0x284   : > { %10532 = vst [vmem:[#allocation65_spill] sm:$0xff] %v7583_v58  ;;  %v7585_v49 = vadd.f32 %v2028_v60, %v1954_v18  ;;  %2442 = vrot.lane.b32.xlu0 %v7583_v58, %s5967_s2  ;;  %v1959_v60 = vadd.f32 %v7473_v29, %v10542_v55  ;;  %v10547_v29 = vld [vmem:[#allocation56_spill] sm:$0xff] }
 0x285   : > { %v2030_v42 = vpop.permute.xlu0 %2029  ;;  %v1962_v50 = vadd.f32 %v7497_v4, %v10547_v29 }
 0x286   : > { %10533 = vst [vmem:[#allocation66_spill] sm:$0xff] %v7585_v49  ;;  %2444 = vrot.lane.b32.xlu1 %v7585_v49, %s5967_s2  ;;  %v7595_v52 = vadd.f32 %v2030_v42, %v1955_v19  ;;  %v10546_v42 = vld [vmem:[#allocation55_spill] sm:$0xff] }
 0x287   : > { %v2032_v54 = vpop.permute.xlu1 %2031 }
 0x288   : > { %10536 = vst [vmem:[#allocation67_spill] sm:$0xff] %v7595_v52  ;;  %v7597_v33 = vadd.f32 %v2032_v54, %v1956_v9  ;;  %2446 = vrot.lane.b32.xlu0 %v7595_v52, %s5967_s2  ;;  %v1961_v54 = vadd.f32 %v7490_v59, %v10546_v42  ;;  %v10551_v59 = vld [vmem:[#allocation71_spill] sm:$0xff] }
 0x289   : > { %v2034_v13 = vpop.permute.xlu0 %2033  ;;  %v1964_v55 = vadd.f32 %v7515_v17, %v10551_v59 }
 0x28a   : > { %10537 = vst [vmem:[#allocation68_spill] sm:$0xff] %v7597_v33  ;;  %2448 = vrot.lane.b32.xlu1 %v7597_v33, %s5967_s2  ;;  %v7607_v26 = vadd.f32 %v2034_v13, %v1957_v24  ;;  %v10550_v13 = vld [vmem:[#allocation57_spill] sm:$0xff] }
 0x28b   : > { %v2036_v44 = vpop.permute.xlu1 %2035 }
 0x28c   : > { %10540 = vst [vmem:[#allocation69_spill] sm:$0xff] %v7607_v26  ;;  %v7609_v18 = vadd.f32 %v2036_v44, %v1958_v23  ;;  %2450 = vrot.lane.b32.xlu0 %v7607_v26, %s5967_s2  ;;  %v1963_v44 = vadd.f32 %v7508_v62, %v10550_v13  ;;  %v10555_v62 = vld [vmem:[#allocation58_spill] sm:$0xff] }
 0x28d   : > { %v2038_v12 = vpop.permute.xlu0 %2037  ;;  %v1966_v42 = vadd.f32 %v7529_v8, %v10555_v62 }
 0x28e   : > { %10541 = vst [vmem:[#allocation70_spill] sm:$0xff] %v7609_v18  ;;  %2452 = vrot.lane.b32.xlu1 %v7609_v18, %s5967_s2  ;;  %v7619_v28 = vadd.f32 %v2038_v12, %v1959_v60  ;;  %v10554_v12 = vld [vmem:[#allocation72_spill] sm:$0xff] }
 0x28f   : > { %v2040_v19 = vpop.permute.xlu1 %2039 }
 0x290   : > { %10544 = vst [vmem:[#allocation54_spill] sm:$0xff] %v7619_v28  ;;  %v7621_v9 = vadd.f32 %v2040_v19, %v1960_v45  ;;  %2454 = vrot.lane.b32.xlu0 %v7619_v28, %s5967_s2  ;;  %v1965_v19 = vadd.f32 %v7524_v53, %v10554_v12  ;;  %v10559_v53 = vld [vmem:[#allocation73_spill] sm:$0xff] }
 0x291   : > { %v2042_v10 = vpop.permute.xlu0 %2041  ;;  %v1968_v13 = vadd.f32 %v7537_v16, %v10559_v53 }
 0x292   : > { %10545 = vst [vmem:[#allocation53_spill] sm:$0xff] %v7621_v9  ;;  %2456 = vrot.lane.b32.xlu1 %v7621_v9, %s5967_s2  ;;  %v7631_v48 = vadd.f32 %v2042_v10, %v1961_v54  ;;  %v10558_v10 = vld [vmem:[#allocation59_spill] sm:$0xff] }
 0x293   : > { %v2044_v24 = vpop.permute.xlu1 %2043 }
 0x294   : > { %10548 = vst [vmem:[#allocation55_spill] sm:$0xff] %v7631_v48  ;;  %v7633_v23 = vadd.f32 %v2044_v24, %v1962_v50  ;;  %2458 = vrot.lane.b32.xlu0 %v7631_v48, %s5967_s2  ;;  %v1967_v24 = vadd.f32 %v7535_v46, %v10558_v10  ;;  %v10563_v46 = vld [vmem:[#allocation75_spill] sm:$0xff] }
 0x295   : > { %v2046_v4 = vpop.permute.xlu0 %2045  ;;  %v1970_v12 = vadd.f32 %v7541_v14, %v10563_v46 }
 0x296   : > { %10549 = vst [vmem:[#allocation56_spill] sm:$0xff] %v7633_v23  ;;  %2460 = vrot.lane.b32.xlu1 %v7633_v23, %s5967_s2  ;;  %v7643_v40 = vadd.f32 %v2046_v4, %v1963_v44  ;;  %v10562_v4 = vld [vmem:[#allocation74_spill] sm:$0xff] }
 0x297   : > { %v2048_v60 = vpop.permute.xlu1 %2047 }
 0x298   : > { %10552 = vst [vmem:[#allocation57_spill] sm:$0xff] %v7643_v40  ;;  %v7645_v45 = vadd.f32 %v2048_v60, %v1964_v55  ;;  %2462 = vrot.lane.b32.xlu0 %v7643_v40, %s5967_s2  ;;  %v1969_v60 = vadd.f32 %v7539_v41, %v10562_v4  ;;  %v10567_v41 = vld [vmem:[#allocation77_spill] sm:$0xff] }
 0x299   : > { %v2050_v17 = vpop.permute.xlu0 %2049  ;;  %v1972_v10 = vadd.f32 %v7545_v56, %v10567_v41 }
 0x29a   : > { %10553 = vst [vmem:[#allocation71_spill] sm:$0xff] %v7645_v45  ;;  %2464 = vrot.lane.b32.xlu1 %v7645_v45, %s5967_s2  ;;  %v7655_v29 = vadd.f32 %v2050_v17, %v1965_v19  ;;  %v10566_v17 = vld [vmem:[#allocation76_spill] sm:$0xff] }
 0x29b   : > { %v2052_v54 = vpop.permute.xlu1 %2051 }
 0x29c   : > { %10556 = vst [vmem:[#allocation72_spill] sm:$0xff] %v7655_v29  ;;  %v7657_v50 = vadd.f32 %v2052_v54, %v1966_v42  ;;  %2466 = vrot.lane.b32.xlu0 %v7655_v29, %s5967_s2  ;;  %v1971_v54 = vadd.f32 %v7543_v39, %v10566_v17  ;;  %v10571_v39 = vld [vmem:[#allocation79_spill] sm:$0xff] }
 0x29d   : > { %v2054_v8 = vpop.permute.xlu0 %2053  ;;  %v1974_v4 = vadd.f32 %v7549_v22, %v10571_v39 }
 0x29e   : > { %10557 = vst [vmem:[#allocation58_spill] sm:$0xff] %v7657_v50  ;;  %2468 = vrot.lane.b32.xlu1 %v7657_v50, %s5967_s2  ;;  %v7667_v59 = vadd.f32 %v2054_v8, %v1967_v24  ;;  %v10570_v8 = vld [vmem:[#allocation78_spill] sm:$0xff] }
 0x29f   : > { %v2056_v44 = vpop.permute.xlu1 %2055 }
 0x2a0   : > { %10560 = vst [vmem:[#allocation59_spill] sm:$0xff] %v7667_v59  ;;  %v7669_v55 = vadd.f32 %v2056_v44, %v1968_v13  ;;  %2470 = vrot.lane.b32.xlu0 %v7667_v59, %s5967_s2  ;;  %v1973_v44 = vadd.f32 %v7547_v21, %v10570_v8  ;;  %v10575_v21 = vld [vmem:[#allocation81_spill] sm:$0xff] }
 0x2a1   : > { %v2058_v16 = vpop.permute.xlu0 %2057  ;;  %v1976_v17 = vadd.f32 %v7553_v20, %v10575_v21 }
 0x2a2   : > { %10561 = vst [vmem:[#allocation73_spill] sm:$0xff] %v7669_v55  ;;  %2472 = vrot.lane.b32.xlu1 %v7669_v55, %s5967_s2  ;;  %v7679_v62 = vadd.f32 %v2058_v16, %v1969_v60  ;;  %v10574_v16 = vld [vmem:[#allocation80_spill] sm:$0xff] }
 0x2a3   : > { %v2060_v19 = vpop.permute.xlu1 %2059 }
 0x2a4   : > { %10564 = vst [vmem:[#allocation74_spill] sm:$0xff] %v7679_v62  ;;  %v7681_v42 = vadd.f32 %v2060_v19, %v1970_v12  ;;  %2474 = vrot.lane.b32.xlu0 %v7679_v62, %s5967_s2  ;;  %v1975_v19 = vadd.f32 %v7551_v38, %v10574_v16 }
 0x2a5   : > { %v2062_v14 = vpop.permute.xlu0 %2061 }
 0x2a6   : > { %10565 = vst [vmem:[#allocation75_spill] sm:$0xff] %v7681_v42  ;;  %2476 = vrot.lane.b32.xlu1 %v7681_v42, %s5967_s2  ;;  %v7691_v53 = vadd.f32 %v2062_v14, %v1971_v54 }
 0x2a7   : > { %v2064_v24 = vpop.permute.xlu1 %2063 }
 0x2a8   : > { %10568 = vst [vmem:[#allocation76_spill] sm:$0xff] %v7691_v53  ;;  %v7693_v13 = vadd.f32 %v2064_v24, %v1972_v10  ;;  %2478 = vrot.lane.b32.xlu0 %v7691_v53, %s5967_s2 }
 0x2a9   : > { %v2066_v56 = vpop.permute.xlu0 %2065 }
 0x2aa   : > { %10569 = vst [vmem:[#allocation77_spill] sm:$0xff] %v7693_v13  ;;  %2480 = vrot.lane.b32.xlu1 %v7693_v13, %s5967_s2  ;;  %v7703_v46 = vadd.f32 %v2066_v56, %v1973_v44 }
 0x2ab   : > { %v2068_v60 = vpop.permute.xlu1 %2067 }
 0x2ac   : > { %10572 = vst [vmem:[#allocation78_spill] sm:$0xff] %v7703_v46  ;;  %v7705_v12 = vadd.f32 %v2068_v60, %v1974_v4  ;;  %2482 = vrot.lane.b32.xlu0 %v7703_v46, %s5967_s2 }
 0x2ad   : > { %v2070_v22 = vpop.permute.xlu0 %2069 }
 0x2ae   : > { %10573 = vst [vmem:[#allocation79_spill] sm:$0xff] %v7705_v12  ;;  %2484 = vrot.lane.b32.xlu1 %v7705_v12, %s5967_s2  ;;  %v7715_v41 = vadd.f32 %v2070_v22, %v1975_v19 }
 0x2af   : > { %v2072_v54 = vpop.permute.xlu1 %2071 }
 0x2b0   : > { %10576 = vst [vmem:[#allocation80_spill] sm:$0xff] %v7715_v41  ;;  %v7717_v10 = vadd.f32 %v2072_v54, %v1976_v17  ;;  %2486 = vrot.lane.b32.xlu0 %v7715_v41, %s5967_s2 }
 0x2b1   : > { %v2395_v38 = vpop.permute.xlu0 %2394 }
 0x2b2   : > { %10577 = vst [vmem:[#allocation81_spill] sm:$0xff] %v7717_v10  ;;  %2488 = vrot.lane.b32.xlu1 %v7717_v10, %s5967_s2  ;;  %v7724_v24 = vadd.f32 %v2395_v38, %v7374_v36 }
 0x2b3   : > { %v2397_v14 = vpop.permute.xlu1 %2396 }
 0x2b4   : > { %v7727_v20 = vadd.f32 %v2397_v14, %v7380_v57  ;;  %v3500_v8 = vrot.slane %v7724_v24, 2 }
 0x2b5   : > { %v2399_v39 = vpop.permute.xlu0 %2398 }
 0x2b6   : > { %v3501_v44 = vrot.slane %v7727_v20, 2  ;;  %v7732_v56 = vadd.f32 %v2399_v39, %v7390_v63 }
 0x2b7   : > { %v2401_v4 = vpop.permute.xlu1 %2400 }
 0x2b8   : > { %v3502_v60 = vsel %vm2217_vm2, %v3500_v8, %v3501_v44  ;;  %v7737_v19 = vadd.f32 %v2401_v4, %v7396_v6  ;;  %v10292_v21 = vrot.slane %v7732_v56, 1  ;;  %v3503_v17 = vrot.slane %v7732_v56, 2 }
 0x2b9   : > { %v3628_v16 = vadd.f32 %v3502_v60, %v7724_v24  ;;  %v2403_v22 = vpop.permute.xlu0 %2402 }
 0x2ba   : > { %v3630_v54 = vadd.f32 %v3503_v17, %v7732_v56  ;;  %v7743_v14 = vadd.f32 %v2403_v22, %v7406_v34  ;;  %2719 = vrot.lane.b32.xlu0 %v10292_v21, %s5968_s4  ;;  %v3504_v39 = vsel %vm2217_vm2, %v3501_v44, %v3503_v17  ;;  %v3505_v4 = vrot.slane %v7737_v19, 2 }
 0x2bb   : > { %v2405_v38 = vpop.permute.xlu1 %2404  ;;  %v3629_v6 = vadd.f32 %v3504_v39, %v7727_v20  ;;  %v4045_v36 = vrot.slane %v3628_v16, 1 }
 0x2bc   : > { %v7749_v8 = vadd.f32 %v2405_v38, %v7412_v32  ;;  %v3506_v60 = vrot.slane %v7743_v14, 2  ;;  %v4048_v57 = vrot.slane %v3630_v54, 1 }
 0x2bd   : > { %v2407_v63 = vpop.permute.xlu0 %2406  ;;  %v4046_v38 = vrot.slane %v3629_v6, 1 }
 0x2be   : > { %v10299_v22 = vrot.slane %v7749_v8, 1  ;;  %v3508_v34 = vrot.slane %v7749_v8, 2  ;;  %v7758_v21 = vadd.f32 %v2407_v63, %v7422_v0  ;;  %v3507_v44 = vsel %vm2217_vm2, %v3505_v4, %v3506_v60 }
 0x2bf   : > { %v2409_v10 = vpop.permute.xlu1 %2408  ;;  %v7772_v6 = vsel %vm2634_vm3, %v4045_v36, %v4046_v38 }
 0x2c0   : > { %v3633_v17 = vadd.f32 %v3508_v34, %v7749_v8  ;;  %v3509_v32 = vsel %vm2217_vm2, %v3506_v60, %v3508_v34  ;;  %v7764_v39 = vadd.f32 %v2409_v10, %v7428_v51  ;;  %2725 = vrot.lane.b32.xlu1 %v10299_v22, %s5968_s4  ;;  %v3510_v63 = vrot.slane %v7758_v21, 2  ;;  %10578 = vst [vmem:[#allocation101_spill] sm:$0xff] %v7772_v6 }
 0x2c1   : > { %v3632_v16 = vadd.f32 %v3509_v32, %v7743_v14  ;;  %v2411_v0 = vpop.permute.xlu0 %2410  ;;  %v7776_v34 = vsel %vm2634_vm3, %v4046_v38, %v4048_v57  ;;  %v3631_v22 = vadd.f32 %v3507_v44, %v7737_v19 }
 0x2c2   : > { %v4053_v54 = vrot.slane %v3633_v17, 1  ;;  %v3511_v4 = vrot.slane %v7764_v39, 2  ;;  %10579 = vst [vmem:[#allocation102_spill] sm:$0xff] %v7776_v34  ;;  %v7779_v51 = vadd.f32 %v2411_v0, %v7438_v11 }
 0x2c3   : > { %v4051_v10 = vrot.slane %v3632_v16, 1  ;;  %v2413_v60 = vpop.permute.xlu1 %2412  ;;  %v4050_v57 = vrot.slane %v3631_v22, 1 }
 0x2c4   : > { %v3512_v32 = vsel %vm2217_vm2, %v3510_v63, %v3511_v4  ;;  %v7784_v41 = vadd.f32 %v2413_v60, %v7444_v1  ;;  %v10306_v17 = vrot.slane %v7779_v51, 1  ;;  %v3513_v6 = vrot.slane %v7779_v51, 2 }
 0x2c5   : > { %v3634_v36 = vadd.f32 %v3512_v32, %v7758_v21  ;;  %v2415_v38 = vpop.permute.xlu0 %2414  ;;  %v7790_v16 = vsel %vm2634_vm3, %v4051_v10, %v4053_v54  ;;  %v7803_v60 = vsel %vm2634_vm3, %v4050_v57, %v4051_v10 }
 0x2c6   : > { %10580 = vst [vmem:[#allocation103_spill] sm:$0xff] %v7790_v16  ;;  %v3636_v0 = vadd.f32 %v3513_v6, %v7779_v51  ;;  %v7794_v44 = vadd.f32 %v2415_v38, %v7454_v7  ;;  %2731 = vrot.lane.b32.xlu0 %v10306_v17, %s5968_s4  ;;  %10581 = vst [vmem:[#allocation104_spill] sm:$0xff] %v7803_v60  ;;  %v3514_v22 = vsel %vm2217_vm2, %v3511_v4, %v3513_v6 }
 0x2c7   : > { %v2417_v34 = vpop.permute.xlu1 %2416  ;;  %v3515_v54 = vrot.slane %v7784_v41, 2  ;;  %v3635_v16 = vadd.f32 %v3514_v22, %v7764_v39  ;;  %v4055_v11 = vrot.slane %v3634_v36, 1 }
 0x2c8   : > { %v7800_v63 = vadd.f32 %v2417_v34, %v7460_v5  ;;  %v3516_v32 = vrot.slane %v7794_v44, 2  ;;  %v4058_v38 = vrot.slane %v3636_v0, 1 }
 0x2c9   : > { %v2419_v17 = vpop.permute.xlu0 %2418  ;;  %v4056_v10 = vrot.slane %v3635_v16, 1 }
 0x2ca   : > { %v10313_v1 = vrot.slane %v7800_v63, 1  ;;  %v3518_v7 = vrot.slane %v7800_v63, 2  ;;  %v7812_v5 = vadd.f32 %v2419_v17, %v7470_v30  ;;  %v3517_v6 = vsel %vm2217_vm2, %v3515_v54, %v3516_v32 }
 0x2cb   : > { %v2421_v34 = vpop.permute.xlu1 %2420  ;;  %v7826_v17 = vsel %vm2634_vm3, %v4055_v11, %v4056_v10 }
 0x2cc   : > { %v3639_v4 = vadd.f32 %v3518_v7, %v7800_v63  ;;  %v3519_v57 = vsel %vm2217_vm2, %v3516_v32, %v3518_v7  ;;  %v7818_v22 = vadd.f32 %v2421_v34, %v7476_v27  ;;  %2737 = vrot.lane.b32.xlu1 %v10313_v1, %s5968_s4  ;;  %v3520_v0 = vrot.slane %v7812_v5, 2  ;;  %10582 = vst [vmem:[#allocation105_spill] sm:$0xff] %v7826_v17 }
 0x2cd   : > { %v3638_v36 = vadd.f32 %v3519_v57, %v7794_v44  ;;  %v2423_v60 = vpop.permute.xlu0 %2422  ;;  %v7830_v7 = vsel %vm2634_vm3, %v4056_v10, %v4058_v38  ;;  %v3637_v1 = vadd.f32 %v3517_v6, %v7784_v41 }
 0x2ce   : > { %v4063_v16 = vrot.slane %v3639_v4, 1  ;;  %v3521_v54 = vrot.slane %v7818_v22, 2  ;;  %10583 = vst [vmem:[#allocation106_spill] sm:$0xff] %v7830_v7  ;;  %v7833_v27 = vadd.f32 %v2423_v60, %v7486_v35 }
 0x2cf   : > { %v4061_v32 = vrot.slane %v3638_v36, 1  ;;  %v2425_v34 = vpop.permute.xlu1 %2424  ;;  %v4060_v38 = vrot.slane %v3637_v1, 1 }
 0x2d0   : > { %v3522_v57 = vsel %vm2217_vm2, %v3520_v0, %v3521_v54  ;;  %v7838_v30 = vadd.f32 %v2425_v34, %v7493_v37  ;;  %v10320_v4 = vrot.slane %v7833_v27, 1  ;;  %v3523_v17 = vrot.slane %v7833_v27, 2 }
 0x2d1   : > { %v3640_v11 = vadd.f32 %v3522_v57, %v7812_v5  ;;  %v2427_v10 = vpop.permute.xlu0 %2426  ;;  %v7844_v36 = vsel %vm2634_vm3, %v4061_v32, %v4063_v16  ;;  %v7857_v34 = vsel %vm2634_vm3, %v4060_v38, %v4061_v32 }
 0x2d2   : > { %10584 = vst [vmem:[#allocation107_spill] sm:$0xff] %v7844_v36  ;;  %v3642_v60 = vadd.f32 %v3523_v17, %v7833_v27  ;;  %v7848_v6 = vadd.f32 %v2427_v10, %v7504_v61  ;;  %2743 = vrot.lane.b32.xlu0 %v10320_v4, %s5968_s4  ;;  %10585 = vst [vmem:[#allocation108_spill] sm:$0xff] %v7857_v34  ;;  %v3524_v1 = vsel %vm2217_vm2, %v3521_v54, %v3523_v17 }
 0x2d3   : > { %v2429_v7 = vpop.permute.xlu1 %2428  ;;  %v3525_v16 = vrot.slane %v7838_v30, 2  ;;  %v3641_v36 = vadd.f32 %v3524_v1, %v7818_v22  ;;  %v4065_v35 = vrot.slane %v3640_v11, 1 }
 0x2d4   : > { %v7854_v0 = vadd.f32 %v2429_v7, %v7511_v43  ;;  %v3526_v57 = vrot.slane %v7848_v6, 2  ;;  %v4068_v10 = vrot.slane %v3642_v60, 1 }
 0x2d5   : > { %v2431_v4 = vpop.permute.xlu0 %2430  ;;  %v4066_v32 = vrot.slane %v3641_v36, 1 }
 0x2d6   : > { %v10325_v37 = vrot.slane %v7854_v0, 1  ;;  %v3528_v61 = vrot.slane %v7854_v0, 2  ;;  %v7866_v43 = vadd.f32 %v2431_v4, %v7522_v2  ;;  %v3527_v17 = vsel %vm2217_vm2, %v3525_v16, %v3526_v57 }
 0x2d7   : > { %v2433_v7 = vpop.permute.xlu1 %2432  ;;  %v7880_v4 = vsel %vm2634_vm3, %v4065_v35, %v4066_v32  ;;  %v7884_v34 = vsel %vm2634_vm3, %v4066_v32, %v4068_v10 }
 0x2d8   : > { %v3645_v54 = vadd.f32 %v3528_v61, %v7854_v0  ;;  %v3529_v38 = vsel %vm2217_vm2, %v3526_v57, %v3528_v61  ;;  %v7872_v1 = vadd.f32 %v2433_v7, %v7527_v25  ;;  %2749 = vrot.lane.b32.xlu1 %v10325_v37, %s5968_s4  ;;  %v3530_v60 = vrot.slane %v7866_v43, 2  ;;  %10586 = vst [vmem:[#allocation109_spill] sm:$0xff] %v7880_v4 }
 0x2d9   : > { %v3644_v11 = vadd.f32 %v3529_v38, %v7848_v6  ;;  %10587 = vst [vmem:[#allocation110_spill] sm:$0xff] %v7884_v34  ;;  %v3643_v57 = vadd.f32 %v3527_v17, %v7838_v30 }
 0x2da   : > { %v4073_v36 = vrot.slane %v3645_v54, 1  ;;  %v3531_v16 = vrot.slane %v7872_v1, 2 }
 0x2db   : > { %v4071_v61 = vrot.slane %v3644_v11, 1  ;;  %v4070_v25 = vrot.slane %v3643_v57, 1 }
 0x2dc   : > { %v3532_v7 = vsel %vm2217_vm2, %v3530_v60, %v3531_v16 }
 0x2dd   : > { %v3646_v37 = vadd.f32 %v3532_v7, %v7866_v43  ;;  %v7890_v38 = vsel %vm2634_vm3, %v4071_v61, %v4073_v36  ;;  %v7893_v35 = vsel %vm2634_vm3, %v4070_v25, %v4071_v61 }
 0x2de   : > { %10588 = vst [vmem:[#allocation111_spill] sm:$0xff] %v7890_v38  ;;  %10589 = vst [vmem:[#allocation112_spill] sm:$0xff] %v7893_v35 }
 0x2ee   : > { %v2435_v54 = vpop.permute.xlu0 %2434 }
 0x2ef   : > { %v7896_v2 = vadd.f32 %v2435_v54, %v7559_v47 }
 0x2f0   : > { %v2437_v4 = vpop.permute.xlu1 %2436 }
 0x2f1   : > { %v7899_v10 = vadd.f32 %v2437_v4, %v7561_v15  ;;  %v10334_v32 = vrot.slane %v7896_v2, 1  ;;  %v3533_v17 = vrot.slane %v7896_v2, 2 }
 0x2f2   : > { %v2439_v11 = vpop.permute.xlu0 %2438 }
 0x2f3   : > { %v3648_v60 = vadd.f32 %v3533_v17, %v7896_v2  ;;  %v7905_v57 = vadd.f32 %v2439_v11, %v7571_v31  ;;  %2755 = vrot.lane.b32.xlu0 %v10334_v32, %s5968_s4  ;;  %v3534_v25 = vsel %vm2217_vm2, %v3531_v16, %v3533_v17  ;;  %v3535_v7 = vrot.slane %v7899_v10, 2 }
 0x2f4   : > { %v2441_v36 = vpop.permute.xlu1 %2440  ;;  %v3647_v61 = vadd.f32 %v3534_v25, %v7872_v1  ;;  %v4075_v31 = vrot.slane %v3646_v37, 1 }
 0x2f5   : > { %v7912_v4 = vadd.f32 %v2441_v36, %v7573_v3  ;;  %v3536_v54 = vrot.slane %v7905_v57, 2  ;;  %v4078_v38 = vrot.slane %v3648_v60, 1 }
 0x2f6   : > { %v2443_v34 = vpop.permute.xlu0 %2442  ;;  %v4076_v15 = vrot.slane %v3647_v61, 1 }
 0x2f7   : > { %v10341_v35 = vrot.slane %v7912_v4, 1  ;;  %v3538_v11 = vrot.slane %v7912_v4, 2  ;;  %v7920_v16 = vadd.f32 %v2443_v34, %v7583_v58  ;;  %v3537_v17 = vsel %vm2217_vm2, %v3535_v7, %v3536_v54 }
 0x2f8   : > { %v2445_v32 = vpop.permute.xlu1 %2444  ;;  %v7934_v34 = vsel %vm2634_vm3, %v4075_v31, %v4076_v15 }
 0x2f9   : > { %v3651_v36 = vadd.f32 %v3538_v11, %v7912_v4  ;;  %v3539_v25 = vsel %vm2217_vm2, %v3536_v54, %v3538_v11  ;;  %v7926_v3 = vadd.f32 %v2445_v32, %v7585_v49  ;;  %2761 = vrot.lane.b32.xlu1 %v10341_v35, %s5968_s4  ;;  %v3540_v37 = vrot.slane %v7920_v16, 2  ;;  %10590 = vst [vmem:[#allocation113_spill] sm:$0xff] %v7934_v34 }
 0x2fa   : > { %v3650_v60 = vadd.f32 %v3539_v25, %v7905_v57  ;;  %v2447_v58 = vpop.permute.xlu0 %2446  ;;  %v7938_v54 = vsel %vm2634_vm3, %v4076_v15, %v4078_v38  ;;  %v3649_v35 = vadd.f32 %v3537_v17, %v7899_v10 }
 0x2fb   : > { %v4083_v61 = vrot.slane %v3651_v36, 1  ;;  %v3541_v7 = vrot.slane %v7926_v3, 2  ;;  %10591 = vst [vmem:[#allocation114_spill] sm:$0xff] %v7938_v54  ;;  %v7941_v49 = vadd.f32 %v2447_v58, %v7595_v52 }
 0x2fc   : > { %v4081_v32 = vrot.slane %v3650_v60, 1  ;;  %v2449_v11 = vpop.permute.xlu1 %2448  ;;  %v4080_v15 = vrot.slane %v3649_v35, 1 }
 0x2fd   : > { %v3542_v25 = vsel %vm2217_vm2, %v3540_v37, %v3541_v7  ;;  %v7946_v47 = vadd.f32 %v2449_v11, %v7597_v33  ;;  %v10348_v36 = vrot.slane %v7941_v49, 1  ;;  %v3543_v34 = vrot.slane %v7941_v49, 2 }
 0x2fe   : > { %v3652_v31 = vadd.f32 %v3542_v25, %v7920_v16  ;;  %v2451_v38 = vpop.permute.xlu0 %2450  ;;  %v7952_v60 = vsel %vm2634_vm3, %v4081_v32, %v4083_v61  ;;  %v7965_v11 = vsel %vm2634_vm3, %v4080_v15, %v4081_v32 }
 0x2ff   : > { %10592 = vst [vmem:[#allocation115_spill] sm:$0xff] %v7952_v60  ;;  %v3654_v58 = vadd.f32 %v3543_v34, %v7941_v49  ;;  %v7956_v17 = vadd.f32 %v2451_v38, %v7607_v26  ;;  %2767 = vrot.lane.b32.xlu0 %v10348_v36, %s5968_s4  ;;  %10593 = vst [vmem:[#allocation116_spill] sm:$0xff] %v7965_v11  ;;  %v3544_v35 = vsel %vm2217_vm2, %v3541_v7, %v3543_v34 }
 0x300   : > { %v2453_v54 = vpop.permute.xlu1 %2452  ;;  %v3545_v61 = vrot.slane %v7946_v47, 2  ;;  %v3653_v60 = vadd.f32 %v3544_v35, %v7926_v3  ;;  %v4085_v52 = vrot.slane %v3652_v31, 1 }
 0x301   : > { %v7962_v37 = vadd.f32 %v2453_v54, %v7609_v18  ;;  %v3546_v25 = vrot.slane %v7956_v17, 2  ;;  %v4088_v38 = vrot.slane %v3654_v58, 1 }
 0x302   : > { %v2455_v36 = vpop.permute.xlu0 %2454  ;;  %v4086_v32 = vrot.slane %v3653_v60, 1 }
 0x303   : > { %v10355_v33 = vrot.slane %v7962_v37, 1  ;;  %v3548_v26 = vrot.slane %v7962_v37, 2  ;;  %v7974_v18 = vadd.f32 %v2455_v36, %v7619_v28  ;;  %v3547_v34 = vsel %vm2217_vm2, %v3545_v61, %v3546_v25 }
 0x304   : > { %v2457_v54 = vpop.permute.xlu1 %2456  ;;  %v7988_v36 = vsel %vm2634_vm3, %v4085_v52, %v4086_v32 }
 0x305   : > { %v3657_v7 = vadd.f32 %v3548_v26, %v7962_v37  ;;  %v3549_v15 = vsel %vm2217_vm2, %v3546_v25, %v3548_v26  ;;  %v7980_v35 = vadd.f32 %v2457_v54, %v7621_v9  ;;  %2773 = vrot.lane.b32.xlu1 %v10355_v33, %s5968_s4  ;;  %v3550_v58 = vrot.slane %v7974_v18, 2  ;;  %10594 = vst [vmem:[#allocation117_spill] sm:$0xff] %v7988_v36 }
 0x306   : > { %v3656_v31 = vadd.f32 %v3549_v15, %v7956_v17  ;;  %v2459_v11 = vpop.permute.xlu0 %2458  ;;  %v7992_v26 = vsel %vm2634_vm3, %v4086_v32, %v4088_v38  ;;  %v3655_v33 = vadd.f32 %v3547_v34, %v7946_v47 }
 0x307   : > { %v4093_v60 = vrot.slane %v3657_v7, 1  ;;  %v3551_v61 = vrot.slane %v7980_v35, 2  ;;  %10595 = vst [vmem:[#allocation118_spill] sm:$0xff] %v7992_v26  ;;  %v7995_v9 = vadd.f32 %v2459_v11, %v7631_v48 }
 0x308   : > { %v4091_v25 = vrot.slane %v3656_v31, 1  ;;  %v2461_v54 = vpop.permute.xlu1 %2460  ;;  %v4090_v38 = vrot.slane %v3655_v33, 1 }
 0x309   : > { %v3552_v15 = vsel %vm2217_vm2, %v3550_v58, %v3551_v61  ;;  %v8000_v28 = vadd.f32 %v2461_v54, %v7633_v23  ;;  %v10362_v7 = vrot.slane %v7995_v9, 1  ;;  %v3553_v36 = vrot.slane %v7995_v9, 2 }
 0x30a   : > { %v3658_v52 = vadd.f32 %v3552_v15, %v7974_v18  ;;  %v2463_v32 = vpop.permute.xlu0 %2462  ;;  %v8006_v31 = vsel %vm2634_vm3, %v4091_v25, %v4093_v60  ;;  %v8019_v54 = vsel %vm2634_vm3, %v4090_v38, %v4091_v25 }
 0x30b   : > { %10596 = vst [vmem:[#allocation119_spill] sm:$0xff] %v8006_v31  ;;  %v3660_v11 = vadd.f32 %v3553_v36, %v7995_v9  ;;  %v8010_v34 = vadd.f32 %v2463_v32, %v7643_v40  ;;  %2779 = vrot.lane.b32.xlu0 %v10362_v7, %s5968_s4  ;;  %10597 = vst [vmem:[#allocation120_spill] sm:$0xff] %v8019_v54  ;;  %v3554_v33 = vsel %vm2217_vm2, %v3551_v61, %v3553_v36 }
 0x30c   : > { %v2465_v26 = vpop.permute.xlu1 %2464  ;;  %v3555_v60 = vrot.slane %v8000_v28, 2  ;;  %v3659_v31 = vadd.f32 %v3554_v33, %v7980_v35  ;;  %v4095_v48 = vrot.slane %v3658_v52, 1 }
 0x30d   : > { %v8016_v58 = vadd.f32 %v2465_v26, %v7645_v45  ;;  %v3556_v15 = vrot.slane %v8010_v34, 2  ;;  %v4098_v32 = vrot.slane %v3660_v11, 1 }
 0x30e   : > { %v2467_v7 = vpop.permute.xlu0 %2466  ;;  %v4096_v25 = vrot.slane %v3659_v31, 1 }
 0x30f   : > { %v10369_v23 = vrot.slane %v8016_v58, 1  ;;  %v3558_v40 = vrot.slane %v8016_v58, 2  ;;  %v8028_v45 = vadd.f32 %v2467_v7, %v7655_v29  ;;  %v3557_v36 = vsel %vm2217_vm2, %v3555_v60, %v3556_v15 }
 0x310   : > { %v2469_v26 = vpop.permute.xlu1 %2468  ;;  %v8042_v7 = vsel %vm2634_vm3, %v4095_v48, %v4096_v25 }
 0x311   : > { %v3663_v61 = vadd.f32 %v3558_v40, %v8016_v58  ;;  %v3559_v38 = vsel %vm2217_vm2, %v3556_v15, %v3558_v40  ;;  %v8034_v33 = vadd.f32 %v2469_v26, %v7657_v50  ;;  %2785 = vrot.lane.b32.xlu1 %v10369_v23, %s5968_s4  ;;  %v3560_v11 = vrot.slane %v8028_v45, 2  ;;  %10598 = vst [vmem:[#allocation121_spill] sm:$0xff] %v8042_v7 }
 0x312   : > { %v3662_v52 = vadd.f32 %v3559_v38, %v8010_v34  ;;  %v2471_v54 = vpop.permute.xlu0 %2470  ;;  %v8046_v40 = vsel %vm2634_vm3, %v4096_v25, %v4098_v32  ;;  %v3661_v23 = vadd.f32 %v3557_v36, %v8000_v28  ;;  %v2636_v25 = vrot.slane %v7727_v20, 1 }
 0x313   : > { %v4103_v31 = vrot.slane %v3663_v61, 1  ;;  %v3561_v60 = vrot.slane %v8034_v33, 2  ;;  %10599 = vst [vmem:[#allocation122_spill] sm:$0xff] %v8046_v40  ;;  %v8049_v50 = vadd.f32 %v2471_v54, %v7667_v59 }
 0x314   : > { %v4101_v15 = vrot.slane %v3662_v52, 1  ;;  %v2473_v26 = vpop.permute.xlu1 %2472  ;;  %v4100_v32 = vrot.slane %v3661_v23, 1  ;;  %v2635_v52 = vrot.slane %v7724_v24, 1  ;;  %v2641_v23 = vrot.slane %v7743_v14, 1 }
 0x315   : > { %v3562_v38 = vsel %vm2217_vm2, %v3560_v11, %v3561_v60  ;;  %v8054_v29 = vadd.f32 %v2473_v26, %v7669_v55  ;;  %v10376_v61 = vrot.slane %v8049_v50, 1  ;;  %v3563_v7 = vrot.slane %v8049_v50, 2 }
 0x316   : > { %v3664_v48 = vadd.f32 %v3562_v38, %v8028_v45  ;;  %v2475_v54 = vpop.permute.xlu0 %2474  ;;  %v8062_v40 = vsel %vm2634_vm3, %v4101_v15, %v4103_v31  ;;  %v8076_v24 = vsel %vm2634_vm3, %v4100_v32, %v4101_v15 }
 0x317   : > { %10600 = vst [vmem:[#allocation123_spill] sm:$0xff] %v8062_v40  ;;  %v3666_v36 = vadd.f32 %v3563_v7, %v8049_v50  ;;  %v8066_v26 = vadd.f32 %v2475_v54, %v7679_v62  ;;  %2791 = vrot.lane.b32.xlu0 %v10376_v61, %s5968_s4  ;;  %10601 = vst [vmem:[#allocation124_spill] sm:$0xff] %v8076_v24  ;;  %v3564_v31 = vsel %vm2217_vm2, %v3561_v60, %v3563_v7 }
 0x318   : > { %v2477_v11 = vpop.permute.xlu1 %2476  ;;  %v3565_v38 = vrot.slane %v8054_v29, 2  ;;  %v3665_v54 = vadd.f32 %v3564_v31, %v8034_v33 }
 0x319   : > { %v8073_v20 = vadd.f32 %v2477_v11, %v7681_v42  ;;  %v3566_v40 = vrot.slane %v8066_v26, 2  ;;  %v4108_v55 = vrot.slane %v3666_v36, 1  ;;  %v2637_v11 = vsel %vm2634_vm3, %v2635_v52, %v2636_v25 }
 0x31a   : > { %v2479_v14 = vpop.permute.xlu0 %2478  ;;  %v4105_v42 = vrot.slane %v3664_v48, 1  ;;  %v4106_v7 = vrot.slane %v3665_v54, 1  ;;  %v10602_v48 = vrot.slane %v7749_v8, 1 }
 0x31b   : > { %v10381_v62 = vrot.slane %v8073_v20, 1  ;;  %v3568_v61 = vrot.slane %v8073_v20, 2  ;;  %v8086_v15 = vadd.f32 %v2479_v14, %v7691_v53  ;;  %2715 = vrot.lane.b32.xlu0 %v2637_v11, %s5968_s4  ;;  %v3567_v60 = vsel %vm2217_vm2, %v3565_v38, %v3566_v40 }
 0x31c   : > { %v2481_v59 = vpop.permute.xlu1 %2480  ;;  %v2644_v52 = vsel %vm2634_vm3, %v2641_v23, %v10602_v48  ;;  %v2645_v14 = vrot.slane %v7758_v21, 1  ;;  %v8105_v11 = vsel %vm2634_vm3, %v4105_v42, %v4106_v7  ;;  %v3667_v42 = vadd.f32 %v3567_v60, %v8054_v29 }
 0x31d   : > { %v3669_v32 = vadd.f32 %v3568_v61, %v8073_v20  ;;  %v3569_v36 = vsel %vm2217_vm2, %v3566_v40, %v3568_v61  ;;  %v8093_v31 = vadd.f32 %v2481_v59, %v7693_v13  ;;  %2797 = vrot.lane.b32.xlu1 %v10381_v62, %s5968_s4  ;;  %v3570_v38 = vrot.slane %v8086_v15, 2  ;;  %10603 = vst [vmem:[#allocation125_spill] sm:$0xff] %v8105_v11 }
 0x31e   : > { %v3668_v54 = vadd.f32 %v3569_v36, %v8066_v26  ;;  %v2646_v59 = vrot.slane %v7764_v39, 1  ;;  %v2483_v24 = vpop.permute.xlu0 %2482  ;;  %v8110_v62 = vsel %vm2634_vm3, %v4106_v7, %v4108_v55  ;;  %v10605_v36 = vrot.slane %v7732_v56, 1 }
 0x31f   : > { %v4113_v40 = vrot.slane %v3669_v32, 1  ;;  %v3571_v61 = vrot.slane %v8093_v31, 2  ;;  %10604 = vst [vmem:[#allocation126_spill] sm:$0xff] %v8110_v62  ;;  %v8113_v21 = vadd.f32 %v2483_v24, %v7703_v46  ;;  %2723 = vrot.lane.b32.xlu0 %v2644_v52, %s5968_s4  ;;  %v2640_v39 = vrot.slane %v7737_v19, 1 }
 0x320   : > { %v4111_v8 = vrot.slane %v3668_v54, 1  ;;  %v2485_v48 = vpop.permute.xlu1 %2484  ;;  %v2639_v13 = vsel %vm2634_vm3, %v2636_v25, %v10605_v36  ;;  %v4110_v56 = vrot.slane %v3667_v42, 1  ;;  %v2651_v25 = vrot.slane %v7794_v44, 1 }
 0x321   : > { %v3572_v32 = vsel %vm2217_vm2, %v3570_v38, %v3571_v61  ;;  %2717 = vrot.lane.b32.xlu1 %v2639_v13, %s5968_s4  ;;  %v8125_v7 = vadd.f32 %v2485_v48, %v7705_v12  ;;  %v3573_v24 = vrot.slane %v8113_v21, 2  ;;  %v2647_v52 = vsel %vm2634_vm3, %v2645_v14, %v2646_v59  ;;  %v10607_v13 = vld [vmem:[#allocation80_spill] sm:$0xff] }
 0x322   : > { %v3670_v55 = vadd.f32 %v3572_v32, %v8086_v15  ;;  %v2487_v54 = vpop.permute.xlu0 %2486  ;;  %v8131_v60 = vsel %vm2634_vm3, %v4111_v8, %v4113_v40  ;;  %v2642_v48 = vsel %vm2634_vm3, %v2640_v39, %v2641_v23  ;;  %v10608_v32 = vld [vmem:[#allocation81_spill] sm:$0xff]  ;;  %v8144_v44 = vsel %vm2634_vm3, %v4110_v56, %v4111_v8 }
 0x323   : > { %10606 = vst [vmem:[#allocation127_spill] sm:$0xff] %v8131_v60  ;;  %v3672_v19 = vadd.f32 %v3573_v24, %v8113_v21  ;;  %v8135_v36 = vadd.f32 %v2487_v54, %v10607_v13  ;;  %2727 = vrot.lane.b32.xlu0 %v2647_v52, %s5968_s4  ;;  %10609 = vst [vmem:[#allocation128_spill] sm:$0xff] %v8144_v44  ;;  %v3574_v14 = vsel %vm2217_vm2, %v3571_v61, %v3573_v24 }
 0x324   : > { %v2489_v38 = vpop.permute.xlu1 %2488  ;;  %v3575_v40 = vrot.slane %v8125_v7, 2  ;;  %v3671_v62 = vadd.f32 %v3574_v14, %v8093_v31  ;;  %v2656_v23 = vrot.slane %v7818_v22, 1  ;;  %v2655_v39 = vrot.slane %v7812_v5, 1 }
 0x325   : > { %v8140_v42 = vadd.f32 %v2489_v38, %v10608_v32  ;;  %2721 = vrot.lane.b32.xlu1 %v2642_v48, %s5968_s4  ;;  %v4118_v60 = vrot.slane %v3672_v19, 1  ;;  %v3576_v54 = vrot.slane %v8135_v36, 2  ;;  %v10610_v38 = vrot.slane %v7800_v63, 1 }
 0x326   : > { %v4115_v56 = vrot.slane %v3670_v55, 1  ;;  %v10611_v61 = vrot.slane %v7779_v51, 1  ;;  %v4116_v19 = vrot.slane %v3671_v62, 1  ;;  %v2650_v14 = vrot.slane %v7784_v41, 1 }
 0x327   : > { %v3578_v52 = vrot.slane %v8140_v42, 2  ;;  %v2654_v8 = vsel %vm2634_vm3, %v2651_v25, %v10610_v38  ;;  %v3577_v48 = vsel %vm2217_vm2, %v3575_v40, %v3576_v54  ;;  %v2661_v62 = vrot.slane %v7848_v6, 1 }
 0x328   : > { %v2649_v24 = vsel %vm2634_vm3, %v2646_v59, %v10611_v61  ;;  %2735 = vrot.lane.b32.xlu0 %v2654_v8, %s5968_s4  ;;  %v3673_v63 = vadd.f32 %v3577_v48, %v8125_v7  ;;  %v8168_v51 = vsel %vm2634_vm3, %v4115_v56, %v4116_v19  ;;  %v8171_v59 = vsel %vm2634_vm3, %v4116_v19, %v4118_v60 }
 0x329   : > { %v3675_v22 = vadd.f32 %v3578_v52, %v8140_v42  ;;  %v3579_v5 = vsel %vm2217_vm2, %v3576_v54, %v3578_v52  ;;  %2729 = vrot.lane.b32.xlu1 %v2649_v24, %s5968_s4  ;;  %10612 = vst [vmem:[#allocation129_spill] sm:$0xff] %v8168_v51  ;;  %10613 = vst [vmem:[#allocation130_spill] sm:$0xff] %v8171_v59  ;;  %v2657_v38 = vsel %vm2634_vm3, %v2655_v39, %v2656_v23 }
 0x32a   : > { %v3674_v55 = vadd.f32 %v3579_v5, %v8135_v36  ;;  %v4120_v54 = vrot.slane %v3673_v63, 1  ;;  %v2652_v8 = vsel %vm2634_vm3, %v2650_v14, %v2651_v25  ;;  %v2666_v60 = vrot.slane %v7872_v1, 1 }
 0x32b   : > { %v4123_v40 = vrot.slane %v3675_v22, 1  ;;  %v2665_v6 = vrot.slane %v7866_v43, 1  ;;  %v10616_v39 = vrot.slane %v7854_v0, 1  ;;  %v10617_v25 = vrot.slane %v7833_v27, 1 }
 0x32c   : > { %v4121_v52 = vrot.slane %v3674_v55, 1  ;;  %2739 = vrot.lane.b32.xlu0 %v2657_v38, %s5968_s4  ;;  %v2660_v19 = vrot.slane %v7838_v30, 1  ;;  %v2671_v48 = vrot.slane %v7905_v57, 1  ;;  %v2676_v27 = vrot.slane %v7926_v3, 1 }
 0x32d   : > { %2733 = vrot.lane.b32.xlu1 %v2652_v8, %s5968_s4  ;;  %v2664_v61 = vsel %vm2634_vm3, %v2661_v62, %v10616_v39  ;;  %v2659_v24 = vsel %vm2634_vm3, %v2656_v23, %v10617_v25  ;;  %v2667_v1 = vsel %vm2634_vm3, %v2665_v6, %v2666_v60  ;;  %v2675_v0 = vrot.slane %v7920_v16, 1 }
 0x32e   : > { %v8179_v41 = vsel %vm2634_vm3, %v4120_v54, %v4121_v52  ;;  %v8182_v56 = vsel %vm2634_vm3, %v4121_v52, %v4123_v40  ;;  %v2662_v43 = vsel %vm2634_vm3, %v2660_v19, %v2661_v62  ;;  %v10618_v23 = vrot.slane %v7912_v4, 1  ;;  %v10628_v19 = vld [vmem:[#allocation84_spill] sm:$0xff] }
 0x32f   : > { %10614 = vst [vmem:[#allocation131_spill] sm:$0xff] %v8179_v41  ;;  %10615 = vst [vmem:[#allocation132_spill] sm:$0xff] %v8182_v56  ;;  %v10619_v30 = vrot.slane %v7896_v2, 1  ;;  %v2670_v5 = vrot.slane %v7899_v10, 1  ;;  %v2681_v63 = vrot.slane %v7956_v17, 1  ;;  %v2677_v3 = vsel %vm2634_vm3, %v2675_v0, %v2676_v27  ;;  %v10634_v0 = vld [vmem:[#allocation90_spill] sm:$0xff] }
 0x330   : > { %2747 = vrot.lane.b32.xlu0 %v2664_v61, %s5968_s4  ;;  %v2674_v22 = vsel %vm2634_vm3, %v2671_v48, %v10618_v23  ;;  %v2686_v2 = vrot.slane %v7980_v35, 1  ;;  %v2685_v4 = vrot.slane %v7974_v18, 1  ;;  %v10620_v14 = vrot.slane %v7962_v37, 1  ;;  %v8293_v23 = vpop.permute.xlu0 %2719 }
 0x331   : > { %2741 = vrot.lane.b32.xlu1 %v2659_v24, %s5968_s4  ;;  %v2669_v57 = vsel %vm2634_vm3, %v2666_v60, %v10619_v30  ;;  %v2672_v16 = vsel %vm2634_vm3, %v2670_v5, %v2671_v48  ;;  %v10621_v10 = vrot.slane %v7941_v49, 1  ;;  %v2680_v62 = vrot.slane %v7946_v47, 1  ;;  %v10630_v48 = vld [vmem:[#allocation86_spill] sm:$0xff]  ;;  %v10637_v30 = vld [vmem:[#allocation92_spill] sm:$0xff] }
 0x332   : > { %v2684_v55 = vsel %vm2634_vm3, %v2681_v63, %v10620_v14  ;;  %v2691_v40 = vrot.slane %v8010_v34, 1  ;;  %v2687_v35 = vsel %vm2634_vm3, %v2685_v4, %v2686_v2  ;;  %v2696_v49 = vrot.slane %v8034_v33, 1  ;;  %v8301_v5 = vpop.permute.xlu1 %2725  ;;  %v10644_v4 = vld [vmem:[#allocation97_spill] sm:$0xff]  ;;  %v10645_v14 = vld [vmem:[#allocation96_spill] sm:$0xff] }
 0x333   : > { %v2679_v17 = vsel %vm2634_vm3, %v2676_v27, %v10621_v10  ;;  %v2682_v18 = vsel %vm2634_vm3, %v2680_v62, %v2681_v63  ;;  %v2695_v37 = vrot.slane %v8028_v45, 1  ;;  %v10622_v38 = vrot.slane %v8016_v58, 1  ;;  %v10633_v27 = vld [vmem:[#allocation91_spill] sm:$0xff]  ;;  %10639 = vst [vmem:[#allocation84_spill] sm:$0xff] %v8301_v5  ;;  %v10649_v62 = vld [vmem:[#allocation98_spill] sm:$0xff] }
 0x334   : > { %2751 = vrot.lane.b32.xlu0 %v2667_v1, %s5968_s4  ;;  %v10623_v47 = vrot.slane %v7995_v9, 1  ;;  %v2690_v52 = vrot.slane %v8000_v28, 1  ;;  %v2701_v8 = vrot.slane %v8066_v26, 1  ;;  %v2706_v9 = vrot.slane %v8093_v31, 1  ;;  %v10631_v1 = vld [vmem:[#allocation89_spill] sm:$0xff]  ;;  %v10640_v63 = vld [vmem:[#allocation95_spill] sm:$0xff] }
 0x335   : > { %2745 = vrot.lane.b32.xlu1 %v2662_v43, %s5968_s4  ;;  %v2694_v54 = vsel %vm2634_vm3, %v2691_v40, %v10622_v38  ;;  %v2697_v33 = vsel %vm2634_vm3, %v2695_v37, %v2696_v49  ;;  %v2705_v58 = vrot.slane %v8086_v15, 1  ;;  %v10624_v60 = vrot.slane %v8073_v20, 1  ;;  %v10632_v43 = vld [vmem:[#allocation88_spill] sm:$0xff] }
 0x336   : > { %v2689_v34 = vsel %vm2634_vm3, %v2686_v2, %v10623_v47  ;;  %v2692_v45 = vsel %vm2634_vm3, %v2690_v52, %v2691_v40  ;;  %v10625_v28 = vrot.slane %v8049_v50, 1  ;;  %v2700_v39 = vrot.slane %v8054_v29, 1  ;;  %v10657_v47 = vld [vmem:[#allocation82_spill] sm:$0xff] }
 0x337   : > { %v2704_v6 = vsel %vm2634_vm3, %v2701_v8, %v10624_v60  ;;  %v2707_v61 = vsel %vm2634_vm3, %v2705_v58, %v2706_v9  ;;  %v2708_v31 = vrot.slane %v8113_v21, 1  ;;  %v2713_v50 = vrot.slane %v8140_v42, 1  ;;  %v10626_v42 = vld [vmem:[#allocation83_spill] sm:$0xff]  ;;  %v10664_v58 = vld [vmem:[#allocation65_spill] sm:$0xff]  ;;  %v10665_v60 = vld [vmem:[#allocation64_spill] sm:$0xff] }
 0x338   : > { %2759 = vrot.lane.b32.xlu0 %v2674_v22, %s5968_s4  ;;  %v2699_v26 = vsel %vm2634_vm3, %v2696_v49, %v10625_v28  ;;  %v2702_v15 = vsel %vm2634_vm3, %v2700_v39, %v2701_v8  ;;  %v2711_v20 = vrot.slane %v8135_v36, 1  ;;  %v2710_v29 = vrot.slane %v8125_v7, 1  ;;  %v10627_v36 = vld [vmem:[#allocation85_spill] sm:$0xff]  ;;  %v10629_v7 = vld [vmem:[#allocation87_spill] sm:$0xff]  ;;  %10635 = vst [vmem:[#allocation83_spill] sm:$0xff] %v8293_v23  ;;  %v10653_v49 = vld [vmem:[#allocation100_spill] sm:$0xff] }
 0x339   : > { %2753 = vrot.lane.b32.xlu1 %v2669_v57, %s5968_s4  ;;  %v2709_v25 = vsel %vm2634_vm3, %v2706_v9, %v2708_v31  ;;  %v10636_v22 = vld [vmem:[#allocation93_spill] sm:$0xff]  ;;  %v8299_v57 = vpop.permute.xlu0 %2731  ;;  %v10660_v8 = vld [vmem:[#allocation63_spill] sm:$0xff]  ;;  %v10669_v39 = vld [vmem:[#allocation66_spill] sm:$0xff] }
 0x33a   : > { %v2714_v21 = vsel %vm2634_vm3, %v2711_v20, %v2713_v50  ;;  %v2712_v24 = vsel %vm2634_vm3, %v2710_v29, %v2711_v20  ;;  %10638 = vst [vmem:[#allocation85_spill] sm:$0xff] %v8299_v57  ;;  %v10676_v29 = vld [vmem:[#allocation54_spill] sm:$0xff] }
 0x33c   : > { %2763 = vrot.lane.b32.xlu0 %v2677_v3, %s5968_s4  ;;  %v10641_v3 = vld [vmem:[#allocation94_spill] sm:$0xff] }
 0x33d   : > { %2757 = vrot.lane.b32.xlu1 %v2672_v16, %s5968_s4 }
 0x33e   : > { %v8309_v2 = vpop.permute.xlu1 %2737 }
 0x33f   : > { %10643 = vst [vmem:[#allocation86_spill] sm:$0xff] %v8309_v2 }
 0x340   : > { %2771 = vrot.lane.b32.xlu0 %v2684_v55, %s5968_s4 }
 0x341   : > { %2765 = vrot.lane.b32.xlu1 %v2679_v17, %s5968_s4  ;;  %v10648_v17 = vld [vmem:[#allocation99_spill] sm:$0xff] }
 0x344   : > { %2775 = vrot.lane.b32.xlu0 %v2687_v35, %s5968_s4  ;;  %v8307_v16 = vpop.permute.xlu0 %2743 }
 0x345   : > { %2769 = vrot.lane.b32.xlu1 %v2682_v18, %s5968_s4  ;;  %10642 = vst [vmem:[#allocation87_spill] sm:$0xff] %v8307_v16  ;;  %v10652_v18 = vld [vmem:[#allocation60_spill] sm:$0xff] }
 0x348   : > { %2783 = vrot.lane.b32.xlu0 %v2694_v54, %s5968_s4  ;;  %v10656_v54 = vld [vmem:[#allocation61_spill] sm:$0xff] }
 0x349   : > { %2777 = vrot.lane.b32.xlu1 %v2689_v34, %s5968_s4 }
 0x34a   : > { %v8317_v10 = vpop.permute.xlu1 %2749 }
 0x34b   : > { %10647 = vst [vmem:[#allocation91_spill] sm:$0xff] %v8317_v10  ;;  %v10697_v10 = vld [vmem:[#allocation73_spill] sm:$0xff] }
 0x34c   : > { %2787 = vrot.lane.b32.xlu0 %v2697_v33, %s5968_s4  ;;  %v10661_v33 = vld [vmem:[#allocation62_spill] sm:$0xff] }
 0x34d   : > { %2781 = vrot.lane.b32.xlu1 %v2692_v45, %s5968_s4 }
 0x350   : > { %2795 = vrot.lane.b32.xlu0 %v2704_v6, %s5968_s4 }
 0x351   : > { %2789 = vrot.lane.b32.xlu1 %v2699_v26, %s5968_s4  ;;  %v10668_v26 = vld [vmem:[#allocation67_spill] sm:$0xff] }
 0x354   : > { %2799 = vrot.lane.b32.xlu0 %v2707_v61, %s5968_s4 }
 0x355   : > { %2793 = vrot.lane.b32.xlu1 %v2702_v15, %s5968_s4  ;;  %v10672_v15 = vld [vmem:[#allocation69_spill] sm:$0xff] }
 0x358   : > { %2803 = vrot.lane.b32.xlu0 %v2708_v31, %s5968_s4 }
 0x359   : > { %2801 = vrot.lane.b32.xlu1 %v2709_v25, %s5968_s4 }
 0x35c   : > { %2807 = vrot.lane.b32.xlu0 %v2714_v21, %s5968_s4  ;;  %v10677_v21 = vld [vmem:[#allocation70_spill] sm:$0xff] }
 0x35d   : > { %2805 = vrot.lane.b32.xlu1 %v2712_v24, %s5968_s4 }
 0x360   : > { %3052 = vrot.lane.b32.xlu0 %v10626_v42, %s5969_s7 }
 0x361   : > { %2809 = vrot.lane.b32.xlu1 %v2713_v50, %s5968_s4  ;;  %v10673_v50 = vld [vmem:[#allocation68_spill] sm:$0xff] }
 0x364   : > { %3056 = vrot.lane.b32.xlu0 %v10627_v36, %s5969_s7 }
 0x365   : > { %3054 = vrot.lane.b32.xlu1 %v10628_v19, %s5969_s7  ;;  %v8315_v55 = vpop.permute.xlu0 %2755 }
 0x366   : > { %10646 = vst [vmem:[#allocation88_spill] sm:$0xff] %v8315_v55 }
 0x368   : > { %3060 = vrot.lane.b32.xlu0 %v10629_v7, %s5969_s7 }
 0x369   : > { %3058 = vrot.lane.b32.xlu1 %v10630_v48, %s5969_s7 }
 0x36b   : > { %v8325_v35 = vpop.permute.xlu1 %2761 }
 0x36c   : > { %3064 = vrot.lane.b32.xlu0 %v10631_v1, %s5969_s7  ;;  %10651 = vst [vmem:[#allocation93_spill] sm:$0xff] %v8325_v35  ;;  %v10693_v35 = vld [vmem:[#allocation58_spill] sm:$0xff] }
 0x36d   : > { %3062 = vrot.lane.b32.xlu1 %v10632_v43, %s5969_s7 }
 0x370   : > { %3068 = vrot.lane.b32.xlu0 %v10633_v27, %s5969_s7 }
 0x371   : > { %3066 = vrot.lane.b32.xlu1 %v10634_v0, %s5969_s7  ;;  %v8323_v40 = vpop.permute.xlu0 %2767 }
 0x372   : > { %10650 = vst [vmem:[#allocation90_spill] sm:$0xff] %v8323_v40 }
 0x374   : > { %3072 = vrot.lane.b32.xlu0 %v10636_v22, %s5969_s7 }
 0x375   : > { %3070 = vrot.lane.b32.xlu1 %v10637_v30, %s5969_s7 }
 0x377   : > { %v8333_v38 = vpop.permute.xlu1 %2773 }
 0x378   : > { %3076 = vrot.lane.b32.xlu0 %v10640_v63, %s5969_s7  ;;  %10655 = vst [vmem:[#allocation95_spill] sm:$0xff] %v8333_v38  ;;  %v10689_v38 = vld [vmem:[#allocation71_spill] sm:$0xff] }
 0x379   : > { %3074 = vrot.lane.b32.xlu1 %v10641_v3, %s5969_s7 }
 0x37c   : > { %3080 = vrot.lane.b32.xlu0 %v10644_v4, %s5969_s7 }
 0x37d   : > { %3078 = vrot.lane.b32.xlu1 %v10645_v14, %s5969_s7  ;;  %v8331_v37 = vpop.permute.xlu0 %2779 }
 0x37e   : > { %10654 = vst [vmem:[#allocation92_spill] sm:$0xff] %v8331_v37  ;;  %v10685_v37 = vld [vmem:[#allocation56_spill] sm:$0xff] }
 0x380   : > { %3084 = vrot.lane.b32.xlu0 %v10648_v17, %s5969_s7 }
 0x381   : > { %3082 = vrot.lane.b32.xlu1 %v10649_v62, %s5969_s7 }
 0x383   : > { %v8341_v52 = vpop.permute.xlu1 %2785 }
 0x384   : > { %3088 = vrot.lane.b32.xlu0 %v10652_v18, %s5969_s7  ;;  %10659 = vst [vmem:[#allocation97_spill] sm:$0xff] %v8341_v52  ;;  %v10681_v52 = vld [vmem:[#allocation53_spill] sm:$0xff] }
 0x385   : > { %3086 = vrot.lane.b32.xlu1 %v10653_v49, %s5969_s7 }
 0x388   : > { %3092 = vrot.lane.b32.xlu0 %v10656_v54, %s5969_s7 }
 0x389   : > { %3090 = vrot.lane.b32.xlu1 %v10657_v47, %s5969_s7  ;;  %v8339_v34 = vpop.permute.xlu0 %2791 }
 0x38a   : > { %10658 = vst [vmem:[#allocation94_spill] sm:$0xff] %v8339_v34  ;;  %v10680_v34 = vld [vmem:[#allocation55_spill] sm:$0xff] }
 0x38c   : > { %3096 = vrot.lane.b32.xlu0 %v10660_v8, %s5969_s7 }
 0x38d   : > { %3094 = vrot.lane.b32.xlu1 %v10661_v33, %s5969_s7  ;;  %v8347_v45 = vpop.permute.xlu0 %2715 }
 0x38e   : > { %10662 = vst [vmem:[#allocation96_spill] sm:$0xff] %v8347_v45 }
 0x38f   : > { %v8349_v9 = vpop.permute.xlu1 %2797 }
 0x390   : > { %10663 = vst [vmem:[#allocation99_spill] sm:$0xff] %v8349_v9  ;;  %3100 = vrot.lane.b32.xlu0 %v10664_v58, %s5969_s7 }
 0x391   : > { %3098 = vrot.lane.b32.xlu1 %v10665_v60, %s5969_s7  ;;  %v8355_v6 = vpop.permute.xlu0 %2723 }
 0x392   : > { %10666 = vst [vmem:[#allocation98_spill] sm:$0xff] %v8355_v6 }
 0x393   : > { %v8357_v28 = vpop.permute.xlu1 %2717 }
 0x394   : > { %10667 = vst [vmem:[#allocation60_spill] sm:$0xff] %v8357_v28  ;;  %3104 = vrot.lane.b32.xlu0 %v10668_v26, %s5969_s7 }
 0x395   : > { %3102 = vrot.lane.b32.xlu1 %v10669_v39, %s5969_s7  ;;  %v8363_v61 = vpop.permute.xlu0 %2727 }
 0x396   : > { %10670 = vst [vmem:[#allocation100_spill] sm:$0xff] %v8363_v61 }
 0x397   : > { %v8365_v31 = vpop.permute.xlu1 %2721 }
 0x398   : > { %10671 = vst [vmem:[#allocation61_spill] sm:$0xff] %v8365_v31  ;;  %3108 = vrot.lane.b32.xlu0 %v10672_v15, %s5969_s7 }
 0x399   : > { %3106 = vrot.lane.b32.xlu1 %v10673_v50, %s5969_s7 }
 0x39a   : > { %v8371_v20 = vpop.permute.xlu0 %2735 }
 0x39b   : > { %10674 = vst [vmem:[#allocation82_spill] sm:$0xff] %v8371_v20  ;;  %v8373_v25 = vpop.permute.xlu1 %2729 }
 0x39c   : > { %10675 = vst [vmem:[#allocation63_spill] sm:$0xff] %v8373_v25  ;;  %3112 = vrot.lane.b32.xlu0 %v10676_v29, %s5969_s7  ;;  %v10684_v25 = vld [vmem:[#allocation57_spill] sm:$0xff] }
 0x39d   : > { %3110 = vrot.lane.b32.xlu1 %v10677_v21, %s5969_s7 }
 0x39e   : > { %v8379_v24 = vpop.permute.xlu0 %2739 }
 0x39f   : > { %10678 = vst [vmem:[#allocation62_spill] sm:$0xff] %v8379_v24  ;;  %v8381_v9 = vpop.permute.xlu1 %2733 }
 0x3a0   : > { %10679 = vst [vmem:[#allocation65_spill] sm:$0xff] %v8381_v9  ;;  %3116 = vrot.lane.b32.xlu0 %v10680_v34, %s5969_s7  ;;  %v10688_v9 = vld [vmem:[#allocation72_spill] sm:$0xff] }
 0x3a1   : > { %3114 = vrot.lane.b32.xlu1 %v10681_v52, %s5969_s7 }
 0x3a2   : > { %v8387_v61 = vpop.permute.xlu0 %2747 }
 0x3a3   : > { %10682 = vst [vmem:[#allocation64_spill] sm:$0xff] %v8387_v61  ;;  %v8389_v20 = vpop.permute.xlu1 %2741 }
 0x3a4   : > { %10683 = vst [vmem:[#allocation67_spill] sm:$0xff] %v8389_v20  ;;  %3120 = vrot.lane.b32.xlu0 %v10684_v25, %s5969_s7  ;;  %v10692_v20 = vld [vmem:[#allocation59_spill] sm:$0xff] }
 0x3a5   : > { %3118 = vrot.lane.b32.xlu1 %v10685_v37, %s5969_s7 }
 0x3a6   : > { %v8395_v31 = vpop.permute.xlu0 %2751 }
 0x3a7   : > { %10686 = vst [vmem:[#allocation66_spill] sm:$0xff] %v8395_v31  ;;  %v8397_v24 = vpop.permute.xlu1 %2745 }
 0x3a8   : > { %10687 = vst [vmem:[#allocation69_spill] sm:$0xff] %v8397_v24  ;;  %3124 = vrot.lane.b32.xlu0 %v10688_v9, %s5969_s7  ;;  %v10696_v24 = vld [vmem:[#allocation74_spill] sm:$0xff] }
 0x3a9   : > { %3122 = vrot.lane.b32.xlu1 %v10689_v38, %s5969_s7 }
 0x3aa   : > { %v8403_v40 = vpop.permute.xlu0 %2759 }
 0x3ab   : > { %10690 = vst [vmem:[#allocation68_spill] sm:$0xff] %v8403_v40  ;;  %v8405_v61 = vpop.permute.xlu1 %2753 }
 0x3ac   : > { %10691 = vst [vmem:[#allocation54_spill] sm:$0xff] %v8405_v61  ;;  %3128 = vrot.lane.b32.xlu0 %v10692_v20, %s5969_s7  ;;  %v10700_v61 = vld [vmem:[#allocation75_spill] sm:$0xff] }
 0x3ad   : > { %3126 = vrot.lane.b32.xlu1 %v10693_v35, %s5969_s7 }
 0x3ae   : > { %v8411_v55 = vpop.permute.xlu0 %2763 }
 0x3af   : > { %10694 = vst [vmem:[#allocation70_spill] sm:$0xff] %v8411_v55  ;;  %v8413_v31 = vpop.permute.xlu1 %2757 }
 0x3b0   : > { %10695 = vst [vmem:[#allocation55_spill] sm:$0xff] %v8413_v31  ;;  %3132 = vrot.lane.b32.xlu0 %v10696_v24, %s5969_s7  ;;  %v10703_v31 = vld [vmem:[#allocation77_spill] sm:$0xff] }
 0x3b1   : > { %3130 = vrot.lane.b32.xlu1 %v10697_v10, %s5969_s7 }
 0x3b2   : > { %v8419_v16 = vpop.permute.xlu0 %2771 }
 0x3b3   : > { %10698 = vst [vmem:[#allocation53_spill] sm:$0xff] %v8419_v16  ;;  %v8421_v40 = vpop.permute.xlu1 %2765 }
 0x3b4   : > { %10699 = vst [vmem:[#allocation57_spill] sm:$0xff] %v8421_v40  ;;  %3136 = vrot.lane.b32.xlu0 %v7691_v53, %s5969_s7 }
 0x3b5   : > { %3134 = vrot.lane.b32.xlu1 %v10700_v61, %s5969_s7 }
 0x3b6   : > { %v8427_v6 = vpop.permute.xlu0 %2775 }
 0x3b7   : > { %10701 = vst [vmem:[#allocation56_spill] sm:$0xff] %v8427_v6  ;;  %v8429_v55 = vpop.permute.xlu1 %2769 }
 0x3b8   : > { %10702 = vst [vmem:[#allocation71_spill] sm:$0xff] %v8429_v55  ;;  %3140 = vrot.lane.b32.xlu0 %v7703_v46, %s5969_s7 }
 0x3b9   : > { %3138 = vrot.lane.b32.xlu1 %v10703_v31, %s5969_s7 }
 0x3ba   : > { %v8435_v28 = vpop.permute.xlu0 %2783 }
 0x3bb   : > { %10704 = vst [vmem:[#allocation133_spill] sm:$0xff] %v8435_v28  ;;  %v8437_v16 = vpop.permute.xlu1 %2777 }
 0x3bc   : > { %10705 = vst [vmem:[#allocation134_spill] sm:$0xff] %v8437_v16  ;;  %3144 = vrot.lane.b32.xlu0 %v10607_v13, %s5969_s7 }
 0x3bd   : > { %3142 = vrot.lane.b32.xlu1 %v7705_v12, %s5969_s7 }
 0x3be   : > { %v8443_v40 = vpop.permute.xlu0 %2787 }
 0x3bf   : > { %10706 = vst [vmem:[#allocation135_spill] sm:$0xff] %v8443_v40  ;;  %v8445_v6 = vpop.permute.xlu1 %2781 }
 0x3c0   : > { %10707 = vst [vmem:[#allocation136_spill] sm:$0xff] %v8445_v6 }
 0x3c1   : > { %3146 = vrot.lane.b32.xlu1 %v10608_v32, %s5969_s7 }
 0x3c2   : > { %v8449_v55 = vpop.permute.xlu0 %2795 }
 0x3c3   : > { %10708 = vst [vmem:[#allocation137_spill] sm:$0xff] %v8449_v55  ;;  %v8451_v2 = vpop.permute.xlu1 %2789 }
 0x3c4   : > { %10709 = vst [vmem:[#allocation138_spill] sm:$0xff] %v8451_v2 }
 0x3c6   : > { %v8453_v28 = vpop.permute.xlu0 %2799 }
 0x3c7   : > { %10710 = vst [vmem:[#allocation139_spill] sm:$0xff] %v8453_v28  ;;  %v8455_v16 = vpop.permute.xlu1 %2793 }
 0x3c8   : > { %10711 = vst [vmem:[#allocation140_spill] sm:$0xff] %v8455_v16 }
 0x3ca   : > { %v8457_v45 = vpop.permute.xlu0 %2803 }
 0x3cb   : > { %10712 = vst [vmem:[#allocation141_spill] sm:$0xff] %v8457_v45  ;;  %v8459_v57 = vpop.permute.xlu1 %2801 }
 0x3cc   : > { %10713 = vst [vmem:[#allocation142_spill] sm:$0xff] %v8459_v57 }
 0x3ce   : > { %v8461_v5 = vpop.permute.xlu0 %2807 }
 0x3cf   : > { %10714 = vst [vmem:[#allocation143_spill] sm:$0xff] %v8461_v5  ;;  %v8463_v40 = vpop.permute.xlu1 %2805 }
 0x3d0   : > { %10715 = vst [vmem:[#allocation144_spill] sm:$0xff] %v8463_v40 }
 0x3d2   : > { %v3053_v6 = vpop.permute.xlu0 %3052 }
 0x3d3   : > { %v8465_v23 = vpop.permute.xlu1 %2809  ;;  %v3196_v56 = vadd.f32 %v3053_v6, %v10626_v42 }
 0x3d4   : > { %10716 = vst [vmem:[#allocation145_spill] sm:$0xff] %v8465_v23 }
 0x3d5   : > { %v3292_v59 = vrot.slane %v3196_v56, 2 }
 0x3d6   : > { %v3057_v55 = vpop.permute.xlu0 %3056 }
 0x3d7   : > { %v3055_v41 = vpop.permute.xlu1 %3054  ;;  %v3198_v2 = vadd.f32 %v3057_v55, %v10627_v36 }
 0x3d8   : > { %v3197_v28 = vadd.f32 %v3055_v41, %v10628_v19 }
 0x3d9   : > { %v3295_v16 = vrot.slane %v3198_v2, 2 }
 0x3da   : > { %v3293_v45 = vrot.slane %v3197_v28, 2  ;;  %v3061_v51 = vpop.permute.xlu0 %3060 }
 0x3db   : > { %v3059_v57 = vpop.permute.xlu1 %3058  ;;  %v3200_v5 = vadd.f32 %v3061_v51, %v10629_v7 }
 0x3dc   : > { %v3199_v40 = vadd.f32 %v3059_v57, %v10630_v48  ;;  %v3294_v44 = vsel %vm2217_vm2, %v3292_v59, %v3293_v45  ;;  %v3296_v23 = vsel %vm2217_vm2, %v3293_v45, %v3295_v16 }
 0x3dd   : > { %v3298_v6 = vrot.slane %v3200_v5, 2  ;;  %3372 = vrot.lane.b32.xlu0 %v3294_v44, %s5970_s10  ;;  %3374 = vrot.lane.b32.xlu1 %v3296_v23, %s5970_s10 }
 0x3de   : > { %v3297_v41 = vrot.slane %v3199_v40, 2  ;;  %v3065_v2 = vpop.permute.xlu0 %3064 }
 0x3df   : > { %v3063_v56 = vpop.permute.xlu1 %3062  ;;  %v3202_v59 = vadd.f32 %v3065_v2, %v10631_v1 }
 0x3e0   : > { %v3201_v55 = vadd.f32 %v3063_v56, %v10632_v43  ;;  %v3299_v28 = vsel %vm2217_vm2, %v3297_v41, %v3298_v6 }
 0x3e1   : > { %3376 = vrot.lane.b32.xlu0 %v3299_v28, %s5970_s10  ;;  %v3302_v45 = vrot.slane %v3202_v59, 2 }
 0x3e2   : > { %v3300_v51 = vrot.slane %v3201_v55, 2  ;;  %v3069_v57 = vpop.permute.xlu0 %3068 }
 0x3e3   : > { %v3067_v16 = vpop.permute.xlu1 %3066  ;;  %v3204_v5 = vadd.f32 %v3069_v57, %v10633_v27 }
 0x3e4   : > { %v3203_v44 = vadd.f32 %v3067_v16, %v10634_v0  ;;  %v3301_v23 = vsel %vm2217_vm2, %v3298_v6, %v3300_v51 }
 0x3e5   : > { %v3305_v40 = vrot.slane %v3204_v5, 2  ;;  %3378 = vrot.lane.b32.xlu1 %v3301_v23, %s5970_s10 }
 0x3e6   : > { %v3303_v56 = vrot.slane %v3203_v44, 2  ;;  %v3073_v11 = vpop.permute.xlu0 %3072 }
 0x3e7   : > { %v3071_v41 = vpop.permute.xlu1 %3070  ;;  %v3206_v28 = vadd.f32 %v3073_v11, %v10636_v22 }
 0x3e8   : > { %v3205_v55 = vadd.f32 %v3071_v41, %v10637_v30  ;;  %v3304_v2 = vsel %vm2217_vm2, %v3302_v45, %v3303_v56  ;;  %v3306_v1 = vsel %vm2217_vm2, %v3303_v56, %v3305_v40 }
 0x3e9   : > { %v3308_v57 = vrot.slane %v3206_v28, 2  ;;  %3380 = vrot.lane.b32.xlu0 %v3304_v2, %s5970_s10  ;;  %3382 = vrot.lane.b32.xlu1 %v3306_v1, %s5970_s10 }
 0x3ea   : > { %v3307_v6 = vrot.slane %v3205_v55, 2  ;;  %v3077_v51 = vpop.permute.xlu0 %3076 }
 0x3eb   : > { %v3075_v16 = vpop.permute.xlu1 %3074  ;;  %v3208_v44 = vadd.f32 %v3077_v51, %v10640_v63 }
 0x3ec   : > { %v3207_v59 = vadd.f32 %v3075_v16, %v10641_v3  ;;  %v3309_v5 = vsel %vm2217_vm2, %v3307_v6, %v3308_v57 }
 0x3ed   : > { %3384 = vrot.lane.b32.xlu0 %v3309_v5, %s5970_s10  ;;  %v3312_v28 = vrot.slane %v3208_v44, 2 }
 0x3ee   : > { %v3310_v11 = vrot.slane %v3207_v59, 2  ;;  %v3081_v23 = vpop.permute.xlu0 %3080 }
 0x3ef   : > { %v3079_v45 = vpop.permute.xlu1 %3078  ;;  %v3210_v40 = vadd.f32 %v3081_v23, %v10644_v4 }
 0x3f0   : > { %v3209_v56 = vadd.f32 %v3079_v45, %v10645_v14  ;;  %v3311_v1 = vsel %vm2217_vm2, %v3308_v57, %v3310_v11 }
 0x3f1   : > { %v3315_v41 = vrot.slane %v3210_v40, 2  ;;  %3386 = vrot.lane.b32.xlu1 %v3311_v1, %s5970_s10 }
 0x3f2   : > { %v3313_v55 = vrot.slane %v3209_v56, 2  ;;  %v3085_v2 = vpop.permute.xlu0 %3084 }
 0x3f3   : > { %v3083_v6 = vpop.permute.xlu1 %3082  ;;  %v3212_v16 = vadd.f32 %v3085_v2, %v10648_v17 }
 0x3f4   : > { %v3211_v59 = vadd.f32 %v3083_v6, %v10649_v62  ;;  %v3314_v51 = vsel %vm2217_vm2, %v3312_v28, %v3313_v55  ;;  %v3316_v5 = vsel %vm2217_vm2, %v3313_v55, %v3315_v41 }
 0x3f5   : > { %v3318_v23 = vrot.slane %v3212_v16, 2  ;;  %3388 = vrot.lane.b32.xlu0 %v3314_v51, %s5970_s10  ;;  %3390 = vrot.lane.b32.xlu1 %v3316_v5, %s5970_s10 }
 0x3f6   : > { %v3317_v57 = vrot.slane %v3211_v59, 2  ;;  %v3089_v11 = vpop.permute.xlu0 %3088 }
 0x3f7   : > { %v3087_v45 = vpop.permute.xlu1 %3086  ;;  %v3214_v1 = vadd.f32 %v3089_v11, %v10652_v18 }
 0x3f8   : > { %v3213_v44 = vadd.f32 %v3087_v45, %v10653_v49  ;;  %v3319_v40 = vsel %vm2217_vm2, %v3317_v57, %v3318_v23 }
 0x3f9   : > { %3392 = vrot.lane.b32.xlu0 %v3319_v40, %s5970_s10  ;;  %v3322_v59 = vrot.slane %v3214_v1, 2 }
 0x3fa   : > { %v3320_v56 = vrot.slane %v3213_v44, 2  ;;  %v3093_v28 = vpop.permute.xlu0 %3092 }
 0x3fb   : > { %v3091_v2 = vpop.permute.xlu1 %3090  ;;  %v3216_v41 = vadd.f32 %v3093_v28, %v10656_v54 }
 0x3fc   : > { %v3215_v55 = vadd.f32 %v3091_v2, %v10657_v47  ;;  %v3321_v6 = vsel %vm2217_vm2, %v3318_v23, %v3320_v56 }
 0x3fd   : > { %v3325_v16 = vrot.slane %v3216_v41, 2  ;;  %3394 = vrot.lane.b32.xlu1 %v3321_v6, %s5970_s10 }
 0x3fe   : > { %v3323_v51 = vrot.slane %v3215_v55, 2  ;;  %v3097_v5 = vpop.permute.xlu0 %3096 }
 0x3ff   : > { %v3095_v57 = vpop.permute.xlu1 %3094  ;;  %v3218_v45 = vadd.f32 %v3097_v5, %v10660_v8 }
 0x400   : > { %v3217_v44 = vadd.f32 %v3095_v57, %v10661_v33  ;;  %v3324_v11 = vsel %vm2217_vm2, %v3322_v59, %v3323_v51  ;;  %v3326_v40 = vsel %vm2217_vm2, %v3323_v51, %v3325_v16 }
 0x401   : > { %v3328_v28 = vrot.slane %v3218_v45, 2  ;;  %3396 = vrot.lane.b32.xlu0 %v3324_v11, %s5970_s10  ;;  %3398 = vrot.lane.b32.xlu1 %v3326_v40, %s5970_s10 }
 0x402   : > { %v3327_v23 = vrot.slane %v3217_v44, 2  ;;  %v3101_v56 = vpop.permute.xlu0 %3100 }
 0x403   : > { %v3099_v2 = vpop.permute.xlu1 %3098  ;;  %v3220_v6 = vadd.f32 %v3101_v56, %v10664_v58 }
 0x404   : > { %v3219_v1 = vadd.f32 %v3099_v2, %v10665_v60  ;;  %v3329_v41 = vsel %vm2217_vm2, %v3327_v23, %v3328_v28 }
 0x405   : > { %3400 = vrot.lane.b32.xlu0 %v3329_v41, %s5970_s10  ;;  %v3332_v44 = vrot.slane %v3220_v6, 2 }
 0x406   : > { %v3330_v55 = vrot.slane %v3219_v1, 2  ;;  %v3105_v59 = vpop.permute.xlu0 %3104 }
 0x407   : > { %v3103_v5 = vpop.permute.xlu1 %3102  ;;  %v3222_v16 = vadd.f32 %v3105_v59, %v10668_v26 }
 0x408   : > { %v3221_v51 = vadd.f32 %v3103_v5, %v10669_v39  ;;  %v3331_v57 = vsel %vm2217_vm2, %v3328_v28, %v3330_v55 }
 0x409   : > { %v3335_v45 = vrot.slane %v3222_v16, 2  ;;  %3402 = vrot.lane.b32.xlu1 %v3331_v57, %s5970_s10 }
 0x40a   : > { %v3333_v11 = vrot.slane %v3221_v51, 2  ;;  %v3109_v40 = vpop.permute.xlu0 %3108 }
 0x40b   : > { %v3107_v23 = vpop.permute.xlu1 %3106  ;;  %v3224_v2 = vadd.f32 %v3109_v40, %v10672_v15 }
 0x40c   : > { %v3223_v1 = vadd.f32 %v3107_v23, %v10673_v50  ;;  %v3334_v56 = vsel %vm2217_vm2, %v3332_v44, %v3333_v11  ;;  %v3336_v41 = vsel %vm2217_vm2, %v3333_v11, %v3335_v45 }
 0x40d   : > { %v3338_v59 = vrot.slane %v3224_v2, 2  ;;  %3404 = vrot.lane.b32.xlu0 %v3334_v56, %s5970_s10  ;;  %3406 = vrot.lane.b32.xlu1 %v3336_v41, %s5970_s10 }
 0x40e   : > { %v3337_v28 = vrot.slane %v3223_v1, 2  ;;  %v3113_v55 = vpop.permute.xlu0 %3112 }
 0x40f   : > { %v3111_v5 = vpop.permute.xlu1 %3110  ;;  %v3226_v57 = vadd.f32 %v3113_v55, %v10676_v29 }
 0x410   : > { %v3225_v6 = vadd.f32 %v3111_v5, %v10677_v21  ;;  %v3339_v16 = vsel %vm2217_vm2, %v3337_v28, %v3338_v59 }
 0x411   : > { %3408 = vrot.lane.b32.xlu0 %v3339_v16, %s5970_s10  ;;  %v3342_v1 = vrot.slane %v3226_v57, 2 }
 0x412   : > { %v3340_v51 = vrot.slane %v3225_v6, 2  ;;  %v3117_v44 = vpop.permute.xlu0 %3116 }
 0x413   : > { %v3115_v40 = vpop.permute.xlu1 %3114  ;;  %v3228_v45 = vadd.f32 %v3117_v44, %v10680_v34 }
 0x414   : > { %v3227_v11 = vadd.f32 %v3115_v40, %v10681_v52  ;;  %v3341_v23 = vsel %vm2217_vm2, %v3338_v59, %v3340_v51 }
 0x415   : > { %v3345_v2 = vrot.slane %v3228_v45, 2  ;;  %3410 = vrot.lane.b32.xlu1 %v3341_v23, %s5970_s10 }
 0x416   : > { %v3343_v56 = vrot.slane %v3227_v11, 2  ;;  %v3121_v41 = vpop.permute.xlu0 %3120 }
 0x417   : > { %v3119_v28 = vpop.permute.xlu1 %3118  ;;  %v3230_v5 = vadd.f32 %v3121_v41, %v10684_v25 }
 0x418   : > { %v3229_v6 = vadd.f32 %v3119_v28, %v10685_v37  ;;  %v3344_v55 = vsel %vm2217_vm2, %v3342_v1, %v3343_v56  ;;  %v3346_v16 = vsel %vm2217_vm2, %v3343_v56, %v3345_v2 }
 0x419   : > { %v3348_v44 = vrot.slane %v3230_v5, 2  ;;  %3412 = vrot.lane.b32.xlu0 %v3344_v55, %s5970_s10  ;;  %3414 = vrot.lane.b32.xlu1 %v3346_v16, %s5970_s10 }
 0x41a   : > { %v3347_v59 = vrot.slane %v3229_v6, 2  ;;  %v3125_v51 = vpop.permute.xlu0 %3124 }
 0x41b   : > { %v3123_v40 = vpop.permute.xlu1 %3122  ;;  %v3232_v23 = vadd.f32 %v3125_v51, %v10688_v9 }
 0x41c   : > { %v3231_v57 = vadd.f32 %v3123_v40, %v10689_v38  ;;  %v3349_v45 = vsel %vm2217_vm2, %v3347_v59, %v3348_v44 }
 0x41d   : > { %3416 = vrot.lane.b32.xlu0 %v3349_v45, %s5970_s10  ;;  %v3352_v6 = vrot.slane %v3232_v23, 2 }
 0x41e   : > { %v3350_v11 = vrot.slane %v3231_v57, 2  ;;  %v3129_v1 = vpop.permute.xlu0 %3128 }
 0x41f   : > { %v3127_v41 = vpop.permute.xlu1 %3126  ;;  %v3234_v2 = vadd.f32 %v3129_v1, %v10692_v20 }
 0x420   : > { %v3233_v56 = vadd.f32 %v3127_v41, %v10693_v35  ;;  %v3351_v28 = vsel %vm2217_vm2, %v3348_v44, %v3350_v11 }
 0x421   : > { %v3355_v5 = vrot.slane %v3234_v2, 2  ;;  %3418 = vrot.lane.b32.xlu1 %v3351_v28, %s5970_s10 }
 0x422   : > { %v3353_v55 = vrot.slane %v3233_v56, 2  ;;  %v3133_v16 = vpop.permute.xlu0 %3132 }
 0x423   : > { %v3131_v59 = vpop.permute.xlu1 %3130  ;;  %v3236_v40 = vadd.f32 %v3133_v16, %v10696_v24 }
 0x424   : > { %v3235_v57 = vadd.f32 %v3131_v59, %v10697_v10  ;;  %v3354_v51 = vsel %vm2217_vm2, %v3352_v6, %v3353_v55  ;;  %v3356_v45 = vsel %vm2217_vm2, %v3353_v55, %v3355_v5 }
 0x425   : > { %v3358_v1 = vrot.slane %v3236_v40, 2  ;;  %3420 = vrot.lane.b32.xlu0 %v3354_v51, %s5970_s10  ;;  %3422 = vrot.lane.b32.xlu1 %v3356_v45, %s5970_s10 }
 0x426   : > { %v3357_v44 = vrot.slane %v3235_v57, 2  ;;  %v3137_v11 = vpop.permute.xlu0 %3136 }
 0x427   : > { %v3135_v41 = vpop.permute.xlu1 %3134  ;;  %v3238_v28 = vadd.f32 %v3137_v11, %v7691_v53 }
 0x428   : > { %v3237_v23 = vadd.f32 %v3135_v41, %v10700_v61  ;;  %v3359_v2 = vsel %vm2217_vm2, %v3357_v44, %v3358_v1 }
 0x429   : > { %3424 = vrot.lane.b32.xlu0 %v3359_v2, %s5970_s10  ;;  %v3362_v57 = vrot.slane %v3238_v28, 2 }
 0x42a   : > { %v3360_v56 = vrot.slane %v3237_v23, 2  ;;  %v3141_v6 = vpop.permute.xlu0 %3140 }
 0x42b   : > { %v3139_v16 = vpop.permute.xlu1 %3138  ;;  %v3240_v5 = vadd.f32 %v3141_v6, %v7703_v46 }
 0x42c   : > { %v3239_v55 = vadd.f32 %v3139_v16, %v10703_v31  ;;  %v3361_v59 = vsel %vm2217_vm2, %v3358_v1, %v3360_v56 }
 0x42d   : > { %v3365_v40 = vrot.slane %v3240_v5, 2  ;;  %3426 = vrot.lane.b32.xlu1 %v3361_v59, %s5970_s10  ;;  %v10717_v59 = vld [vmem:[#allocation101_spill] sm:$0xff] }
 0x42e   : > { %v3363_v51 = vrot.slane %v3239_v55, 2  ;;  %v3145_v45 = vpop.permute.xlu0 %3144 }
 0x42f   : > { %v3143_v44 = vpop.permute.xlu1 %3142  ;;  %v3242_v41 = vadd.f32 %v3145_v45, %v10607_v13  ;;  %v10721_v45 = vld [vmem:[#allocation105_spill] sm:$0xff] }
 0x430   : > { %v3241_v23 = vadd.f32 %v3143_v44, %v7705_v12  ;;  %v3364_v11 = vsel %vm2217_vm2, %v3362_v57, %v3363_v51  ;;  %v3366_v2 = vsel %vm2217_vm2, %v3363_v51, %v3365_v40  ;;  %v10718_v40 = vld [vmem:[#allocation102_spill] sm:$0xff]  ;;  %v10719_v57 = vld [vmem:[#allocation104_spill] sm:$0xff]  ;;  %v10720_v51 = vld [vmem:[#allocation103_spill] sm:$0xff] }
 0x431   : > { %v3368_v6 = vrot.slane %v3242_v41, 2  ;;  %3428 = vrot.lane.b32.xlu0 %v3364_v11, %s5970_s10  ;;  %3430 = vrot.lane.b32.xlu1 %v3366_v2, %s5970_s10  ;;  %v10722_v44 = vld [vmem:[#allocation106_spill] sm:$0xff]  ;;  %v10723_v41 = vld [vmem:[#allocation108_spill] sm:$0xff]  ;;  %v10725_v11 = vld [vmem:[#allocation109_spill] sm:$0xff] }
 0x432   : > { %v3367_v1 = vrot.slane %v3241_v23, 2  ;;  %v10724_v23 = vld [vmem:[#allocation107_spill] sm:$0xff]  ;;  %v10726_v2 = vld [vmem:[#allocation110_spill] sm:$0xff] }
 0x433   : > { %v3147_v56 = vpop.permute.xlu1 %3146 }
 0x434   : > { %v3243_v28 = vadd.f32 %v3147_v56, %v10608_v32  ;;  %v3369_v16 = vsel %vm2217_vm2, %v3367_v1, %v3368_v6  ;;  %v10728_v1 = vld [vmem:[#allocation111_spill] sm:$0xff]  ;;  %v10729_v56 = vld [vmem:[#allocation113_spill] sm:$0xff] }
 0x435   : > { %3432 = vrot.lane.b32.xlu0 %v3369_v16, %s5970_s10  ;;  %v10731_v16 = vld [vmem:[#allocation116_spill] sm:$0xff] }
 0x436   : > { %v3370_v5 = vrot.slane %v3243_v28, 2  ;;  %v10730_v28 = vld [vmem:[#allocation114_spill] sm:$0xff] }
 0x438   : > { %v3371_v55 = vsel %vm2217_vm2, %v3368_v6, %v3370_v5  ;;  %v10727_v6 = vld [vmem:[#allocation112_spill] sm:$0xff]  ;;  %v10732_v5 = vld [vmem:[#allocation115_spill] sm:$0xff] }
 0x439   : > { %3434 = vrot.lane.b32.xlu1 %v3371_v55, %s5970_s10  ;;  %4125 = vrot.lane.b32.xlu0 %v10717_v59, %s5968_s4  ;;  %v10733_v55 = vld [vmem:[#allocation117_spill] sm:$0xff]  ;;  %v2218_v59 = vrot.slane %v10626_v42, 2 }
 0x43d   : > { %4127 = vrot.lane.b32.xlu1 %v10718_v40, %s5968_s4  ;;  %4129 = vrot.lane.b32.xlu0 %v10719_v57, %s5968_s4  ;;  %v2219_v40 = vrot.slane %v10628_v19, 2  ;;  %v2909_v57 = vrot.slane %v10628_v19, 4 }
 0x441   : > { %4131 = vrot.lane.b32.xlu1 %v10720_v51, %s5968_s4  ;;  %4133 = vrot.lane.b32.xlu0 %v10721_v45, %s5968_s4  ;;  %v2908_v51 = vrot.slane %v10626_v42, 4  ;;  %v2221_v45 = vrot.slane %v10627_v36, 2 }
 0x445   : > { %4135 = vrot.lane.b32.xlu1 %v10722_v44, %s5968_s4  ;;  %4137 = vrot.lane.b32.xlu0 %v10723_v41, %s5968_s4  ;;  %v10735_v41 = vld [vmem:[#allocation118_spill] sm:$0xff] }
 0x449   : > { %4139 = vrot.lane.b32.xlu1 %v10724_v23, %s5968_s4  ;;  %4141 = vrot.lane.b32.xlu0 %v10725_v11, %s5968_s4  ;;  %v10736_v23 = vld [vmem:[#allocation120_spill] sm:$0xff]  ;;  %v2220_v11 = vsel %vm2217_vm2, %v2218_v59, %v2219_v40 }
 0x44a   : > { %v8638_v59 = vadd.f32 %v2220_v11, %v10626_v42  ;;  %v8657_v11 = vadd.f32 %v2221_v45, %v10627_v36 }
 0x44c   : > { %10740 = vst [vmem:[#allocation104_spill] sm:$0xff] %v8638_v59  ;;  %10746 = vst [vmem:[#allocation109_spill] sm:$0xff] %v8657_v11  ;;  %v2916_v59 = vrot.slane %v10632_v43, 4 }
 0x44d   : > { %4143 = vrot.lane.b32.xlu1 %v10726_v2, %s5968_s4  ;;  %4145 = vrot.lane.b32.xlu0 %v10727_v6, %s5968_s4  ;;  %v2911_v2 = vrot.slane %v10627_v36, 4  ;;  %v2910_v6 = vsel %vm2907_vm4, %v2908_v51, %v2909_v57  ;;  %v8641_v51 = vmul.f32 -24.0, %v10626_v42 }
 0x44f   : > { %v8618_v44 = vpop.permute.xlu0 %3372  ;;  %10741 = vst [vmem:[#allocation103_spill] sm:$0xff] %v8641_v51 }
 0x450   : > { %10734 = vst [vmem:[#allocation101_spill] sm:$0xff] %v8618_v44  ;;  %v8651_v44 = vadd.f32 %v2910_v6, %v10626_v42  ;;  %v10748_v42 = vld [vmem:[#allocation89_spill] sm:$0xff] }
 0x451   : > { %4147 = vrot.lane.b32.xlu1 %v10728_v1, %s5968_s4  ;;  %4149 = vrot.lane.b32.xlu0 %v10729_v56, %s5968_s4  ;;  %v2226_v1 = vrot.slane %v10632_v43, 2  ;;  %v2222_v56 = vsel %vm2217_vm2, %v2219_v40, %v2221_v45  ;;  %v8644_v40 = vmul.f32 -24.0, %v10628_v19  ;;  %v2228_v6 = vrot.slane %v10748_v42, 2  ;;  %v10750_v45 = vld [vmem:[#allocation122_spill] sm:$0xff] }
 0x452   : > { %10744 = vst [vmem:[#allocation108_spill] sm:$0xff] %v8651_v44  ;;  %v8660_v51 = vadd.f32 %v2222_v56, %v10628_v19  ;;  %v10751_v56 = vld [vmem:[#allocation124_spill] sm:$0xff] }
 0x453   : > { %10742 = vst [vmem:[#allocation105_spill] sm:$0xff] %v8644_v40  ;;  %v2912_v40 = vsel %vm2907_vm4, %v2909_v57, %v2911_v2  ;;  %v2231_v57 = vrot.slane %v10633_v27, 2  ;;  %v2229_v2 = vrot.slane %v10634_v0, 2 }
 0x454   : > { %10747 = vst [vmem:[#allocation110_spill] sm:$0xff] %v8660_v51  ;;  %v8691_v51 = vadd.f32 %v2226_v1, %v10632_v43 }
 0x455   : > { %4151 = vrot.lane.b32.xlu1 %v10730_v28, %s5968_s4  ;;  %4153 = vrot.lane.b32.xlu0 %v10731_v16, %s5968_s4  ;;  %v2224_v28 = vrot.slane %v10629_v7, 2  ;;  %v8630_v16 = vpop.permute.xlu1 %3374 }
 0x456   : > { %10737 = vst [vmem:[#allocation102_spill] sm:$0xff] %v8630_v16  ;;  %v8648_v16 = vmul.f32 -24.0, %v10630_v48 }
 0x457   : > { %v2227_v12 = vsel %vm2217_vm2, %v2224_v28, %v2226_v1 }
 0x458   : > { %10743 = vst [vmem:[#allocation106_spill] sm:$0xff] %v8648_v16  ;;  %v8694_v11 = vadd.f32 %v2227_v12, %v10629_v7  ;;  %v10760_v12 = vld [vmem:[#allocation123_spill] sm:$0xff] }
 0x459   : > { %4155 = vrot.lane.b32.xlu1 %v10732_v5, %s5968_s4  ;;  %4157 = vrot.lane.b32.xlu0 %v10733_v55, %s5968_s4  ;;  %v2914_v5 = vrot.slane %v10629_v7, 4  ;;  %v10738_v55 = vld [vmem:[#allocation119_spill] sm:$0xff]  ;;  %v8668_v32 = vpop.permute.xlu1 %3378 }
 0x45a   : > { %10749 = vst [vmem:[#allocation112_spill] sm:$0xff] %v8668_v32  ;;  %v2921_v32 = vrot.slane %v10633_v27, 4 }
 0x45b   : > { %v2917_v1 = vsel %vm2907_vm4, %v2914_v5, %v2916_v59  ;;  %v2926_v59 = vrot.slane %v10641_v3, 4 }
 0x45d   : > { %4159 = vrot.lane.b32.xlu1 %v10735_v41, %s5968_s4  ;;  %4161 = vrot.lane.b32.xlu0 %v10736_v23, %s5968_s4  ;;  %v10739_v41 = vld [vmem:[#allocation121_spill] sm:$0xff]  ;;  %v2223_v23 = vrot.slane %v10630_v48, 2 }
 0x45f   : > { %v2225_v16 = vsel %vm2217_vm2, %v2223_v23, %v2224_v28  ;;  %v2918_v28 = vrot.slane %v10748_v42, 4  ;;  %v8679_v23 = vmul.f32 -24.0, %v10629_v7 }
 0x460   : > { %v8697_v13 = vadd.f32 %v2225_v16, %v10630_v48  ;;  %v10761_v16 = vld [vmem:[#allocation125_spill] sm:$0xff] }
 0x461   : > { %4163 = vrot.lane.b32.xlu1 %v10738_v55, %s5968_s4  ;;  %4165 = vrot.lane.b32.xlu0 %v10739_v41, %s5968_s4  ;;  %v2913_v55 = vrot.slane %v10630_v48, 4  ;;  %v8654_v41 = vpop.permute.xlu0 %3376  ;;  %10752 = vst [vmem:[#allocation111_spill] sm:$0xff] %v8679_v23  ;;  %v8700_v23 = vmul.f32 -24.0, %v10632_v43  ;;  %v2230_v43 = vsel %vm2217_vm2, %v2228_v6, %v2229_v2  ;;  %v2238_v6 = vrot.slane %v10640_v63, 2 }
 0x462   : > { %10745 = vst [vmem:[#allocation107_spill] sm:$0xff] %v8654_v41  ;;  %v2919_v41 = vrot.slane %v10634_v0, 4 }
 0x463   : > { %v2915_v44 = vsel %vm2907_vm4, %v2913_v55, %v2914_v5  ;;  %v8682_v55 = vadd.f32 %v2912_v40, %v10628_v19  ;;  %10756 = vst [vmem:[#allocation115_spill] sm:$0xff] %v8700_v23  ;;  %v8703_v19 = vmul.f32 -24.0, %v10748_v42  ;;  %v8706_v40 = vmul.f32 -24.0, %v10634_v0 }
 0x464   : > { %v2924_v5 = vrot.slane %v10636_v22, 4 }
 0x465   : > { %4167 = vrot.lane.b32.xlu1 %v10750_v45, %s5968_s4  ;;  %4169 = vrot.lane.b32.xlu0 %v10751_v56, %s5968_s4  ;;  %10753 = vst [vmem:[#allocation113_spill] sm:$0xff] %v8682_v55  ;;  %v8685_v45 = vpop.permute.xlu0 %3380  ;;  %v8688_v56 = vmul.f32 -24.0, %v10627_v36  ;;  %10757 = vst [vmem:[#allocation117_spill] sm:$0xff] %v8703_v19  ;;  %v8709_v36 = vadd.f32 %v2915_v44, %v10630_v48  ;;  %v2234_v19 = vrot.slane %v10636_v22, 2  ;;  %v8722_v44 = vpop.permute.xlu1 %3382  ;;  %v10767_v55 = vld [vmem:[#allocation128_spill] sm:$0xff] }
 0x466   : > { %10754 = vst [vmem:[#allocation114_spill] sm:$0xff] %v8685_v45  ;;  %10758 = vst [vmem:[#allocation118_spill] sm:$0xff] %v8706_v40  ;;  %v2232_v45 = vsel %vm2217_vm2, %v2229_v2, %v2231_v57  ;;  %v2236_v40 = vrot.slane %v10641_v3, 2  ;;  %v2922_v48 = vsel %vm2907_vm4, %v2919_v41, %v2921_v32  ;;  %v2239_v2 = vrot.slane %v10645_v14, 2 }
 0x467   : > { %10755 = vst [vmem:[#allocation116_spill] sm:$0xff] %v8688_v56  ;;  %10759 = vst [vmem:[#allocation120_spill] sm:$0xff] %v8709_v36  ;;  %v2920_v56 = vsel %vm2907_vm4, %v2918_v28, %v2919_v41  ;;  %v8733_v28 = vadd.f32 %v2231_v57, %v10633_v27  ;;  %v8736_v32 = vadd.f32 %v2230_v43, %v10748_v42  ;;  %v8739_v41 = vmul.f32 -24.0, %v10637_v30  ;;  %v10766_v36 = vld [vmem:[#allocation126_spill] sm:$0xff] }
 0x468   : > { %10762 = vst [vmem:[#allocation119_spill] sm:$0xff] %v8722_v44  ;;  %v2923_v44 = vrot.slane %v10637_v30, 4  ;;  %v8756_v43 = vadd.f32 %v2920_v56, %v10748_v42  ;;  %v8769_v42 = vadd.f32 %v2236_v40, %v10641_v3  ;;  %v8772_v56 = vmul.f32 -24.0, %v10636_v22 }
 0x469   : > { %4171 = vrot.lane.b32.xlu1 %v10760_v12, %s5968_s4  ;;  %4173 = vrot.lane.b32.xlu0 %v10761_v16, %s5968_s4  ;;  %v2233_v12 = vrot.slane %v10637_v30, 2  ;;  %v8730_v16 = vadd.f32 %v2917_v1, %v10629_v7  ;;  %10764 = vst [vmem:[#allocation89_spill] sm:$0xff] %v8739_v41  ;;  %v8742_v23 = vpop.permute.xlu0 %3384  ;;  %v8749_v7 = vadd.f32 %v2232_v45, %v10634_v0  ;;  %v2241_v41 = vrot.slane %v10644_v4, 2 }
 0x46a   : > { %10765 = vst [vmem:[#allocation122_spill] sm:$0xff] %v8742_v23  ;;  %v8753_v1 = vadd.f32 %v2922_v48, %v10634_v0  ;;  %v2237_v23 = vsel %vm2217_vm2, %v2234_v19, %v2236_v40  ;;  %v2240_v45 = vsel %vm2217_vm2, %v2238_v6, %v2239_v2  ;;  %v2931_v0 = vrot.slane %v10644_v4, 4  ;;  %10770 = vst [vmem:[#allocation125_spill] sm:$0xff] %v8772_v56 }
 0x46b   : > { %10763 = vst [vmem:[#allocation121_spill] sm:$0xff] %v8730_v16  ;;  %v2235_v57 = vsel %vm2217_vm2, %v2233_v12, %v2234_v19  ;;  %v2927_v16 = vsel %vm2907_vm4, %v2924_v5, %v2926_v59  ;;  %v2929_v12 = vrot.slane %v10645_v14, 4  ;;  %v2928_v48 = vrot.slane %v10640_v63, 4 }
 0x46c   : > { %10768 = vst [vmem:[#allocation124_spill] sm:$0xff] %v8753_v1  ;;  %v8781_v59 = vmul.f32 -24.0, %v10633_v27  ;;  %v8784_v6 = vmul.f32 -24.0, %v10641_v3  ;;  %v8787_v40 = vadd.f32 %v2237_v23, %v10636_v22  ;;  %v8793_v56 = vmul.f32 -24.0, %v10640_v63 }
 0x46d   : > { %4175 = vrot.lane.b32.xlu1 %v10766_v36, %s5968_s4  ;;  %4177 = vrot.lane.b32.xlu0 %v10767_v55, %s5968_s4  ;;  %v2925_v36 = vsel %vm2907_vm4, %v2923_v44, %v2924_v5  ;;  %v8762_v55 = vpop.permute.xlu1 %3386  ;;  %v8774_v19 = vpop.permute.xlu0 %3388  ;;  %v10772_v44 = vld [vmem:[#allocation127_spill] sm:$0xff]  ;;  %v10773_v5 = vld [vmem:[#allocation129_spill] sm:$0xff]  ;;  %v2242_v27 = vsel %vm2217_vm2, %v2239_v2, %v2241_v41  ;;  %v8806_v23 = vadd.f32 %v2927_v16, %v10636_v22  ;;  %v2936_v2 = vrot.slane %v10653_v49, 4  ;;  %v10782_v22 = vld [vmem:[#allocation130_spill] sm:$0xff] }
 0x46e   : > { %10769 = vst [vmem:[#allocation123_spill] sm:$0xff] %v8762_v55  ;;  %10771 = vst [vmem:[#allocation126_spill] sm:$0xff] %v8774_v19  ;;  %v8790_v55 = vadd.f32 %v2235_v57, %v10637_v30  ;;  %v8803_v3 = vadd.f32 %v2925_v36, %v10637_v30  ;;  %v2246_v57 = vrot.slane %v10653_v49, 2  ;;  %v2934_v30 = vrot.slane %v10648_v17, 4  ;;  %v10783_v16 = vld [vmem:[#allocation131_spill] sm:$0xff] }
 0x46f   : > { %10774 = vst [vmem:[#allocation128_spill] sm:$0xff] %v8781_v59  ;;  %10775 = vst [vmem:[#allocation127_spill] sm:$0xff] %v8784_v6  ;;  %v2244_v6 = vrot.slane %v10648_v17, 2  ;;  %v2930_v59 = vsel %vm2907_vm4, %v2928_v48, %v2929_v12  ;;  %v2243_v36 = vrot.slane %v10649_v62, 2  ;;  %v2938_v48 = vrot.slane %v10652_v18, 4 }
 0x470   : > { %10776 = vst [vmem:[#allocation129_spill] sm:$0xff] %v8793_v56  ;;  %10779 = vst [vmem:[#allocation148_spill] sm:$0xff] %v8803_v3  ;;  %v2932_v56 = vsel %vm2907_vm4, %v2929_v12, %v2931_v0  ;;  %v8824_v12 = vmul.f32 -24.0, %v10649_v62  ;;  %v2939_v0 = vrot.slane %v10657_v47, 4 }
 0x471   : > { %4179 = vrot.lane.b32.xlu1 %v10772_v44, %s5968_s4  ;;  %4181 = vrot.lane.b32.xlu0 %v10773_v5, %s5968_s4  ;;  %v8796_v44 = vmul.f32 -24.0, %v10645_v14  ;;  %v8799_v5 = vadd.f32 %v2240_v45, %v10640_v63  ;;  %10780 = vst [vmem:[#allocation149_spill] sm:$0xff] %v8806_v23  ;;  %v2249_v45 = vrot.slane %v10657_v47, 2  ;;  %v8814_v19 = vpop.permute.xlu1 %3390  ;;  %v8832_v23 = vadd.f32 %v2242_v27, %v10645_v14  ;;  %v8838_v3 = vpop.permute.xlu0 %3392 }
 0x472   : > { %10781 = vst [vmem:[#allocation150_spill] sm:$0xff] %v8814_v19  ;;  %10784 = vst [vmem:[#allocation130_spill] sm:$0xff] %v8824_v12  ;;  %v8829_v19 = vadd.f32 %v2241_v41, %v10644_v4  ;;  %v2247_v1 = vsel %vm2217_vm2, %v2244_v6, %v2246_v57  ;;  %v2245_v12 = vsel %vm2217_vm2, %v2243_v36, %v2244_v6 }
 0x473   : > { %10777 = vst [vmem:[#allocation146_spill] sm:$0xff] %v8796_v44  ;;  %10778 = vst [vmem:[#allocation147_spill] sm:$0xff] %v8799_v5  ;;  %v2248_v44 = vrot.slane %v10652_v18, 2  ;;  %v8843_v5 = vmul.f32 -24.0, %v10648_v17  ;;  %v8846_v41 = vadd.f32 %v2930_v59, %v10640_v63  ;;  %v8859_v6 = vadd.f32 %v2246_v57, %v10653_v49 }
 0x474   : > { %10785 = vst [vmem:[#allocation131_spill] sm:$0xff] %v8832_v23  ;;  %10787 = vst [vmem:[#allocation152_spill] sm:$0xff] %v8838_v3  ;;  %v10790_v3 = vld [vmem:[#allocation132_spill] sm:$0xff]  ;;  %v2251_v63 = vrot.slane %v10656_v54, 2  ;;  %v2941_v59 = vrot.slane %v10656_v54, 4  ;;  %v8865_v36 = vadd.f32 %v2247_v1, %v10648_v17 }
 0x475   : > { %4183 = vrot.lane.b32.xlu1 %v10782_v22, %s5968_s4  ;;  %4185 = vrot.lane.b32.xlu0 %v10783_v16, %s5968_s4  ;;  %v8835_v22 = vadd.f32 %v2932_v56, %v10645_v14  ;;  %v2933_v16 = vrot.slane %v10649_v62, 4  ;;  %10788 = vst [vmem:[#allocation153_spill] sm:$0xff] %v8843_v5  ;;  %v2250_v27 = vsel %vm2217_vm2, %v2248_v44, %v2249_v45  ;;  %v8851_v56 = vpop.permute.xlu1 %3394  ;;  %v8876_v57 = vpop.permute.xlu0 %3396  ;;  %v2254_v5 = vrot.slane %v10660_v8, 2 }
 0x476   : > { %v2937_v14 = vsel %vm2907_vm4, %v2934_v30, %v2936_v2  ;;  %10789 = vst [vmem:[#allocation154_spill] sm:$0xff] %v8851_v56  ;;  %v2940_v44 = vsel %vm2907_vm4, %v2938_v48, %v2939_v0  ;;  %10794 = vst [vmem:[#allocation157_spill] sm:$0xff] %v8876_v57  ;;  %v8879_v2 = vadd.f32 %v2250_v27, %v10652_v18  ;;  %v2256_v48 = vrot.slane %v10665_v60, 2 }
 0x477   : > { %10786 = vst [vmem:[#allocation151_spill] sm:$0xff] %v8835_v22  ;;  %v2935_v23 = vsel %vm2907_vm4, %v2933_v16, %v2934_v30  ;;  %v8856_v22 = vmul.f32 -24.0, %v10644_v4  ;;  %v8868_v30 = vadd.f32 %v2245_v12, %v10649_v62  ;;  %v8874_v4 = vmul.f32 -24.0, %v10657_v47 }
 0x478   : > { %v8882_v16 = vadd.f32 %v2935_v23, %v10649_v62  ;;  %v8885_v1 = vadd.f32 %v2937_v14, %v10648_v17  ;;  %v8888_v12 = vmul.f32 -24.0, %v10653_v49  ;;  %v8896_v57 = vmul.f32 -24.0, %v10656_v54 }
 0x479   : > { %4187 = vrot.lane.b32.xlu1 %v10790_v3, %s5968_s4  ;;  %10791 = vst [vmem:[#allocation132_spill] sm:$0xff] %v8856_v22  ;;  %v8871_v3 = vmul.f32 -24.0, %v10652_v18  ;;  %10793 = vst [vmem:[#allocation156_spill] sm:$0xff] %v8874_v4  ;;  %v8893_v4 = vadd.f32 %v2940_v44, %v10652_v18  ;;  %v2252_v27 = vsel %vm2217_vm2, %v2249_v45, %v2251_v63  ;;  %v2944_v17 = vrot.slane %v10660_v8, 4  ;;  %v8908_v44 = vpop.permute.xlu1 %3398 }
 0x47a   : > { %10795 = vst [vmem:[#allocation158_spill] sm:$0xff] %v8882_v16  ;;  %10796 = vst [vmem:[#allocation159_spill] sm:$0xff] %v8888_v12  ;;  %v2942_v62 = vsel %vm2907_vm4, %v2939_v0, %v2941_v59  ;;  %v2946_v23 = vrot.slane %v10665_v60, 4  ;;  %v2253_v49 = vrot.slane %v10661_v33, 2  ;;  %v8904_v14 = vmul.f32 -24.0, %v10661_v33 }
 0x47b   : > { %10792 = vst [vmem:[#allocation155_spill] sm:$0xff] %v8871_v3  ;;  %10797 = vst [vmem:[#allocation160_spill] sm:$0xff] %v8893_v4  ;;  %v2258_v22 = vrot.slane %v10664_v58, 2  ;;  %v2259_v18 = vrot.slane %v10669_v39, 2  ;;  %v2943_v45 = vrot.slane %v10661_v33, 4  ;;  %v2949_v0 = vrot.slane %v10669_v39, 4 }
 0x47c   : > { %10798 = vst [vmem:[#allocation161_spill] sm:$0xff] %v8896_v57  ;;  %10799 = vst [vmem:[#allocation162_spill] sm:$0xff] %v8904_v14  ;;  %v8911_v57 = vadd.f32 %v2251_v63, %v10656_v54  ;;  %v2948_v59 = vrot.slane %v10664_v58, 4  ;;  %v8917_v4 = vadd.f32 %v2252_v27, %v10657_v47  ;;  %v2257_v14 = vsel %vm2217_vm2, %v2254_v5, %v2256_v48 }
 0x47d   : > { %10800 = vst [vmem:[#allocation163_spill] sm:$0xff] %v8908_v44  ;;  %v2255_v3 = vsel %vm2217_vm2, %v2253_v49, %v2254_v5  ;;  %v8922_v12 = vadd.f32 %v2942_v62, %v10657_v47  ;;  %v8924_v44 = vpop.permute.xlu0 %3400  ;;  %v8927_v54 = vmul.f32 -24.0, %v10660_v8  ;;  %v2945_v63 = vsel %vm2907_vm4, %v2943_v45, %v2944_v17  ;;  %v8939_v62 = vpop.permute.xlu1 %3402 }
 0x47e   : > { %10802 = vst [vmem:[#allocation165_spill] sm:$0xff] %v8924_v44  ;;  %v2947_v16 = vsel %vm2907_vm4, %v2944_v17, %v2946_v23  ;;  %v8932_v56 = vmul.f32 -24.0, %v10665_v60  ;;  %v8935_v27 = vadd.f32 %v2256_v48, %v10665_v60  ;;  %v2261_v5 = vrot.slane %v10668_v26, 2  ;;  %10805 = vst [vmem:[#allocation168_spill] sm:$0xff] %v8939_v62 }
 0x47f   : > { %10801 = vst [vmem:[#allocation164_spill] sm:$0xff] %v8922_v12  ;;  %10803 = vst [vmem:[#allocation166_spill] sm:$0xff] %v8927_v54  ;;  %v2260_v47 = vsel %vm2217_vm2, %v2258_v22, %v2259_v18  ;;  %v2951_v49 = vrot.slane %v10668_v26, 4  ;;  %v8943_v54 = vadd.f32 %v2257_v14, %v10660_v8  ;;  %v8946_v45 = vadd.f32 %v2255_v3, %v10661_v33 }
 0x480   : > { %10804 = vst [vmem:[#allocation167_spill] sm:$0xff] %v8932_v56  ;;  %v8949_v17 = vmul.f32 -24.0, %v10664_v58  ;;  %v2950_v60 = vsel %vm2907_vm4, %v2948_v59, %v2949_v0  ;;  %v8953_v48 = vmul.f32 -24.0, %v10669_v39  ;;  %v2264_v22 = vrot.slane %v10672_v15, 2 }
 0x481   : > { %10806 = vst [vmem:[#allocation169_spill] sm:$0xff] %v8946_v45  ;;  %v8957_v23 = vadd.f32 %v2945_v63, %v10661_v33  ;;  %v8960_v56 = vadd.f32 %v2947_v16, %v10660_v8  ;;  %v8962_v14 = vpop.permute.xlu0 %3404  ;;  %v2266_v3 = vrot.slane %v10677_v21, 2  ;;  %v8966_v12 = vadd.f32 %v2260_v47, %v10664_v58 }
 0x482   : > { %10807 = vst [vmem:[#allocation170_spill] sm:$0xff] %v8949_v17  ;;  %10808 = vst [vmem:[#allocation171_spill] sm:$0xff] %v8953_v48  ;;  %v2263_v59 = vrot.slane %v10673_v50, 2  ;;  %v8970_v17 = vmul.f32 -24.0, %v10673_v50  ;;  %v2262_v48 = vsel %vm2217_vm2, %v2259_v18, %v2261_v5  ;;  %v2952_v33 = vsel %vm2907_vm4, %v2949_v0, %v2951_v49 }
 0x483   : > { %10809 = vst [vmem:[#allocation172_spill] sm:$0xff] %v8960_v56  ;;  %10810 = vst [vmem:[#allocation173_spill] sm:$0xff] %v8962_v14  ;;  %v8975_v63 = vadd.f32 %v2950_v60, %v10664_v58  ;;  %v2954_v8 = vrot.slane %v10672_v15, 4  ;;  %v2268_v16 = vrot.slane %v10676_v29, 2  ;;  %v2269_v14 = vrot.slane %v10681_v52, 2 }
 0x484   : > { %10811 = vst [vmem:[#allocation174_spill] sm:$0xff] %v8966_v12  ;;  %10812 = vst [vmem:[#allocation175_spill] sm:$0xff] %v8970_v17  ;;  %v2953_v47 = vrot.slane %v10673_v50, 4  ;;  %v2956_v12 = vrot.slane %v10677_v21, 4  ;;  %v8983_v45 = vadd.f32 %v2261_v5, %v10668_v26  ;;  %v2265_v18 = vsel %vm2217_vm2, %v2263_v59, %v2264_v22  ;;  %v8986_v17 = vpop.permute.xlu1 %3406 }
 0x485   : > { %10813 = vst [vmem:[#allocation176_spill] sm:$0xff] %v8975_v63  ;;  %10814 = vst [vmem:[#allocation177_spill] sm:$0xff] %v8986_v17  ;;  %v2959_v58 = vrot.slane %v10681_v52, 4  ;;  %v2958_v0 = vrot.slane %v10676_v29, 4  ;;  %v2271_v49 = vrot.slane %v10680_v34, 2  ;;  %v8992_v60 = vadd.f32 %v2262_v48, %v10669_v39  ;;  %v9002_v17 = vpop.permute.xlu0 %3408 }
 0x486   : > { %v2267_v63 = vsel %vm2217_vm2, %v2264_v22, %v2266_v3  ;;  %v8996_v62 = vadd.f32 %v2952_v33, %v10669_v39  ;;  %v8999_v5 = vmul.f32 -24.0, %v10672_v15  ;;  %v2955_v59 = vsel %vm2907_vm4, %v2953_v47, %v2954_v8 }
 0x487   : > { %10815 = vst [vmem:[#allocation178_spill] sm:$0xff] %v8992_v60  ;;  %v9005_v56 = vmul.f32 -24.0, %v10668_v26  ;;  %v9008_v44 = vmul.f32 -24.0, %v10677_v21  ;;  %v9011_v48 = vadd.f32 %v2266_v3, %v10677_v21  ;;  %v9014_v22 = vadd.f32 %v2265_v18, %v10673_v50 }
 0x488   : > { %10816 = vst [vmem:[#allocation179_spill] sm:$0xff] %v8999_v5  ;;  %v2270_v39 = vsel %vm2217_vm2, %v2268_v16, %v2269_v14  ;;  %v2957_v33 = vsel %vm2907_vm4, %v2954_v8, %v2956_v12  ;;  %v9019_v47 = vadd.f32 %v2267_v63, %v10672_v15  ;;  %v9022_v5 = vmul.f32 -24.0, %v10676_v29  ;;  %v9024_v26 = vpop.permute.xlu1 %3410 }
 0x489   : > { %10817 = vst [vmem:[#allocation180_spill] sm:$0xff] %v9005_v56  ;;  %10818 = vst [vmem:[#allocation181_spill] sm:$0xff] %v9008_v44  ;;  %v2961_v44 = vrot.slane %v10680_v34, 4  ;;  %v2960_v21 = vsel %vm2907_vm4, %v2958_v0, %v2959_v58  ;;  %v2276_v3 = vrot.slane %v10689_v38, 2  ;;  %v2272_v18 = vsel %vm2217_vm2, %v2269_v14, %v2271_v49 }
 0x48a   : > { %10819 = vst [vmem:[#allocation182_spill] sm:$0xff] %v9014_v22  ;;  %10820 = vst [vmem:[#allocation183_spill] sm:$0xff] %v9019_v47  ;;  %v2274_v16 = vrot.slane %v10684_v25, 2  ;;  %v9032_v12 = vadd.f32 %v2955_v59, %v10673_v50  ;;  %v9035_v63 = vadd.f32 %v2270_v39, %v10676_v29  ;;  %v9038_v8 = vmul.f32 -24.0, %v10681_v52 }
 0x48b   : > { %10821 = vst [vmem:[#allocation184_spill] sm:$0xff] %v9022_v5  ;;  %v9041_v5 = vadd.f32 %v2957_v33, %v10672_v15  ;;  %v9043_v56 = vpop.permute.xlu0 %3412  ;;  %v2964_v0 = vrot.slane %v10684_v25, 4  ;;  %v2273_v14 = vrot.slane %v10685_v37, 2  ;;  %v9048_v22 = vmul.f32 -24.0, %v10685_v37 }
 0x48c   : > { %10822 = vst [vmem:[#allocation185_spill] sm:$0xff] %v9035_v63  ;;  %10823 = vst [vmem:[#allocation186_spill] sm:$0xff] %v9038_v8  ;;  %v9051_v50 = vadd.f32 %v2960_v21, %v10676_v29  ;;  %v2963_v59 = vrot.slane %v10685_v37, 4  ;;  %v9055_v39 = vadd.f32 %v2271_v49, %v10680_v34  ;;  %v9058_v15 = vadd.f32 %v2272_v18, %v10681_v52 }
 0x48d   : > { %10824 = vst [vmem:[#allocation187_spill] sm:$0xff] %v9043_v56  ;;  %10825 = vst [vmem:[#allocation188_spill] sm:$0xff] %v9048_v22  ;;  %v2962_v33 = vsel %vm2907_vm4, %v2959_v58, %v2961_v44  ;;  %v2966_v8 = vrot.slane %v10689_v38, 4  ;;  %v2277_v63 = vsel %vm2217_vm2, %v2274_v16, %v2276_v3  ;;  %v2275_v47 = vsel %vm2217_vm2, %v2273_v14, %v2274_v16  ;;  %v9067_v56 = vpop.permute.xlu1 %3414 }
 0x48e   : > { %10826 = vst [vmem:[#allocation189_spill] sm:$0xff] %v9051_v50  ;;  %10827 = vst [vmem:[#allocation190_spill] sm:$0xff] %v9058_v15  ;;  %v2278_v22 = vrot.slane %v10688_v9, 2  ;;  %v2279_v29 = vrot.slane %v10693_v35, 2  ;;  %v2281_v21 = vrot.slane %v10692_v20, 2  ;;  %v2965_v49 = vsel %vm2907_vm4, %v2963_v59, %v2964_v0 }
 0x48f   : > { %10828 = vst [vmem:[#allocation191_spill] sm:$0xff] %v9067_v56  ;;  %v2969_v18 = vrot.slane %v10693_v35, 4  ;;  %v2968_v44 = vrot.slane %v10688_v9, 4  ;;  %v9073_v58 = vmul.f32 -24.0, %v10684_v25  ;;  %v9076_v15 = vadd.f32 %v2962_v33, %v10681_v52  ;;  %v9093_v60 = vpop.permute.xlu0 %3416 }
 0x490   : > { %v9079_v16 = vmul.f32 -24.0, %v10680_v34  ;;  %v9082_v14 = vmul.f32 -24.0, %v10689_v38  ;;  %v9085_v56 = vadd.f32 %v2276_v3, %v10689_v38  ;;  %v9088_v59 = vadd.f32 %v2277_v63, %v10684_v25  ;;  %10835 = vst [vmem:[#allocation198_spill] sm:$0xff] %v9093_v60 }
 0x491   : > { %10829 = vst [vmem:[#allocation192_spill] sm:$0xff] %v9073_v58  ;;  %10830 = vst [vmem:[#allocation193_spill] sm:$0xff] %v9076_v15  ;;  %v9091_v50 = vadd.f32 %v2275_v47, %v10685_v37  ;;  %v2971_v52 = vrot.slane %v10692_v20, 4  ;;  %v2280_v33 = vsel %vm2217_vm2, %v2278_v22, %v2279_v29  ;;  %v2284_v34 = vrot.slane %v10696_v24, 2 }
 0x492   : > { %10831 = vst [vmem:[#allocation194_spill] sm:$0xff] %v9079_v16  ;;  %10832 = vst [vmem:[#allocation195_spill] sm:$0xff] %v9082_v14  ;;  %v9099_v58 = vadd.f32 %v2965_v49, %v10685_v37  ;;  %v2967_v38 = vsel %vm2907_vm4, %v2964_v0, %v2966_v8  ;;  %v2282_v3 = vsel %vm2217_vm2, %v2279_v29, %v2281_v21  ;;  %v2283_v63 = vrot.slane %v10697_v10, 2 }
 0x493   : > { %10833 = vst [vmem:[#allocation196_spill] sm:$0xff] %v9088_v59  ;;  %10834 = vst [vmem:[#allocation197_spill] sm:$0xff] %v9091_v50  ;;  %v9104_v14 = vpop.permute.xlu1 %3418  ;;  %v2970_v47 = vsel %vm2907_vm4, %v2968_v44, %v2969_v18  ;;  %v2974_v16 = vrot.slane %v10696_v24, 4  ;;  %v2286_v59 = vrot.slane %v10700_v61, 2  ;;  %v2288_v22 = vrot.slane %v7691_v53, 2 }
 0x494   : > { %10836 = vst [vmem:[#allocation199_spill] sm:$0xff] %v9099_v58  ;;  %10837 = vst [vmem:[#allocation200_spill] sm:$0xff] %v9104_v14  ;;  %v2976_v37 = vrot.slane %v10700_v61, 4  ;;  %v9113_v8 = vadd.f32 %v2280_v33, %v10688_v9  ;;  %v9116_v0 = vadd.f32 %v2967_v38, %v10684_v25  ;;  %v2972_v29 = vsel %vm2907_vm4, %v2969_v18, %v2971_v52 }
 0x495   : > { %v2973_v44 = vrot.slane %v10697_v10, 4  ;;  %v2285_v14 = vsel %vm2217_vm2, %v2283_v63, %v2284_v34  ;;  %v2979_v60 = vrot.slane %v10703_v31, 4  ;;  %v2981_v50 = vrot.slane %v7703_v46, 4 }
 0x496   : > { %10838 = vst [vmem:[#allocation201_spill] sm:$0xff] %v9113_v8  ;;  %10839 = vst [vmem:[#allocation202_spill] sm:$0xff] %v9116_v0  ;;  %v2978_v58 = vrot.slane %v7691_v53, 4  ;;  %v9127_v33 = vadd.f32 %v2281_v21, %v10692_v20  ;;  %v9130_v25 = vadd.f32 %v2282_v3, %v10693_v35  ;;  %v9133_v18 = vadd.f32 %v2970_v47, %v10688_v9  ;;  %v10844_v0 = vld [vmem:[#allocation80_spill] sm:$0xff]  ;;  %v10882_v9 = vld [vmem:[#allocation113_spill] sm:$0xff] }
 0x497   : > { %v9119_v49 = vpop.permute.xlu0 %3420  ;;  %v2975_v52 = vsel %vm2907_vm4, %v2973_v44, %v2974_v16  ;;  %v2287_v38 = vsel %vm2217_vm2, %v2284_v34, %v2286_v59  ;;  %v10843_v63 = vrot.slane %v10703_v31, 2  ;;  %v2984_v15 = vrot.slane %v10844_v0, 4  ;;  %v9151_v44 = vpop.permute.xlu1 %3422  ;;  %v10847_v34 = vld [vmem:[#allocation81_spill] sm:$0xff] }
 0x498   : > { %10840 = vst [vmem:[#allocation203_spill] sm:$0xff] %v9119_v49  ;;  %10841 = vst [vmem:[#allocation204_spill] sm:$0xff] %v9127_v33  ;;  %v2977_v49 = vsel %vm2907_vm4, %v2974_v16, %v2976_v37  ;;  %v9143_v21 = vadd.f32 %v2286_v59, %v10700_v61  ;;  %v9146_v3 = vadd.f32 %v2285_v14, %v10697_v10  ;;  %v2986_v20 = vrot.slane %v10847_v34, 4  ;;  %v10848_v33 = vld [vmem:[#allocation109_spill] sm:$0xff]  ;;  %v10862_v34 = vld [vmem:[#allocation87_spill] sm:$0xff] }
 0x499   : > { %10842 = vst [vmem:[#allocation205_spill] sm:$0xff] %v9130_v25  ;;  %v2290_v8 = vsel %vm2217_vm2, %v2288_v22, %v10843_v63  ;;  %v9149_v47 = vadd.f32 %v2972_v29, %v10693_v35  ;;  %v10849_v25 = vld [vmem:[#allocation83_spill] sm:$0xff]  ;;  %v2982_v16 = vsel %vm2907_vm4, %v2979_v60, %v2981_v50  ;;  %v2980_v37 = vsel %vm2907_vm4, %v2978_v58, %v2979_v60  ;;  %v10853_v50 = vld [vmem:[#allocation84_spill] sm:$0xff]  ;;  %v10854_v60 = vld [vmem:[#allocation85_spill] sm:$0xff] }
 0x49a   : > { %10845 = vst [vmem:[#allocation206_spill] sm:$0xff] %v9143_v21  ;;  %10846 = vst [vmem:[#allocation207_spill] sm:$0xff] %v9146_v3  ;;  %v2861_v22 = vadd.f32 %v10849_v25, %v10848_v33  ;;  %v10850_v63 = vld [vmem:[#allocation79_spill] sm:$0xff]  ;;  %v9160_v61 = vadd.f32 %v2287_v38, %v10696_v24  ;;  %v9163_v14 = vadd.f32 %v2290_v8, %v7691_v53  ;;  %v10855_v8 = vld [vmem:[#allocation104_spill] sm:$0xff] }
 0x49b   : > { %v2983_v59 = vrot.slane %v10850_v63, 4  ;;  %v9166_v29 = vadd.f32 %v2975_v52, %v10697_v10  ;;  %v9168_v35 = vpop.permute.xlu0 %3424  ;;  %v9171_v21 = vadd.f32 %v2977_v49, %v10696_v24  ;;  %v2864_v33 = vadd.f32 %v10853_v50, %v8691_v51  ;;  %v10859_v25 = vld [vmem:[#allocation110_spill] sm:$0xff]  ;;  %v10863_v3 = vld [vmem:[#allocation91_spill] sm:$0xff] }
 0x49c   : > { %10851 = vst [vmem:[#allocation109_spill] sm:$0xff] %v9160_v61  ;;  %10852 = vst [vmem:[#allocation83_spill] sm:$0xff] %v9163_v14  ;;  %v2867_v58 = vadd.f32 %v10854_v60, %v8733_v28  ;;  %v10856_v14 = vld [vmem:[#allocation96_spill] sm:$0xff]  ;;  %v9184_v10 = vadd.f32 %v2982_v16, %v10703_v31  ;;  %v9187_v49 = vadd.f32 %v2980_v37, %v7691_v53  ;;  %v9190_v50 = vmul.f32 2.0, %v2861_v22  ;;  %v10858_v28 = vld [vmem:[#allocation86_spill] sm:$0xff] }
 0x49d   : > { %v2985_v38 = vsel %vm2907_vm4, %v2983_v59, %v2984_v15  ;;  %v2859_v61 = vadd.f32 %v10856_v14, %v10855_v8  ;;  %v2987_v51 = vsel %vm2907_vm4, %v2984_v15, %v2986_v20  ;;  %v2870_v60 = vadd.f32 %v10858_v28, %v8769_v42  ;;  %v10860_v59 = vld [vmem:[#allocation60_spill] sm:$0xff]  ;;  %v10861_v14 = vld [vmem:[#allocation98_spill] sm:$0xff] }
 0x49e   : > { %10857 = vst [vmem:[#allocation84_spill] sm:$0xff] %v9184_v10  ;;  %v2860_v24 = vadd.f32 %v10860_v59, %v10859_v25  ;;  %v2863_v8 = vadd.f32 %v10861_v14, %v8694_v11  ;;  %v2873_v16 = vadd.f32 %v10862_v34, %v8829_v19  ;;  %v2876_v37 = vadd.f32 %v10863_v3, %v8859_v6  ;;  %v10864_v53 = vld [vmem:[#allocation88_spill] sm:$0xff]  ;;  %v10867_v25 = vld [vmem:[#allocation93_spill] sm:$0xff]  ;;  %v10868_v59 = vld [vmem:[#allocation90_spill] sm:$0xff] }
 0x49f   : > { %v9181_v52 = vpop.permute.xlu1 %3426  ;;  %v2879_v20 = vadd.f32 %v10864_v53, %v8911_v57  ;;  %v9207_v22 = vadd.f32 %v2985_v38, %v10850_v63  ;;  %v3729_v42 = vmul.f32 2.0, %v2864_v33  ;;  %v9209_v28 = vmul.f32 2.0, %v2867_v58  ;;  %v10869_v34 = vld [vmem:[#allocation95_spill] sm:$0xff]  ;;  %v10875_v63 = vld [vmem:[#allocation108_spill] sm:$0xff]  ;;  %v10891_v10 = vld [vmem:[#allocation121_spill] sm:$0xff] }
 0x4a0   : > { %v2882_v11 = vadd.f32 %v10867_v25, %v8935_v27  ;;  %v2885_v19 = vadd.f32 %v10868_v59, %v8983_v45  ;;  %v2888_v6 = vadd.f32 %v10869_v34, %v9011_v48  ;;  %v3724_v3 = vmul.f32 2.0, %v2859_v61  ;;  %v10871_v48 = vld [vmem:[#allocation61_spill] sm:$0xff] }
 0x4a1   : > { %10866 = vst [vmem:[#allocation104_spill] sm:$0xff] %v9207_v22  ;;  %v9218_v53 = vadd.f32 %v2987_v51, %v10844_v0  ;;  %v3824_v57 = vrot.slane %v9190_v50, 7  ;;  %v9221_v38 = vmul.f32 2.0, %v2870_v60  ;;  %v3725_v33 = vmul.f32 2.0, %v2860_v24 }
 0x4a2   : > { %v9223_v58 = vmul.f32 2.0, %v2863_v8  ;;  %v9225_v14 = vmul.f32 2.0, %v2873_v16  ;;  %v9227_v27 = vmul.f32 2.0, %v2876_v37  ;;  %v9229_v45 = vmul.f32 2.0, %v2879_v20  ;;  %v10874_v16 = vld [vmem:[#allocation92_spill] sm:$0xff] }
 0x4a3   : > { %v9204_v15 = vpop.permute.xlu0 %3428  ;;  %10870 = vst [vmem:[#allocation96_spill] sm:$0xff] %v9218_v53  ;;  %v2862_v61 = vadd.f32 %v10871_v48, %v8697_v13  ;;  %v9233_v25 = vpop.permute.xlu1 %3430  ;;  %v3829_v59 = vrot.slane %v3729_v42, 7  ;;  %v9238_v60 = vmul.f32 2.0, %v2882_v11  ;;  %v9240_v24 = vmul.f32 2.0, %v2885_v19  ;;  %v10876_v42 = vld [vmem:[#allocation101_spill] sm:$0xff]  ;;  %v10881_v11 = vld [vmem:[#allocation63_spill] sm:$0xff] }
 0x4a4   : > { %10865 = vst [vmem:[#allocation85_spill] sm:$0xff] %v9204_v15  ;;  %10872 = vst [vmem:[#allocation86_spill] sm:$0xff] %v9233_v25  ;;  %v9242_v8 = vmul.f32 2.0, %v2888_v6  ;;  %v2891_v37 = vadd.f32 %v10874_v16, %v9055_v39  ;;  %v3821_v20 = vrot.slane %v3724_v3, 7  ;;  %v3822_v34 = vrot.slane %v3725_v33, 7  ;;  %v10879_v16 = vld [vmem:[#allocation100_spill] sm:$0xff] }
 0x4a5   : > { %v3827_v48 = vrot.slane %v9223_v58, 7  ;;  %v3468_v0 = vadd.f32 %v10876_v42, %v10875_v63  ;;  %v10877_v50 = vmov 0.0   ;;  %v3727_v19 = vmul.f32 2.0, %v2862_v61  ;;  %v10880_v39 = vld [vmem:[#allocation103_spill] sm:$0xff] }
 0x4a6   : > { %4433 = vst.msk [vmem:[#allocation3 + $0x10] sm:$0xff] %vm4430_vm6, %v10877_v50  ;;  %4434 = vst.msk [vmem:[#allocation3 + $0x18] sm:$0xff] %vm4430_vm6, %v10877_v50  ;;  %v2865_v42 = vadd.f32 %v10879_v16, %v8736_v32  ;;  %v9276_v31 = vmul.f32 2.0, %v2891_v37  ;;  %v3949_v63 = vadd.f32 %v3821_v20, %v10880_v39  ;;  %v2866_v61 = vadd.f32 %v10881_v11, %v8749_v7  ;;  %v10884_v32 = vld [vmem:[#allocation82_spill] sm:$0xff]  ;;  %v10886_v37 = vld [vmem:[#allocation107_spill] sm:$0xff] }
 0x4a7   : > { %v9235_v51 = vpop.permute.xlu0 %3432  ;;  %4431 = vst.msk [vmem:[#allocation3] sm:$0xff] %vm4430_vm6, %v10877_v50  ;;  %4432 = vst.msk [vmem:[#allocation3 + $0x8] sm:$0xff] %vm4430_vm6, %v10877_v50  ;;  %v3823_v46 = vsel %vm3820_vm5, %v3821_v20, %v3822_v34  ;;  %v3830_v58 = vsel %vm3820_vm5, %v3827_v48, %v3829_v59  ;;  %v3825_v39 = vsel %vm3820_vm5, %v3822_v34, %v3824_v57  ;;  %v10887_v7 = vld [vmem:[#allocation97_spill] sm:$0xff]  ;;  %v10893_v57 = vld [vmem:[#allocation116_spill] sm:$0xff] }
 0x4a8   : > { %10873 = vst [vmem:[#allocation110_spill] sm:$0xff] %v9235_v51  ;;  %4436 = vst.msk [vmem:[#allocation3 + $0x120] sm:$0xff] %vm4430_vm6, %v10877_v50  ;;  %v3826_v51 = vrot.slane %v3727_v19, 7  ;;  %v9292_v20 = vadd.f32 %v10887_v7, %v9085_v56  ;;  %v3730_v11 = vmul.f32 2.0, %v2865_v42  ;;  %v10889_v19 = vld [vmem:[#allocation115_spill] sm:$0xff]  ;;  %v3951_v34 = vadd.f32 %v3825_v39, %v10893_v57  ;;  %v10899_v57 = vld [vmem:[#allocation124_spill] sm:$0xff] }
 0x4a9   : > { %4437 = vst.msk [vmem:[#allocation3 + $0x128] sm:$0xff] %vm4430_vm6, %v10877_v50  ;;  %4438 = vst.msk [vmem:[#allocation3 + $0x130] sm:$0xff] %vm4430_vm6, %v10877_v50  ;;  %v3954_v25 = vadd.f32 %v3830_v58, %v10889_v19 }
 0x4aa   : > { %4439 = vst.msk [vmem:[#allocation3 + $0x138] sm:$0xff] %vm4430_vm6, %v10877_v50  ;;  %10888 = vst [vmem:[#allocation98_spill] sm:$0xff] %v9292_v20  ;;  %v3828_v56 = vsel %vm3820_vm5, %v3826_v51, %v3827_v48  ;;  %v10901_v20 = vld [vmem:[#allocation106_spill] sm:$0xff] }
 0x4ab   : > { %v9269_v6 = vpop.permute.xlu1 %3434  ;;  %v4126_v3 = vpop.permute.xlu0 %4125 }
 0x4ac   : > { %10878 = vst [vmem:[#allocation60_spill] sm:$0xff] %v9269_v6  ;;  %v4221_v13 = vadd.f32 %v4126_v3, %v3468_v0  ;;  %v10883_v6 = vld [vmem:[#allocation102_spill] sm:$0xff]  ;;  %v2869_v0 = vadd.f32 %v10884_v32, %v8787_v40  ;;  %v10885_v3 = vld [vmem:[#allocation120_spill] sm:$0xff]  ;;  %v10890_v40 = vld [vmem:[#allocation105_spill] sm:$0xff] }
 0x4ad   : > { %v3469_v33 = vadd.f32 %v10883_v6, %v10882_v9  ;;  %v3470_v16 = vadd.f32 %v10886_v37, %v10885_v3  ;;  %v3731_v6 = vmul.f32 2.0, %v2866_v61  ;;  %v3950_v32 = vadd.f32 %v3823_v46, %v10890_v40  ;;  %v10892_v3 = vld [vmem:[#allocation112_spill] sm:$0xff]  ;;  %v10896_v46 = vld [vmem:[#allocation147_spill] sm:$0xff] }
 0x4ae   : > { %v4286_v53 = vrot.slane %v4221_v13, 6  ;;  %v3471_v37 = vadd.f32 %v10892_v3, %v10891_v10  ;;  %v3734_v42 = vmul.f32 2.0, %v2869_v0  ;;  %v3831_v0 = vrot.slane %v3730_v11, 7  ;;  %v10898_v3 = vld [vmem:[#allocation64_spill] sm:$0xff] }
 0x4af   : > { %v4128_v50 = vpop.permute.xlu1 %4127  ;;  %v4130_v22 = vpop.permute.xlu0 %4129  ;;  %v3832_v19 = vrot.slane %v3731_v6, 7  ;;  %v10904_v6 = vld [vmem:[#allocation67_spill] sm:$0xff] }
 0x4b0   : > { %v4382_v9 = vadd.f32 %v4286_v53, %v3949_v63  ;;  %v4222_v13 = vadd.f32 %v4128_v50, %v3469_v33  ;;  %v4223_v59 = vadd.f32 %v4130_v22, %v3470_v16  ;;  %v10894_v63 = vld [vmem:[#allocation65_spill] sm:$0xff]  ;;  %v10895_v22 = vld [vmem:[#allocation114_spill] sm:$0xff] }
 0x4b1   : > { %v2868_v33 = vadd.f32 %v10894_v63, %v8790_v55  ;;  %v3472_v50 = vadd.f32 %v10895_v22, %v8756_v43  ;;  %v10897_v16 = vld [vmem:[#allocation62_spill] sm:$0xff]  ;;  %v2875_v55 = vadd.f32 %v10898_v3, %v8865_v36  ;;  %v10900_v63 = vld [vmem:[#allocation119_spill] sm:$0xff]  ;;  %v10907_v3 = vld [vmem:[#allocation149_spill] sm:$0xff] }
 0x4b2   : > { %v4287_v15 = vrot.slane %v4222_v13, 6  ;;  %4488 = vrot.lane.b32.xlu0 %v4382_v9, %s5967_s2  ;;  %v2871_v7 = vadd.f32 %v10897_v16, %v10896_v46  ;;  %v4289_v40 = vrot.slane %v4223_v59, 6  ;;  %v3473_v43 = vadd.f32 %v10900_v63, %v10899_v57  ;;  %v10902_v16 = vld [vmem:[#allocation111_spill] sm:$0xff] }
 0x4b3   : > { %v4132_v58 = vpop.permute.xlu1 %4131  ;;  %v4134_v61 = vpop.permute.xlu0 %4133  ;;  %v3952_v46 = vadd.f32 %v3826_v51, %v10901_v20  ;;  %v10908_v57 = vld [vmem:[#allocation123_spill] sm:$0xff] }
 0x4b4   : > { %v4288_v10 = vsel %vm4285_vm7, %v4286_v53, %v4287_v15  ;;  %v4384_v39 = vadd.f32 %v4287_v15, %v3951_v34  ;;  %v4224_v13 = vadd.f32 %v4132_v58, %v3471_v37  ;;  %v4225_v48 = vadd.f32 %v4134_v61, %v3472_v50  ;;  %v10903_v37 = vld [vmem:[#allocation131_spill] sm:$0xff] }
 0x4b5   : > { %v4383_v9 = vadd.f32 %v4288_v10, %v3950_v32  ;;  %v3953_v53 = vadd.f32 %v3828_v56, %v10902_v16  ;;  %v3733_v15 = vmul.f32 2.0, %v2868_v33  ;;  %v2872_v32 = vadd.f32 %v10904_v6, %v10903_v37  ;;  %v10905_v33 = vld [vmem:[#allocation148_spill] sm:$0xff] }
 0x4b6   : > { %v4290_v22 = vrot.slane %v4224_v13, 6  ;;  %4492 = vrot.lane.b32.xlu0 %v4384_v39, %s5967_s2  ;;  %v3837_v34 = vrot.slane %v3734_v42, 7  ;;  %v9318_v36 = vmul.f32 2.0, %v2871_v7  ;;  %v3833_v61 = vsel %vm3820_vm5, %v3831_v0, %v3832_v19  ;;  %v10906_v39 = vld [vmem:[#allocation122_spill] sm:$0xff]  ;;  %v10909_v42 = vld [vmem:[#allocation117_spill] sm:$0xff] }
 0x4b7   : > { %v4136_v59 = vpop.permute.xlu1 %4135  ;;  %4490 = vrot.lane.b32.xlu1 %v4383_v9, %s5967_s2  ;;  %v4138_v11 = vpop.permute.xlu0 %4137  ;;  %v4385_v10 = vadd.f32 %v4289_v40, %v3952_v46  ;;  %v4292_v20 = vrot.slane %v4225_v48, 6  ;;  %v9322_v56 = vmul.f32 2.0, %v2875_v55  ;;  %v3474_v13 = vadd.f32 %v10906_v39, %v10905_v33  ;;  %v10911_v55 = vld [vmem:[#allocation69_spill] sm:$0xff] }
 0x4b8   : > { %v4291_v50 = vsel %vm4285_vm7, %v4289_v40, %v4290_v22  ;;  %v4226_v58 = vadd.f32 %v4136_v59, %v3473_v43  ;;  %v3475_v9 = vadd.f32 %v10908_v57, %v10907_v3  ;;  %v3955_v7 = vadd.f32 %v3831_v0, %v10909_v42  ;;  %v10918_v57 = vld [vmem:[#allocation150_spill] sm:$0xff] }
 0x4b9   : > { %v4386_v51 = vadd.f32 %v4291_v50, %v3953_v53  ;;  %v3836_v16 = vrot.slane %v3733_v15, 7  ;;  %v3737_v37 = vmul.f32 2.0, %v2872_v32  ;;  %v10910_v43 = vrot.slane %v9209_v28, 7  ;;  %v10912_v53 = vld [vmem:[#allocation66_spill] sm:$0xff] }
 0x4ba   : > { %v4293_v63 = vrot.slane %v4226_v58, 6  ;;  %v2874_v46 = vadd.f32 %v10911_v55, %v8868_v30  ;;  %v2877_v59 = vadd.f32 %v10912_v53, %v8879_v2  ;;  %v4227_v50 = vadd.f32 %v4138_v11, %v3474_v13  ;;  %v10913_v15 = vld [vmem:[#allocation118_spill] sm:$0xff] }
 0x4bb   : > { %v3835_v6 = vsel %vm3820_vm5, %v3832_v19, %v10910_v43  ;;  %v4140_v40 = vpop.permute.xlu1 %4139  ;;  %4494 = vrot.lane.b32.xlu1 %v4385_v10, %s5967_s2  ;;  %4496 = vrot.lane.b32.xlu0 %v4386_v51, %s5967_s2  ;;  %v4142_v48 = vpop.permute.xlu0 %4141  ;;  %v3956_v32 = vadd.f32 %v3833_v61, %v10913_v15  ;;  %v4387_v28 = vadd.f32 %v4290_v22, %v3954_v25  ;;  %v10914_v19 = vrot.slane %v9221_v38, 7  ;;  %v10915_v13 = vld [vmem:[#allocation126_spill] sm:$0xff]  ;;  %v10916_v25 = vld [vmem:[#allocation128_spill] sm:$0xff] }
 0x4bc   : > { %v9338_v0 = vadd.f32 %v4140_v40, %v3475_v9  ;;  %v4388_v58 = vadd.f32 %v4292_v20, %v3955_v7  ;;  %v3841_v51 = vrot.slane %v9318_v36, 7  ;;  %v3847_v33 = vrot.slane %v9322_v56, 7  ;;  %v10920_v40 = vld [vmem:[#allocation125_spill] sm:$0xff] }
 0x4bd   : > { %v3840_v10 = vsel %vm3820_vm5, %v3837_v34, %v10914_v19  ;;  %v4294_v30 = vsel %vm4285_vm7, %v4292_v20, %v4293_v63  ;;  %v3838_v2 = vsel %vm3820_vm5, %v3836_v16, %v3837_v34  ;;  %v3842_v11 = vrot.slane %v3737_v37, 7  ;;  %v10917_v20 = vld [vmem:[#allocation151_spill] sm:$0xff]  ;;  %v10919_v34 = vld [vmem:[#allocation89_spill] sm:$0xff]  ;;  %v10924_v19 = vld [vmem:[#allocation158_spill] sm:$0xff] }
 0x4be   : > { %v4296_v39 = vrot.slane %v9338_v0, 6  ;;  %v3476_v61 = vadd.f32 %v10915_v13, %v8846_v41  ;;  %v3957_v22 = vadd.f32 %v3835_v6, %v10916_v25  ;;  %v3739_v36 = vmul.f32 2.0, %v2874_v46 }
 0x4bf   : > { %v4144_v3 = vpop.permute.xlu1 %4143  ;;  %4498 = vrot.lane.b32.xlu1 %v4387_v28, %s5967_s2  ;;  %4500 = vrot.lane.b32.xlu0 %v4388_v58, %s5967_s2  ;;  %v4146_v38 = vpop.permute.xlu0 %4145  ;;  %v9354_v56 = vmul.f32 2.0, %v2877_v59  ;;  %v3477_v9 = vadd.f32 %v10918_v57, %v10917_v20  ;;  %v4295_v42 = vrot.slane %v4227_v50, 6  ;;  %v3958_v7 = vadd.f32 %v3836_v16, %v10919_v34  ;;  %v10922_v50 = vld [vmem:[#allocation68_spill] sm:$0xff]  ;;  %v10923_v16 = vld [vmem:[#allocation154_spill] sm:$0xff] }
 0x4c0   : > { %v4389_v37 = vadd.f32 %v4294_v30, %v3956_v32  ;;  %v4390_v43 = vadd.f32 %v4293_v63, %v3957_v22  ;;  %v4229_v41 = vadd.f32 %v4142_v48, %v3476_v61  ;;  %v3959_v6 = vadd.f32 %v3838_v2, %v10920_v40  ;;  %v10925_v30 = vld [vmem:[#allocation152_spill] sm:$0xff]  ;;  %v10928_v57 = vld [vmem:[#allocation54_spill] sm:$0xff] }
 0x4c1   : > { %v4297_v55 = vsel %vm4285_vm7, %v4295_v42, %v4296_v39  ;;  %v4230_v53 = vadd.f32 %v4144_v3, %v3477_v9  ;;  %v10921_v0 = vrot.slane %v9227_v27, 7  ;;  %v3874_v59 = vrot.slane %v9276_v31, 7  ;;  %v10927_v3 = vld [vmem:[#allocation129_spill] sm:$0xff]  ;;  %v11001_v31 = vld [vmem:[#allocation98_spill] sm:$0xff] }
 0x4c2   : > { %v3843_v15 = vsel %vm3820_vm5, %v3841_v51, %v3842_v11  ;;  %v2881_v28 = vadd.f32 %v10922_v50, %v8943_v54  ;;  %v3479_v63 = vadd.f32 %v10923_v16, %v8885_v1  ;;  %v3846_v58 = vrot.slane %v3739_v36, 7  ;;  %v10929_v36 = vld [vmem:[#allocation127_spill] sm:$0xff] }
 0x4c3   : > { %v3850_v46 = vsel %vm3820_vm5, %v3847_v33, %v10921_v0  ;;  %v4148_v48 = vpop.permute.xlu1 %4147  ;;  %4504 = vrot.lane.b32.xlu0 %v4390_v43, %s5967_s2  ;;  %4502 = vrot.lane.b32.xlu1 %v4389_v37, %s5967_s2  ;;  %v4150_v32 = vpop.permute.xlu0 %4149  ;;  %v3851_v27 = vrot.slane %v9354_v56, 7  ;;  %v3478_v2 = vadd.f32 %v10925_v30, %v10924_v19  ;;  %v10926_v13 = vrot.slane %v9225_v14, 7  ;;  %v10930_v43 = vld [vmem:[#allocation146_spill] sm:$0xff]  ;;  %v10931_v50 = vld [vmem:[#allocation159_spill] sm:$0xff]  ;;  %v10937_v19 = vld [vmem:[#allocation168_spill] sm:$0xff] }
 0x4c4   : > { %v4391_v54 = vadd.f32 %v4295_v42, %v3958_v7  ;;  %v4392_v25 = vadd.f32 %v4297_v55, %v3959_v6  ;;  %v4298_v22 = vrot.slane %v4229_v41, 6  ;;  %v9378_v1 = vadd.f32 %v4148_v48, %v3479_v63  ;;  %v10933_v41 = vld [vmem:[#allocation165_spill] sm:$0xff]  ;;  %v10936_v48 = vld [vmem:[#allocation172_spill] sm:$0xff] }
 0x4c5   : > { %v3845_v61 = vsel %vm3820_vm5, %v3842_v11, %v10926_v13  ;;  %v3961_v20 = vadd.f32 %v3841_v51, %v10927_v3  ;;  %v2878_v9 = vadd.f32 %v10928_v57, %v8917_v4  ;;  %v3960_v34 = vadd.f32 %v3840_v10, %v10929_v36  ;;  %v10932_v4 = vld [vmem:[#allocation155_spill] sm:$0xff]  ;;  %v10941_v3 = vld [vmem:[#allocation157_spill] sm:$0xff]  ;;  %v10942_v57 = vld [vmem:[#allocation164_spill] sm:$0xff] }
 0x4c6   : > { %v4299_v37 = vrot.slane %v4230_v53, 6  ;;  %v3962_v40 = vadd.f32 %v3843_v15, %v10930_v43  ;;  %v9385_v0 = vmul.f32 2.0, %v2881_v28  ;;  %v4231_v14 = vadd.f32 %v4146_v38, %v3478_v2  ;;  %v10934_v38 = vld [vmem:[#allocation132_spill] sm:$0xff]  ;;  %v10935_v53 = vld [vmem:[#allocation130_spill] sm:$0xff]  ;;  %v10944_v36 = vld [vmem:[#allocation177_spill] sm:$0xff] }
 0x4c7   : > { %v9388_v11 = vadd.f32 %v3850_v46, %v10931_v50  ;;  %v4152_v42 = vpop.permute.xlu1 %4151  ;;  %4506 = vrot.lane.b32.xlu1 %v4391_v54, %s5967_s2  ;;  %4508 = vrot.lane.b32.xlu0 %v4392_v25, %s5967_s2  ;;  %v4154_v51 = vpop.permute.xlu0 %4153  ;;  %v3848_v7 = vsel %vm3820_vm5, %v3846_v58, %v3847_v33  ;;  %v9396_v10 = vadd.f32 %v3851_v27, %v10932_v4  ;;  %v4302_v16 = vrot.slane %v9378_v1, 6  ;;  %v10938_v54 = vld [vmem:[#allocation169_spill] sm:$0xff]  ;;  %v10945_v43 = vld [vmem:[#allocation176_spill] sm:$0xff] }
 0x4c8   : > { %v3482_v6 = vadd.f32 %v10933_v41, %v8957_v23  ;;  %v3963_v55 = vadd.f32 %v3845_v61, %v10934_v38  ;;  %v3964_v46 = vadd.f32 %v3846_v58, %v10935_v53  ;;  %v4393_v15 = vadd.f32 %v4296_v39, %v3960_v34  ;;  %v10939_v23 = vld [vmem:[#allocation55_spill] sm:$0xff]  ;;  %v10940_v61 = vld [vmem:[#allocation160_spill] sm:$0xff]  ;;  %v10946_v50 = vld [vmem:[#allocation173_spill] sm:$0xff] }
 0x4c9   : > { %v4394_v28 = vadd.f32 %v4298_v22, %v3961_v20  ;;  %v3743_v63 = vmul.f32 2.0, %v2878_v9  ;;  %v3483_v33 = vadd.f32 %v10937_v19, %v10936_v48  ;;  %v4300_v30 = vsel %vm4285_vm7, %v4298_v22, %v4299_v37  ;;  %v10943_v9 = vld [vmem:[#allocation163_spill] sm:$0xff]  ;;  %v10947_v19 = vld [vmem:[#allocation153_spill] sm:$0xff] }
 0x4ca   : > { %v9406_v2 = vadd.f32 %v4154_v51, %v3482_v6  ;;  %v3857_v13 = vrot.slane %v9385_v0, 7  ;;  %v2880_v25 = vadd.f32 %v10939_v23, %v10938_v54  ;;  %v3480_v58 = vadd.f32 %v10941_v3, %v10940_v61  ;;  %v10948_v23 = vld [vmem:[#allocation174_spill] sm:$0xff]  ;;  %v10967_v0 = vld [vmem:[#allocation200_spill] sm:$0xff] }
 0x4cb   : > { %v4301_v39 = vrot.slane %v4231_v14, 6  ;;  %v4156_v20 = vpop.permute.xlu1 %4155  ;;  %4510 = vrot.lane.b32.xlu1 %v4393_v15, %s5967_s2  ;;  %4512 = vrot.lane.b32.xlu0 %v4394_v28, %s5967_s2  ;;  %v4158_v1 = vpop.permute.xlu0 %4157  ;;  %v3481_v22 = vadd.f32 %v10943_v9, %v10942_v57  ;;  %v3485_v34 = vadd.f32 %v10944_v36, %v8996_v62  ;;  %v3484_v51 = vadd.f32 %v10946_v50, %v10945_v43  ;;  %v10949_v61 = vld [vmem:[#allocation70_spill] sm:$0xff]  ;;  %v10952_v36 = vld [vmem:[#allocation57_spill] sm:$0xff] }
 0x4cc   : > { %v9421_v4 = vadd.f32 %v4156_v20, %v3483_v33  ;;  %v4395_v41 = vadd.f32 %v4300_v30, %v3962_v40  ;;  %v4396_v6 = vadd.f32 %v4299_v37, %v3963_v55  ;;  %v4233_v38 = vadd.f32 %v4150_v32, %v3480_v58  ;;  %v10954_v50 = vld [vmem:[#allocation189_spill] sm:$0xff] }
 0x4cd   : > { %v4303_v14 = vsel %vm4285_vm7, %v4301_v39, %v4302_v16  ;;  %v4234_v53 = vadd.f32 %v4152_v42, %v3481_v22  ;;  %v4307_v15 = vrot.slane %v9406_v2, 6  ;;  %v9426_v48 = vadd.f32 %v4158_v1, %v3484_v51  ;;  %v10951_v22 = vld [vmem:[#allocation178_spill] sm:$0xff]  ;;  %v10955_v51 = vld [vmem:[#allocation187_spill] sm:$0xff] }
 0x4ce   : > { %v4308_v28 = vrot.slane %v9421_v4, 6  ;;  %v3965_v54 = vadd.f32 %v3848_v7, %v10947_v19  ;;  %v3852_v62 = vrot.slane %v3743_v63, 7  ;;  %v2883_v3 = vadd.f32 %v10949_v61, %v10948_v23 }
 0x4cf   : > { %v10950_v33 = vrot.slane %v9238_v60, 7  ;;  %v4160_v32 = vpop.permute.xlu1 %4159  ;;  %4516 = vrot.lane.b32.xlu0 %v4396_v6, %s5967_s2  ;;  %4514 = vrot.lane.b32.xlu1 %v4395_v41, %s5967_s2  ;;  %v4162_v40 = vpop.permute.xlu0 %4161  ;;  %v3745_v42 = vmul.f32 2.0, %v2880_v25  ;;  %v3486_v7 = vadd.f32 %v9002_v17, %v9032_v12  ;;  %v3487_v63 = vadd.f32 %v9024_v26, %v9041_v5  ;;  %v10956_v41 = vld [vmem:[#allocation183_spill] sm:$0xff]  ;;  %v10957_v6 = vld [vmem:[#allocation53_spill] sm:$0xff] }
 0x4d0   : > { %v9447_v60 = vsel %vm4285_vm7, %v4307_v15, %v4308_v28  ;;  %v9449_v55 = vadd.f32 %v4160_v32, %v3485_v34  ;;  %v4397_v30 = vadd.f32 %v4301_v39, %v3964_v46  ;;  %v4398_v58 = vadd.f32 %v4303_v14, %v3965_v54  ;;  %v10960_v32 = vld [vmem:[#allocation156_spill] sm:$0xff] }
 0x4d1   : > { %v9436_v37 = vsel %vm3820_vm5, %v3857_v13, %v10950_v33  ;;  %v4304_v20 = vrot.slane %v4233_v38, 6  ;;  %v4305_v1 = vrot.slane %v4234_v53, 6  ;;  %v4310_v25 = vrot.slane %v9426_v48, 6  ;;  %v10958_v38 = vld [vmem:[#allocation193_spill] sm:$0xff]  ;;  %v10959_v53 = vld [vmem:[#allocation191_spill] sm:$0xff]  ;;  %v10980_v48 = vld [vmem:[#allocation180_spill] sm:$0xff] }
 0x4d2   : > { %v4311_v17 = vrot.slane %v9449_v55, 6  ;;  %v9455_v12 = vadd.f32 %v4162_v40, %v3486_v7  ;;  %v3853_v57 = vsel %vm3820_vm5, %v3851_v27, %v3852_v62  ;;  %v3748_v9 = vmul.f32 2.0, %v2883_v3  ;;  %v10961_v7 = vld [vmem:[#allocation182_spill] sm:$0xff] }
 0x4d3   : > { %v2884_v34 = vadd.f32 %v10952_v36, %v10951_v22  ;;  %v10953_v5 = vrot.slane %v9229_v45, 7  ;;  %v4164_v46 = vpop.permute.xlu1 %4163  ;;  %4518 = vrot.lane.b32.xlu1 %v4397_v30, %s5967_s2  ;;  %4520 = vrot.lane.b32.xlu0 %v4398_v58, %s5967_s2  ;;  %v4166_v39 = vpop.permute.xlu0 %4165  ;;  %v3856_v43 = vrot.slane %v3745_v42, 7  ;;  %v3488_v56 = vadd.f32 %v10955_v51, %v10954_v50  ;;  %v10963_v58 = vld [vmem:[#allocation161_spill] sm:$0xff]  ;;  %v10966_v51 = vld [vmem:[#allocation202_spill] sm:$0xff] }
 0x4d4   : > { %v9474_v27 = vsel %vm4285_vm7, %v4310_v25, %v4311_v17  ;;  %v9476_v45 = vadd.f32 %v4164_v46, %v3487_v63  ;;  %v2887_v14 = vadd.f32 %v10957_v6, %v10956_v41  ;;  %v3489_v19 = vadd.f32 %v10959_v53, %v10958_v38  ;;  %v10962_v63 = vld [vmem:[#allocation71_spill] sm:$0xff]  ;;  %v10968_v38 = vld [vmem:[#allocation162_spill] sm:$0xff] }
 0x4d5   : > { %v3855_v26 = vsel %vm3820_vm5, %v3852_v62, %v10953_v5  ;;  %v4399_v54 = vadd.f32 %v4302_v16, %v9388_v11  ;;  %v4400_v62 = vadd.f32 %v4304_v20, %v9396_v10  ;;  %v4306_v23 = vsel %vm4285_vm7, %v4304_v20, %v4305_v1  ;;  %v10964_v16 = vld [vmem:[#allocation199_spill] sm:$0xff]  ;;  %v10965_v20 = vld [vmem:[#allocation198_spill] sm:$0xff] }
 0x4d6   : > { %v4313_v61 = vrot.slane %v9455_v12, 6  ;;  %v4314_v3 = vrot.slane %v9476_v45, 6  ;;  %v9487_v33 = vadd.f32 %v4166_v39, %v3488_v56  ;;  %v3968_v40 = vadd.f32 %v3853_v57, %v10960_v32 }
 0x4d7   : > { %v3749_v42 = vmul.f32 2.0, %v2884_v34  ;;  %v2886_v30 = vadd.f32 %v10962_v63, %v10961_v7  ;;  %v3969_v22 = vadd.f32 %v3855_v26, %v10963_v58  ;;  %v4168_v36 = vpop.permute.xlu1 %4167  ;;  %4522 = vrot.lane.b32.xlu1 %v4399_v54, %s5967_s2  ;;  %4524 = vrot.lane.b32.xlu0 %v4400_v62, %s5967_s2  ;;  %v4170_v11 = vpop.permute.xlu0 %4169  ;;  %v3858_v10 = vsel %vm3820_vm5, %v3856_v43, %v3857_v13  ;;  %v10969_v54 = vld [vmem:[#allocation166_spill] sm:$0xff]  ;;  %v10973_v58 = vld [vmem:[#allocation56_spill] sm:$0xff] }
 0x4d8   : > { %v3490_v5 = vadd.f32 %v10965_v20, %v10964_v16  ;;  %v9505_v57 = vsel %vm4285_vm7, %v4313_v61, %v4314_v3  ;;  %v9507_v34 = vadd.f32 %v4168_v36, %v3489_v19  ;;  %v3861_v26 = vrot.slane %v3748_v9, 7  ;;  %v10970_v9 = vld [vmem:[#allocation203_spill] sm:$0xff]  ;;  %v10974_v20 = vld [vmem:[#allocation170_spill] sm:$0xff] }
 0x4d9   : > { %v3752_v46 = vmul.f32 2.0, %v2887_v14  ;;  %v4401_v39 = vadd.f32 %v4306_v23, %v3968_v40  ;;  %v4402_v50 = vadd.f32 %v4305_v1, %v3969_v22  ;;  %v3491_v56 = vadd.f32 %v10967_v0, %v10966_v51  ;;  %v10971_v23 = vld [vmem:[#allocation167_spill] sm:$0xff]  ;;  %v10976_v51 = vld [vmem:[#allocation134_spill] sm:$0xff] }
 0x4da   : > { %v4316_v13 = vrot.slane %v9487_v33, 6  ;;  %v4317_v41 = vrot.slane %v9507_v34, 6  ;;  %v9513_v6 = vadd.f32 %v4170_v11, %v3490_v5  ;;  %v3970_v53 = vadd.f32 %v3856_v43, %v10968_v38  ;;  %v11011_v33 = vld [vmem:[#allocation207_spill] sm:$0xff] }
 0x4db   : > { %v3971_v62 = vadd.f32 %v3858_v10, %v10969_v54  ;;  %v3862_v32 = vrot.slane %v3749_v42, 7  ;;  %v3751_v19 = vmul.f32 2.0, %v2886_v30  ;;  %v4172_v7 = vpop.permute.xlu1 %4171  ;;  %4528 = vrot.lane.b32.xlu0 %v4402_v50, %s5967_s2  ;;  %4526 = vrot.lane.b32.xlu1 %v4401_v39, %s5967_s2  ;;  %v4174_v1 = vpop.permute.xlu0 %4173  ;;  %v3492_v14 = vadd.f32 %v10970_v9, %v9133_v18  ;;  %v10972_v30 = vld [vmem:[#allocation185_spill] sm:$0xff]  ;;  %v10975_v50 = vld [vmem:[#allocation190_spill] sm:$0xff] }
 0x4dc   : > { %v3972_v40 = vadd.f32 %v9436_v37, %v10971_v23  ;;  %v9528_v43 = vsel %vm4285_vm7, %v4316_v13, %v4317_v41  ;;  %v9530_v42 = vadd.f32 %v4172_v7, %v3491_v56  ;;  %v3867_v63 = vrot.slane %v3752_v46, 7  ;;  %v10979_v7 = vld [vmem:[#allocation171_spill] sm:$0xff]  ;;  %v10983_v23 = vld [vmem:[#allocation85_spill] sm:$0xff] }
 0x4dd   : > { %v2889_v22 = vadd.f32 %v10973_v58, %v10972_v30  ;;  %v4403_v36 = vadd.f32 %v4307_v15, %v3970_v53  ;;  %v4404_v18 = vadd.f32 %v9447_v60, %v3971_v62  ;;  %v3493_v37 = vadd.f32 %v9151_v44, %v9149_v47 }
 0x4de   : > { %v4319_v11 = vrot.slane %v9513_v6, 6  ;;  %v4320_v10 = vrot.slane %v9530_v42, 6  ;;  %v9541_v16 = vadd.f32 %v4174_v1, %v3492_v14  ;;  %v3973_v5 = vadd.f32 %v3861_v26, %v10974_v20 }
 0x4df   : > { %v3863_v46 = vsel %vm3820_vm5, %v3861_v26, %v3862_v32  ;;  %v3866_v39 = vrot.slane %v3751_v19, 7  ;;  %v2890_v2 = vadd.f32 %v10976_v51, %v10975_v50  ;;  %v4176_v15 = vpop.permute.xlu1 %4175  ;;  %4530 = vrot.lane.b32.xlu1 %v4403_v36, %s5967_s2  ;;  %4532 = vrot.lane.b32.xlu0 %v4404_v18, %s5967_s2  ;;  %v4178_v47 = vpop.permute.xlu0 %4177  ;;  %v3494_v44 = vadd.f32 %v9168_v35, %v9166_v29  ;;  %v10985_v36 = vld [vmem:[#allocation133_spill] sm:$0xff] }
 0x4e0   : > { %v10977_v60 = vrot.slane %v9240_v24, 7  ;;  %v9559_v26 = vsel %vm4285_vm7, %v4319_v11, %v4320_v10  ;;  %v9561_v56 = vadd.f32 %v4176_v15, %v3493_v37  ;;  %v3754_v38 = vmul.f32 2.0, %v2889_v22  ;;  %v10984_v22 = vld [vmem:[#allocation196_spill] sm:$0xff]  ;;  %v10988_v15 = vld [vmem:[#allocation175_spill] sm:$0xff] }
 0x4e1   : > { %v4405_v53 = vadd.f32 %v4308_v28, %v3972_v40  ;;  %v4406_v35 = vadd.f32 %v4310_v25, %v3973_v5  ;;  %v10978_v29 = vrot.slane %v9242_v8, 7  ;;  %v3495_v54 = vadd.f32 %v9181_v52, %v9171_v21  ;;  %v10981_v21 = vld [vmem:[#allocation197_spill] sm:$0xff]  ;;  %v10982_v52 = vld [vmem:[#allocation136_spill] sm:$0xff] }
 0x4e2   : > { %v3865_v0 = vsel %vm3820_vm5, %v3862_v32, %v10977_v60  ;;  %v4322_v62 = vrot.slane %v9541_v16, 6  ;;  %v4323_v32 = vrot.slane %v9561_v56, 6  ;;  %v9574_v19 = vadd.f32 %v4178_v47, %v3494_v44  ;;  %v10986_v5 = vld [vmem:[#allocation84_spill] sm:$0xff]  ;;  %v10989_v44 = vld [vmem:[#allocation179_spill] sm:$0xff] }
 0x4e3   : > { %v3870_v24 = vsel %vm3820_vm5, %v3867_v63, %v10978_v29  ;;  %v3974_v1 = vadd.f32 %v3863_v46, %v10979_v7  ;;  %v3868_v4 = vsel %vm3820_vm5, %v3866_v39, %v3867_v63  ;;  %v3755_v28 = vmul.f32 2.0, %v2890_v2  ;;  %v4180_v9 = vpop.permute.xlu1 %4179  ;;  %4534 = vrot.lane.b32.xlu1 %v4405_v53, %s5967_s2  ;;  %4536 = vrot.lane.b32.xlu0 %v4406_v35, %s5967_s2  ;;  %v4182_v8 = vpop.permute.xlu0 %4181  ;;  %v10991_v35 = vld [vmem:[#allocation104_spill] sm:$0xff]  ;;  %v10992_v29 = vld [vmem:[#allocation110_spill] sm:$0xff] }
 0x4e4   : > { %v3975_v25 = vadd.f32 %v3865_v0, %v10980_v48  ;;  %v2892_v14 = vadd.f32 %v10982_v52, %v10981_v21  ;;  %v3496_v40 = vadd.f32 %v10983_v23, %v9187_v49  ;;  %v9590_v63 = vsel %vm4285_vm7, %v4322_v62, %v4323_v32  ;;  %v10987_v49 = vld [vmem:[#allocation86_spill] sm:$0xff]  ;;  %v11029_v16 = vld [vmem:[#allocation144_spill] sm:$0xff] }
 0x4e5   : > { %v9592_v30 = vadd.f32 %v4180_v9, %v3495_v54  ;;  %v3871_v58 = vrot.slane %v3754_v38, 7  ;;  %v2893_v18 = vadd.f32 %v10985_v36, %v10984_v22  ;;  %v4407_v37 = vadd.f32 %v9474_v27, %v3974_v1  ;;  %v10990_v38 = vld [vmem:[#allocation181_spill] sm:$0xff]  ;;  %v10995_v9 = vld [vmem:[#allocation60_spill] sm:$0xff] }
 0x4e6   : > { %v4408_v20 = vadd.f32 %v4311_v17, %v3975_v25  ;;  %v3497_v46 = vadd.f32 %v10987_v49, %v10986_v5  ;;  %v4325_v50 = vrot.slane %v9574_v19, 6  ;;  %v9603_v2 = vadd.f32 %v4182_v8, %v3496_v40  ;;  %v10994_v25 = vld [vmem:[#allocation96_spill] sm:$0xff]  ;;  %v10997_v36 = vld [vmem:[#allocation201_spill] sm:$0xff]  ;;  %v11000_v5 = vld [vmem:[#allocation138_spill] sm:$0xff] }
 0x4e7   : > { %v4326_v51 = vrot.slane %v9592_v30, 6  ;;  %v3976_v47 = vadd.f32 %v3866_v39, %v10988_v15  ;;  %v3977_v60 = vadd.f32 %v3868_v4, %v10989_v44  ;;  %v3872_v0 = vrot.slane %v3755_v28, 7  ;;  %v4184_v27 = vpop.permute.xlu1 %4183  ;;  %4538 = vrot.lane.b32.xlu1 %v4407_v37, %s5967_s2  ;;  %v4186_v55 = vpop.permute.xlu0 %4185  ;;  %v10996_v40 = vld [vmem:[#allocation72_spill] sm:$0xff]  ;;  %v11002_v15 = vld [vmem:[#allocation78_spill] sm:$0xff]  ;;  %v11004_v44 = vld [vmem:[#allocation77_spill] sm:$0xff] }
 0x4e8   : > { %v3978_v53 = vadd.f32 %v3870_v24, %v10990_v38  ;;  %4540 = vrot.lane.b32.xlu0 %v4408_v20, %s5967_s2  ;;  %v3757_v17 = vmul.f32 2.0, %v2892_v14  ;;  %v3498_v54 = vadd.f32 %v10992_v29, %v10991_v35  ;;  %v9619_v7 = vadd.f32 %v4184_v27, %v3497_v46  ;;  %v10993_v24 = vld [vmem:[#allocation184_spill] sm:$0xff]  ;;  %v10999_v20 = vld [vmem:[#allocation205_spill] sm:$0xff] }
 0x4e9   : > { %v9617_v39 = vsel %vm4285_vm7, %v4325_v50, %v4326_v51  ;;  %v3979_v1 = vadd.f32 %v3871_v58, %v10993_v24  ;;  %v3758_v4 = vmul.f32 2.0, %v2893_v18  ;;  %v4409_v28 = vadd.f32 %v4313_v61, %v3976_v47  ;;  %v10998_v18 = vld [vmem:[#allocation135_spill] sm:$0xff] }
 0x4ea   : > { %v4410_v48 = vadd.f32 %v9505_v57, %v3977_v60  ;;  %v3499_v8 = vadd.f32 %v10995_v9, %v10994_v25  ;;  %v4328_v21 = vrot.slane %v9603_v2, 6  ;;  %v4329_v52 = vrot.slane %v9619_v7, 6  ;;  %v11009_v9 = vld [vmem:[#allocation80_spill] sm:$0xff] }
 0x4eb   : > { %v9629_v14 = vadd.f32 %v4186_v55, %v3498_v54  ;;  %v3873_v23 = vsel %vm3820_vm5, %v3871_v58, %v3872_v0  ;;  %v3712_v22 = vmul.f32 -24.0, %v10996_v40  ;;  %v2895_v37 = vadd.f32 %v10998_v18, %v10997_v36  ;;  %v4188_v61 = vpop.permute.xlu1 %4187  ;;  %4542 = vrot.lane.b32.xlu1 %v4409_v28, %s5967_s2  ;;  %v11006_v55 = vld [vmem:[#allocation204_spill] sm:$0xff]  ;;  %v11008_v28 = vld [vmem:[#allocation186_spill] sm:$0xff] }
 0x4ec   : > { %v3875_v12 = vsel %vm3820_vm5, %v3872_v0, %v3874_v59  ;;  %4544 = vrot.lane.b32.xlu0 %v4410_v48, %s5967_s2  ;;  %v3876_v57 = vrot.slane %v3757_v17, 7  ;;  %v2896_v49 = vadd.f32 %v11000_v5, %v10999_v20  ;;  %v9647_v58 = vsel %vm4285_vm7, %v4328_v21, %v4329_v52  ;;  %v11007_v17 = vld [vmem:[#allocation94_spill] sm:$0xff]  ;;  %v11015_v5 = vld [vmem:[#allocation99_spill] sm:$0xff] }
 0x4ed   : > { %v9649_v46 = vadd.f32 %v4188_v61, %v3499_v8  ;;  %v3759_v59 = vmul.f32 2.0, %v11001_v31  ;;  %v11003_v47 = vrot.slane %v11002_v15, 2  ;;  %v11005_v60 = vrot.slane %v11004_v44, 2  ;;  %v11010_v40 = vld [vmem:[#allocation194_spill] sm:$0xff]  ;;  %v11016_v31 = vld [vmem:[#allocation109_spill] sm:$0xff] }
 0x4ee   : > { %v4411_v38 = vadd.f32 %v4314_v3, %v3978_v53  ;;  %v4412_v27 = vadd.f32 %v4316_v13, %v3979_v1  ;;  %v2897_v35 = vadd.f32 %v11007_v17, %v11006_v55  ;;  %v3877_v29 = vrot.slane %v3758_v4, 7  ;;  %v11012_v13 = vld [vmem:[#allocation140_spill] sm:$0xff]  ;;  %v11014_v20 = vld [vmem:[#allocation206_spill] sm:$0xff] }
 0x4ef   : > { %v2292_v0 = vsel %vm2217_vm2, %v11005_v60, %v11003_v47  ;;  %v4331_v54 = vrot.slane %v9629_v14, 6  ;;  %v4332_v24 = vrot.slane %v9649_v46, 6  ;;  %v3980_v48 = vadd.f32 %v3873_v23, %v11008_v28  ;;  %v11013_v23 = vld [vmem:[#allocation81_spill] sm:$0xff]  ;;  %v11019_v55 = vld [vmem:[#allocation188_spill] sm:$0xff] }
 0x4f0   : > { %v3760_v25 = vmul.f32 2.0, %v2895_v37  ;;  %v2294_v8 = vrot.slane %v11009_v9, 2  ;;  %v3981_v36 = vadd.f32 %v3875_v12, %v11010_v40  ;;  %4546 = vrot.lane.b32.xlu1 %v4411_v38, %s5967_s2  ;;  %4548 = vrot.lane.b32.xlu0 %v4412_v27, %s5967_s2  ;;  %v3878_v45 = vsel %vm3820_vm5, %v3876_v57, %v3877_v29  ;;  %v11017_v47 = vld [vmem:[#allocation137_spill] sm:$0xff]  ;;  %v11018_v38 = vld [vmem:[#allocation79_spill] sm:$0xff]  ;;  %v11020_v28 = vld [vmem:[#allocation192_spill] sm:$0xff] }
 0x4f1   : > { %v3761_v3 = vmul.f32 2.0, %v2896_v49  ;;  %v2898_v53 = vadd.f32 %v11012_v13, %v11011_v33  ;;  %v9678_v1 = vsel %vm4285_vm7, %v4331_v54, %v4332_v24  ;;  %v3879_v4 = vrot.slane %v3759_v59, 7 }
 0x4f2   : > { %v2296_v18 = vrot.slane %v11013_v23, 2  ;;  %v4413_v37 = vadd.f32 %v9528_v43, %v3980_v48  ;;  %v4414_v12 = vadd.f32 %v4317_v41, %v3981_v36  ;;  %v3762_v61 = vmul.f32 2.0, %v2897_v35 }
 0x4f3   : > { %v2900_v49 = vadd.f32 %v11015_v5, %v11014_v20  ;;  %v2899_v60 = vadd.f32 %v11017_v47, %v11016_v31  ;;  %v2293_v27 = vrot.slane %v11018_v38, 2  ;;  %v3982_v17 = vadd.f32 %v3876_v57, %v11019_v55  ;;  %v11025_v5 = vld [vmem:[#allocation142_spill] sm:$0xff] }
 0x4f4   : > { %v3983_v59 = vadd.f32 %v3878_v45, %v11020_v28  ;;  %v3881_v40 = vrot.slane %v3760_v25, 7  ;;  %v3880_v33 = vsel %vm3820_vm5, %v3877_v29, %v3879_v4  ;;  %4552 = vrot.lane.b32.xlu0 %v4414_v12, %s5967_s2  ;;  %4550 = vrot.lane.b32.xlu1 %v4413_v37, %s5967_s2  ;;  %v3882_v34 = vrot.slane %v3761_v3, 7  ;;  %v11022_v3 = vld [vmem:[#allocation195_spill] sm:$0xff] }
 0x4f5   : > { %v3763_v41 = vmul.f32 2.0, %v2898_v53  ;;  %v2389_v43 = vadd.f32 %v2292_v0, %v11004_v44  ;;  %v11021_v35 = vrot.slane %v11002_v15, 2  ;;  %v2295_v36 = vsel %vm2217_vm2, %v2293_v27, %v2294_v8  ;;  %v11023_v0 = vld [vmem:[#allocation83_spill] sm:$0xff] }
 0x4f6   : > { %v2297_v57 = vsel %vm2217_vm2, %v2294_v8, %v2296_v18  ;;  %v4415_v25 = vadd.f32 %v4319_v11, %v3982_v17  ;;  %v4416_v29 = vadd.f32 %v9559_v26, %v3983_v59  ;;  %v3884_v45 = vrot.slane %v3762_v61, 7  ;;  %v11024_v12 = vld [vmem:[#allocation139_spill] sm:$0xff]  ;;  %v11026_v8 = vld [vmem:[#allocation141_spill] sm:$0xff] }
 0x4f7   : > { %v2390_v48 = vadd.f32 %v11021_v35, %v11002_v15  ;;  %v3765_v13 = vmul.f32 2.0, %v2900_v49  ;;  %v3764_v4 = vmul.f32 2.0, %v2899_v60  ;;  %v3984_v53 = vadd.f32 %v3880_v33, %v11022_v3  ;;  %v11027_v49 = vld [vmem:[#allocation58_spill] sm:$0xff]  ;;  %v11028_v27 = vld [vmem:[#allocation59_spill] sm:$0xff] }
 0x4f8   : > { %v3985_v37 = vadd.f32 %v3881_v40, %v3712_v22  ;;  %v2901_v20 = vadd.f32 %v11024_v12, %v11023_v0  ;;  %v2902_v31 = vadd.f32 %v11025_v5, %v2389_v43  ;;  %4554 = vrot.lane.b32.xlu1 %v4415_v25, %s5967_s2  ;;  %4556 = vrot.lane.b32.xlu0 %v4416_v29, %s5967_s2  ;;  %v3886_v11 = vrot.slane %v3763_v41, 7  ;;  %v11030_v35 = vld [vmem:[#allocation143_spill] sm:$0xff]  ;;  %v11031_v25 = vld [vmem:[#allocation73_spill] sm:$0xff] }
 0x4f9   : > { %v3883_v6 = vsel %vm3820_vm5, %v3881_v40, %v3882_v34  ;;  %v2903_v26 = vadd.f32 %v11026_v8, %v2390_v48  ;;  %v3885_v61 = vsel %vm3820_vm5, %v3882_v34, %v3884_v45  ;;  %v3713_v47 = vmul.f32 -24.0, %v11027_v49  ;;  %v11034_v8 = vld [vmem:[#allocation76_spill] sm:$0xff] }
 0x4fa   : > { %v4417_v22 = vadd.f32 %v4320_v10, %v3984_v53  ;;  %v4418_v60 = vadd.f32 %v4322_v62, %v3985_v37  ;;  %v3714_v55 = vmul.f32 -24.0, %v11028_v27  ;;  %v3889_v17 = vrot.slane %v3765_v13, 7 }
 0x4fb   : > { %v3887_v28 = vrot.slane %v3764_v4, 7  ;;  %v2391_v59 = vadd.f32 %v2295_v36, %v11018_v38  ;;  %v2392_v40 = vadd.f32 %v2297_v57, %v11009_v9  ;;  %v3986_v33 = vadd.f32 %v3883_v6, %v3713_v47  ;;  %v11032_v36 = vld [vmem:[#allocation74_spill] sm:$0xff]  ;;  %v11033_v6 = vld [vmem:[#allocation145_spill] sm:$0xff] }
 0x4fc   : > { %v3766_v41 = vmul.f32 2.0, %v2901_v20  ;;  %v3767_v43 = vmul.f32 2.0, %v2902_v31  ;;  %v3987_v34 = vadd.f32 %v3885_v61, %v3714_v55  ;;  %4558 = vrot.lane.b32.xlu1 %v4417_v22, %s5967_s2  ;;  %4560 = vrot.lane.b32.xlu0 %v4418_v60, %s5967_s2  ;;  %v3768_v10 = vmul.f32 2.0, %v2903_v26 }
 0x4fd   : > { %v3888_v42 = vsel %vm3820_vm5, %v3886_v11, %v3887_v28  ;;  %v2904_v62 = vadd.f32 %v11029_v16, %v2391_v59  ;;  %v2905_v48 = vadd.f32 %v11030_v35, %v2392_v40  ;;  %v3715_v29 = vmul.f32 -24.0, %v11031_v25  ;;  %v4684_v16 = vld [vmem:[#allocation3 + $0x8] sm:$0xff]  ;;  %v4685_v35 = vld [vmem:[#allocation3 + $0x10] sm:$0xff] }
 0x4fe   : > { %v3716_v45 = vmul.f32 -24.0, %v11032_v36  ;;  %v4419_v57 = vadd.f32 %v9590_v63, %v3986_v33  ;;  %v4420_v13 = vadd.f32 %v4323_v32, %v3987_v34  ;;  %v2393_v4 = vadd.f32 %v2296_v18, %v11013_v23  ;;  %v11035_v18 = vld [vmem:[#allocation75_spill] sm:$0xff] }
 0x4ff   : > { %v3890_v3 = vsel %vm3820_vm5, %v3887_v28, %v3889_v17  ;;  %v3988_v53 = vadd.f32 %v3886_v11, %v3715_v29  ;;  %v3891_v0 = vrot.slane %v3766_v41, 7  ;;  %v3892_v12 = vrot.slane %v3767_v43, 7 }
 0x500   : > { %v3989_v37 = vadd.f32 %v3888_v42, %v3716_v45  ;;  %4564 = vrot.lane.b32.xlu0 %v4420_v13, %s5967_s2  ;;  %4562 = vrot.lane.b32.xlu1 %v4419_v57, %s5967_s2  ;;  %v3894_v20 = vrot.slane %v3768_v10, 7  ;;  %v3769_v5 = vmul.f32 2.0, %v2904_v62  ;;  %v3770_v31 = vmul.f32 2.0, %v2905_v48  ;;  %v4683_v42 = vld [vmem:[#allocation3] sm:$0xff]  ;;  %v4686_v48 = vld [vmem:[#allocation3 + $0x18] sm:$0xff]  ;;  %v11036_v45 = vld [vmem:[#allocation22_spill] sm:$0xff] }
 0x501   : > { %v2906_v63 = vadd.f32 %v11033_v6, %v2393_v4  ;;  %v3718_v56 = vmul.f32 -24.0, %v11034_v8  ;;  %v4421_v32 = vadd.f32 %v4325_v50, %v3988_v53  ;;  %v3717_v26 = vmul.f32 -24.0, %v11035_v18 }
 0x502   : > { %v4422_v11 = vadd.f32 %v9617_v39, %v3989_v37  ;;  %v3893_v49 = vsel %vm3820_vm5, %v3891_v0, %v3892_v12  ;;  %v3896_v22 = vrot.slane %v3769_v5, 7  ;;  %v3897_v60 = vrot.slane %v3770_v31, 7  ;;  %v11037_v37 = vld [vmem:[#allocation24_spill] sm:$0xff] }
 0x503   : > { %v3991_v61 = vadd.f32 %v3891_v0, %v3718_v56  ;;  %v3990_v47 = vadd.f32 %v3890_v3, %v3717_v26  ;;  %v3771_v27 = vmul.f32 2.0, %v2906_v63  ;;  %v3895_v55 = vsel %vm3820_vm5, %v3892_v12, %v3894_v20  ;;  %v11038_v26 = vld [vmem:[#allocation21_spill] sm:$0xff] }
 0x504   : > { %4566 = vrot.lane.b32.xlu1 %v4421_v32, %s5967_s2  ;;  %4568 = vrot.lane.b32.xlu0 %v4422_v11, %s5967_s2  ;;  %v3719_v19 = vmul.f32 -24.0, %v11004_v44  ;;  %v3720_v17 = vmul.f32 -24.0, %v11002_v15  ;;  %v3898_v40 = vsel %vm3820_vm5, %v3896_v22, %v3897_v60  ;;  %v3721_v41 = vmul.f32 -24.0, %v11018_v38 }
 0x505   : > { %v4423_v50 = vadd.f32 %v4326_v51, %v3990_v47  ;;  %v4424_v39 = vadd.f32 %v4328_v21, %v3991_v61  ;;  %v3899_v33 = vrot.slane %v3771_v27, 7  ;;  %v3722_v44 = vmul.f32 -24.0, %v11009_v9 }
 0x506   : > { %v3992_v28 = vadd.f32 %v3893_v49, %v3719_v19  ;;  %v3993_v59 = vadd.f32 %v3895_v55, %v3720_v17  ;;  %v3994_v2 = vadd.f32 %v3896_v22, %v3721_v41  ;;  %v3723_v38 = vmul.f32 -24.0, %v11013_v23 }
 0x507   : > { %v3995_v21 = vadd.f32 %v3898_v40, %v3722_v44  ;;  %v3900_v15 = vsel %vm3820_vm5, %v3897_v60, %v3899_v33  ;;  %v4748_v36 = vadd.f32 %v4685_v35, %v4683_v42  ;;  %v4974_v57 = vmul.f32 0.05, %v11036_v45 }
 0x508   : > { %4570 = vrot.lane.b32.xlu1 %v4423_v50, %s5967_s2  ;;  %4572 = vrot.lane.b32.xlu0 %v4424_v39, %s5967_s2  ;;  %v4425_v30 = vadd.f32 %v9647_v58, %v3992_v28  ;;  %v4426_v51 = vadd.f32 %v4329_v52, %v3993_v59  ;;  %v4427_v43 = vadd.f32 %v4331_v54, %v3994_v2  ;;  %v5006_v53 = vsub.f32 1.0, %v11036_v45  ;;  %v11039_v2 = vld [vmem:[#allocation23_spill] sm:$0xff] }
 0x509   : > { %v4428_v9 = vadd.f32 %v9678_v1, %v3995_v21  ;;  %v3996_v34 = vadd.f32 %v3900_v15, %v3723_v38  ;;  %v4749_v13 = vadd.f32 %v4686_v48, %v4684_v16  ;;  %v4975_v0 = vmul.f32 0.05, %v11037_v37 }
 0x50a   : > { %v5007_v12 = vsub.f32 1.0, %v11037_v37  ;;  %v5038_v56 = vmul.f32 %v5006_v53, %v4974_v57  ;;  %v4976_v11 = vmul.f32 0.05, %v11038_v26  ;;  %v5008_v61 = vsub.f32 1.0, %v11038_v26 }
 0x50b   : > { %v4429_v7 = vadd.f32 %v4332_v24, %v3996_v34  ;;  %v4977_v21 = vmul.f32 0.05, %v11039_v2  ;;  %v5009_v15 = vsub.f32 1.0, %v11039_v2 }
 0x50c   : > { %4576 = vrot.lane.b32.xlu0 %v4426_v51, %s5967_s2  ;;  %4574 = vrot.lane.b32.xlu1 %v4425_v30, %s5967_s2  ;;  %v5039_v32 = vmul.f32 %v5007_v12, %v4975_v0  ;;  %v5040_v44 = vmul.f32 %v5008_v61, %v4976_v11  ;;  %v11043_v11 = vld [vmem:[#allocation27_spill] sm:$0xff] }
 0x50d   : > { %v5041_v16 = vmul.f32 %v5009_v15, %v4977_v21  ;;  %v4981_v61 = vmul.f32 0.05, %v11043_v11  ;;  %v11044_v15 = vld [vmem:[#allocation30_spill] sm:$0xff] }
 0x510   : > { %4578 = vrot.lane.b32.xlu1 %v4427_v43, %s5967_s2  ;;  %4580 = vrot.lane.b32.xlu0 %v4428_v9, %s5967_s2 }
 0x514   : > { %4582 = vrot.lane.b32.xlu1 %v4429_v7, %s5967_s2 }
 0x524   : > { %v4489_v52 = vpop.permute.xlu0 %4488 }
 0x525   : > { %4634 = vst.msk [vmem:[#allocation3 + $0x1e] sm:$0xfc] %vm4633_vm8, %v4489_v52 }
 0x528   : > { %v4493_v14 = vpop.permute.xlu0 %4492 }
 0x529   : > { %4637 = vst.msk [vmem:[#allocation3 + $0x2e] sm:$0x3] %vm4636_vm9, %v4493_v14  ;;  %v4491_v58 = vpop.permute.xlu1 %4490  ;;  %v11040_v14 = vld [vmem:[#allocation26_spill] sm:$0xff] }
 0x52a   : > { %4635 = vst.msk [vmem:[#allocation3 + $0x26] sm:$0xff] %vm4430_vm6, %v4491_v58  ;;  %v4978_v58 = vmul.f32 0.05, %v11040_v14 }
 0x52d   : > { %v4495_v54 = vpop.permute.xlu1 %4494  ;;  %v4497_v1 = vpop.permute.xlu0 %4496 }
 0x52e   : > { %4638 = vst.msk [vmem:[#allocation3 + $0x2e] sm:$0xfc] %vm4633_vm8, %v4495_v54  ;;  %v5010_v54 = vsub.f32 1.0, %v11040_v14 }
 0x52f   : > { %4639 = vst.msk [vmem:[#allocation3 + $0x36] sm:$0xff] %vm4430_vm6, %v4497_v1 }
 0x531   : > { %v4499_v46 = vpop.permute.xlu1 %4498  ;;  %v4501_v24 = vpop.permute.xlu0 %4500  ;;  %v4687_v25 = vld [vmem:[#allocation3 + $0x20] sm:$0xff]  ;;  %v4688_v4 = vld [vmem:[#allocation3 + $0x28] sm:$0xff] }
 0x532   : > { %4640 = vst.msk [vmem:[#allocation3 + $0x3e] sm:$0x3] %vm4636_vm9, %v4499_v46  ;;  %v4750_v22 = vadd.f32 %v4687_v25, %v4685_v35  ;;  %v4751_v51 = vadd.f32 %v4688_v4, %v4686_v48  ;;  %v11041_v35 = vld [vmem:[#allocation25_spill] sm:$0xff] }
 0x533   : > { %4641 = vst.msk [vmem:[#allocation3 + $0x3e] sm:$0xfc] %vm4633_vm8, %v4501_v24  ;;  %v4979_v48 = vmul.f32 0.05, %v11041_v35 }
 0x535   : > { %v4503_v10 = vpop.permute.xlu1 %4502  ;;  %v4505_v62 = vpop.permute.xlu0 %4504 }
 0x536   : > { %v4689_v23 = vld [vmem:[#allocation3 + $0x30] sm:$0xff]  ;;  %4642 = vst.msk [vmem:[#allocation3 + $0x46] sm:$0xff] %vm4430_vm6, %v4503_v10 }
 0x537   : > { %4643 = vst.msk [vmem:[#allocation3 + $0x4e] sm:$0x3] %vm4636_vm9, %v4505_v62  ;;  %v9779_v29 = vadd.f32 %v4689_v23, %v4687_v25  ;;  %v5011_v25 = vsub.f32 1.0, %v11041_v35 }
 0x539   : > { %v4690_v3 = vld [vmem:[#allocation3 + $0x38] sm:$0xff]  ;;  %v4507_v20 = vpop.permute.xlu1 %4506  ;;  %v4509_v5 = vpop.permute.xlu0 %4508  ;;  %v4877_v6 = vadd.f32 %v9779_v29, %v4748_v36 }
 0x53a   : > { %v4753_v31 = vadd.f32 %v4690_v3, %v4688_v4  ;;  %4644 = vst.msk [vmem:[#allocation3 + $0x4e] sm:$0xfc] %vm4633_vm8, %v4507_v20  ;;  %v5042_v4 = vmul.f32 %v5010_v54, %v4978_v58 }
 0x53b   : > { %4645 = vst.msk [vmem:[#allocation3 + $0x56] sm:$0xff] %vm4430_vm6, %v4509_v5 }
 0x53c   : > { %v4878_v63 = vadd.f32 %v4753_v31, %v4749_v13 }
 0x53d   : > { %v4691_v8 = vld [vmem:[#allocation3 + $0x40] sm:$0xff]  ;;  %v4511_v49 = vpop.permute.xlu1 %4510  ;;  %v4513_v47 = vpop.permute.xlu0 %4512 }
 0x53e   : > { %v4692_v18 = vld [vmem:[#allocation3 + $0x48] sm:$0xff]  ;;  %v9790_v60 = vadd.f32 %v4691_v8, %v4689_v23  ;;  %v4942_v27 = vadd.f32 %v4877_v6, %v4691_v8  ;;  %4646 = vst.msk [vmem:[#allocation3 + $0x5e] sm:$0x3] %vm4636_vm9, %v4511_v49 }
 0x53f   : > { %v4943_v55 = vadd.f32 %v4878_v63, %v4692_v18  ;;  %4647 = vst.msk [vmem:[#allocation3 + $0x5e] sm:$0xfc] %vm4633_vm8, %v4513_v47  ;;  %v9796_v17 = vadd.f32 %v4692_v18, %v4690_v3 }
 0x540   : > { %v5070_v19 = vmul.f32 0.01, %v4942_v27  ;;  %v4879_v39 = vadd.f32 %v9790_v60, %v4750_v22  ;;  %v5013_v27 = vsub.f32 1.0, %v11043_v11 }
 0x541   : > { %v5071_v50 = vmul.f32 0.01, %v4943_v55  ;;  %v4515_v59 = vpop.permute.xlu1 %4514  ;;  %v4517_v40 = vpop.permute.xlu0 %4516  ;;  %v4880_v52 = vadd.f32 %v9796_v17, %v4751_v51 }
 0x542   : > { %v4693_v28 = vld [vmem:[#allocation3 + $0x50] sm:$0xff]  ;;  %v5102_v33 = vadd.f32 %v5070_v19, %v5038_v56  ;;  %4648 = vst.msk [vmem:[#allocation3 + $0x66] sm:$0xff] %vm4430_vm6, %v4515_v59  ;;  %v5045_v51 = vmul.f32 %v5013_v27, %v4981_v61 }
 0x543   : > { %v5103_v41 = vadd.f32 %v5071_v50, %v5039_v32  ;;  %v4944_v30 = vadd.f32 %v4879_v39, %v4693_v28  ;;  %4649 = vst.msk [vmem:[#allocation3 + $0x6e] sm:$0x3] %vm4636_vm9, %v4517_v40  ;;  %v9804_v9 = vadd.f32 %v4693_v28, %v4691_v8 }
 0x544   : > { %v5134_v43 = vmul.f32 0.1, %v5102_v33 }
 0x545   : > { %v5135_v38 = vmul.f32 0.1, %v5103_v41  ;;  %v5072_v34 = vmul.f32 0.01, %v4944_v30  ;;  %v4694_v7 = vld [vmem:[#allocation3 + $0x58] sm:$0xff]  ;;  %v4519_v1 = vpop.permute.xlu1 %4518  ;;  %v4521_v46 = vpop.permute.xlu0 %4520 }
 0x546   : > { %v5166_v24 = vadd.f32 %v11036_v45, %v5134_v43  ;;  %v9811_v10 = vadd.f32 %v4694_v7, %v4692_v18  ;;  %4650 = vst.msk [vmem:[#allocation3 + $0x6e] sm:$0xfc] %vm4633_vm8, %v4519_v1  ;;  %v4945_v62 = vadd.f32 %v4880_v52, %v4694_v7  ;;  %v4881_v45 = vadd.f32 %v9804_v9, %v9779_v29  ;;  %v11045_v1 = vld [vmem:[#allocation29_spill] sm:$0xff] }
 0x547   : > { %v5167_v23 = vadd.f32 %v11037_v37, %v5135_v38  ;;  %v5104_v42 = vadd.f32 %v5072_v34, %v5040_v44  ;;  %4651 = vst.msk [vmem:[#allocation3 + $0x76] sm:$0xff] %vm4430_vm6, %v4521_v46  ;;  %v11042_v37 = vld [vmem:[#allocation28_spill] sm:$0xff]  ;;  %v4982_v43 = vmul.f32 0.05, %v11044_v15  ;;  %v5014_v38 = vsub.f32 1.0, %v11044_v15 }
 0x548   : > { %5198 = vst.msk [vmem:[%s9817_s25] sm:$0xff] %vm4430_vm6, %v5166_v24  ;;  %v4882_v57 = vadd.f32 %v9811_v10, %v4753_v31  ;;  %v5073_v13 = vmul.f32 0.01, %v4945_v62  ;;  %v4980_v0 = vmul.f32 0.05, %v11042_v37  ;;  %v5012_v8 = vsub.f32 1.0, %v11042_v37 }
 0x549   : > { %5199 = vst.msk [vmem:[%s9817_s25 + $0x8] sm:$0xff] %vm4430_vm6, %v5167_v23  ;;  %v5136_v36 = vmul.f32 0.1, %v5104_v42  ;;  %v4695_v3 = vld [vmem:[#allocation3 + $0x60] sm:$0xff]  ;;  %v4523_v12 = vpop.permute.xlu1 %4522  ;;  %v4525_v20 = vpop.permute.xlu0 %4524  ;;  %v5043_v31 = vmul.f32 %v5011_v25, %v4979_v48  ;;  %v4983_v46 = vmul.f32 0.05, %v11045_v1  ;;  %v5046_v62 = vmul.f32 %v5014_v38, %v4982_v43 }
 0x54a   : > { %v4696_v53 = vld [vmem:[#allocation3 + $0x68] sm:$0xff]  ;;  %v9828_v6 = vadd.f32 %v4695_v3, %v4693_v28  ;;  %v4946_v63 = vadd.f32 %v4881_v45, %v4695_v3  ;;  %4652 = vst.msk [vmem:[#allocation3 + $0x7e] sm:$0x3] %vm4636_vm9, %v4523_v12  ;;  %v5105_v29 = vadd.f32 %v5073_v13, %v5041_v16  ;;  %v5044_v39 = vmul.f32 %v5012_v8, %v4980_v0  ;;  %v11046_v25 = vld [vmem:[#allocation32_spill] sm:$0xff]  ;;  %v11049_v38 = vld [vmem:[#allocation33_spill] sm:$0xff] }
 0x54b   : > { %v5168_v5 = vadd.f32 %v11038_v26, %v5136_v36  ;;  %4653 = vst.msk [vmem:[#allocation3 + $0x7e] sm:$0xfc] %vm4633_vm8, %v4525_v20  ;;  %v4947_v56 = vadd.f32 %v4882_v57, %v4696_v53  ;;  %v9835_v18 = vadd.f32 %v4696_v53, %v4694_v7  ;;  %v5015_v24 = vsub.f32 1.0, %v11045_v1 }
 0x54c   : > { %v5074_v32 = vmul.f32 0.01, %v4946_v63  ;;  %v4883_v26 = vadd.f32 %v9828_v6, %v9790_v60  ;;  %v5137_v49 = vmul.f32 0.1, %v5105_v29  ;;  %v4984_v36 = vmul.f32 0.05, %v11046_v25 }
 0x54d   : > { %5200 = vst.msk [vmem:[%s9817_s25 + $0x10] sm:$0xff] %vm4430_vm6, %v5168_v5  ;;  %v5075_v47 = vmul.f32 0.01, %v4947_v56  ;;  %v4527_v55 = vpop.permute.xlu1 %4526  ;;  %v4529_v19 = vpop.permute.xlu0 %4528  ;;  %v4884_v44 = vadd.f32 %v9835_v18, %v9796_v17  ;;  %v5016_v45 = vsub.f32 1.0, %v11046_v25  ;;  %v11047_v29 = vld [vmem:[#allocation31_spill] sm:$0xff] }
 0x54e   : > { %v4697_v22 = vld [vmem:[#allocation3 + $0x70] sm:$0xff]  ;;  %v5106_v50 = vadd.f32 %v5074_v32, %v5042_v4  ;;  %4654 = vst.msk [vmem:[#allocation3 + $0x86] sm:$0xff] %vm4430_vm6, %v4527_v55  ;;  %v5169_v59 = vadd.f32 %v11039_v2, %v5137_v49  ;;  %v5017_v56 = vsub.f32 1.0, %v11047_v29 }
 0x54f   : > { %v4948_v28 = vadd.f32 %v4883_v26, %v4697_v22  ;;  %4655 = vst.msk [vmem:[#allocation3 + $0x8e] sm:$0x3] %vm4636_vm9, %v4529_v19  ;;  %v5107_v60 = vadd.f32 %v5075_v47, %v5043_v31  ;;  %v9844_v33 = vadd.f32 %v4697_v22, %v4695_v3  ;;  %v4985_v31 = vmul.f32 0.05, %v11047_v29 }
 0x550   : > { %v5138_v40 = vmul.f32 0.1, %v5106_v50  ;;  %5201 = vst.msk [vmem:[%s9817_s25 + $0x18] sm:$0xff] %vm4430_vm6, %v5169_v59  ;;  %v5048_v47 = vmul.f32 %v5016_v45, %v4984_v36  ;;  %v11048_v59 = vld [vmem:[#allocation34_spill] sm:$0xff] }
 0x551   : > { %v5076_v41 = vmul.f32 0.01, %v4948_v28  ;;  %v5139_v30 = vmul.f32 0.1, %v5107_v60  ;;  %v4698_v21 = vld [vmem:[#allocation3 + $0x78] sm:$0xff]  ;;  %v4531_v34 = vpop.permute.xlu1 %4530  ;;  %v4533_v2 = vpop.permute.xlu0 %4532 }
 0x552   : > { %v5170_v7 = vadd.f32 %v11040_v14, %v5138_v40  ;;  %v9853_v58 = vadd.f32 %v4698_v21, %v4696_v53  ;;  %v4949_v54 = vadd.f32 %v4884_v44, %v4698_v21  ;;  %4656 = vst.msk [vmem:[#allocation3 + $0x8e] sm:$0xfc] %vm4633_vm8, %v4531_v34  ;;  %v4885_v14 = vadd.f32 %v9844_v33, %v9804_v9 }
 0x553   : > { %v5108_v52 = vadd.f32 %v5076_v41, %v5044_v39  ;;  %4657 = vst.msk [vmem:[#allocation3 + $0x96] sm:$0xff] %vm4430_vm6, %v4533_v2  ;;  %v5171_v17 = vadd.f32 %v11041_v35, %v5139_v30  ;;  %v4986_v60 = vmul.f32 0.05, %v11048_v59  ;;  %v5018_v40 = vsub.f32 1.0, %v11048_v59 }
 0x554   : > { %5202 = vst.msk [vmem:[%s9817_s25 + $0x20] sm:$0xff] %vm4430_vm6, %v5170_v7  ;;  %v5077_v42 = vmul.f32 0.01, %v4949_v54  ;;  %v4886_v16 = vadd.f32 %v9853_v58, %v9811_v10  ;;  %v5047_v10 = vmul.f32 %v5015_v24, %v4983_v46  ;;  %v4987_v34 = vmul.f32 0.05, %v11049_v38  ;;  %v11050_v24 = vld [vmem:[#allocation36_spill] sm:$0xff] }
 0x555   : > { %v5140_v23 = vmul.f32 0.1, %v5108_v52  ;;  %5203 = vst.msk [vmem:[%s9817_s25 + $0x28] sm:$0xff] %vm4430_vm6, %v5171_v17  ;;  %v4699_v48 = vld [vmem:[#allocation3 + $0x80] sm:$0xff]  ;;  %v4535_v57 = vpop.permute.xlu1 %4534  ;;  %v4537_v13 = vpop.permute.xlu0 %4536  ;;  %v5019_v2 = vsub.f32 1.0, %v11049_v38  ;;  %v5050_v17 = vmul.f32 %v5018_v40, %v4986_v60 }
 0x556   : > { %v4700_v35 = vld [vmem:[#allocation3 + $0x88] sm:$0xff]  ;;  %v5109_v3 = vadd.f32 %v5077_v42, %v5045_v51  ;;  %v9871_v53 = vadd.f32 %v4699_v48, %v4697_v22  ;;  %v4950_v9 = vadd.f32 %v4885_v14, %v4699_v48  ;;  %4658 = vst.msk [vmem:[#allocation3 + $0x9e] sm:$0x3] %vm4636_vm9, %v4535_v57  ;;  %v5020_v42 = vsub.f32 1.0, %v11050_v24  ;;  %v11053_v40 = vld [vmem:[#allocation37_spill] sm:$0xff] }
 0x557   : > { %v5172_v4 = vadd.f32 %v11042_v37, %v5140_v23  ;;  %4659 = vst.msk [vmem:[#allocation3 + $0x9e] sm:$0xfc] %vm4633_vm8, %v4537_v13  ;;  %v4951_v0 = vadd.f32 %v4886_v16, %v4700_v35  ;;  %v9877_v5 = vadd.f32 %v4700_v35, %v4698_v21  ;;  %v4988_v23 = vmul.f32 0.05, %v11050_v24 }
 0x558   : > { %v5141_v12 = vmul.f32 0.1, %v5109_v3  ;;  %v5078_v20 = vmul.f32 0.01, %v4950_v9  ;;  %v4887_v37 = vadd.f32 %v9871_v53, %v9828_v6  ;;  %v11051_v9 = vld [vmem:[#allocation35_spill] sm:$0xff] }
 0x559   : > { %5204 = vst.msk [vmem:[%s9817_s25 + $0x30] sm:$0xff] %vm4430_vm6, %v5172_v4  ;;  %v5079_v63 = vmul.f32 0.01, %v4951_v0  ;;  %v4539_v32 = vpop.permute.xlu1 %4538  ;;  %v4888_v50 = vadd.f32 %v9877_v5, %v9835_v18  ;;  %v5021_v0 = vsub.f32 1.0, %v11051_v9 }
 0x55a   : > { %v4701_v8 = vld [vmem:[#allocation3 + $0x90] sm:$0xff]  ;;  %v4541_v26 = vpop.permute.xlu0 %4540  ;;  %v5173_v61 = vadd.f32 %v11043_v11, %v5141_v12  ;;  %v5110_v49 = vadd.f32 %v5078_v20, %v5046_v62  ;;  %4660 = vst.msk [vmem:[#allocation3 + $0xa6] sm:$0xff] %vm4430_vm6, %v4539_v32  ;;  %v5049_v11 = vmul.f32 %v5017_v56, %v4985_v31 }
 0x55b   : > { %v4952_v22 = vadd.f32 %v4887_v37, %v4701_v8  ;;  %4661 = vst.msk [vmem:[#allocation3 + $0xae] sm:$0x3] %vm4636_vm9, %v4541_v26  ;;  %v5111_v27 = vadd.f32 %v5079_v63, %v5047_v10  ;;  %v9888_v55 = vadd.f32 %v4701_v8, %v4699_v48  ;;  %v4989_v10 = vmul.f32 0.05, %v11051_v9 }
 0x55c   : > { %5205 = vst.msk [vmem:[%s9817_s25 + $0x38] sm:$0xff] %vm4430_vm6, %v5173_v61  ;;  %v5142_v6 = vmul.f32 0.1, %v5110_v49 }
 0x55d   : > { %v5080_v19 = vmul.f32 0.01, %v4952_v22  ;;  %v5143_v39 = vmul.f32 0.1, %v5111_v27  ;;  %v4702_v28 = vld [vmem:[#allocation3 + $0x98] sm:$0xff]  ;;  %v4543_v41 = vpop.permute.xlu1 %4542  ;;  %v11052_v22 = vld [vmem:[#allocation38_spill] sm:$0xff] }
 0x55e   : > { %v4545_v44 = vpop.permute.xlu0 %4544  ;;  %v5174_v30 = vadd.f32 %v11044_v15, %v5142_v6  ;;  %v9895_v21 = vadd.f32 %v4702_v28, %v4700_v35  ;;  %v4953_v43 = vadd.f32 %v4888_v50, %v4702_v28  ;;  %4662 = vst.msk [vmem:[#allocation3 + $0xae] sm:$0xfc] %vm4633_vm8, %v4543_v41  ;;  %v4889_v15 = vadd.f32 %v9888_v55, %v9844_v33 }
 0x55f   : > { %v5112_v51 = vadd.f32 %v5080_v19, %v5048_v47  ;;  %4663 = vst.msk [vmem:[#allocation3 + $0xb6] sm:$0xff] %vm4430_vm6, %v4545_v44  ;;  %v5175_v18 = vadd.f32 %v11045_v1, %v5143_v39  ;;  %v4990_v27 = vmul.f32 0.05, %v11052_v22  ;;  %v5022_v6 = vsub.f32 1.0, %v11052_v22 }
 0x560   : > { %5206 = vst.msk [vmem:[%s9817_s25 + $0x40] sm:$0xff] %vm4430_vm6, %v5174_v30  ;;  %v5081_v52 = vmul.f32 0.01, %v4953_v43  ;;  %v4890_v54 = vadd.f32 %v9895_v21, %v9853_v58  ;;  %v5051_v58 = vmul.f32 %v5019_v2, %v4987_v34  ;;  %v4991_v41 = vmul.f32 0.05, %v11053_v40  ;;  %v11054_v2 = vld [vmem:[#allocation40_spill] sm:$0xff] }
 0x561   : > { %v5144_v7 = vmul.f32 0.1, %v5112_v51  ;;  %5207 = vst.msk [vmem:[%s9817_s25 + $0x48] sm:$0xff] %vm4430_vm6, %v5175_v18  ;;  %v4703_v46 = vld [vmem:[#allocation3 + $0xa0] sm:$0xff]  ;;  %v5023_v44 = vsub.f32 1.0, %v11053_v40  ;;  %v5054_v18 = vmul.f32 %v5022_v6, %v4990_v27 }
 0x562   : > { %v4704_v1 = vld [vmem:[#allocation3 + $0xa8] sm:$0xff]  ;;  %v4547_v14 = vpop.permute.xlu1 %4546  ;;  %v4549_v16 = vpop.permute.xlu0 %4548  ;;  %v5113_v48 = vadd.f32 %v5081_v52, %v5049_v11  ;;  %v9913_v35 = vadd.f32 %v4703_v46, %v4701_v8  ;;  %v4954_v33 = vadd.f32 %v4889_v15, %v4703_v46  ;;  %v5052_v8 = vmul.f32 %v5020_v42, %v4988_v23  ;;  %v11057_v6 = vld [vmem:[#allocation41_spill] sm:$0xff] }
 0x563   : > { %v5176_v62 = vadd.f32 %v11046_v25, %v5144_v7  ;;  %4664 = vst.msk [vmem:[#allocation3 + $0xbe] sm:$0x3] %vm4636_vm9, %v4547_v14  ;;  %v4955_v36 = vadd.f32 %v4890_v54, %v4704_v1  ;;  %v9919_v13 = vadd.f32 %v4704_v1, %v4702_v28  ;;  %v4992_v7 = vmul.f32 0.05, %v11054_v2 }
 0x564   : > { %4665 = vst.msk [vmem:[#allocation3 + $0xbe] sm:$0xfc] %vm4633_vm8, %v4549_v16  ;;  %v5145_v45 = vmul.f32 0.1, %v5113_v48  ;;  %v5082_v57 = vmul.f32 0.01, %v4954_v33  ;;  %v4891_v25 = vadd.f32 %v9913_v35, %v9871_v53 }
 0x565   : > { %5208 = vst.msk [vmem:[%s9817_s25 + $0x50] sm:$0xff] %vm4430_vm6, %v5176_v62  ;;  %v5083_v4 = vmul.f32 0.01, %v4955_v36  ;;  %v4892_v61 = vadd.f32 %v9919_v13, %v9877_v5  ;;  %v5024_v52 = vsub.f32 1.0, %v11054_v2  ;;  %v11055_v33 = vld [vmem:[#allocation39_spill] sm:$0xff] }
 0x566   : > { %v4705_v3 = vld [vmem:[#allocation3 + $0xb0] sm:$0xff]  ;;  %v4551_v12 = vpop.permute.xlu1 %4550  ;;  %v4553_v20 = vpop.permute.xlu0 %4552  ;;  %v5177_v37 = vadd.f32 %v11047_v29, %v5145_v45  ;;  %v5114_v63 = vadd.f32 %v5082_v57, %v5050_v17  ;;  %v5053_v29 = vmul.f32 %v5021_v0, %v4989_v10  ;;  %v5025_v36 = vsub.f32 1.0, %v11055_v33 }
 0x567   : > { %v4956_v31 = vadd.f32 %v4891_v25, %v4705_v3  ;;  %4666 = vst.msk [vmem:[#allocation3 + $0xc6] sm:$0xff] %vm4430_vm6, %v4551_v12  ;;  %v5115_v56 = vadd.f32 %v5083_v4, %v5051_v58  ;;  %v9930_v32 = vadd.f32 %v4705_v3, %v4703_v46  ;;  %v4993_v58 = vmul.f32 0.05, %v11055_v33 }
 0x568   : > { %4667 = vst.msk [vmem:[#allocation3 + $0xce] sm:$0x3] %vm4636_vm9, %v4553_v20  ;;  %v5146_v53 = vmul.f32 0.1, %v5114_v63 }
 0x569   : > { %5209 = vst.msk [vmem:[%s9817_s25 + $0x58] sm:$0xff] %vm4430_vm6, %v5177_v37  ;;  %v5084_v26 = vmul.f32 0.01, %v4956_v31  ;;  %v5147_v49 = vmul.f32 0.1, %v5115_v56  ;;  %v11056_v31 = vld [vmem:[#allocation42_spill] sm:$0xff] }
 0x56a   : > { %v4706_v47 = vld [vmem:[#allocation3 + $0xb8] sm:$0xff]  ;;  %v4555_v19 = vpop.permute.xlu1 %4554  ;;  %v4557_v50 = vpop.permute.xlu0 %4556  ;;  %v5178_v39 = vadd.f32 %v11048_v59, %v5146_v53  ;;  %v4893_v59 = vadd.f32 %v9930_v32, %v9888_v55  ;;  %v4994_v56 = vmul.f32 0.05, %v11056_v31  ;;  %v5026_v53 = vsub.f32 1.0, %v11056_v31 }
 0x56b   : > { %v5116_v11 = vadd.f32 %v5084_v26, %v5052_v8  ;;  %v9937_v28 = vadd.f32 %v4706_v47, %v4704_v1  ;;  %v4957_v60 = vadd.f32 %v4892_v61, %v4706_v47  ;;  %4668 = vst.msk [vmem:[#allocation3 + $0xce] sm:$0xfc] %vm4633_vm8, %v4555_v19  ;;  %v5179_v5 = vadd.f32 %v11049_v38, %v5147_v49 }
 0x56c   : > { %4669 = vst.msk [vmem:[#allocation3 + $0xd6] sm:$0xff] %vm4430_vm6, %v4557_v50  ;;  %5210 = vst.msk [vmem:[%s9817_s25 + $0x60] sm:$0xff] %vm4430_vm6, %v5178_v39  ;;  %v4995_v19 = vmul.f32 0.05, %v11057_v6  ;;  %v5027_v50 = vsub.f32 1.0, %v11057_v6 }
 0x56d   : > { %v5148_v30 = vmul.f32 0.1, %v5116_v11  ;;  %v5085_v51 = vmul.f32 0.01, %v4957_v60  ;;  %v4894_v43 = vadd.f32 %v9937_v28, %v9895_v21  ;;  %5211 = vst.msk [vmem:[%s9817_s25 + $0x68] sm:$0xff] %vm4430_vm6, %v5179_v5  ;;  %v5055_v21 = vmul.f32 %v5023_v44, %v4991_v41  ;;  %v11058_v44 = vld [vmem:[#allocation44_spill] sm:$0xff] }
 0x56e   : > { %v4707_v34 = vld [vmem:[#allocation3 + $0xc0] sm:$0xff]  ;;  %v4559_v15 = vpop.permute.xlu1 %4558  ;;  %v4561_v54 = vpop.permute.xlu0 %4560  ;;  %v5058_v5 = vmul.f32 %v5026_v53, %v4994_v56 }
 0x56f   : > { %v4708_v38 = vld [vmem:[#allocation3 + $0xc8] sm:$0xff]  ;;  %v5180_v17 = vadd.f32 %v11050_v24, %v5148_v30  ;;  %v5117_v46 = vadd.f32 %v5085_v51, %v5053_v29  ;;  %v9955_v1 = vadd.f32 %v4707_v34, %v4705_v3  ;;  %v4958_v55 = vadd.f32 %v4893_v59, %v4707_v34  ;;  %4670 = vst.msk [vmem:[#allocation3 + $0xde] sm:$0x3] %vm4636_vm9, %v4559_v15 }
 0x570   : > { %4671 = vst.msk [vmem:[#allocation3 + $0xde] sm:$0xfc] %vm4633_vm8, %v4561_v54  ;;  %v4959_v23 = vadd.f32 %v4894_v43, %v4708_v38  ;;  %v9961_v16 = vadd.f32 %v4708_v38, %v4706_v47  ;;  %v5056_v3 = vmul.f32 %v5024_v52, %v4992_v7  ;;  %v4996_v30 = vmul.f32 0.05, %v11058_v44 }
 0x571   : > { %5212 = vst.msk [vmem:[%s9817_s25 + $0x70] sm:$0xff] %vm4430_vm6, %v5180_v17  ;;  %v5149_v42 = vmul.f32 0.1, %v5117_v46  ;;  %v5086_v14 = vmul.f32 0.01, %v4958_v55  ;;  %v4895_v24 = vadd.f32 %v9955_v1, %v9913_v35  ;;  %v5028_v51 = vsub.f32 1.0, %v11058_v44 }
 0x572   : > { %v5087_v62 = vmul.f32 0.01, %v4959_v23  ;;  %v4563_v45 = vpop.permute.xlu1 %4562  ;;  %v4565_v57 = vpop.permute.xlu0 %4564  ;;  %v4896_v37 = vadd.f32 %v9961_v16, %v9919_v13 }
 0x573   : > { %v4709_v48 = vld [vmem:[#allocation3 + $0xd0] sm:$0xff]  ;;  %v5181_v25 = vadd.f32 %v11051_v9, %v5149_v42  ;;  %v5118_v4 = vadd.f32 %v5086_v14, %v5054_v18  ;;  %4672 = vst.msk [vmem:[#allocation3 + $0xe6] sm:$0xff] %vm4430_vm6, %v4563_v45  ;;  %v5057_v9 = vmul.f32 %v5025_v36, %v4993_v58  ;;  %v5060_v46 = vmul.f32 %v5028_v51, %v4996_v30  ;;  %v11060_v36 = vld [vmem:[#allocation46_spill] sm:$0xff] }
 0x574   : > { %v4960_v10 = vadd.f32 %v4895_v24, %v4709_v48  ;;  %4673 = vst.msk [vmem:[#allocation3 + $0xee] sm:$0x3] %vm4636_vm9, %v4565_v57  ;;  %v5119_v0 = vadd.f32 %v5087_v62, %v5055_v21  ;;  %v9972_v12 = vadd.f32 %v4709_v48, %v4707_v34  ;;  %v11059_v21 = vld [vmem:[#allocation43_spill] sm:$0xff]  ;;  %v4998_v45 = vmul.f32 0.05, %v11060_v36 }
 0x575   : > { %5213 = vst.msk [vmem:[%s9817_s25 + $0x78] sm:$0xff] %vm4430_vm6, %v5181_v25  ;;  %v5150_v35 = vmul.f32 0.1, %v5118_v4  ;;  %v4997_v23 = vmul.f32 0.05, %v11059_v21  ;;  %v5029_v42 = vsub.f32 1.0, %v11059_v21 }
 0x576   : > { %v5088_v20 = vmul.f32 0.01, %v4960_v10  ;;  %v5151_v63 = vmul.f32 0.1, %v5119_v0  ;;  %v4710_v8 = vld [vmem:[#allocation3 + $0xd8] sm:$0xff]  ;;  %v4567_v26 = vpop.permute.xlu1 %4566  ;;  %v4569_v61 = vpop.permute.xlu0 %4568  ;;  %v5030_v57 = vsub.f32 1.0, %v11060_v36 }
 0x577   : > { %v5182_v49 = vadd.f32 %v11052_v22, %v5150_v35  ;;  %v9979_v47 = vadd.f32 %v4710_v8, %v4708_v38  ;;  %v4961_v27 = vadd.f32 %v4896_v37, %v4710_v8  ;;  %4674 = vst.msk [vmem:[#allocation3 + $0xee] sm:$0xfc] %vm4633_vm8, %v4567_v26  ;;  %v4897_v22 = vadd.f32 %v9972_v12, %v9930_v32  ;;  %v11061_v25 = vld [vmem:[#allocation45_spill] sm:$0xff]  ;;  %v11065_v51 = vld [vmem:[#allocation47_spill] sm:$0xff] }
 0x578   : > { %v5120_v29 = vadd.f32 %v5088_v20, %v5056_v3  ;;  %4675 = vst.msk [vmem:[#allocation3 + $0xf6] sm:$0xff] %vm4430_vm6, %v4569_v61  ;;  %v5183_v13 = vadd.f32 %v11053_v40, %v5151_v63  ;;  %v4999_v4 = vmul.f32 0.05, %v11061_v25  ;;  %v5031_v3 = vsub.f32 1.0, %v11061_v25 }
 0x579   : > { %5214 = vst.msk [vmem:[%s9817_s25 + $0x80] sm:$0xff] %vm4430_vm6, %v5182_v49  ;;  %v5089_v11 = vmul.f32 0.01, %v4961_v27  ;;  %v4898_v60 = vadd.f32 %v9979_v47, %v9937_v28  ;;  %v5059_v28 = vmul.f32 %v5027_v50, %v4995_v19  ;;  %v5061_v37 = vmul.f32 %v5029_v42, %v4997_v23  ;;  %v11064_v50 = vld [vmem:[#allocation52_spill] sm:$0xff] }
 0x57a   : > { %v5152_v39 = vmul.f32 0.1, %v5120_v29  ;;  %5215 = vst.msk [vmem:[%s9817_s25 + $0x88] sm:$0xff] %vm4430_vm6, %v5183_v13  ;;  %v4711_v41 = vld [vmem:[#allocation3 + $0xe0] sm:$0xff]  ;;  %v4571_v59 = vpop.permute.xlu1 %4570  ;;  %v4573_v43 = vpop.permute.xlu0 %4572  ;;  %v11063_v13 = vld [vmem:[#allocation50_spill] sm:$0xff]  ;;  %v5036_v30 = vsub.f32 1.0, %v11064_v50 }
 0x57b   : > { %v4712_v40 = vld [vmem:[#allocation3 + $0xe8] sm:$0xff]  ;;  %v5121_v34 = vadd.f32 %v5089_v11, %v5057_v9  ;;  %v9997_v38 = vadd.f32 %v4711_v41, %v4709_v48  ;;  %v4962_v32 = vadd.f32 %v4897_v22, %v4711_v41  ;;  %4676 = vst.msk [vmem:[#allocation3 + $0xfe] sm:$0x3] %vm4636_vm9, %v4571_v59  ;;  %v5002_v19 = vmul.f32 0.05, %v11063_v13 }
 0x57c   : > { %v5184_v18 = vadd.f32 %v11054_v2, %v5152_v39  ;;  %4677 = vst.msk [vmem:[#allocation3 + $0xfe] sm:$0xfc] %vm4633_vm8, %v4573_v43  ;;  %v4963_v7 = vadd.f32 %v4898_v60, %v4712_v40  ;;  %v10003_v54 = vadd.f32 %v4712_v40, %v4710_v8  ;;  %v11062_v8 = vld [vmem:[#allocation48_spill] sm:$0xff]  ;;  %v5004_v39 = vmul.f32 0.05, %v11064_v50 }
 0x57d   : > { %v5153_v52 = vmul.f32 0.1, %v5121_v34  ;;  %v5090_v15 = vmul.f32 0.01, %v4962_v32  ;;  %v4899_v17 = vadd.f32 %v9997_v38, %v9955_v1  ;;  %v5000_v56 = vmul.f32 0.05, %v11062_v8 }
 0x57e   : > { %5216 = vst.msk [vmem:[%s9817_s25 + $0x90] sm:$0xff] %vm4430_vm6, %v5184_v18  ;;  %v5091_v2 = vmul.f32 0.01, %v4963_v7  ;;  %v4575_v14 = vpop.permute.xlu1 %4574  ;;  %v4577_v24 = vpop.permute.xlu0 %4576  ;;  %v4900_v35 = vadd.f32 %v10003_v54, %v9961_v16  ;;  %v5032_v53 = vsub.f32 1.0, %v11062_v8  ;;  %v5034_v11 = vsub.f32 1.0, %v11063_v13 }
 0x57f   : > { %v4713_v55 = vld [vmem:[#allocation3 + $0xf0] sm:$0xff]  ;;  %v5185_v62 = vadd.f32 %v11055_v33, %v5153_v52  ;;  %v5122_v48 = vadd.f32 %v5090_v15, %v5058_v5  ;;  %4678 = vst.msk [vmem:[#allocation3 + $0x106] sm:$0xff] %vm4430_vm6, %v4575_v14  ;;  %v5001_v59 = vmul.f32 0.05, %v11065_v51  ;;  %v5033_v43 = vsub.f32 1.0, %v11065_v51  ;;  %v4843_v52 = vld [vmem:[#allocation3 + $0x120] sm:$0xff] }
 0x580   : > { %v4964_v58 = vadd.f32 %v4899_v17, %v4713_v55  ;;  %4679 = vst.msk [vmem:[#allocation3 + $0x10e] sm:$0x3] %vm4636_vm9, %v4577_v24  ;;  %v5123_v1 = vadd.f32 %v5091_v2, %v5059_v28  ;;  %v10018_v0 = vadd.f32 %v4713_v55, %v4711_v41  ;;  %v5062_v41 = vmul.f32 %v5030_v57, %v4998_v45  ;;  %v4940_v57 = vld [vmem:[#allocation3 + $0x130] sm:$0xff] }
 0x581   : > { %5217 = vst.msk [vmem:[%s9817_s25 + $0x98] sm:$0xff] %vm4430_vm6, %v5185_v62  ;;  %v5154_v10 = vmul.f32 0.1, %v5122_v48  ;;  %v5064_v15 = vmul.f32 %v5032_v53, %v5000_v56  ;;  %v5066_v23 = vmul.f32 %v5034_v11, %v5002_v19 }
 0x582   : > { %v5092_v33 = vmul.f32 0.01, %v4964_v58  ;;  %v5155_v20 = vmul.f32 0.1, %v5123_v1  ;;  %v4714_v63 = vld [vmem:[#allocation3 + $0xf8] sm:$0xff]  ;;  %v4579_v9 = vpop.permute.xlu1 %4578  ;;  %v4581_v26 = vpop.permute.xlu0 %4580  ;;  %v4901_v60 = vadd.f32 %v10018_v0, %v9972_v12 }
 0x583   : > { %v5186_v61 = vadd.f32 %v11056_v31, %v5154_v10  ;;  %v10025_v29 = vadd.f32 %v4714_v63, %v4712_v40  ;;  %v4965_v27 = vadd.f32 %v4900_v35, %v4714_v63  ;;  %4680 = vst.msk [vmem:[#allocation3 + $0x10e] sm:$0xfc] %vm4633_vm8, %v4579_v9 }
 0x584   : > { %v5124_v49 = vadd.f32 %v5092_v33, %v5060_v46  ;;  %4681 = vst.msk [vmem:[#allocation3 + $0x116] sm:$0xff] %vm4430_vm6, %v4581_v26  ;;  %v5187_v16 = vadd.f32 %v11057_v6, %v5155_v20  ;;  %v11067_v33 = vld [vmem:[#allocation51_spill] sm:$0xff] }
 0x585   : > { %5218 = vst.msk [vmem:[%s9817_s25 + $0xa0] sm:$0xff] %vm4430_vm6, %v5186_v61  ;;  %v5093_v31 = vmul.f32 0.01, %v4965_v27  ;;  %v4902_v5 = vadd.f32 %v10025_v29, %v9979_v47  ;;  %v5063_v47 = vmul.f32 %v5031_v3, %v4999_v4  ;;  %v11066_v3 = vld [vmem:[#allocation49_spill] sm:$0xff]  ;;  %v5005_v35 = vmul.f32 0.05, %v11067_v33 }
 0x586   : > { %v5156_v22 = vmul.f32 0.1, %v5124_v49  ;;  %5219 = vst.msk [vmem:[%s9817_s25 + $0xa8] sm:$0xff] %vm4430_vm6, %v5187_v16  ;;  %v4746_v6 = vld [vmem:[#allocation3 + $0x100] sm:$0xff]  ;;  %v4583_v18 = vpop.permute.xlu1 %4582  ;;  %v5003_v10 = vmul.f32 0.05, %v11066_v3 }
 0x587   : > { %v4747_v40 = vld [vmem:[#allocation3 + $0x108] sm:$0xff]  ;;  %v5125_v32 = vadd.f32 %v5093_v31, %v5061_v37  ;;  %v4778_v12 = vadd.f32 %v4746_v6, %v4713_v55  ;;  %v4966_v28 = vadd.f32 %v4901_v60, %v4746_v6  ;;  %4682 = vst.msk [vmem:[#allocation3 + $0x11e] sm:$0x3] %vm4636_vm9, %v4583_v18  ;;  %v5065_v55 = vmul.f32 %v5033_v43, %v5001_v59 }
 0x588   : > { %v5188_v34 = vadd.f32 %v11058_v44, %v5156_v22  ;;  %v4967_v7 = vadd.f32 %v4902_v5, %v4747_v40  ;;  %v4779_v42 = vadd.f32 %v4747_v40, %v4714_v63  ;;  %v5068_v44 = vmul.f32 %v5036_v30, %v5004_v39  ;;  %v4844_v63 = vld [vmem:[#allocation3 + $0x128] sm:$0xff]  ;;  %v4941_v5 = vld [vmem:[#allocation3 + $0x138] sm:$0xff] }
 0x589   : > { %v5157_v17 = vmul.f32 0.1, %v5125_v32  ;;  %v5094_v2 = vmul.f32 0.01, %v4966_v28  ;;  %v4903_v46 = vadd.f32 %v4778_v12, %v9997_v38  ;;  %v5037_v53 = vsub.f32 1.0, %v11067_v33 }
 0x58a   : > { %5220 = vst.msk [vmem:[%s9817_s25 + $0xb0] sm:$0xff] %vm4430_vm6, %v5188_v34  ;;  %v5095_v14 = vmul.f32 0.01, %v4967_v7  ;;  %v4904_v61 = vadd.f32 %v4779_v42, %v10003_v54 }
 0x58b   : > { %v4810_v24 = vld [vmem:[#allocation3 + $0x110] sm:$0xff]  ;;  %v5189_v62 = vadd.f32 %v11059_v21, %v5157_v17  ;;  %v5126_v48 = vadd.f32 %v5094_v2, %v5062_v41  ;;  %v5035_v21 = vsub.f32 1.0, %v11066_v3  ;;  %v5069_v18 = vmul.f32 %v5037_v53, %v5005_v35 }
 0x58c   : > { %v4873_v58 = vadd.f32 %v4810_v24, %v4746_v6  ;;  %v4875_v45 = vadd.f32 %v4843_v52, %v4810_v24  ;;  %v5127_v1 = vadd.f32 %v5095_v14, %v5063_v47  ;;  %v4968_v4 = vadd.f32 %v4903_v46, %v4810_v24 }
 0x58d   : > { %5221 = vst.msk [vmem:[%s9817_s25 + $0xb8] sm:$0xff] %vm4430_vm6, %v5189_v62  ;;  %v5158_v38 = vmul.f32 0.1, %v5126_v48  ;;  %v5067_v30 = vmul.f32 %v5035_v21, %v5003_v10 }
 0x58e   : > { %v4905_v20 = vadd.f32 %v4873_v58, %v10018_v0  ;;  %v4907_v37 = vadd.f32 %v4875_v45, %v4778_v12  ;;  %v5159_v9 = vmul.f32 0.1, %v5127_v1  ;;  %v5096_v56 = vmul.f32 0.01, %v4968_v4  ;;  %v4811_v26 = vld [vmem:[#allocation3 + $0x118] sm:$0xff] }
 0x58f   : > { %v5190_v49 = vadd.f32 %v11060_v36, %v5158_v38  ;;  %v4874_v19 = vadd.f32 %v4811_v26, %v4747_v40  ;;  %v4876_v11 = vadd.f32 %v4844_v63, %v4811_v26  ;;  %v4969_v22 = vadd.f32 %v4904_v61, %v4811_v26 }
 0x590   : > { %v4970_v27 = vadd.f32 %v4905_v20, %v4843_v52  ;;  %v4972_v16 = vadd.f32 %v4940_v57, %v4907_v37  ;;  %v5191_v0 = vadd.f32 %v11061_v25, %v5159_v9  ;;  %v5128_v39 = vadd.f32 %v5096_v56, %v5064_v15 }
 0x591   : > { %5222 = vst.msk [vmem:[%s9817_s25 + $0xc0] sm:$0xff] %vm4430_vm6, %v5190_v49  ;;  %v4906_v41 = vadd.f32 %v4874_v19, %v10025_v29  ;;  %v4908_v36 = vadd.f32 %v4876_v11, %v4779_v42  ;;  %v5097_v6 = vmul.f32 0.01, %v4969_v22 }
 0x592   : > { %v5098_v31 = vmul.f32 0.01, %v4970_v27  ;;  %v5100_v60 = vmul.f32 0.01, %v4972_v16  ;;  %5223 = vst.msk [vmem:[%s9817_s25 + $0xc8] sm:$0xff] %vm4430_vm6, %v5191_v0 }
 0x593   : > { %v5160_v54 = vmul.f32 0.1, %v5128_v39  ;;  %v4971_v59 = vadd.f32 %v4906_v41, %v4844_v63  ;;  %v4973_v34 = vadd.f32 %v4941_v5, %v4908_v36  ;;  %v5129_v29 = vadd.f32 %v5097_v6, %v5065_v55 }
 0x594   : > { %v5130_v40 = vadd.f32 %v5098_v31, %v5066_v23  ;;  %v5132_v25 = vadd.f32 %v5100_v60, %v5068_v44 }
 0x595   : > { %v5192_v43 = vadd.f32 %v11062_v8, %v5160_v54  ;;  %v5099_v28 = vmul.f32 0.01, %v4971_v59  ;;  %v5101_v47 = vmul.f32 0.01, %v4973_v34  ;;  %v5161_v7 = vmul.f32 0.1, %v5129_v29 }
 0x596   : > { %v5162_v32 = vmul.f32 0.1, %v5130_v40  ;;  %v5164_v12 = vmul.f32 0.1, %v5132_v25 }
 0x597   : > { %5224 = vst.msk [vmem:[%s9817_s25 + $0xd0] sm:$0xff] %vm4430_vm6, %v5192_v43  ;;  %v5131_v15 = vadd.f32 %v5099_v28, %v5067_v30  ;;  %v5133_v17 = vadd.f32 %v5101_v47, %v5069_v18  ;;  %v5193_v2 = vadd.f32 %v11065_v51, %v5161_v7 }
 0x598   : > { %v5194_v52 = vadd.f32 %v11063_v13, %v5162_v32  ;;  %v5196_v8 = vadd.f32 %v11064_v50, %v5164_v12 }
 0x599   : > { %v5163_v46 = vmul.f32 0.1, %v5131_v15  ;;  %v5165_v23 = vmul.f32 0.1, %v5133_v17  ;;  %5225 = vst.msk [vmem:[%s9817_s25 + $0xd8] sm:$0xff] %vm4430_vm6, %v5193_v2 }
 0x59a   : > { %5226 = vst.msk [vmem:[%s9817_s25 + $0xe0] sm:$0xff] %vm4430_vm6, %v5194_v52  ;;  %5228 = vst.msk [vmem:[%s9817_s25 + $0xf0] sm:$0xff] %vm4430_vm6, %v5196_v8 }
 0x59b   : > { %v5195_v13 = vadd.f32 %v11066_v3, %v5163_v46  ;;  %v5197_v50 = vadd.f32 %v11067_v33, %v5165_v23 }
 0x59d   : > { %5227 = vst.msk [vmem:[%s9817_s25 + $0xe8] sm:$0xff] %vm4430_vm6, %v5195_v13  ;;  %5229 = vst.msk [vmem:[%s9817_s25 + $0xf8] sm:$0xff] %vm4430_vm6, %v5197_v50 }
 0x59e   : > { %5840 = shalt.err (!%p5837_p1)
}
 0x59f   : > { %s5841_s2 = scalar_lea.hbm %s10087_s6, 4096  ;;  %s5845_s10 = scalar_lea.hbm %s10158_s3, 16384 }
 0x5a0   : > { %p5842_p4 = scmp.ne.s32.totalorder %s10087_s6, %s5841_s2  ;;  %p5846_p11 = scmp.lt.s32.totalorder %s10087_s6, %s10158_s3 }
 0x5a1   : > { %p5847_p6 = scmp.lt.s32.totalorder %s5845_s10, %s5841_s2 }
 0x5a2   : > { %p5843_p2 = pnand %p5842_p4, %p11068_p12 }
 0x5a3   : > { %p5848_p3 = por %p5847_p6, %p5846_p11 }
 0x5a4   : > { %p5844_p8 = pneg %p5843_p2 }
 0x5a6   : > { %p5849_p10 = pnand %p5848_p3, %p5844_p8 }
 0x5a8   : > { %5852 = shalt.err (!%p5849_p10)
}
 0x5a9   : > { %s5972_s25 = smov 128   ;;  %s5973_s29 = smov 8  }
 0x5aa   : > { %5515 = dma.vmem_to_hbm [thread:$0]  (%p11068_p12), %s10081_s18, 4096, %s10087_s6, %s10095_s27, %s5972_s25, %s5972_s25, %s5973_s29  }
 0x5ab PF: > { %s11069_s8 = sld [smem:[#allocation18_spill]] }
 0x5ac   : > { %s11070_s23 = sld [smem:[#allocation16_spill]] }
 0x5ad   : > { %s11071_s19 = sld [smem:[#allocation19_spill]] }
 0x5b1   : > { %p5537_p0 = scmp.ge.s32.totalorder %s11069_s8, 2 }
 0x5b2   : > { %s5261_s11 = sand.u32 1, %s11070_s23  }
 0x5b3   : > { %p11072_p5 = scmp.ne.s32.totalorder %s11071_s19, 0  ;;  %s5262_s26 = scalar_lea.sflag [#allocation6], %s5261_s11 }
 0x5b5   : > { %p5529_p7 = pnand %p5537_p0, %p11072_p5 }
 0x5b7   : > { %p5530_p9 = pneg %p5529_p7 }
 0x5b9   : > { %5910 = dma.done.wait (%p5530_p9), %s5262_s26, 4096  }
 0x5ba   : > { %5912 = vsyncadd (%p5530_p9), %s5262_s26, 4294963200  ;;  %s21_s22 = sadd.s32 1, %s11069_s8   ;;  %s11073_s30 = smov %s6135_s12 }
 0x5bb   : > { %p18_p13 = scmp.ge.s32.totalorder %s21_s22, 6   ;;  %s11074_s18 = sld [smem:[#allocation17_spill]] }
 0x5bc   : > { %s11075_s6 = sld [smem:[#allocation20_spill]]  ;;  %s11076_s12 = smov %s5919_s13 }
 0x5bd   : > { %s11077_s13 = smov %s5923_s14  ;;  %s11078_s14 = smov %s6140_s20 }
 0x5be   : > { %s11079_s15 = smov %s5931_s16  ;;  %s11080_s16 = smov %s5935_s17 }
 0x5bf   : > { %s11081_s17 = smov %s11073_s30  ;;  %s11082_s19 = smov %s5951_s21 }
 0x5c0   : > { %s11084_s21 = smov %s11090_s9  ;;  %20 = sbr.rel (!%p18_p13) target bundleno = 14 (0xe), region = 94 }
 0x5c2   : > { %s11083_s20 = smov %s11075_s6 }
 0x5c5   :  { %5267 = vsyncpa [#allocation5], 1 }
 0x5c6   :  { %5269 = vsyncpa [#allocation5 + $0x1], 1 }
 0x5c7   :  { %5270 = vsyncpa [#allocation6], 1 }
 0x5c8   :  { %5272 = vsyncpa [#allocation6 + $0x1], 1 }
 0x5c9   :  { %5273 = vsyncpa [#allocation7], 1 }
 0x5ca   :  { %5275 = vsyncpa [#allocation7 + $0x1], 1 }
 0x5cb   :  { %5276 = vsyncpa [#allocation10], 1 }

</bundles_post_ra>
